<compile_context>
chip_gen: v7x
topology: tpu7x:2x2x1
jax: 0.10.0
libtpu: 0.0.40
codegen_flags: <defaults>
</compile_context>

<pallas_src>
import functools

import jax
import jax.numpy as jnp
from jax import lax
from jax.experimental import pallas as pl
from jax.experimental.pallas import tpu as pltpu


# ---------------------------------------------------------------------------
# Fully fused Inception-E kernel (one image per grid step).
# ---------------------------------------------------------------------------
def _inception_kernel(x_ref, w1_ref, s1_ref, t1_ref,
                      w2_ref, s2_ref, t2_ref,
                      wm_ref, sm_ref, tm_ref,
                      w3_ref, s3_ref, t3_ref,
                      o_ref, pad_ref, *, H, W, c_b1, c_r2, c_r3):
    f32, bf16 = jnp.float32, jnp.bfloat16
    M = H * W
    cin = x_ref.shape[-1]

    # Fresh zero halo every invocation (scratch persists across grid steps);
    # only the interior is ever rewritten, so the border stays zero.
    pad_ref[...] = jnp.zeros_like(pad_ref)

    # ----------------- level 1: everything that reads x ---------------------
    x = x_ref[0]                                            # (H, W, Cin) bf16
    pad_ref[1:1 + H, 1:1 + W, :cin] = x
    # AvgPool3x3 as a VPU window SUM (the 1/9 is folded into branch-4 weights).
    psum = jnp.zeros((H, W, cin), f32)
    for dy in range(3):
        for dx in range(3):
            psum = psum + pad_ref[dy:dy + H, dx:dx + W, :cin].astype(f32)

    lhs1 = jnp.concatenate(
        [x.reshape(M, cin), psum.astype(bf16).reshape(M, cin)], axis=-1)
    acc1 = jnp.dot(lhs1, w1_ref[...], preferred_element_type=f32)
    y1 = jnp.clip(acc1 * s1_ref[...] + t1_ref[...], 0.0, 6.0)    # (M, C1) f32

    c0, c1, c2 = c_b1, c_b1 + c_r2, c_b1 + c_r2 + c_r3
    br1 = y1[:, :c0]                         # branch1 output (f32)
    x2 = y1[:, c0:c1].astype(bf16)           # branch2 reduce
    x3i = y1[:, c1:c2].astype(bf16)          # branch3 reduce
    br4 = y1[:, c2:]                         # branch4 output (f32)

    # Shared helper: "same"-padded conv as one im2col-in-VMEM matmul.
    def conv_stage(act_mc, taps, w_r, s_r, t_r):
        C = act_mc.shape[-1]
        pad_ref[1:1 + H, 1:1 + W, :C] = act_mc.reshape(H, W, C)
        cols = [pad_ref[1 + dy:1 + dy + H, 1 + dx:1 + dx + W, :C]
                for (dy, dx) in taps]
        col = jnp.concatenate(cols, axis=-1).reshape(M, len(taps) * C)
        acc = jnp.dot(col, w_r[...], preferred_element_type=f32)
        return jnp.clip(acc * s_r[...] + t_r[...], 0.0, 6.0)

    T5 = [(-1, 0), (0, -1), (0, 0), (0, 1), (1, 0)]   # union of 1x3 & 3x1 taps
    T9 = [(dy, dx) for dy in (-1, 0, 1) for dx in (-1, 0, 1)]

    out2 = conv_stage(x2, T5, w2_ref, s2_ref, t2_ref)            # (M, 2*out_b2)
    x3 = conv_stage(x3i, T9, wm_ref, sm_ref, tm_ref)             # (M, out_b3)
    out3 = conv_stage(x3.astype(bf16), T5, w3_ref, s3_ref, t3_ref)

    out = jnp.concatenate([br1, out2, out3, br4], axis=-1)       # (M, Ctot) f32
    ctot = out.shape[-1]
    pad_c = (-ctot) % 128
    if pad_c:                                 # pad so the 2-D transpose is tile-aligned
        out = jnp.concatenate([out, jnp.zeros((M, pad_c), f32)], axis=-1)
    o_ref[0] = out.T[:ctot, :]                # lane-dense (Ctot, H*W) store


# ---------------------------------------------------------------------------
# Host-side weight preparation (exact rewrites) + pallas_call wrapper.
# ---------------------------------------------------------------------------
def _fold_bn(blk, eps=1e-5):
    inv = lax.rsqrt(blk['var'].astype(jnp.float32) + eps)
    s = blk['gamma'].astype(jnp.float32) * inv
    t = blk['beta'].astype(jnp.float32) + s * (
        blk['b'].astype(jnp.float32) - blk['mean'].astype(jnp.float32))
    return s, t


def _cross_rhs(wa, wb):
    """(1x3 || 3x1) pair -> one (5*Cin, 2*Cout) RHS over the cross taps
    [(-1,0),(0,-1),(0,0),(0,1),(1,0)]; unused taps are zero (no 3x3 blow-up)."""
    cout, cin_ = wa.shape[0], wa.shape[1]
    z = jnp.zeros((cin_, cout), jnp.float32)
    a = [wa[:, :, 0, j].T for j in range(3)]       # dx = -1, 0, +1
    b = [wb[:, :, j, 0].T for j in range(3)]       # dy = -1, 0, +1
    rows = [jnp.concatenate(r, axis=1) for r in
            ([z, b[0]], [a[0], z], [a[1], b[1]], [a[2], z], [z, b[2]])]
    return jnp.concatenate(rows, axis=0)


@jax.jit
def inception_forward(x_nchw, p):
    n, cin, h, w = x_nchw.shape
    m = h * w
    assert m % 128 == 0, "kernel stores (Ctot, H*W); needs H*W % 128 == 0"
    x = jnp.transpose(x_nchw, (0, 2, 3, 1)).astype(jnp.bfloat16)   # NHWC bf16

    c_b1 = p['b1']['w'].shape[0]
    c_r2 = p['b2c1']['w'].shape[0]
    c_o2 = p['b2a']['w'].shape[0]
    c_r3 = p['b3c1']['w'].shape[0]
    c_o3 = p['b3c2']['w'].shape[0]
    c_b4 = p['b4']['w'].shape[0]
    ctot = c_b1 + 2 * c_o2 + 2 * c_o3 + c_b4

    # Level-1 RHS over LHS = [x | pooled-sum]; /9 folded into branch-4 weights.
    w_b1 = p['b1']['w'][:, :, 0, 0].T
    w_b2 = p['b2c1']['w'][:, :, 0, 0].T
    w_b3 = p['b3c1']['w'][:, :, 0, 0].T
    w_b4 = p['b4']['w'][:, :, 0, 0].T / 9.0
    w1 = jnp.concatenate([
        jnp.concatenate([w_b1, w_b2, w_b3,
                         jnp.zeros((cin, c_b4), jnp.float32)], axis=1),
        jnp.concatenate([jnp.zeros((cin, c_b1 + c_r2 + c_r3), jnp.float32),
                         w_b4], axis=1)], axis=0).astype(jnp.bfloat16)
    f1 = [_fold_bn(p[k]) for k in ('b1', 'b2c1', 'b3c1', 'b4')]
    s1 = jnp.concatenate([s for s, _ in f1]).reshape(1, -1)
    t1 = jnp.concatenate([t for _, t in f1]).reshape(1, -1)

    # Branch-2 (1x3 || 3x1) pair on x2.
    w2 = _cross_rhs(p['b2a']['w'], p['b2b']['w']).astype(jnp.bfloat16)
    f2 = [_fold_bn(p[k]) for k in ('b2a', 'b2b')]
    s2 = jnp.concatenate([s for s, _ in f2]).reshape(1, -1)
    t2 = jnp.concatenate([t for _, t in f2]).reshape(1, -1)

    # Branch-3 middle 3x3.
    wm = jnp.transpose(p['b3c2']['w'], (2, 3, 1, 0)).reshape(9 * c_r3, c_o3)
    wm = wm.astype(jnp.bfloat16)
    sm, tm = _fold_bn(p['b3c2'])
    sm, tm = sm.reshape(1, -1), tm.reshape(1, -1)

    # Branch-3 (1x3 || 3x1) pair on x3.
    w3 = _cross_rhs(p['b3a']['w'], p['b3b']['w']).astype(jnp.bfloat16)
    f3 = [_fold_bn(p[k]) for k in ('b3a', 'b3b')]
    s3 = jnp.concatenate([s for s, _ in f3]).reshape(1, -1)
    t3 = jnp.concatenate([t for _, t in f3]).reshape(1, -1)

    cmax = max(cin, c_r2, c_r3, c_o3)
    kernel = functools.partial(_inception_kernel, H=h, W=w,
                               c_b1=c_b1, c_r2=c_r2, c_r3=c_r3)
    const2 = lambda i: (0, 0)

    out = pl.pallas_call(
        kernel,
        out_shape=jax.ShapeDtypeStruct((n, ctot, m), jnp.float32),
        grid=(n,),
        in_specs=[
            pl.BlockSpec((1, h, w, cin), lambda i: (i, 0, 0, 0)),
            pl.BlockSpec(w1.shape, const2), pl.BlockSpec(s1.shape, const2),
            pl.BlockSpec(t1.shape, const2),
            pl.BlockSpec(w2.shape, const2), pl.BlockSpec(s2.shape, const2),
            pl.BlockSpec(t2.shape, const2),
            pl.BlockSpec(wm.shape, const2), pl.BlockSpec(sm.shape, const2),
            pl.BlockSpec(tm.shape, const2),
            pl.BlockSpec(w3.shape, const2), pl.BlockSpec(s3.shape, const2),
            pl.BlockSpec(t3.shape, const2),
        ],
        out_specs=pl.BlockSpec((1, ctot, m), lambda i: (i, 0, 0)),
        scratch_shapes=[pltpu.VMEM((h + 2, w + 2, cmax), jnp.bfloat16)],
        compiler_params=pltpu.CompilerParams(
            dimension_semantics=("parallel",)),
    )(x, w1, s1, t1, w2, s2, t2, wm, sm, tm, w3, s3, t3)

    # Output is already channel-major (N, Ctot, H*W): free reshape to NCHW.
    return out.reshape(n, ctot, h, w)


# ---------------------------------------------------------------------------
# Pure-JAX reference (mirrors the original PyTorch branch structure).
# ---------------------------------------------------------------------------
def _conv_block_ref(x_nhwc, blk, kh, kw, ph, pw, eps=1e-5):
    w_hwio = jnp.transpose(blk['w'], (2, 3, 1, 0))
    y = lax.conv_general_dilated(
        x_nhwc.astype(jnp.bfloat16), w_hwio.astype(jnp.bfloat16),
        window_strides=(1, 1), padding=[(ph, ph), (pw, pw)],
        dimension_numbers=("NHWC", "HWIO", "NHWC"),
        preferred_element_type=jnp.float32)
    scale = blk['gamma'] / jnp.sqrt(blk['var'] + eps)
    y = y * scale + (blk['beta'] + scale * (blk['b'] - blk['mean']))
    return jnp.clip(y, 0.0, 6.0)


def inception_reference(x_nchw, p):
    x = jnp.transpose(x_nchw, (0, 2, 3, 1)).astype(jnp.float32)
    br1 = _conv_block_ref(x, p['b1'], 1, 1, 0, 0)
    x2 = _conv_block_ref(x, p['b2c1'], 1, 1, 0, 0)
    x3 = _conv_block_ref(_conv_block_ref(x, p['b3c1'], 1, 1, 0, 0),
                         p['b3c2'], 3, 3, 1, 1)
    out2 = jnp.concatenate([_conv_block_ref(x2, p['b2a'], 1, 3, 0, 1),
                            _conv_block_ref(x2, p['b2b'], 3, 1, 1, 0)], axis=-1)
    out3 = jnp.concatenate([_conv_block_ref(x3, p['b3a'], 1, 3, 0, 1),
                            _conv_block_ref(x3, p['b3b'], 3, 1, 1, 0)], axis=-1)
    pooled = lax.reduce_window(x, jnp.array(0.0, x.dtype), lax.add,
                               (1, 3, 3, 1), (1, 1, 1, 1),
                               [(0, 0), (1, 1), (1, 1), (0, 0)]) / 9.0
    br4 = _conv_block_ref(pooled, p['b4'], 1, 1, 0, 0)
    out = jnp.concatenate([br1, out2, out3, br4], axis=-1)
    return jnp.transpose(out, (0, 3, 1, 2))


def _make_block(key, cin, cout, kh, kw):
    kw_, kb, kg, kbe, km, kv = jax.random.split(key, 6)
    return dict(
        w=0.1 * jax.random.normal(kw_, (cout, cin, kh, kw), jnp.float32),
        b=0.1 * jax.random.normal(kb, (cout,), jnp.float32),
        gamma=1.0 + 0.1 * jax.random.normal(kg, (cout,), jnp.float32),
        beta=0.1 * jax.random.normal(kbe, (cout,), jnp.float32),
        mean=0.1 * jax.random.normal(km, (cout,), jnp.float32),
        var=jnp.abs(1.0 + 0.1 * jax.random.normal(kv, (cout,), jnp.float32)),
    )


if __name__ == "__main__":
    key = jax.random.PRNGKey(0)
    keys = jax.random.split(key, 10)

    N, Cin, H, W = 2, 4, 16, 16
    out_b1, red_b2, out_b2, red_b3, out_b3, out_b4 = 8, 8, 8, 8, 16, 8

    x = jax.random.normal(keys[0], (N, Cin, H, W), jnp.float32)
    params = {
        'b1':   _make_block(keys[1], Cin, out_b1, 1, 1),
        'b2c1': _make_block(keys[2], Cin, red_b2, 1, 1),
        'b2a':  _make_block(keys[3], red_b2, out_b2, 1, 3),
        'b2b':  _make_block(keys[4], red_b2, out_b2, 3, 1),
        'b3c1': _make_block(keys[5], Cin, red_b3, 1, 1),
        'b3c2': _make_block(keys[6], red_b3, out_b3, 3, 3),
        'b3a':  _make_block(keys[7], out_b3, out_b3, 1, 3),
        'b3b':  _make_block(keys[8], out_b3, out_b3, 3, 1),
        'b4':   _make_block(keys[9], Cin, out_b4, 1, 1),
    }

    out = inception_forward(x, params)
    out = jax.block_until_ready(out)

    ref = inception_reference(x, params)
    total_c = out_b1 + 2 * out_b2 + 2 * out_b3 + out_b4
    assert out.shape == (N, total_c, H, W), out.shape
    max_err = float(jnp.max(jnp.abs(out - ref)))
    assert jnp.allclose(out, ref, atol=2e-2, rtol=2e-2), max_err

    print("KERNEL_OK")
</pallas_src>

<mosaic_0001>
module attributes {stable_mosaic.version = 11 : i64} {
  func.func @_inception_kernel(%arg0: i32, %arg1: memref<1x16x16x4xbf16, #tpu.memory_space<vmem>>, %arg2: memref<8x32xbf16, #tpu.memory_space<vmem>>, %arg3: memref<1x32xf32, #tpu.memory_space<vmem>>, %arg4: memref<1x32xf32, #tpu.memory_space<vmem>>, %arg5: memref<40x16xbf16, #tpu.memory_space<vmem>>, %arg6: memref<1x16xf32, #tpu.memory_space<vmem>>, %arg7: memref<1x16xf32, #tpu.memory_space<vmem>>, %arg8: memref<72x16xbf16, #tpu.memory_space<vmem>>, %arg9: memref<1x16xf32, #tpu.memory_space<vmem>>, %arg10: memref<1x16xf32, #tpu.memory_space<vmem>>, %arg11: memref<80x32xbf16, #tpu.memory_space<vmem>>, %arg12: memref<1x32xf32, #tpu.memory_space<vmem>>, %arg13: memref<1x32xf32, #tpu.memory_space<vmem>>, %arg14: memref<1x64x256xf32, #tpu.memory_space<vmem>>, %arg15: memref<18x18x16xbf16, #tpu.memory_space<vmem>>) attributes {dimension_semantics = [#tpu.dimension_semantics<parallel>], iteration_bounds = array<i64: 2>, scalar_prefetch = 0 : i64, scratch_operands = 1 : i64, tpu.core_type = #tpu.core_type<tc>, window_params = [{transform_indices = @transform_0, window_bounds = array<i64: 1, 16, 16, 4>}, {pipeline_mode = #tpu.pipeline_mode<synchronous>, transform_indices = @transform_1, window_bounds = array<i64: 8, 32>}, {pipeline_mode = #tpu.pipeline_mode<synchronous>, transform_indices = @transform_2, window_bounds = array<i64: 1, 32>}, {pipeline_mode = #tpu.pipeline_mode<synchronous>, transform_indices = @transform_3, window_bounds = array<i64: 1, 32>}, {pipeline_mode = #tpu.pipeline_mode<synchronous>, transform_indices = @transform_4, window_bounds = array<i64: 40, 16>}, {pipeline_mode = #tpu.pipeline_mode<synchronous>, transform_indices = @transform_5, window_bounds = array<i64: 1, 16>}, {pipeline_mode = #tpu.pipeline_mode<synchronous>, transform_indices = @transform_6, window_bounds = array<i64: 1, 16>}, {pipeline_mode = #tpu.pipeline_mode<synchronous>, transform_indices = @transform_7, window_bounds = array<i64: 72, 16>}, {pipeline_mode = #tpu.pipeline_mode<synchronous>, transform_indices = @transform_8, window_bounds = array<i64: 1, 16>}, {pipeline_mode = #tpu.pipeline_mode<synchronous>, transform_indices = @transform_9, window_bounds = array<i64: 1, 16>}, {pipeline_mode = #tpu.pipeline_mode<synchronous>, transform_indices = @transform_10, window_bounds = array<i64: 80, 32>}, {pipeline_mode = #tpu.pipeline_mode<synchronous>, transform_indices = @transform_11, window_bounds = array<i64: 1, 32>}, {pipeline_mode = #tpu.pipeline_mode<synchronous>, transform_indices = @transform_12, window_bounds = array<i64: 1, 32>}, {transform_indices = @transform_13, window_bounds = array<i64: 1, 64, 256>}]} {
    %cst = arith.constant 0.000000e+00 : bf16
    %0 = vector.broadcast %cst : bf16 to vector<18x18x16xbf16>
    %c0 = arith.constant 0 : index
    %c0_0 = arith.constant 0 : index
    %c0_1 = arith.constant 0 : index
    %1 = vector.load %arg15[%c0, %c0_0, %c0_1] : memref<18x18x16xbf16, #tpu.memory_space<vmem>>, vector<18x18x16xbf16>
    tpu.vector_store %arg15[%c0, %c0_0, %c0_1], %0 {strides = array<i32>} : memref<18x18x16xbf16, #tpu.memory_space<vmem>>, vector<18x18x16xbf16>,
    %c0_2 = arith.constant 0 : index
    %c0_3 = arith.constant 0 : index
    %c0_4 = arith.constant 0 : index
    %c0_5 = arith.constant 0 : index
    %2 = vector.load %arg1[%c0_2, %c0_3, %c0_4, %c0_5] : memref<1x16x16x4xbf16, #tpu.memory_space<vmem>>, vector<1x16x16x4xbf16>
    %3 = vector.shape_cast %2 : vector<1x16x16x4xbf16> to vector<16x16x4xbf16>
    %c1 = arith.constant 1 : index
    %c1_6 = arith.constant 1 : index
    %c0_7 = arith.constant 0 : index
    %4 = vector.load %arg15[%c1, %c1_6, %c0_7] : memref<18x18x16xbf16, #tpu.memory_space<vmem>>, vector<16x16x4xbf16>
    tpu.vector_store %arg15[%c1, %c1_6, %c0_7], %3 {strides = array<i32>} : memref<18x18x16xbf16, #tpu.memory_space<vmem>>, vector<16x16x4xbf16>,
    %cst_8 = arith.constant 0.000000e+00 : f32
    %5 = vector.broadcast %cst_8 : f32 to vector<16x16x4xf32>
    %c0_9 = arith.constant 0 : index
    %c0_10 = arith.constant 0 : index
    %c0_11 = arith.constant 0 : index
    %6 = vector.load %arg15[%c0_9, %c0_10, %c0_11] : memref<18x18x16xbf16, #tpu.memory_space<vmem>>, vector<16x16x4xbf16>
    %7 = arith.extf %6 : vector<16x16x4xbf16> to vector<16x16x4xf32>
    %8 = arith.addf %5, %7 : vector<16x16x4xf32>
    %c0_12 = arith.constant 0 : index
    %c1_13 = arith.constant 1 : index
    %c0_14 = arith.constant 0 : index
    %9 = vector.load %arg15[%c0_12, %c1_13, %c0_14] : memref<18x18x16xbf16, #tpu.memory_space<vmem>>, vector<16x16x4xbf16>
    %10 = arith.extf %9 : vector<16x16x4xbf16> to vector<16x16x4xf32>
    %11 = arith.addf %8, %10 : vector<16x16x4xf32>
    %c0_15 = arith.constant 0 : index
    %c2 = arith.constant 2 : index
    %c0_16 = arith.constant 0 : index
    %12 = vector.load %arg15[%c0_15, %c2, %c0_16] : memref<18x18x16xbf16, #tpu.memory_space<vmem>>, vector<16x16x4xbf16>
    %13 = arith.extf %12 : vector<16x16x4xbf16> to vector<16x16x4xf32>
    %14 = arith.addf %11, %13 : vector<16x16x4xf32>
    %c1_17 = arith.constant 1 : index
    %c0_18 = arith.constant 0 : index
    %c0_19 = arith.constant 0 : index
    %15 = vector.load %arg15[%c1_17, %c0_18, %c0_19] : memref<18x18x16xbf16, #tpu.memory_space<vmem>>, vector<16x16x4xbf16>
    %16 = arith.extf %15 : vector<16x16x4xbf16> to vector<16x16x4xf32>
    %17 = arith.addf %14, %16 : vector<16x16x4xf32>
    %c1_20 = arith.constant 1 : index
    %c1_21 = arith.constant 1 : index
    %c0_22 = arith.constant 0 : index
    %18 = vector.load %arg15[%c1_20, %c1_21, %c0_22] : memref<18x18x16xbf16, #tpu.memory_space<vmem>>, vector<16x16x4xbf16>
    %19 = arith.extf %18 : vector<16x16x4xbf16> to vector<16x16x4xf32>
    %20 = arith.addf %17, %19 : vector<16x16x4xf32>
    %c1_23 = arith.constant 1 : index
    %c2_24 = arith.constant 2 : index
    %c0_25 = arith.constant 0 : index
    %21 = vector.load %arg15[%c1_23, %c2_24, %c0_25] : memref<18x18x16xbf16, #tpu.memory_space<vmem>>, vector<16x16x4xbf16>
    %22 = arith.extf %21 : vector<16x16x4xbf16> to vector<16x16x4xf32>
    %23 = arith.addf %20, %22 : vector<16x16x4xf32>
    %c2_26 = arith.constant 2 : index
    %c0_27 = arith.constant 0 : index
    %c0_28 = arith.constant 0 : index
    %24 = vector.load %arg15[%c2_26, %c0_27, %c0_28] : memref<18x18x16xbf16, #tpu.memory_space<vmem>>, vector<16x16x4xbf16>
    %25 = arith.extf %24 : vector<16x16x4xbf16> to vector<16x16x4xf32>
    %26 = arith.addf %23, %25 : vector<16x16x4xf32>
    %c2_29 = arith.constant 2 : index
    %c1_30 = arith.constant 1 : index
    %c0_31 = arith.constant 0 : index
    %27 = vector.load %arg15[%c2_29, %c1_30, %c0_31] : memref<18x18x16xbf16, #tpu.memory_space<vmem>>, vector<16x16x4xbf16>
    %28 = arith.extf %27 : vector<16x16x4xbf16> to vector<16x16x4xf32>
    %29 = arith.addf %26, %28 : vector<16x16x4xf32>
    %c2_32 = arith.constant 2 : index
    %c2_33 = arith.constant 2 : index
    %c0_34 = arith.constant 0 : index
    %30 = vector.load %arg15[%c2_32, %c2_33, %c0_34] : memref<18x18x16xbf16, #tpu.memory_space<vmem>>, vector<16x16x4xbf16>
    %31 = arith.extf %30 : vector<16x16x4xbf16> to vector<16x16x4xf32>
    %32 = arith.addf %29, %31 : vector<16x16x4xf32>
    %33 = vector.shape_cast %3 : vector<16x16x4xbf16> to vector<256x4xbf16>
    %34 = arith.truncf %32 : vector<16x16x4xf32> to vector<16x16x4xbf16>
    %35 = vector.shape_cast %34 : vector<16x16x4xbf16> to vector<256x4xbf16>
    %36 = tpu.concatenate %33, %35 in 1 : vector<256x4xbf16>, vector<256x4xbf16> -> vector<256x8xbf16>
    %c0_35 = arith.constant 0 : index
    %c0_36 = arith.constant 0 : index
    %37 = vector.load %arg2[%c0_35, %c0_36] : memref<8x32xbf16, #tpu.memory_space<vmem>>, vector<8x32xbf16>
    %cst_37 = arith.constant dense<0.000000e+00> : vector<256x32xf32>
    %38 = tpu.matmul %36, %37, %cst_37 {dimension_numbers = #tpu.dot_dimension_numbers<[1], [0], [0], [1], [0, 0, 1, 1], [], []>} : vector<256x8xbf16>, vector<8x32xbf16>, vector<256x32xf32> -> vector<256x32xf32>
    %c0_38 = arith.constant 0 : index
    %c0_39 = arith.constant 0 : index
    %39 = vector.load %arg3[%c0_38, %c0_39] : memref<1x32xf32, #tpu.memory_space<vmem>>, vector<1x32xf32>
    %40 = vector.broadcast %39 : vector<1x32xf32> to vector<256x32xf32>
    %41 = arith.mulf %38, %40 : vector<256x32xf32>
    %c0_40 = arith.constant 0 : index
    %c0_41 = arith.constant 0 : index
    %42 = vector.load %arg4[%c0_40, %c0_41] : memref<1x32xf32, #tpu.memory_space<vmem>>, vector<1x32xf32>
    %43 = vector.broadcast %42 : vector<1x32xf32> to vector<256x32xf32>
    %44 = arith.addf %41, %43 : vector<256x32xf32>
    %cst_42 = arith.constant 0.000000e+00 : f32
    %cst_43 = arith.constant 6.000000e+00 : f32
    %45 = vector.broadcast %cst_42 : f32 to vector<256x32xf32>
    %46 = arith.maximumf %45, %44 : vector<256x32xf32>
    %47 = vector.broadcast %cst_43 : f32 to vector<256x32xf32>
    %48 = arith.minimumf %47, %46 : vector<256x32xf32>
    %49 = vector.extract_strided_slice %48 {offsets = [0, 0], sizes = [256, 8], strides = [1, 1]} : vector<256x32xf32> to vector<256x8xf32>
    %50 = vector.extract_strided_slice %48 {offsets = [0, 8], sizes = [256, 8], strides = [1, 1]} : vector<256x32xf32> to vector<256x8xf32>
    %51 = arith.truncf %50 : vector<256x8xf32> to vector<256x8xbf16>
    %52 = vector.extract_strided_slice %48 {offsets = [0, 16], sizes = [256, 8], strides = [1, 1]} : vector<256x32xf32> to vector<256x8xf32>
    %53 = arith.truncf %52 : vector<256x8xf32> to vector<256x8xbf16>
    %54 = vector.extract_strided_slice %48 {offsets = [0, 24], sizes = [256, 8], strides = [1, 1]} : vector<256x32xf32> to vector<256x8xf32>
    %55 = vector.shape_cast %51 : vector<256x8xbf16> to vector<16x16x8xbf16>
    %c1_44 = arith.constant 1 : index
    %c1_45 = arith.constant 1 : index
    %c0_46 = arith.constant 0 : index
    %56 = vector.load %arg15[%c1_44, %c1_45, %c0_46] : memref<18x18x16xbf16, #tpu.memory_space<vmem>>, vector<16x16x8xbf16>
    tpu.vector_store %arg15[%c1_44, %c1_45, %c0_46], %55 {strides = array<i32>} : memref<18x18x16xbf16, #tpu.memory_space<vmem>>, vector<16x16x8xbf16>,
    %c0_47 = arith.constant 0 : index
    %c1_48 = arith.constant 1 : index
    %c0_49 = arith.constant 0 : index
    %57 = vector.load %arg15[%c0_47, %c1_48, %c0_49] : memref<18x18x16xbf16, #tpu.memory_space<vmem>>, vector<16x16x8xbf16>
    %c1_50 = arith.constant 1 : index
    %c0_51 = arith.constant 0 : index
    %c0_52 = arith.constant 0 : index
    %58 = vector.load %arg15[%c1_50, %c0_51, %c0_52] : memref<18x18x16xbf16, #tpu.memory_space<vmem>>, vector<16x16x8xbf16>
    %c1_53 = arith.constant 1 : index
    %c1_54 = arith.constant 1 : index
    %c0_55 = arith.constant 0 : index
    %59 = vector.load %arg15[%c1_53, %c1_54, %c0_55] : memref<18x18x16xbf16, #tpu.memory_space<vmem>>, vector<16x16x8xbf16>
    %c1_56 = arith.constant 1 : index
    %c2_57 = arith.constant 2 : index
    %c0_58 = arith.constant 0 : index
    %60 = vector.load %arg15[%c1_56, %c2_57, %c0_58] : memref<18x18x16xbf16, #tpu.memory_space<vmem>>, vector<16x16x8xbf16>
    %c2_59 = arith.constant 2 : index
    %c1_60 = arith.constant 1 : index
    %c0_61 = arith.constant 0 : index
    %61 = vector.load %arg15[%c2_59, %c1_60, %c0_61] : memref<18x18x16xbf16, #tpu.memory_space<vmem>>, vector<16x16x8xbf16>
    %62 = tpu.concatenate %57, %58, %59, %60, %61 in 2 : vector<16x16x8xbf16>, vector<16x16x8xbf16>, vector<16x16x8xbf16>, vector<16x16x8xbf16>, vector<16x16x8xbf16> -> vector<16x16x40xbf16>
    %63 = vector.shape_cast %62 : vector<16x16x40xbf16> to vector<256x40xbf16>
    %c0_62 = arith.constant 0 : index
    %c0_63 = arith.constant 0 : index
    %64 = vector.load %arg5[%c0_62, %c0_63] : memref<40x16xbf16, #tpu.memory_space<vmem>>, vector<40x16xbf16>
    %cst_64 = arith.constant dense<0.000000e+00> : vector<256x16xf32>
    %65 = tpu.matmul %63, %64, %cst_64 {dimension_numbers = #tpu.dot_dimension_numbers<[1], [0], [0], [1], [0, 0, 1, 1], [], []>} : vector<256x40xbf16>, vector<40x16xbf16>, vector<256x16xf32> -> vector<256x16xf32>
    %c0_65 = arith.constant 0 : index
    %c0_66 = arith.constant 0 : index
    %66 = vector.load %arg6[%c0_65, %c0_66] : memref<1x16xf32, #tpu.memory_space<vmem>>, vector<1x16xf32>
    %67 = vector.broadcast %66 : vector<1x16xf32> to vector<256x16xf32>
    %68 = arith.mulf %65, %67 : vector<256x16xf32>
    %c0_67 = arith.constant 0 : index
    %c0_68 = arith.constant 0 : index
    %69 = vector.load %arg7[%c0_67, %c0_68] : memref<1x16xf32, #tpu.memory_space<vmem>>, vector<1x16xf32>
    %70 = vector.broadcast %69 : vector<1x16xf32> to vector<256x16xf32>
    %71 = arith.addf %68, %70 : vector<256x16xf32>
    %cst_69 = arith.constant 0.000000e+00 : f32
    %cst_70 = arith.constant 6.000000e+00 : f32
    %72 = vector.broadcast %cst_69 : f32 to vector<256x16xf32>
    %73 = arith.maximumf %72, %71 : vector<256x16xf32>
    %74 = vector.broadcast %cst_70 : f32 to vector<256x16xf32>
    %75 = arith.minimumf %74, %73 : vector<256x16xf32>
    %76 = vector.shape_cast %53 : vector<256x8xbf16> to vector<16x16x8xbf16>
    %c1_71 = arith.constant 1 : index
    %c1_72 = arith.constant 1 : index
    %c0_73 = arith.constant 0 : index
    %77 = vector.load %arg15[%c1_71, %c1_72, %c0_73] : memref<18x18x16xbf16, #tpu.memory_space<vmem>>, vector<16x16x8xbf16>
    tpu.vector_store %arg15[%c1_71, %c1_72, %c0_73], %76 {strides = array<i32>} : memref<18x18x16xbf16, #tpu.memory_space<vmem>>, vector<16x16x8xbf16>,
    %c0_74 = arith.constant 0 : index
    %c0_75 = arith.constant 0 : index
    %c0_76 = arith.constant 0 : index
    %78 = vector.load %arg15[%c0_74, %c0_75, %c0_76] : memref<18x18x16xbf16, #tpu.memory_space<vmem>>, vector<16x16x8xbf16>
    %c0_77 = arith.constant 0 : index
    %c1_78 = arith.constant 1 : index
    %c0_79 = arith.constant 0 : index
    %79 = vector.load %arg15[%c0_77, %c1_78, %c0_79] : memref<18x18x16xbf16, #tpu.memory_space<vmem>>, vector<16x16x8xbf16>
    %c0_80 = arith.constant 0 : index
    %c2_81 = arith.constant 2 : index
    %c0_82 = arith.constant 0 : index
    %80 = vector.load %arg15[%c0_80, %c2_81, %c0_82] : memref<18x18x16xbf16, #tpu.memory_space<vmem>>, vector<16x16x8xbf16>
    %c1_83 = arith.constant 1 : index
    %c0_84 = arith.constant 0 : index
    %c0_85 = arith.constant 0 : index
    %81 = vector.load %arg15[%c1_83, %c0_84, %c0_85] : memref<18x18x16xbf16, #tpu.memory_space<vmem>>, vector<16x16x8xbf16>
    %c1_86 = arith.constant 1 : index
    %c1_87 = arith.constant 1 : index
    %c0_88 = arith.constant 0 : index
    %82 = vector.load %arg15[%c1_86, %c1_87, %c0_88] : memref<18x18x16xbf16, #tpu.memory_space<vmem>>, vector<16x16x8xbf16>
    %c1_89 = arith.constant 1 : index
    %c2_90 = arith.constant 2 : index
    %c0_91 = arith.constant 0 : index
    %83 = vector.load %arg15[%c1_89, %c2_90, %c0_91] : memref<18x18x16xbf16, #tpu.memory_space<vmem>>, vector<16x16x8xbf16>
    %c2_92 = arith.constant 2 : index
    %c0_93 = arith.constant 0 : index
    %c0_94 = arith.constant 0 : index
    %84 = vector.load %arg15[%c2_92, %c0_93, %c0_94] : memref<18x18x16xbf16, #tpu.memory_space<vmem>>, vector<16x16x8xbf16>
    %c2_95 = arith.constant 2 : index
    %c1_96 = arith.constant 1 : index
    %c0_97 = arith.constant 0 : index
    %85 = vector.load %arg15[%c2_95, %c1_96, %c0_97] : memref<18x18x16xbf16, #tpu.memory_space<vmem>>, vector<16x16x8xbf16>
    %c2_98 = arith.constant 2 : index
    %c2_99 = arith.constant 2 : index
    %c0_100 = arith.constant 0 : index
    %86 = vector.load %arg15[%c2_98, %c2_99, %c0_100] : memref<18x18x16xbf16, #tpu.memory_space<vmem>>, vector<16x16x8xbf16>
    %87 = tpu.concatenate %78, %79, %80, %81, %82, %83, %84, %85, %86 in 2 : vector<16x16x8xbf16>, vector<16x16x8xbf16>, vector<16x16x8xbf16>, vector<16x16x8xbf16>, vector<16x16x8xbf16>, vector<16x16x8xbf16>, vector<16x16x8xbf16>, vector<16x16x8xbf16>, vector<16x16x8xbf16> -> vector<16x16x72xbf16>
    %88 = vector.shape_cast %87 : vector<16x16x72xbf16> to vector<256x72xbf16>
    %c0_101 = arith.constant 0 : index
    %c0_102 = arith.constant 0 : index
    %89 = vector.load %arg8[%c0_101, %c0_102] : memref<72x16xbf16, #tpu.memory_space<vmem>>, vector<72x16xbf16>
    %cst_103 = arith.constant dense<0.000000e+00> : vector<256x16xf32>
    %90 = tpu.matmul %88, %89, %cst_103 {dimension_numbers = #tpu.dot_dimension_numbers<[1], [0], [0], [1], [0, 0, 1, 1], [], []>} : vector<256x72xbf16>, vector<72x16xbf16>, vector<256x16xf32> -> vector<256x16xf32>
    %c0_104 = arith.constant 0 : index
    %c0_105 = arith.constant 0 : index
    %91 = vector.load %arg9[%c0_104, %c0_105] : memref<1x16xf32, #tpu.memory_space<vmem>>, vector<1x16xf32>
    %92 = vector.broadcast %91 : vector<1x16xf32> to vector<256x16xf32>
    %93 = arith.mulf %90, %92 : vector<256x16xf32>
    %c0_106 = arith.constant 0 : index
    %c0_107 = arith.constant 0 : index
    %94 = vector.load %arg10[%c0_106, %c0_107] : memref<1x16xf32, #tpu.memory_space<vmem>>, vector<1x16xf32>
    %95 = vector.broadcast %94 : vector<1x16xf32> to vector<256x16xf32>
    %96 = arith.addf %93, %95 : vector<256x16xf32>
    %cst_108 = arith.constant 0.000000e+00 : f32
    %cst_109 = arith.constant 6.000000e+00 : f32
    %97 = vector.broadcast %cst_108 : f32 to vector<256x16xf32>
    %98 = arith.maximumf %97, %96 : vector<256x16xf32>
    %99 = vector.broadcast %cst_109 : f32 to vector<256x16xf32>
    %100 = arith.minimumf %99, %98 : vector<256x16xf32>
    %101 = arith.truncf %100 : vector<256x16xf32> to vector<256x16xbf16>
    %102 = vector.shape_cast %101 : vector<256x16xbf16> to vector<16x16x16xbf16>
    %c1_110 = arith.constant 1 : index
    %c1_111 = arith.constant 1 : index
    %c0_112 = arith.constant 0 : index
    %103 = vector.load %arg15[%c1_110, %c1_111, %c0_112] : memref<18x18x16xbf16, #tpu.memory_space<vmem>>, vector<16x16x16xbf16>
    tpu.vector_store %arg15[%c1_110, %c1_111, %c0_112], %102 {strides = array<i32>} : memref<18x18x16xbf16, #tpu.memory_space<vmem>>, vector<16x16x16xbf16>,
    %c0_113 = arith.constant 0 : index
    %c1_114 = arith.constant 1 : index
    %c0_115 = arith.constant 0 : index
    %104 = vector.load %arg15[%c0_113, %c1_114, %c0_115] : memref<18x18x16xbf16, #tpu.memory_space<vmem>>, vector<16x16x16xbf16>
    %c1_116 = arith.constant 1 : index
    %c0_117 = arith.constant 0 : index
    %c0_118 = arith.constant 0 : index
    %105 = vector.load %arg15[%c1_116, %c0_117, %c0_118] : memref<18x18x16xbf16, #tpu.memory_space<vmem>>, vector<16x16x16xbf16>
    %c1_119 = arith.constant 1 : index
    %c1_120 = arith.constant 1 : index
    %c0_121 = arith.constant 0 : index
    %106 = vector.load %arg15[%c1_119, %c1_120, %c0_121] : memref<18x18x16xbf16, #tpu.memory_space<vmem>>, vector<16x16x16xbf16>
    %c1_122 = arith.constant 1 : index
    %c2_123 = arith.constant 2 : index
    %c0_124 = arith.constant 0 : index
    %107 = vector.load %arg15[%c1_122, %c2_123, %c0_124] : memref<18x18x16xbf16, #tpu.memory_space<vmem>>, vector<16x16x16xbf16>
    %c2_125 = arith.constant 2 : index
    %c1_126 = arith.constant 1 : index
    %c0_127 = arith.constant 0 : index
    %108 = vector.load %arg15[%c2_125, %c1_126, %c0_127] : memref<18x18x16xbf16, #tpu.memory_space<vmem>>, vector<16x16x16xbf16>
    %109 = tpu.concatenate %104, %105, %106, %107, %108 in 2 : vector<16x16x16xbf16>, vector<16x16x16xbf16>, vector<16x16x16xbf16>, vector<16x16x16xbf16>, vector<16x16x16xbf16> -> vector<16x16x80xbf16>
    %110 = vector.shape_cast %109 : vector<16x16x80xbf16> to vector<256x80xbf16>
    %c0_128 = arith.constant 0 : index
    %c0_129 = arith.constant 0 : index
    %111 = vector.load %arg11[%c0_128, %c0_129] : memref<80x32xbf16, #tpu.memory_space<vmem>>, vector<80x32xbf16>
    %cst_130 = arith.constant dense<0.000000e+00> : vector<256x32xf32>
    %112 = tpu.matmul %110, %111, %cst_130 {dimension_numbers = #tpu.dot_dimension_numbers<[1], [0], [0], [1], [0, 0, 1, 1], [], []>} : vector<256x80xbf16>, vector<80x32xbf16>, vector<256x32xf32> -> vector<256x32xf32>
    %c0_131 = arith.constant 0 : index
    %c0_132 = arith.constant 0 : index
    %113 = vector.load %arg12[%c0_131, %c0_132] : memref<1x32xf32, #tpu.memory_space<vmem>>, vector<1x32xf32>
    %114 = vector.broadcast %113 : vector<1x32xf32> to vector<256x32xf32>
    %115 = arith.mulf %112, %114 : vector<256x32xf32>
    %c0_133 = arith.constant 0 : index
    %c0_134 = arith.constant 0 : index
    %116 = vector.load %arg13[%c0_133, %c0_134] : memref<1x32xf32, #tpu.memory_space<vmem>>, vector<1x32xf32>
    %117 = vector.broadcast %116 : vector<1x32xf32> to vector<256x32xf32>
    %118 = arith.addf %115, %117 : vector<256x32xf32>
    %cst_135 = arith.constant 0.000000e+00 : f32
    %cst_136 = arith.constant 6.000000e+00 : f32
    %119 = vector.broadcast %cst_135 : f32 to vector<256x32xf32>
    %120 = arith.maximumf %119, %118 : vector<256x32xf32>
    %121 = vector.broadcast %cst_136 : f32 to vector<256x32xf32>
    %122 = arith.minimumf %121, %120 : vector<256x32xf32>
    %123 = tpu.concatenate %49, %75, %122, %54 in 1 : vector<256x8xf32>, vector<256x16xf32>, vector<256x32xf32>, vector<256x8xf32> -> vector<256x64xf32>
    %cst_137 = arith.constant 0.000000e+00 : f32
    %124 = vector.broadcast %cst_137 : f32 to vector<256x64xf32>
    %125 = tpu.concatenate %123, %124 in 1 : vector<256x64xf32>, vector<256x64xf32> -> vector<256x128xf32>
    %126 = tpu.transpose %125, [1, 0] : vector<256x128xf32> -> vector<128x256xf32>
    %127 = vector.extract_strided_slice %126 {offsets = [0, 0], sizes = [64, 256], strides = [1, 1]} : vector<128x256xf32> to vector<64x256xf32>
    %c0_138 = arith.constant 0 : index
    %c0_139 = arith.constant 0 : index
    %c0_140 = arith.constant 0 : index
    %128 = vector.load %arg14[%c0_138, %c0_139, %c0_140] : memref<1x64x256xf32, #tpu.memory_space<vmem>>, vector<1x64x256xf32>
    %129 = vector.shape_cast %128 : vector<1x64x256xf32> to vector<64x256xf32>
    %130 = vector.shape_cast %127 : vector<64x256xf32> to vector<1x64x256xf32>
    tpu.vector_store %arg14[%c0_138, %c0_139, %c0_140], %130 {strides = array<i32>} : memref<1x64x256xf32, #tpu.memory_space<vmem>>, vector<1x64x256xf32>,
    return
  }
  func.func @transform_0(%arg0: i32) -> (i32, i32, i32, i32) {
    %c0_i32 = arith.constant 0 : i32
    %c0_i32_0 = arith.constant 0 : i32
    %c0_i32_1 = arith.constant 0 : i32
    %c0_i32_2 = arith.constant 0 : i32
    return %arg0, %c0_i32, %c0_i32_0, %c0_i32_1 : i32, i32, i32, i32
  }
  func.func @transform_1(%arg0: i32) -> (i32, i32) {
    %c0_i32 = arith.constant 0 : i32
    %c0_i32_0 = arith.constant 0 : i32
    %c0_i32_1 = arith.constant 0 : i32
    return %c0_i32, %c0_i32_0 : i32, i32
  }
  func.func @transform_2(%arg0: i32) -> (i32, i32) {
    %c0_i32 = arith.constant 0 : i32
    %c0_i32_0 = arith.constant 0 : i32
    %c0_i32_1 = arith.constant 0 : i32
    return %c0_i32, %c0_i32_0 : i32, i32
  }
  func.func @transform_3(%arg0: i32) -> (i32, i32) {
    %c0_i32 = arith.constant 0 : i32
    %c0_i32_0 = arith.constant 0 : i32
    %c0_i32_1 = arith.constant 0 : i32
    return %c0_i32, %c0_i32_0 : i32, i32
  }
  func.func @transform_4(%arg0: i32) -> (i32, i32) {
    %c0_i32 = arith.constant 0 : i32
    %c0_i32_0 = arith.constant 0 : i32
    %c0_i32_1 = arith.constant 0 : i32
    return %c0_i32, %c0_i32_0 : i32, i32
  }
  func.func @transform_5(%arg0: i32) -> (i32, i32) {
    %c0_i32 = arith.constant 0 : i32
    %c0_i32_0 = arith.constant 0 : i32
    %c0_i32_1 = arith.constant 0 : i32
    return %c0_i32, %c0_i32_0 : i32, i32
  }
  func.func @transform_6(%arg0: i32) -> (i32, i32) {
    %c0_i32 = arith.constant 0 : i32
    %c0_i32_0 = arith.constant 0 : i32
    %c0_i32_1 = arith.constant 0 : i32
    return %c0_i32, %c0_i32_0 : i32, i32
  }
  func.func @transform_7(%arg0: i32) -> (i32, i32) {
    %c0_i32 = arith.constant 0 : i32
    %c0_i32_0 = arith.constant 0 : i32
    %c0_i32_1 = arith.constant 0 : i32
    return %c0_i32, %c0_i32_0 : i32, i32
  }
  func.func @transform_8(%arg0: i32) -> (i32, i32) {
    %c0_i32 = arith.constant 0 : i32
    %c0_i32_0 = arith.constant 0 : i32
    %c0_i32_1 = arith.constant 0 : i32
    return %c0_i32, %c0_i32_0 : i32, i32
  }
  func.func @transform_9(%arg0: i32) -> (i32, i32) {
    %c0_i32 = arith.constant 0 : i32
    %c0_i32_0 = arith.constant 0 : i32
    %c0_i32_1 = arith.constant 0 : i32
    return %c0_i32, %c0_i32_0 : i32, i32
  }
  func.func @transform_10(%arg0: i32) -> (i32, i32) {
    %c0_i32 = arith.constant 0 : i32
    %c0_i32_0 = arith.constant 0 : i32
    %c0_i32_1 = arith.constant 0 : i32
    return %c0_i32, %c0_i32_0 : i32, i32
  }
  func.func @transform_11(%arg0: i32) -> (i32, i32) {
    %c0_i32 = arith.constant 0 : i32
    %c0_i32_0 = arith.constant 0 : i32
    %c0_i32_1 = arith.constant 0 : i32
    return %c0_i32, %c0_i32_0 : i32, i32
  }
  func.func @transform_12(%arg0: i32) -> (i32, i32) {
    %c0_i32 = arith.constant 0 : i32
    %c0_i32_0 = arith.constant 0 : i32
    %c0_i32_1 = arith.constant 0 : i32
    return %c0_i32, %c0_i32_0 : i32, i32
  }
  func.func @transform_13(%arg0: i32) -> (i32, i32, i32) {
    %c0_i32 = arith.constant 0 : i32
    %c0_i32_0 = arith.constant 0 : i32
    %c0_i32_1 = arith.constant 0 : i32
    return %arg0, %c0_i32, %c0_i32_0 : i32, i32, i32
  }
}

</mosaic_0001>

<bundles_post_ra>
// kernel: inception_forward.1
= control target key start
LH: loop header
LB: loop body
LE: loop exit
PB: predicated region body
PF: predicated region fallthrough
CT: control target
= control target key end

     0   :  { %s12914_s25 = smov 0   ;;  %s18056_s0 = inlined_call_operand.vmem [shape: bf16[2,16,16,4], index: 0, kind: input, shape index: {}]   ;;  %s18057_s1 = inlined_call_operand.vmem [shape: bf16[8,32], index: 1, kind: input, shape index: {}]   ;;  %s18058_s2 = inlined_call_operand.vmem [shape: f32[1,32], index: 2, kind: input, shape index: {}]   ;;  %s18059_s3 = inlined_call_operand.vmem [shape: f32[1,32], index: 3, kind: input, shape index: {}]   ;;  %s18060_s4 = inlined_call_operand.vmem [shape: bf16[40,16], index: 4, kind: input, shape index: {}]   ;;  %s18061_s5 = inlined_call_operand.vmem [shape: f32[1,16], index: 5, kind: input, shape index: {}]   ;;  %s18062_s6 = inlined_call_operand.vmem [shape: f32[1,16], index: 6, kind: input, shape index: {}]   ;;  %s18063_s7 = inlined_call_operand.vmem [shape: bf16[72,16], index: 7, kind: input, shape index: {}]   ;;  %s18064_s8 = inlined_call_operand.vmem [shape: f32[1,16], index: 8, kind: input, shape index: {}]   ;;  %s18065_s9 = inlined_call_operand.vmem [shape: f32[1,16], index: 9, kind: input, shape index: {}]   ;;  %s18066_s10 = inlined_call_operand.vmem [shape: bf16[80,32], index: 10, kind: input, shape index: {}]   ;;  %s18067_s11 = inlined_call_operand.vmem [shape: f32[1,32], index: 11, kind: input, shape index: {}]   ;;  %s18068_s12 = inlined_call_operand.vmem [shape: f32[1,32], index: 12, kind: input, shape index: {}]   ;;  %s18069_s13 = inlined_call_operand.vmem [shape: f32[2,64,256], index: 13, kind: output, shape index: {}]  }
   0x1 LB: > { %s11472_s26 = sadd.s32 4294967295, %s12830_s25   ;;  %p11476_p0 = scmp.ge.s32.totalorder %s12830_s25, 1  ;;  %s12830_s25 = sphi %s12914_s25, %s23_s25  }
   0x2   : > { %p387_p1 = scmp.lt.s32.totalorder %s12830_s25, 3 }
   0x4   : > { %p388_p2 = pnand %p11476_p0, %p387_p1 }
   0x6   : > { %391 = sbr.rel (%p388_p2) target bundleno = 2156 (0x86c), region = 72 }
   0xd   : > { %vm442_vm0 = vcmask 125952   ;;  %vm445_vm1 = vcmask 122880   ;;  %v12832_v0 = vmov 0   ;;  %p431_p3 = scmp.lt.s32.totalorder %s11472_s26, 1  ;;  %vm530_vm2 = vsmask.f32 256 }
   0xe   : > { %495 = vst.msk [vmem:[#allocation2 + $0xcc] sm:$0xf] %vm442_vm0, %v12832_v0  ;;  %496 = vst.msk [vmem:[#allocation2 + $0xd0] sm:$0xf] %vm442_vm0, %v12832_v0  ;;  %vm531_vm3 = vsmask.f32 4368 }
   0xf   : > { %443 = vst.msk [vmem:[#allocation2] sm:$0xf] %vm442_vm0, %v12832_v0  ;;  %444 = vst.msk [vmem:[#allocation2 + $0x4] sm:$0xf] %vm442_vm0, %v12832_v0  ;;  %s18599_s26 = smov (!%p431_p3, %s11472_s26), 1  ;;  %vm1148_vm4 = vcmask 1046528  }
  0x10   : > { %447 = vst.msk [vmem:[#allocation2 + $0xc] sm:$0xf] %vm442_vm0, %v12832_v0  ;;  %448 = vst.msk [vmem:[#allocation2 + $0x10] sm:$0xf] %vm442_vm0, %v12832_v0  ;;  %s12016_s27 = sshll.u32 %s18599_s26, 7  ;;  %vm854_vm6 = vcmask 27648  }
  0x11   : > { %450 = vst.msk [vmem:[#allocation2 + $0x18] sm:$0xf] %vm442_vm0, %v12832_v0  ;;  %451 = vst.msk [vmem:[#allocation2 + $0x1c] sm:$0xf] %vm442_vm0, %v12832_v0  ;;  %s12988_s30 = scalar_lea.vmem %s18056_s0, %s12016_s27  ;;  %vm855_vm5 = vsmask.f32 7938  ;;  %s18035_s20 = scalar_lea.vmem %s18069_s13, %s12016_s27 }
  0x12   : > { %453 = vst.msk [vmem:[#allocation2 + $0x24] sm:$0xf] %vm442_vm0, %v12832_v0  ;;  %454 = vst.msk [vmem:[#allocation2 + $0x28] sm:$0xf] %vm442_vm0, %v12832_v0  ;;  %v498_v1 = vld [vmem:[%s12988_s30] sm:$0xf] }
  0x13   : > { %456 = vst.msk [vmem:[#allocation2 + $0x30] sm:$0xf] %vm442_vm0, %v12832_v0  ;;  %457 = vst.msk [vmem:[#allocation2 + $0x34] sm:$0xf] %vm442_vm0, %v12832_v0  ;;  %v499_v2 = vld [vmem:[%s12988_s30 + $0x4] sm:$0xf] }
  0x14   : > { %459 = vst.msk [vmem:[#allocation2 + $0x3c] sm:$0xf] %vm442_vm0, %v12832_v0  ;;  %460 = vst.msk [vmem:[#allocation2 + $0x40] sm:$0xf] %vm442_vm0, %v12832_v0  ;;  %vm862_vm7 = vcmask 24576   ;;  %v534_v4 = vshrl.u32 %v498_v1, 16 }
  0x15   : > { %462 = vst.msk [vmem:[#allocation2 + $0x48] sm:$0xf] %vm442_vm0, %v12832_v0  ;;  %463 = vst.msk [vmem:[#allocation2 + $0x4c] sm:$0xf] %vm442_vm0, %v12832_v0  ;;  %v12457_v3 = vld [vmem:[#allocation2 + $0xcc] sm:$0xff]   ;;  %s12833_s14 = smov 32  }
  0x16   : > { %465 = vst.msk [vmem:[#allocation2 + $0x54] sm:$0xf] %vm442_vm0, %v12832_v0  ;;  %466 = vst.msk [vmem:[#allocation2 + $0x58] sm:$0xf] %vm442_vm0, %v12832_v0  ;;  %vm4377_vm8 = vsmask.f32 7424  ;;  %4854 = vrot.lane.b32.xlu0 %v12457_v3, %s12833_s14 }
  0x17   : > { %468 = vst.msk [vmem:[#allocation2 + $0x60] sm:$0xf] %vm442_vm0, %v12832_v0  ;;  %469 = vst.msk [vmem:[#allocation2 + $0x64] sm:$0xf] %vm442_vm0, %v12832_v0  ;;  %v5940_v5 = vld [vmem:[#allocation2 + $0x4] sm:$0xf] }
  0x18   : > { %471 = vst.msk [vmem:[#allocation2 + $0x6c] sm:$0xf] %vm442_vm0, %v12832_v0  ;;  %472 = vst.msk [vmem:[#allocation2 + $0x70] sm:$0xf] %vm442_vm0, %v12832_v0  ;;  %v5987_v6 = vld [vmem:[#allocation2] sm:$0xe] }
  0x19   : > { %474 = vst.msk [vmem:[#allocation2 + $0x78] sm:$0xf] %vm442_vm0, %v12832_v0  ;;  %475 = vst.msk [vmem:[#allocation2 + $0x7c] sm:$0xf] %vm442_vm0, %v12832_v0  ;;  %v11712_v8 = vcombine.low %v5987_v6, %v5940_v5  ;;  %v5939_v9 = vld [vmem:[#allocation2] sm:$0xf] }
  0x1a   : > { %477 = vst.msk [vmem:[#allocation2 + $0x84] sm:$0xf] %vm442_vm0, %v12832_v0  ;;  %478 = vst.msk [vmem:[#allocation2 + $0x88] sm:$0xf] %vm442_vm0, %v12832_v0  ;;  %v536_v10 = vrot.slane %v534_v4, 7  ;;  %v12993_v11 = vcombine.low %v5939_v9, %v5940_v5  ;;  %v537_v13 = vshll.u32 %v498_v1, 16 }
  0x1b   : > { %480 = vst.msk [vmem:[#allocation2 + $0x90] sm:$0xf] %vm442_vm0, %v12832_v0  ;;  %481 = vst.msk [vmem:[#allocation2 + $0x94] sm:$0xf] %vm442_vm0, %v12832_v0  ;;  %v500_v12 = vld [vmem:[%s12988_s30 + $0x8] sm:$0xf] }
  0x1c   : > { %483 = vst.msk [vmem:[#allocation2 + $0x9c] sm:$0xf] %vm442_vm0, %v12832_v0  ;;  %484 = vst.msk [vmem:[#allocation2 + $0xa0] sm:$0xf] %vm442_vm0, %v12832_v0  ;;  %v542_v14 = vshrl.u32 %v499_v2, 16  ;;  %v545_v15 = vshll.u32 %v499_v2, 16  ;;  %v539_v24 = vor.u32 %v537_v13, %v536_v10 }
  0x1d   : > { %486 = vst.msk [vmem:[#allocation2 + $0xa8] sm:$0xf] %vm442_vm0, %v12832_v0  ;;  %487 = vst.msk [vmem:[#allocation2 + $0xac] sm:$0xf] %vm442_vm0, %v12832_v0  ;;  %v6532_v16 = vrot.slane %v11712_v8, 1  ;;  %v18157_v20 = vmov 0 }
  0x1e   : > { %489 = vst.msk [vmem:[#allocation2 + $0xb4] sm:$0xf] %vm442_vm0, %v12832_v0  ;;  %490 = vst.msk [vmem:[#allocation2 + $0xb8] sm:$0xf] %vm442_vm0, %v12832_v0  ;;  %v501_v19 = vld [vmem:[%s12988_s30 + $0xc] sm:$0xf] }
  0x1f   : > { %492 = vst.msk [vmem:[#allocation2 + $0xc0] sm:$0xf] %vm442_vm0, %v12832_v0  ;;  %493 = vst.msk [vmem:[#allocation2 + $0xc4] sm:$0xf] %vm442_vm0, %v12832_v0  ;;  %v540_v21 = vrot.slane %v536_v10, 4  ;;  %vm1341_vm10 = vcmask 1045504  }
  0x20   : > { %446 = vst.msk [vmem:[#allocation2 + $0x8] sm:$0x1] %vm445_vm1, %v12832_v0  ;;  %449 = vst.msk [vmem:[#allocation2 + $0x14] sm:$0x1] %vm445_vm1, %v12832_v0  ;;  %v6260_v22 = vshrl.u32 %v12993_v11, 16  ;;  %v6262_v23 = vshll.u32 %v12993_v11, 16 }
  0x21   : > { %452 = vst.msk [vmem:[#allocation2 + $0x20] sm:$0x1] %vm445_vm1, %v12832_v0  ;;  %455 = vst.msk [vmem:[#allocation2 + $0x2c] sm:$0x1] %vm445_vm1, %v12832_v0  ;;  %v544_v25 = vrot.slane %v542_v14, 7  ;;  %v12083_v28 = vld [vmem:[#allocation2] sm:$0xff]  }
  0x22   : > { %458 = vst.msk [vmem:[#allocation2 + $0x38] sm:$0x1] %vm445_vm1, %v12832_v0  ;;  %461 = vst.msk [vmem:[#allocation2 + $0x44] sm:$0x1] %vm445_vm1, %v12832_v0  ;;  %v857_v27 = vld [vmem:[#allocation2 + $0xc] sm:$0xf]  ;;  %v12084_v42 = vunpack.c.l.bf16 %v12083_v28  ;;  %v12085_v53 = vunpack.c.h.bf16 %v12083_v28 }
  0x23   : > { %464 = vst.msk [vmem:[#allocation2 + $0x50] sm:$0x1] %vm445_vm1, %v12832_v0  ;;  %467 = vst.msk [vmem:[#allocation2 + $0x5c] sm:$0x1] %vm445_vm1, %v12832_v0  ;;  %v551_v31 = vshrl.u32 %v500_v12, 16  ;;  %v554_v32 = vshll.u32 %v500_v12, 16  ;;  %v547_v36 = vor.u32 %v545_v15, %v544_v25 }
  0x24   : > { %470 = vst.msk [vmem:[#allocation2 + $0x68] sm:$0x1] %vm445_vm1, %v12832_v0  ;;  %473 = vst.msk [vmem:[#allocation2 + $0x74] sm:$0x1] %vm445_vm1, %v12832_v0  ;;  %s12834_s15 = smov 16   ;;  %v6264_v35 = vrot.slane %v6262_v23, 1 }
  0x25   : > { %476 = vst.msk [vmem:[#allocation2 + $0x80] sm:$0x1] %vm445_vm1, %v12832_v0  ;;  %479 = vst.msk [vmem:[#allocation2 + $0x8c] sm:$0x1] %vm445_vm1, %v12832_v0  ;;  %v549_v37 = vrot.slane %v544_v25, 4  ;;  %v559_v38 = vshrl.u32 %v501_v19, 16 }
  0x26   : > { %482 = vst.msk [vmem:[#allocation2 + $0x98] sm:$0x1] %vm445_vm1, %v12832_v0  ;;  %485 = vst.msk [vmem:[#allocation2 + $0xa4] sm:$0x1] %vm445_vm1, %v12832_v0  ;;  %v553_v39 = vrot.slane %v551_v31, 7  ;;  %v562_v40 = vshll.u32 %v501_v19, 16  ;;  %v6265_v44 = vor.u32 %v6264_v35, %v6260_v22 }
  0x27   : > { %488 = vst.msk [vmem:[#allocation2 + $0xb0] sm:$0x1] %vm445_vm1, %v12832_v0  ;;  %491 = vst.msk [vmem:[#allocation2 + $0xbc] sm:$0x1] %vm445_vm1, %v12832_v0  ;;  %v864_v34 = vld [vmem:[#allocation2 + $0x14] sm:$0x1] }
  0x28   : > { %494 = vst.msk [vmem:[#allocation2 + $0xc8] sm:$0x1] %vm445_vm1, %v12832_v0  ;;  %497 = vst.msk [vmem:[#allocation2 + $0xd4] sm:$0x1] %vm445_vm1, %v12832_v0  ;;  %v1068_v43 = vld [vmem:[#allocation2 + $0x8] sm:$0x1]  ;;  %v556_v50 = vor.u32 %v554_v32, %v553_v39 }
  0x29   : > { %v12458_v7 = vld [vmem:[#allocation2 + $0x8] ss:$0 sps:$4 sm:$0x11]   ;;  %18156 = vst [vmem:[#allocation3_spill] sm:$0xff] %v12993_v11  ;;  %vm12999_vm9 = vmor %vm530_vm2, %vm531_vm3  ;;  %v561_v46 = vrot.slane %v559_v38, 7  ;;  %v557_v51 = vrot.slane %v553_v39, 4  ;;  %v1084_v54 = vunpack.c.l.bf16 %v1068_v43 }
  0x2a   : > { %v6533_v17 = vrot.slane %v12458_v7, 1  ;;  %v6267_v18 = vshll.u32 %v12458_v7, 16  ;;  %v18158_v20 = vsel %vm12999_vm9, 4294967295, %v18157_v20  ;;  %vm13007_vm11 = vmand %vm854_vm6, %vm855_vm5  ;;  %v548_v45 = vsel %vm12999_vm9, %v540_v21, %v547_v36  ;;  %v867_v48 = vld [vmem:[#allocation2 + $0x18] sm:$0xf]  ;;  %s12835_s16 = smov 8  }
  0x2b   : > { %18159 = vst [vmem:[#allocation4_spill] sm:$0xff] %v18158_v20  ;;  %vm13014_vm12 = vmand %vm862_vm7, %vm530_vm2  ;;  %v858_v41 = vsel %vm13007_vm11, %v539_v24, %v857_v27  ;;  %v1293_v49 = vld [vmem:[#allocation2] sm:$0xe]  ;;  %v871_v52 = vld [vmem:[#allocation2 + $0x20] sm:$0x1]  ;;  %v564_v56 = vor.u32 %v562_v40, %v561_v46  ;;  %v566_v57 = vrot.slane %v561_v46, 4  ;;  %v868_v60 = vsel %vm13007_vm11, %v556_v50, %v867_v48 }
  0x2c   : > { %v6534_v29 = vsel %vm1148_vm4, %v6532_v16, %v6533_v17  ;;  %v6269_v30 = vrot.slane %v6267_v18, 1  ;;  %859 = vst [vmem:[#allocation2 + $0xc] sm:$0xf] %v858_v41  ;;  %v865_v47 = vsel %vm13014_vm12, %v549_v37, %v864_v34  ;;  %861 = vst.msk [vmem:[#allocation2 + $0x10] sm:$0xf] %vm854_vm6, %v548_v45  ;;  %v1149_v58 = vrot.slane %v12084_v42, 1 }
  0x2d   : > { %6580 = vrot.lane.b32.xlu0 %v6534_v29, %s12834_s15  ;;  %866 = vst [vmem:[#allocation2 + $0x14] sm:$0x1] %v865_v47  ;;  %v502_v59 = vld [vmem:[%s12988_s30 + $0x10] sm:$0xf]  ;;  %v1150_v61 = vrot.slane %v12085_v53, 1  ;;  %v1152_v62 = vrot.slane %v1084_v54, 1  ;;  %v1309_v63 = vunpack.c.l.bf16 %v1293_v49  ;;  %v565_v1 = vsel %vm12999_vm9, %v557_v51, %v564_v56 }
  0x2e   : > { %v6270_v55 = vsel %vm4377_vm8, %v6265_v44, %v6269_v30  ;;  %869 = vst [vmem:[#allocation2 + $0x18] sm:$0xf] %v868_v60  ;;  %v872_v2 = vsel %vm13014_vm12, %v566_v57, %v871_v52  ;;  %v1343_v3 = vrot.slane %v12085_v53, 2  ;;  %v1345_v4 = vrot.slane %v1084_v54, 2  ;;  %v503_v5 = vld [vmem:[%s12988_s30 + $0x14] sm:$0xf] }
  0x2f   : > { %v12461_v0 = vld [vmem:[#allocation2 + $0xd4] ss:$0 sps:$4 sm:$0x11]   ;;  %870 = vst.msk [vmem:[#allocation2 + $0x1c] sm:$0xf] %vm854_vm6, %v565_v1  ;;  %v1151_v6 = vsel %vm1148_vm4, %v1149_v58, %v1150_v61  ;;  %v1153_v7 = vsel %vm1148_vm4, %v1150_v61, %v1152_v62  ;;  %v1342_v8 = vrot.slane %v1309_v63, 2 }
  0x30   : > { %873 = vst [vmem:[#allocation2 + $0x20] sm:$0x1] %v872_v2  ;;  %v568_v9 = vshrl.u32 %v502_v59, 16  ;;  %4856 = vrot.lane.b32.xlu1 %v12461_v0, %s12833_s14  ;;  %v1261_v10 = vadd.f32 %v12084_v42, %v1151_v6  ;;  %v1262_v12 = vadd.f32 %v12085_v53, %v1153_v7  ;;  %v1346_v13 = vsel %vm1341_vm10, %v1343_v3, %v1345_v4  ;;  %v874_v56 = vld [vmem:[#allocation2 + $0x24] sm:$0xf]  ;;  %s12836_s17 = smov 4  }
  0x31   : > { %6451 = vrot.lane.b32.xlu0 %v6270_v55, %s12835_s16  ;;  %v571_v14 = vshll.u32 %v502_v59, 16  ;;  %v1344_v15 = vsel %vm1341_vm10, %v1342_v8, %v1343_v3  ;;  %v576_v19 = vshrl.u32 %v503_v5, 16  ;;  %v579_v46 = vshll.u32 %v503_v5, 16  ;;  %v878_v1 = vld [vmem:[#allocation2 + $0x2c] sm:$0x1]  ;;  %s12837_s24 = smov 120  }
  0x32   : > { %v570_v18 = vrot.slane %v568_v9, 7  ;;  %v1454_v21 = vadd.f32 %v1344_v15, %v1261_v10  ;;  %v1455_v22 = vadd.f32 %v1346_v13, %v1262_v12  ;;  %vm2738_vm13 = vcmask 1043456   ;;  %s12838_s28 = smov 112   ;;  %s12839_s19 = smov 24  }
  0x33   : > { %v1486_v16 = vld [vmem:[#allocation2 + $0xc] sm:$0xf]  ;;  %v578_v36 = vrot.slane %v576_v19, 7  ;;  %v975_v6 = vld [vmem:[#allocation2 + $0x10] sm:$0xf]  ;;  %vm2705_vm14 = vcmask 64512  }
  0x34   : > { %v1806_v17 = vld [vmem:[#allocation2 + $0xc] sm:$0xe]  ;;  %v1518_v24 = vunpack.c.l.bf16 %v1486_v16  ;;  %v1582_v25 = vld [vmem:[#allocation2 + $0x14] sm:$0x1]  ;;  %v573_v30 = vor.u32 %v571_v14, %v570_v18  ;;  %v574_v31 = vrot.slane %v570_v18, 4  ;;  %vm2655_vm15 = vcmask 31744  }
  0x35   : > { %v13042_v23 = vld [vmem:[#allocation2 + $0xc] sm:$0xff]   ;;  %v1822_v27 = vunpack.c.l.bf16 %v1806_v17  ;;  %v1598_v29 = vunpack.c.l.bf16 %v1582_v25  ;;  %v2319_v41 = vld [vmem:[#allocation2 + $0x18] sm:$0xe]  ;;  %v583_v47 = vrot.slane %v578_v36, 4  ;;  %v581_v60 = vor.u32 %v579_v46, %v578_v36  ;;  %v1069_v7 = vld [vmem:[#allocation2 + $0x14] sm:$0x1] }
  0x36   : > { %v1519_v28 = vunpack.c.h.bf16 %v13042_v23  ;;  %v1550_v32 = vadd.f32 %v1518_v24, %v1454_v21  ;;  %v1662_v34 = vrot.slane %v1518_v24, 1  ;;  %v12147_v43 = vld [vmem:[#allocation2 + $0x18] sm:$0xff]   ;;  %v2335_v45 = vunpack.c.l.bf16 %v2319_v41  ;;  %v1294_v13 = vld [vmem:[#allocation2 + $0xc] sm:$0xe]  ;;  %s12840_s22 = smov 48   ;;  %s12843_s18 = smov 56  }
  0x37   : > { %v1854_v35 = vrot.slane %v1822_v27, 2  ;;  %v1665_v39 = vrot.slane %v1598_v29, 1  ;;  %v1857_v42 = vrot.slane %v1598_v29, 2  ;;  %v2095_v44 = vld [vmem:[#allocation2 + $0x20] sm:$0x1]  ;;  %v13048_v51 = vunpack.c.l.bf16 %v12147_v43 }
  0x38   : > { %v1551_v37 = vadd.f32 %v1519_v28, %v1455_v22  ;;  %v1663_v38 = vrot.slane %v1519_v28, 1  ;;  %v1855_v40 = vrot.slane %v1519_v28, 2  ;;  %v13051_v55 = vunpack.c.h.bf16 %v12147_v43  ;;  %v1583_v14 = vld [vmem:[#allocation2 + $0x20] sm:$0x1]  ;;  %v1807_v15 = vld [vmem:[#allocation2 + $0x18] sm:$0xe] }
  0x39   : > { %v2111_v57 = vunpack.c.l.bf16 %v2095_v44  ;;  %v2175_v58 = vrot.slane %v13048_v51, 1  ;;  %v2367_v59 = vrot.slane %v2335_v45, 2  ;;  %v582_v4 = vsel %vm12999_vm9, %v574_v31, %v581_v60 }
  0x3a   : > { %v1664_v48 = vsel %vm1148_vm4, %v1662_v34, %v1663_v38  ;;  %v1666_v49 = vsel %vm1148_vm4, %v1663_v38, %v1665_v39  ;;  %v1856_v50 = vsel %vm1341_vm10, %v1854_v35, %v1855_v40  ;;  %v1858_v54 = vsel %vm1341_vm10, %v1855_v40, %v1857_v42  ;;  %877 = vst.msk [vmem:[#allocation2 + $0x28] sm:$0xf] %vm854_vm6, %v582_v4 }
  0x3b   : > { %v1774_v52 = vadd.f32 %v1664_v48, %v1550_v32  ;;  %v1775_v53 = vadd.f32 %v1666_v49, %v1551_v37  ;;  %v13055_v63 = vrot.slane %v13051_v55, 1  ;;  %v13058_v0 = vrot.slane %v13051_v55, 2  ;;  %v504_v49 = vld [vmem:[%s12988_s30 + $0x18] sm:$0xf] }
  0x3c   : > { %v2178_v2 = vrot.slane %v2111_v57, 1  ;;  %v2370_v3 = vrot.slane %v2111_v57, 2  ;;  %v875_v5 = vsel %vm13007_vm11, %v573_v30, %v874_v56  ;;  %v879_v18 = vsel %vm13014_vm12, %v583_v47, %v878_v1 }
  0x3d   : > { %v1966_v61 = vadd.f32 %v1856_v50, %v1774_v52  ;;  %v1967_v62 = vadd.f32 %v1858_v54, %v1775_v53  ;;  %v13068_v10 = vsel %vm1148_vm4, %v2175_v58, %v13055_v63  ;;  %v2369_v12 = vsel %vm1341_vm10, %v2367_v59, %v13058_v0  ;;  %876 = vst [vmem:[#allocation2 + $0x24] sm:$0xf] %v875_v5 }
  0x3e   : > { %v2179_v16 = vsel %vm1148_vm4, %v13055_v63, %v2178_v2  ;;  %v2371_v17 = vsel %vm1341_vm10, %v13058_v0, %v2370_v3  ;;  %v1006_v19 = vunpack.c.l.bf16 %v13042_v23  ;;  %880 = vst [vmem:[#allocation2 + $0x2c] sm:$0x1] %v879_v18  ;;  %v1007_v24 = vunpack.c.l.bf16 %v975_v6  ;;  %v505_v2 = vld [vmem:[%s12988_s30 + $0x1c] sm:$0xf] }
  0x3f   : > { %v2063_v8 = vadd.f32 %v13048_v51, %v1966_v61  ;;  %v2064_v9 = vadd.f32 %v13051_v55, %v1967_v62  ;;  %v1085_v25 = vunpack.c.l.bf16 %v1069_v7  ;;  %v1310_v28 = vunpack.c.l.bf16 %v1294_v13 }
  0x40   : > { %v1154_v27 = vrot.slane %v1006_v19, 1  ;;  %v1599_v29 = vunpack.c.l.bf16 %v1583_v14  ;;  %v1823_v30 = vunpack.c.l.bf16 %v1807_v15  ;;  %v1155_v34 = vrot.slane %v1007_v24, 1 }
  0x41   : > { %v2287_v21 = vadd.f32 %v13068_v10, %v2063_v8  ;;  %v2288_v22 = vadd.f32 %v2179_v16, %v2064_v9  ;;  %v1157_v35 = vrot.slane %v1085_v25, 1  ;;  %v1347_v36 = vrot.slane %v1310_v28, 2  ;;  %v1070_v8 = vld [vmem:[#allocation2 + $0x20] sm:$0x1]  ;;  %v1295_v9 = vld [vmem:[#allocation2 + $0x18] sm:$0xe] }
  0x42   : > { %v1348_v37 = vrot.slane %v1007_v24, 2  ;;  %v1350_v38 = vrot.slane %v1085_v25, 2  ;;  %v1670_v39 = vrot.slane %v1599_v29, 1  ;;  %v1156_v40 = vsel %vm1148_vm4, %v1154_v27, %v1155_v34  ;;  %v881_v16 = vld [vmem:[#allocation2 + $0x30] sm:$0xf] }
  0x43   : > { %v2479_v31 = vadd.f32 %v2369_v12, %v2287_v21  ;;  %v2480_v32 = vadd.f32 %v2371_v17, %v2288_v22  ;;  %v1158_v41 = vsel %vm1148_vm4, %v1155_v34, %v1157_v35  ;;  %v1859_v42 = vrot.slane %v1823_v30, 2  ;;  %v885_v35 = vld [vmem:[#allocation2 + $0x38] sm:$0x1] }
  0x44   : > { %v1263_v43 = vadd.f32 %v1156_v40, %v1006_v19  ;;  %v1264_v44 = vadd.f32 %v1158_v41, %v1007_v24  ;;  %v1349_v45 = vsel %vm1341_vm10, %v1347_v36, %v1348_v37  ;;  %v1351_v46 = vsel %vm1341_vm10, %v1348_v37, %v1350_v38  ;;  %v2001_v47 = vld [vmem:[#allocation2 + $0x24] sm:$0xff]  }
  0x45   : > { %v2511_v23 = vpack.c.bf16 %v2480_v32, %v2479_v31  ;;  %v2320_v48 = vld [vmem:[#allocation2 + $0x24] sm:$0xe]  ;;  %v1671_v50 = vsel %vm1148_vm4, %v13055_v63, %v1670_v39  ;;  %v1861_v52 = vsel %vm1341_vm10, %v1859_v42, %v13058_v0  ;;  %v1862_v53 = vrot.slane %v1599_v29, 2  ;;  %v2096_v59 = vld [vmem:[#allocation2 + $0x2c] sm:$0x1] }
  0x46   : > { %v2033_v54 = vunpack.c.l.bf16 %v2001_v47  ;;  %v1456_v56 = vadd.f32 %v1349_v45, %v1263_v43  ;;  %v1457_v57 = vadd.f32 %v1351_v46, %v1264_v44  ;;  %v2034_v58 = vunpack.c.h.bf16 %v2001_v47  ;;  %v1490_v32 = vld [vmem:[#allocation2 + $0x24] sm:$0xff]  }
  0x47   : > { %2623 = vrot.lane.b32.xlu0 %v2511_v23, %s12836_s17  ;;  %v2336_v60 = vunpack.c.l.bf16 %v2320_v48  ;;  %v1863_v61 = vsel %vm1341_vm10, %v13058_v0, %v1862_v53  ;;  %v2112_v62 = vunpack.c.l.bf16 %v2096_v59  ;;  %v585_v3 = vshrl.u32 %v504_v49, 16 }
  0x48   : > { %v2180_v1 = vrot.slane %v2033_v54, 1  ;;  %v1552_v4 = vadd.f32 %v13048_v51, %v1456_v56  ;;  %v1553_v5 = vadd.f32 %v13051_v55, %v1457_v57  ;;  %v2181_v6 = vrot.slane %v2034_v58, 1  ;;  %v506_v56 = vld [vmem:[%s12988_s30 + $0x20] sm:$0xf] }
  0x49   : > { %v2372_v7 = vrot.slane %v2336_v60, 2  ;;  %v2183_v12 = vrot.slane %v2112_v62, 1  ;;  %v2373_v13 = vrot.slane %v2034_v58, 2  ;;  %v2375_v14 = vrot.slane %v2112_v62, 2 }
  0x4a   : > { %v587_v15 = vrot.slane %v585_v3, 7  ;;  %v1776_v17 = vadd.f32 %v13068_v10, %v1552_v4  ;;  %v1777_v18 = vadd.f32 %v1671_v50, %v1553_v5  ;;  %v2182_v19 = vsel %vm1148_vm4, %v2180_v1, %v2181_v6  ;;  %v1584_v50 = vld [vmem:[#allocation2 + $0x2c] sm:$0x1] }
  0x4b   : > { %v588_v21 = vshll.u32 %v504_v49, 16  ;;  %v2184_v22 = vsel %vm1148_vm4, %v2181_v6, %v2183_v12  ;;  %v2374_v24 = vsel %vm1341_vm10, %v2372_v7, %v2373_v13  ;;  %v2376_v25 = vsel %vm1341_vm10, %v2373_v13, %v2375_v14 }
  0x4c   : > { %v591_v27 = vrot.slane %v587_v15, 4  ;;  %v1968_v28 = vadd.f32 %v1861_v52, %v1776_v17  ;;  %v1969_v29 = vadd.f32 %v1863_v61, %v1777_v18  ;;  %v593_v31 = vshrl.u32 %v505_v2, 16  ;;  %v1808_v52 = vld [vmem:[#allocation2 + $0x24] sm:$0xe] }
  0x4d   : > { %v590_v30 = vor.u32 %v588_v21, %v587_v15  ;;  %v596_v34 = vshll.u32 %v505_v2, 16  ;;  %v1086_v36 = vunpack.c.l.bf16 %v1070_v8  ;;  %v1265_v37 = vadd.f32 %v13048_v51, %v13068_v10 }
  0x4e   : > { %v1311_v38 = vunpack.c.l.bf16 %v1295_v9  ;;  %v2065_v39 = vadd.f32 %v2033_v54, %v1968_v28  ;;  %v2066_v23 = vadd.f32 %v2034_v58, %v1969_v29  ;;  %v595_v40 = vrot.slane %v593_v31, 7  ;;  %v507_v9 = vld [vmem:[%s12988_s30 + $0x24] sm:$0xf]  ;;  %v888_v31 = vld [vmem:[#allocation2 + $0x3c] sm:$0xf] }
  0x4f   : > { %v882_v41 = vsel %vm13007_vm11, %v590_v30, %v881_v16  ;;  %v1162_v42 = vrot.slane %v1086_v36, 1  ;;  %v1355_v44 = vrot.slane %v1086_v36, 2  ;;  %v1522_v45 = vunpack.c.l.bf16 %v1490_v32  ;;  %v13121_v16 = vld [vmem:[#allocation2 + $0x24] sm:$0xff]  }
  0x50   : > { %883 = vst [vmem:[#allocation2 + $0x30] sm:$0xf] %v882_v41  ;;  %v1352_v43 = vrot.slane %v1311_v38, 2  ;;  %v2289_v46 = vadd.f32 %v2182_v19, %v2065_v39  ;;  %v2290_v47 = vadd.f32 %v2184_v22, %v2066_v23  ;;  %v598_v48 = vor.u32 %v596_v34, %v595_v40 }
  0x51   : > { %v600_v49 = vrot.slane %v595_v40, 4  ;;  %v1163_v51 = vsel %vm1148_vm4, %v13055_v63, %v1162_v42  ;;  %v1356_v53 = vsel %vm1341_vm10, %v13058_v0, %v1355_v44  ;;  %v1523_v54 = vunpack.c.h.bf16 %v1490_v32 }
  0x52   : > { %v1354_v10 = vsel %vm1341_vm10, %v1352_v43, %v13058_v0  ;;  %v2481_v57 = vadd.f32 %v2374_v24, %v2289_v46  ;;  %v2482_v58 = vadd.f32 %v2376_v25, %v2290_v47  ;;  %v599_v59 = vsel %vm12999_vm9, %v591_v27, %v598_v48  ;;  %v892_v46 = vld [vmem:[#allocation2 + $0x44] sm:$0x1]  ;;  %v1071_v48 = vld [vmem:[#allocation2 + $0x2c] sm:$0x1] }
  0x53   : > { %v886_v60 = vsel %vm13014_vm12, %v600_v49, %v885_v35  ;;  %884 = vst.msk [vmem:[#allocation2 + $0x34] sm:$0xf] %vm854_vm6, %v599_v59  ;;  %v1266_v63 = vadd.f32 %v13051_v55, %v1163_v51  ;;  %v1458_v61 = vadd.f32 %v1354_v10, %v1265_v37  ;;  %v1600_v62 = vunpack.c.l.bf16 %v1584_v50 }
  0x54   : > { %887 = vst [vmem:[#allocation2 + $0x38] sm:$0x1] %v886_v60  ;;  %v1672_v1 = vrot.slane %v1522_v45, 1  ;;  %v2512_v0 = vpack.c.bf16 %v2482_v58, %v2481_v57  ;;  %v1673_v2 = vrot.slane %v1523_v54, 1  ;;  %v1824_v3 = vunpack.c.l.bf16 %v1808_v52  ;;  %v1296_v57 = vld [vmem:[#allocation2 + $0x24] sm:$0xe] }
  0x55   : > { %v1865_v4 = vrot.slane %v1523_v54, 2  ;;  %v1459_v5 = vadd.f32 %v1356_v53, %v1266_v63  ;;  %v1554_v6 = vadd.f32 %v1522_v45, %v1458_v61  ;;  %v1675_v7 = vrot.slane %v1600_v62, 1 }
  0x56   : > { %v1867_v8 = vrot.slane %v1600_v62, 2  ;;  %2625 = vrot.lane.b32.xlu0 %v2512_v0, %s12836_s17  ;;  %v1674_v12 = vsel %vm1148_vm4, %v1672_v1, %v1673_v2  ;;  %v1864_v13 = vrot.slane %v1824_v3, 2  ;;  %v602_v15 = vshrl.u32 %v506_v56, 16 }
  0x57   : > { %v2321_v14 = vld [vmem:[#allocation2 + $0x30] sm:$0xe]  ;;  %v605_v55 = vshll.u32 %v506_v56, 16  ;;  %v1555_v17 = vadd.f32 %v1523_v54, %v1459_v5  ;;  %v1676_v18 = vsel %vm1148_vm4, %v1673_v2, %v1675_v7  ;;  %v1778_v19 = vadd.f32 %v1674_v12, %v1554_v6 }
  0x58   : > { %v1868_v21 = vsel %vm1341_vm10, %v1865_v4, %v1867_v8  ;;  %v1866_v22 = vsel %vm1341_vm10, %v1864_v13, %v1865_v4  ;;  %v2337_v24 = vunpack.c.l.bf16 %v2321_v14  ;;  %v604_v25 = vrot.slane %v602_v15, 7  ;;  %v1809_v13 = vld [vmem:[#allocation2 + $0x30] sm:$0xe] }
  0x59   : > { %v610_v27 = vshrl.u32 %v507_v9, 16  ;;  %v1779_v28 = vadd.f32 %v1676_v18, %v1555_v17  ;;  %v1970_v29 = vadd.f32 %v1866_v22, %v1778_v19  ;;  %v613_v30 = vshll.u32 %v507_v9, 16 }
  0x5a   : > { %v1010_v32 = vunpack.c.l.bf16 %v13121_v16  ;;  %v12193_v34 = vld [vmem:[#allocation2 + $0x30] sm:$0xff]   ;;  %v2377_v36 = vrot.slane %v2337_v24, 2  ;;  %v607_v37 = vor.u32 %v605_v55, %v604_v25  ;;  %v608_v38 = vrot.slane %v604_v25, 4 }
  0x5b   : > { %v2097_v35 = vld [vmem:[#allocation2 + $0x38] sm:$0x1]  ;;  %v612_v39 = vrot.slane %v610_v27, 7  ;;  %v1971_v23 = vadd.f32 %v1868_v21, %v1779_v28  ;;  %v13127_v40 = vunpack.c.l.bf16 %v12193_v34  ;;  %v13129_v41 = vunpack.c.h.bf16 %v12193_v34 }
  0x5c   : > { %v2113_v42 = vunpack.c.l.bf16 %v2097_v35  ;;  %v889_v45 = vsel %vm13007_vm11, %v607_v37, %v888_v31  ;;  %v1011_v47 = vunpack.c.h.bf16 %v13121_v16  ;;  %v1087_v60 = vunpack.c.l.bf16 %v1071_v48  ;;  %v1585_v61 = vld [vmem:[#allocation2 + $0x38] sm:$0x1] }
  0x5d   : > { %v615_v43 = vor.u32 %v613_v30, %v612_v39  ;;  %v617_v44 = vrot.slane %v612_v39, 4  ;;  %v2067_v49 = vadd.f32 %v13127_v40, %v1970_v29  ;;  %v2068_v50 = vadd.f32 %v13129_v41, %v1971_v23  ;;  %890 = vst [vmem:[#allocation2 + $0x3c] sm:$0xf] %v889_v45  ;;  %v508_v45 = vld [vmem:[%s12988_s30 + $0x28] sm:$0xf] }
  0x5e   : > { %v2185_v52 = vrot.slane %v13127_v40, 1  ;;  %v13138_v51 = vrot.slane %v13129_v41, 1  ;;  %v2188_v10 = vrot.slane %v2113_v42, 1  ;;  %v13141_v53 = vrot.slane %v13129_v41, 2 }
  0x5f   : > { %v2380_v54 = vrot.slane %v2113_v42, 2  ;;  %v616_v56 = vsel %vm12999_vm9, %v608_v38, %v615_v43  ;;  %v893_v59 = vsel %vm13014_vm12, %v617_v44, %v892_v46  ;;  %v1164_v63 = vrot.slane %v1010_v32, 1 }
  0x60   : > { %v13147_v58 = vsel %vm1148_vm4, %v2185_v52, %v13138_v51  ;;  %891 = vst.msk [vmem:[#allocation2 + $0x40] sm:$0xf] %vm854_vm6, %v616_v56  ;;  %v2189_v62 = vsel %vm1148_vm4, %v13138_v51, %v2188_v10  ;;  %v2379_v0 = vsel %vm1341_vm10, %v2377_v36, %v13141_v53  ;;  %894 = vst [vmem:[#allocation2 + $0x44] sm:$0x1] %v893_v59  ;;  %v1165_v4 = vrot.slane %v1011_v47, 1 }
  0x61   : > { %v2291_v1 = vadd.f32 %v13147_v58, %v2067_v49  ;;  %v2381_v2 = vsel %vm1341_vm10, %v13141_v53, %v2380_v54  ;;  %v2292_v3 = vadd.f32 %v2189_v62, %v2068_v50  ;;  %v1167_v5 = vrot.slane %v1087_v60, 1  ;;  %v509_v56 = vld [vmem:[%s12988_s30 + $0x2c] sm:$0xf]  ;;  %v1297_v62 = vld [vmem:[#allocation2 + $0x30] sm:$0xe] }
  0x62   : > { %v1312_v6 = vunpack.c.l.bf16 %v1296_v57  ;;  %v1358_v8 = vrot.slane %v1011_v47, 2  ;;  %v1360_v9 = vrot.slane %v1087_v60, 2  ;;  %v1601_v12 = vunpack.c.l.bf16 %v1585_v61  ;;  %v1072_v57 = vld [vmem:[#allocation2 + $0x38] sm:$0x1] }
  0x63   : > { %v2483_v7 = vadd.f32 %v2379_v0, %v2291_v1  ;;  %v2484_v14 = vadd.f32 %v2381_v2, %v2292_v3  ;;  %v1166_v15 = vsel %vm1148_vm4, %v1164_v63, %v1165_v4  ;;  %v1168_v55 = vsel %vm1148_vm4, %v1165_v4, %v1167_v5 }
  0x64   : > { %v1357_v16 = vrot.slane %v1312_v6, 2  ;;  %v1267_v17 = vadd.f32 %v1166_v15, %v1010_v32  ;;  %v1268_v18 = vadd.f32 %v1168_v55, %v1011_v47  ;;  %v1361_v19 = vsel %vm1341_vm10, %v1358_v8, %v1360_v9  ;;  %v2322_v22 = vld [vmem:[#allocation2 + $0x3c] sm:$0xe] }
  0x65   : > { %v1680_v21 = vrot.slane %v1601_v12, 1  ;;  %v2513_v24 = vpack.c.bf16 %v2484_v14, %v2483_v7  ;;  %v1825_v27 = vunpack.c.l.bf16 %v1809_v13  ;;  %v1872_v28 = vrot.slane %v1601_v12, 2  ;;  %v895_v12 = vld [vmem:[#allocation2 + $0x48] sm:$0xf] }
  0x66   : > { %v1359_v25 = vsel %vm1341_vm10, %v1357_v16, %v1358_v8  ;;  %v1461_v30 = vadd.f32 %v1361_v19, %v1268_v18  ;;  %v2338_v35 = vunpack.c.l.bf16 %v2322_v22  ;;  %v619_v63 = vshrl.u32 %v508_v45, 16 }
  0x67   : > { %v1460_v29 = vadd.f32 %v1359_v25, %v1267_v17  ;;  %v1681_v31 = vsel %vm1148_vm4, %v13138_v51, %v1680_v21  ;;  %v2005_v34 = vld [vmem:[#allocation2 + $0x3c] sm:$0xff]   ;;  %2627 = vrot.lane.b32.xlu1 %v2513_v24, %s12836_s17  ;;  %v1869_v32 = vrot.slane %v1825_v27, 2  ;;  %v1873_v36 = vsel %vm1341_vm10, %v13141_v53, %v1872_v28  ;;  %v2098_v39 = vld [vmem:[#allocation2 + $0x44] sm:$0x1]  ;;  %v899_v21 = vld [vmem:[#allocation2 + $0x50] sm:$0x1] }
  0x68   : > { %v2037_v37 = vunpack.c.l.bf16 %v2005_v34  ;;  %v2038_v38 = vunpack.c.h.bf16 %v2005_v34  ;;  %v1557_v42 = vadd.f32 %v13129_v41, %v1461_v30  ;;  %v2114_v43 = vunpack.c.l.bf16 %v2098_v39 }
  0x69   : > { %v1556_v23 = vadd.f32 %v13127_v40, %v1460_v29  ;;  %v2382_v44 = vrot.slane %v2338_v35, 2  ;;  %v1871_v46 = vsel %vm1341_vm10, %v1869_v32, %v13141_v53  ;;  %v622_v61 = vshll.u32 %v508_v45, 16  ;;  %v1586_v35 = vld [vmem:[#allocation2 + $0x44] sm:$0x1]  ;;  %v1810_v32 = vld [vmem:[#allocation2 + $0x3c] sm:$0xe] }
  0x6a   : > { %v2190_v47 = vrot.slane %v2037_v37, 1  ;;  %v2191_v48 = vrot.slane %v2038_v38, 1  ;;  %v2383_v49 = vrot.slane %v2038_v38, 2  ;;  %v1781_v52 = vadd.f32 %v1681_v31, %v1557_v42 }
  0x6b   : > { %v1780_v50 = vadd.f32 %v13147_v58, %v1556_v23  ;;  %v2193_v10 = vrot.slane %v2114_v43, 1  ;;  %v2385_v54 = vrot.slane %v2114_v43, 2  ;;  %v621_v4 = vrot.slane %v619_v63, 7 }
  0x6c   : > { %v2192_v59 = vsel %vm1148_vm4, %v2190_v47, %v2191_v48  ;;  %v2384_v60 = vsel %vm1341_vm10, %v2382_v44, %v2383_v49  ;;  %v1973_v0 = vadd.f32 %v1873_v36, %v1781_v52  ;;  %v627_v5 = vshrl.u32 %v509_v56, 16  ;;  %v510_v36 = vld [vmem:[%s12988_s30 + $0x30] sm:$0xf] }
  0x6d   : > { %v1972_v1 = vadd.f32 %v1871_v46, %v1780_v50  ;;  %v2194_v2 = vsel %vm1148_vm4, %v2191_v48, %v2193_v10  ;;  %v2386_v3 = vsel %vm1341_vm10, %v2383_v49, %v2385_v54  ;;  %v630_v6 = vshll.u32 %v509_v56, 16  ;;  %v511_v46 = vld [vmem:[%s12988_s30 + $0x34] sm:$0xf] }
  0x6e   : > { %v1088_v7 = vunpack.c.l.bf16 %v1072_v57  ;;  %v2070_v9 = vadd.f32 %v2038_v38, %v1973_v0  ;;  %v1269_v13 = vadd.f32 %v13127_v40, %v13147_v58  ;;  %v1313_v14 = vunpack.c.l.bf16 %v1297_v62  ;;  %v1494_v40 = vld [vmem:[#allocation2 + $0x3c] sm:$0xff]  }
  0x6f   : > { %v2069_v8 = vadd.f32 %v2037_v37, %v1972_v1  ;;  %v624_v15 = vor.u32 %v622_v61, %v621_v4  ;;  %v625_v55 = vrot.slane %v621_v4, 4  ;;  %v629_v16 = vrot.slane %v627_v5, 7  ;;  %v982_v62 = vld [vmem:[#allocation2 + $0x3c] sm:$0xff]  }
  0x70   : > { %v1172_v17 = vrot.slane %v1088_v7, 1  ;;  %v2294_v19 = vadd.f32 %v2194_v2, %v2070_v9  ;;  %v1362_v22 = vrot.slane %v1313_v14, 2  ;;  %v1365_v24 = vrot.slane %v1088_v7, 2  ;;  %v902_v9 = vld [vmem:[#allocation2 + $0x54] sm:$0xf] }
  0x71   : > { %v2293_v18 = vadd.f32 %v2192_v59, %v2069_v8  ;;  %v632_v25 = vor.u32 %v630_v6, %v629_v16  ;;  %v634_v27 = vrot.slane %v629_v16, 4  ;;  %v896_v28 = vsel %vm13007_vm11, %v624_v15, %v895_v12 }
  0x72   : > { %v1173_v29 = vsel %vm1148_vm4, %v13138_v51, %v1172_v17  ;;  %v2486_v30 = vadd.f32 %v2386_v3, %v2294_v19  ;;  %897 = vst [vmem:[#allocation2 + $0x48] sm:$0xf] %v896_v28  ;;  %v1364_v34 = vsel %vm1341_vm10, %v1362_v22, %v13141_v53  ;;  %v1366_v51 = vsel %vm1341_vm10, %v13141_v53, %v1365_v24  ;;  %v906_v28 = vld [vmem:[#allocation2 + $0x5c] sm:$0x1] }
  0x73   : > { %v2485_v58 = vadd.f32 %v2384_v60, %v2293_v18  ;;  %v1270_v31 = vadd.f32 %v13129_v41, %v1173_v29  ;;  %v633_v37 = vsel %vm12999_vm9, %v625_v55, %v632_v25  ;;  %v900_v38 = vsel %vm13014_vm12, %v634_v27, %v899_v21  ;;  %v1073_v29 = vld [vmem:[#allocation2 + $0x44] sm:$0x1] }
  0x74   : > { %v1462_v39 = vadd.f32 %v1364_v34, %v1269_v13  ;;  %898 = vst.msk [vmem:[#allocation2 + $0x4c] sm:$0xf] %vm854_vm6, %v633_v37  ;;  %901 = vst [vmem:[#allocation2 + $0x50] sm:$0x1] %v900_v38  ;;  %v1526_v42 = vunpack.c.l.bf16 %v1494_v40  ;;  %v1527_v43 = vunpack.c.h.bf16 %v1494_v40  ;;  %v1602_v44 = vunpack.c.l.bf16 %v1586_v35  ;;  %v1298_v37 = vld [vmem:[#allocation2 + $0x3c] sm:$0xe] }
  0x75   : > { %v2514_v23 = vpack.c.bf16 %v2486_v30, %v2485_v58  ;;  %v1463_v41 = vadd.f32 %v1366_v51, %v1270_v31  ;;  %v1826_v45 = vunpack.c.l.bf16 %v1810_v32  ;;  %v636_v47 = vshrl.u32 %v510_v36, 16 }
  0x76   : > { %v639_v48 = vshll.u32 %v510_v36, 16  ;;  %v1558_v49 = vadd.f32 %v1526_v42, %v1462_v39  ;;  %v1682_v52 = vrot.slane %v1526_v42, 1  ;;  %v1683_v10 = vrot.slane %v1527_v43, 1 }
  0x77   : > { %2629 = vrot.lane.b32.xlu1 %v2514_v23, %s12836_s17  ;;  %v1559_v50 = vadd.f32 %v1527_v43, %v1463_v41  ;;  %v1685_v53 = vrot.slane %v1602_v44, 1  ;;  %v1874_v54 = vrot.slane %v1826_v45, 2  ;;  %v1875_v56 = vrot.slane %v1527_v43, 2 }
  0x78   : > { %v1877_v57 = vrot.slane %v1602_v44, 2  ;;  %v1684_v59 = vsel %vm1148_vm4, %v1682_v52, %v1683_v10  ;;  %v638_v60 = vrot.slane %v636_v47, 7  ;;  %v644_v63 = vshrl.u32 %v511_v46, 16 }
  0x79   : > { %v647_v61 = vshll.u32 %v511_v46, 16  ;;  %v1686_v1 = vsel %vm1148_vm4, %v1683_v10, %v1685_v53  ;;  %v1782_v0 = vadd.f32 %v1684_v59, %v1558_v49  ;;  %v1876_v2 = vsel %vm1341_vm10, %v1874_v54, %v1875_v56  ;;  %v2323_v4 = vld [vmem:[#allocation2 + $0x48] sm:$0xe] }
  0x7a   : > { %v1878_v3 = vsel %vm1341_vm10, %v1875_v56, %v1877_v57  ;;  %v1783_v5 = vadd.f32 %v1686_v1, %v1559_v50  ;;  %v2339_v6 = vunpack.c.l.bf16 %v2323_v4  ;;  %v641_v7 = vor.u32 %v639_v48, %v638_v60  ;;  %v1811_v54 = vld [vmem:[#allocation2 + $0x48] sm:$0xe] }
  0x7b   : > { %v642_v8 = vrot.slane %v638_v60, 4  ;;  %v1974_v12 = vadd.f32 %v1876_v2, %v1782_v0  ;;  %v12194_v13 = vld [vmem:[#allocation2 + $0x48] sm:$0xff]   ;;  %v2099_v14 = vld [vmem:[#allocation2 + $0x50] sm:$0x1]  ;;  %v646_v15 = vrot.slane %v644_v63, 7  ;;  %v1014_v55 = vunpack.c.l.bf16 %v982_v62 }
  0x7c   : > { %v1015_v16 = vunpack.c.h.bf16 %v982_v62  ;;  %v1975_v17 = vadd.f32 %v1878_v3, %v1783_v5  ;;  %v13202_v18 = vunpack.c.l.bf16 %v12194_v13  ;;  %v13204_v19 = vunpack.c.h.bf16 %v12194_v13  ;;  %v1587_v41 = vld [vmem:[#allocation2 + $0x50] sm:$0x1] }
  0x7d   : > { %v2115_v21 = vunpack.c.l.bf16 %v2099_v14  ;;  %v2387_v22 = vrot.slane %v2339_v6, 2  ;;  %v649_v24 = vor.u32 %v647_v61, %v646_v15  ;;  %v651_v25 = vrot.slane %v646_v15, 4 }
  0x7e   : > { %v903_v27 = vsel %vm13007_vm11, %v641_v7, %v902_v9  ;;  %v2071_v40 = vadd.f32 %v13202_v18, %v1974_v12  ;;  %v2072_v58 = vadd.f32 %v13204_v19, %v1975_v17  ;;  %v2195_v30 = vrot.slane %v13202_v18, 1 }
  0x7f   : > { %v13212_v31 = vrot.slane %v13204_v19, 1  ;;  %904 = vst [vmem:[#allocation2 + $0x54] sm:$0xf] %v903_v27  ;;  %v2198_v34 = vrot.slane %v2115_v21, 1  ;;  %v13215_v35 = vrot.slane %v13204_v19, 2  ;;  %v2390_v32 = vrot.slane %v2115_v21, 2 }
  0x80   : > { %v650_v36 = vsel %vm12999_vm9, %v642_v8, %v649_v24  ;;  %v907_v51 = vsel %vm13014_vm12, %v651_v25, %v906_v28  ;;  %v1089_v39 = vunpack.c.l.bf16 %v1073_v29  ;;  %v1174_v23 = vrot.slane %v1014_v55, 1  ;;  %v512_v25 = vld [vmem:[%s12988_s30 + $0x38] sm:$0xf] }
  0x81   : > { %v13221_v38 = vsel %vm1148_vm4, %v2195_v30, %v13212_v31  ;;  %905 = vst.msk [vmem:[#allocation2 + $0x58] sm:$0xf] %vm854_vm6, %v650_v36  ;;  %v2199_v42 = vsel %vm1148_vm4, %v13212_v31, %v2198_v34  ;;  %v2389_v44 = vsel %vm1341_vm10, %v2387_v22, %v13215_v35  ;;  %v2391_v45 = vsel %vm1341_vm10, %v13215_v35, %v2390_v32  ;;  %v513_v36 = vld [vmem:[%s12988_s30 + $0x3c] sm:$0xf] }
  0x82   : > { %v2295_v43 = vadd.f32 %v13221_v38, %v2071_v40  ;;  %908 = vst [vmem:[#allocation2 + $0x5c] sm:$0x1] %v907_v51  ;;  %v2296_v46 = vadd.f32 %v2199_v42, %v2072_v58  ;;  %v1175_v47 = vrot.slane %v1015_v16, 1  ;;  %v1177_v48 = vrot.slane %v1089_v39, 1  ;;  %v1299_v42 = vld [vmem:[#allocation2 + $0x48] sm:$0xe] }
  0x83   : > { %v1314_v49 = vunpack.c.l.bf16 %v1298_v37  ;;  %v1368_v52 = vrot.slane %v1015_v16, 2  ;;  %v1370_v10 = vrot.slane %v1089_v39, 2  ;;  %v1603_v53 = vunpack.c.l.bf16 %v1587_v41  ;;  %v1074_v37 = vld [vmem:[#allocation2 + $0x50] sm:$0x1] }
  0x84   : > { %v2487_v50 = vadd.f32 %v2389_v44, %v2295_v43  ;;  %v2488_v56 = vadd.f32 %v2391_v45, %v2296_v46  ;;  %v1176_v57 = vsel %vm1148_vm4, %v1174_v23, %v1175_v47  ;;  %v1178_v59 = vsel %vm1148_vm4, %v1175_v47, %v1177_v48 }
  0x85   : > { %v1367_v60 = vrot.slane %v1314_v49, 2  ;;  %v1271_v63 = vadd.f32 %v1176_v57, %v1014_v55  ;;  %v1272_v61 = vadd.f32 %v1178_v59, %v1015_v16  ;;  %v1371_v62 = vsel %vm1341_vm10, %v1368_v52, %v1370_v10 }
  0x86   : > { %v1690_v1 = vrot.slane %v1603_v53, 1  ;;  %v2324_v0 = vld [vmem:[#allocation2 + $0x54] sm:$0xe]  ;;  %v2515_v2 = vpack.c.bf16 %v2488_v56, %v2487_v50  ;;  %v1827_v4 = vunpack.c.l.bf16 %v1811_v54  ;;  %v1882_v5 = vrot.slane %v1603_v53, 2  ;;  %v909_v53 = vld [vmem:[#allocation2 + $0x60] sm:$0xf] }
  0x87   : > { %v1369_v3 = vsel %vm1341_vm10, %v1367_v60, %v1368_v52  ;;  %v1465_v7 = vadd.f32 %v1371_v62, %v1272_v61  ;;  %v2340_v12 = vunpack.c.l.bf16 %v2324_v0  ;;  %v653_v23 = vshrl.u32 %v512_v25, 16 }
  0x88   : > { %v1464_v6 = vadd.f32 %v1369_v3, %v1271_v63  ;;  %v1691_v8 = vsel %vm1148_vm4, %v13212_v31, %v1690_v1  ;;  %v2009_v9 = vld [vmem:[#allocation2 + $0x54] sm:$0xff]   ;;  %2631 = vrot.lane.b32.xlu0 %v2515_v2, %s12836_s17  ;;  %v1879_v13 = vrot.slane %v1827_v4, 2  ;;  %v1883_v14 = vsel %vm1341_vm10, %v13215_v35, %v1882_v5  ;;  %v913_v1 = vld [vmem:[#allocation2 + $0x68] sm:$0x1] }
  0x89   : > { %v2041_v15 = vunpack.c.l.bf16 %v2009_v9  ;;  %v2042_v55 = vunpack.c.h.bf16 %v2009_v9  ;;  %v2100_v16 = vld [vmem:[#allocation2 + $0x5c] sm:$0x1]  ;;  %v1561_v21 = vadd.f32 %v13204_v19, %v1465_v7  ;;  %v2392_v24 = vrot.slane %v2340_v12, 2 }
  0x8a   : > { %v1560_v17 = vadd.f32 %v13202_v18, %v1464_v6  ;;  %v2116_v22 = vunpack.c.l.bf16 %v2100_v16  ;;  %v1881_v27 = vsel %vm1341_vm10, %v1879_v13, %v13215_v35  ;;  %v656_v41 = vshll.u32 %v512_v25, 16  ;;  %v1588_v12 = vld [vmem:[#allocation2 + $0x5c] sm:$0x1]  ;;  %v1812_v13 = vld [vmem:[#allocation2 + $0x54] sm:$0xe] }
  0x8b   : > { %v2200_v28 = vrot.slane %v2041_v15, 1  ;;  %v2201_v29 = vrot.slane %v2042_v55, 1  ;;  %v2393_v40 = vrot.slane %v2042_v55, 2  ;;  %v1785_v30 = vadd.f32 %v1691_v8, %v1561_v21 }
  0x8c   : > { %v1784_v58 = vadd.f32 %v13221_v38, %v1560_v17  ;;  %v2203_v34 = vrot.slane %v2116_v22, 1  ;;  %v2395_v32 = vrot.slane %v2116_v22, 2  ;;  %v655_v47 = vrot.slane %v653_v23, 7 }
  0x8d   : > { %v2202_v51 = vsel %vm1148_vm4, %v2200_v28, %v2201_v29  ;;  %v2394_v39 = vsel %vm1341_vm10, %v2392_v24, %v2393_v40  ;;  %v1977_v44 = vadd.f32 %v1883_v14, %v1785_v30  ;;  %v661_v48 = vshrl.u32 %v513_v36, 16  ;;  %v514_v14 = vld [vmem:[%s12988_s30 + $0x40] sm:$0xf] }
  0x8e   : > { %v1976_v43 = vadd.f32 %v1881_v27, %v1784_v58  ;;  %v2204_v45 = vsel %vm1148_vm4, %v2201_v29, %v2203_v34  ;;  %v2396_v46 = vsel %vm1341_vm10, %v2393_v40, %v2395_v32  ;;  %v664_v49 = vshll.u32 %v513_v36, 16  ;;  %v515_v27 = vld [vmem:[%s12988_s30 + $0x44] sm:$0xf] }
  0x8f   : > { %v1090_v50 = vunpack.c.l.bf16 %v1074_v37  ;;  %v2074_v10 = vadd.f32 %v2042_v55, %v1977_v44  ;;  %v1273_v54 = vadd.f32 %v13202_v18, %v13221_v38  ;;  %v1315_v56 = vunpack.c.l.bf16 %v1299_v42  ;;  %v1498_v18 = vld [vmem:[#allocation2 + $0x54] sm:$0xff]  }
  0x90   : > { %v2073_v52 = vadd.f32 %v2041_v15, %v1976_v43  ;;  %v658_v57 = vor.u32 %v656_v41, %v655_v47  ;;  %v659_v59 = vrot.slane %v655_v47, 4  ;;  %v663_v60 = vrot.slane %v661_v48, 7  ;;  %v986_v42 = vld [vmem:[#allocation2 + $0x54] sm:$0xff]  }
  0x91   : > { %v1182_v63 = vrot.slane %v1090_v50, 1  ;;  %v2298_v62 = vadd.f32 %v2204_v45, %v2074_v10  ;;  %v1372_v0 = vrot.slane %v1315_v56, 2  ;;  %v1375_v2 = vrot.slane %v1090_v50, 2  ;;  %v916_v10 = vld [vmem:[#allocation2 + $0x6c] sm:$0xf] }
  0x92   : > { %v2297_v61 = vadd.f32 %v2202_v51, %v2073_v52  ;;  %v666_v3 = vor.u32 %v664_v49, %v663_v60  ;;  %v668_v4 = vrot.slane %v663_v60, 4  ;;  %v910_v5 = vsel %vm13007_vm11, %v658_v57, %v909_v53 }
  0x93   : > { %v1183_v6 = vsel %vm1148_vm4, %v13212_v31, %v1182_v63  ;;  %v2490_v7 = vadd.f32 %v2396_v46, %v2298_v62  ;;  %911 = vst [vmem:[#allocation2 + $0x60] sm:$0xf] %v910_v5  ;;  %v1374_v9 = vsel %vm1341_vm10, %v1372_v0, %v13215_v35  ;;  %v1376_v31 = vsel %vm1341_vm10, %v13215_v35, %v1375_v2  ;;  %v920_v5 = vld [vmem:[#allocation2 + $0x74] sm:$0x1] }
  0x94   : > { %v2489_v38 = vadd.f32 %v2394_v39, %v2297_v61  ;;  %v1274_v8 = vadd.f32 %v13204_v19, %v1183_v6  ;;  %v667_v15 = vsel %vm12999_vm9, %v659_v59, %v666_v3  ;;  %v914_v55 = vsel %vm13014_vm12, %v668_v4, %v913_v1  ;;  %v1075_v6 = vld [vmem:[#allocation2 + $0x5c] sm:$0x1] }
  0x95   : > { %v1466_v16 = vadd.f32 %v1374_v9, %v1273_v54  ;;  %912 = vst.msk [vmem:[#allocation2 + $0x64] sm:$0xf] %vm854_vm6, %v667_v15  ;;  %915 = vst [vmem:[#allocation2 + $0x68] sm:$0x1] %v914_v55  ;;  %v1530_v21 = vunpack.c.l.bf16 %v1498_v18  ;;  %v1531_v22 = vunpack.c.h.bf16 %v1498_v18  ;;  %v1604_v24 = vunpack.c.l.bf16 %v1588_v12  ;;  %v1300_v15 = vld [vmem:[#allocation2 + $0x54] sm:$0xe] }
  0x96   : > { %v2516_v17 = vpack.c.bf16 %v2490_v7, %v2489_v38  ;;  %v1467_v19 = vadd.f32 %v1376_v31, %v1274_v8  ;;  %v1828_v25 = vunpack.c.l.bf16 %v1812_v13  ;;  %v670_v28 = vshrl.u32 %v514_v14, 16 }
  0x97   : > { %v673_v29 = vshll.u32 %v514_v14, 16  ;;  %v1562_v40 = vadd.f32 %v1530_v21, %v1466_v16  ;;  %v1692_v30 = vrot.slane %v1530_v21, 1  ;;  %v1693_v34 = vrot.slane %v1531_v22, 1 }
  0x98   : > { %2633 = vrot.lane.b32.xlu1 %v2516_v17, %s12836_s17  ;;  %v1563_v58 = vadd.f32 %v1531_v22, %v1467_v19  ;;  %v1695_v35 = vrot.slane %v1604_v24, 1  ;;  %v1884_v32 = vrot.slane %v1828_v25, 2  ;;  %v1885_v36 = vrot.slane %v1531_v22, 2 }
  0x99   : > { %v1887_v37 = vrot.slane %v1604_v24, 2  ;;  %v1694_v51 = vsel %vm1148_vm4, %v1692_v30, %v1693_v34  ;;  %v672_v39 = vrot.slane %v670_v28, 7  ;;  %v678_v23 = vshrl.u32 %v515_v27, 16 }
  0x9a   : > { %v681_v41 = vshll.u32 %v515_v27, 16  ;;  %v1696_v43 = vsel %vm1148_vm4, %v1693_v34, %v1695_v35  ;;  %v1786_v44 = vadd.f32 %v1694_v51, %v1562_v40  ;;  %v1886_v45 = vsel %vm1341_vm10, %v1884_v32, %v1885_v36  ;;  %v2325_v47 = vld [vmem:[#allocation2 + $0x60] sm:$0xe] }
  0x9b   : > { %v1888_v46 = vsel %vm1341_vm10, %v1885_v36, %v1887_v37  ;;  %v1787_v48 = vadd.f32 %v1696_v43, %v1563_v58  ;;  %v2341_v49 = vunpack.c.l.bf16 %v2325_v47  ;;  %v675_v50 = vor.u32 %v673_v29, %v672_v39  ;;  %v1813_v32 = vld [vmem:[#allocation2 + $0x60] sm:$0xe] }
  0x9c   : > { %v676_v52 = vrot.slane %v672_v39, 4  ;;  %v1978_v53 = vadd.f32 %v1886_v45, %v1786_v44  ;;  %v12195_v54 = vld [vmem:[#allocation2 + $0x60] sm:$0xff]   ;;  %v2101_v56 = vld [vmem:[#allocation2 + $0x68] sm:$0x1]  ;;  %v680_v57 = vrot.slane %v678_v23, 7  ;;  %v1018_v59 = vunpack.c.l.bf16 %v986_v42 }
  0x9d   : > { %v1019_v60 = vunpack.c.h.bf16 %v986_v42  ;;  %v1979_v63 = vadd.f32 %v1888_v46, %v1787_v48  ;;  %v13276_v61 = vunpack.c.l.bf16 %v12195_v54  ;;  %v13278_v62 = vunpack.c.h.bf16 %v12195_v54  ;;  %v1589_v19 = vld [vmem:[#allocation2 + $0x68] sm:$0x1] }
  0x9e   : > { %v2117_v1 = vunpack.c.l.bf16 %v2101_v56  ;;  %v2397_v0 = vrot.slane %v2341_v49, 2  ;;  %v683_v2 = vor.u32 %v681_v41, %v680_v57  ;;  %v685_v3 = vrot.slane %v680_v57, 4 }
  0x9f   : > { %v917_v4 = vsel %vm13007_vm11, %v675_v50, %v916_v10  ;;  %v2075_v18 = vadd.f32 %v13276_v61, %v1978_v53  ;;  %v2076_v38 = vadd.f32 %v13278_v62, %v1979_v63  ;;  %v2205_v7 = vrot.slane %v13276_v61, 1 }
  0xa0   : > { %v13286_v8 = vrot.slane %v13278_v62, 1  ;;  %918 = vst [vmem:[#allocation2 + $0x6c] sm:$0xf] %v917_v4  ;;  %v2208_v9 = vrot.slane %v2117_v1, 1  ;;  %v13289_v12 = vrot.slane %v13278_v62, 2  ;;  %v2400_v13 = vrot.slane %v2117_v1, 2 }
  0xa1   : > { %v684_v14 = vsel %vm12999_vm9, %v676_v52, %v683_v2  ;;  %v921_v31 = vsel %vm13014_vm12, %v685_v3, %v920_v5  ;;  %v1091_v16 = vunpack.c.l.bf16 %v1075_v6  ;;  %v1184_v17 = vrot.slane %v1018_v59, 1  ;;  %v516_v3 = vld [vmem:[%s12988_s30 + $0x48] sm:$0xf] }
  0xa2   : > { %v13295_v55 = vsel %vm1148_vm4, %v2205_v7, %v13286_v8  ;;  %919 = vst.msk [vmem:[#allocation2 + $0x70] sm:$0xf] %vm854_vm6, %v684_v14  ;;  %v2209_v21 = vsel %vm1148_vm4, %v13286_v8, %v2208_v9  ;;  %v2399_v24 = vsel %vm1341_vm10, %v2397_v0, %v13289_v12  ;;  %v2401_v25 = vsel %vm1341_vm10, %v13289_v12, %v2400_v13  ;;  %v517_v14 = vld [vmem:[%s12988_s30 + $0x4c] sm:$0xf] }
  0xa3   : > { %v2299_v22 = vadd.f32 %v13295_v55, %v2075_v18  ;;  %922 = vst [vmem:[#allocation2 + $0x74] sm:$0x1] %v921_v31  ;;  %v2300_v27 = vadd.f32 %v2209_v21, %v2076_v38  ;;  %v1185_v28 = vrot.slane %v1019_v60, 1  ;;  %v1187_v29 = vrot.slane %v1091_v16, 1  ;;  %v1301_v21 = vld [vmem:[#allocation2 + $0x60] sm:$0xe] }
  0xa4   : > { %v1316_v40 = vunpack.c.l.bf16 %v1300_v15  ;;  %v1378_v30 = vrot.slane %v1019_v60, 2  ;;  %v1380_v34 = vrot.slane %v1091_v16, 2  ;;  %v1605_v35 = vunpack.c.l.bf16 %v1589_v19  ;;  %v1076_v15 = vld [vmem:[#allocation2 + $0x68] sm:$0x1] }
  0xa5   : > { %v2491_v58 = vadd.f32 %v2399_v24, %v2299_v22  ;;  %v2492_v36 = vadd.f32 %v2401_v25, %v2300_v27  ;;  %v1186_v37 = vsel %vm1148_vm4, %v1184_v17, %v1185_v28  ;;  %v1188_v51 = vsel %vm1148_vm4, %v1185_v28, %v1187_v29 }
  0xa6   : > { %v1377_v39 = vrot.slane %v1316_v40, 2  ;;  %v1275_v23 = vadd.f32 %v1186_v37, %v1018_v59  ;;  %v1276_v41 = vadd.f32 %v1188_v51, %v1019_v60  ;;  %v1381_v42 = vsel %vm1341_vm10, %v1378_v30, %v1380_v34 }
  0xa7   : > { %v1700_v43 = vrot.slane %v1605_v35, 1  ;;  %v2326_v44 = vld [vmem:[#allocation2 + $0x6c] sm:$0xe]  ;;  %v2517_v45 = vpack.c.bf16 %v2492_v36, %v2491_v58  ;;  %v1829_v47 = vunpack.c.l.bf16 %v1813_v32  ;;  %v1892_v48 = vrot.slane %v1605_v35, 2  ;;  %v923_v35 = vld [vmem:[#allocation2 + $0x78] sm:$0xf] }
  0xa8   : > { %v1379_v46 = vsel %vm1341_vm10, %v1377_v39, %v1378_v30  ;;  %v1469_v50 = vadd.f32 %v1381_v42, %v1276_v41  ;;  %v2342_v53 = vunpack.c.l.bf16 %v2326_v44  ;;  %v687_v17 = vshrl.u32 %v516_v3, 16 }
  0xa9   : > { %v1468_v49 = vadd.f32 %v1379_v46, %v1275_v23  ;;  %v1701_v52 = vsel %vm1148_vm4, %v13286_v8, %v1700_v43  ;;  %v2013_v10 = vld [vmem:[#allocation2 + $0x6c] sm:$0xff]   ;;  %2635 = vrot.lane.b32.xlu0 %v2517_v45, %s12836_s17  ;;  %v1889_v54 = vrot.slane %v1829_v47, 2  ;;  %v1893_v56 = vsel %vm1341_vm10, %v13289_v12, %v1892_v48  ;;  %v927_v43 = vld [vmem:[#allocation2 + $0x80] sm:$0x1] }
  0xaa   : > { %v2045_v57 = vunpack.c.l.bf16 %v2013_v10  ;;  %v2046_v59 = vunpack.c.h.bf16 %v2013_v10  ;;  %v2102_v60 = vld [vmem:[#allocation2 + $0x74] sm:$0x1]  ;;  %v1565_v1 = vadd.f32 %v13278_v62, %v1469_v50  ;;  %v2402_v2 = vrot.slane %v2342_v53, 2 }
  0xab   : > { %v1564_v63 = vadd.f32 %v13276_v61, %v1468_v49  ;;  %v2118_v0 = vunpack.c.l.bf16 %v2102_v60  ;;  %v1891_v4 = vsel %vm1341_vm10, %v1889_v54, %v13289_v12  ;;  %v690_v19 = vshll.u32 %v516_v3, 16  ;;  %v1590_v53 = vld [vmem:[#allocation2 + $0x74] sm:$0x1]  ;;  %v1814_v54 = vld [vmem:[#allocation2 + $0x6c] sm:$0xe] }
  0xac   : > { %v2210_v5 = vrot.slane %v2045_v57, 1  ;;  %v2211_v6 = vrot.slane %v2046_v59, 1  ;;  %v2403_v18 = vrot.slane %v2046_v59, 2  ;;  %v1789_v7 = vadd.f32 %v1701_v52, %v1565_v1 }
  0xad   : > { %v1788_v38 = vadd.f32 %v13295_v55, %v1564_v63  ;;  %v2213_v9 = vrot.slane %v2118_v0, 1  ;;  %v2405_v13 = vrot.slane %v2118_v0, 2  ;;  %v689_v28 = vrot.slane %v687_v17, 7 }
  0xae   : > { %v2212_v31 = vsel %vm1148_vm4, %v2210_v5, %v2211_v6  ;;  %v2404_v16 = vsel %vm1341_vm10, %v2402_v2, %v2403_v18  ;;  %v1981_v24 = vadd.f32 %v1893_v56, %v1789_v7  ;;  %v695_v29 = vshrl.u32 %v517_v14, 16  ;;  %v518_v56 = vld [vmem:[%s12988_s30 + $0x50] sm:$0xf] }
  0xaf   : > { %v1980_v22 = vadd.f32 %v1891_v4, %v1788_v38  ;;  %v2214_v25 = vsel %vm1148_vm4, %v2211_v6, %v2213_v9  ;;  %v2406_v27 = vsel %vm1341_vm10, %v2403_v18, %v2405_v13  ;;  %v698_v40 = vshll.u32 %v517_v14, 16  ;;  %v519_v4 = vld [vmem:[%s12988_s30 + $0x54] sm:$0xf] }
  0xb0   : > { %v1092_v58 = vunpack.c.l.bf16 %v1076_v15  ;;  %v2078_v34 = vadd.f32 %v2046_v59, %v1981_v24  ;;  %v1277_v32 = vadd.f32 %v13276_v61, %v13295_v55  ;;  %v1317_v36 = vunpack.c.l.bf16 %v1301_v21  ;;  %v1502_v61 = vld [vmem:[#allocation2 + $0x6c] sm:$0xff]  }
  0xb1   : > { %v2077_v30 = vadd.f32 %v2045_v57, %v1980_v22  ;;  %v692_v37 = vor.u32 %v690_v19, %v689_v28  ;;  %v693_v51 = vrot.slane %v689_v28, 4  ;;  %v697_v39 = vrot.slane %v695_v29, 7  ;;  %v13347_v21 = vld [vmem:[#allocation2 + $0x6c] sm:$0xff]  }
  0xb2   : > { %v1192_v23 = vrot.slane %v1092_v58, 1  ;;  %v2302_v42 = vadd.f32 %v2214_v25, %v2078_v34  ;;  %v1382_v44 = vrot.slane %v1317_v36, 2  ;;  %v1385_v45 = vrot.slane %v1092_v58, 2  ;;  %v930_v34 = vld [vmem:[#allocation2 + $0x84] sm:$0xf] }
  0xb3   : > { %v2301_v41 = vadd.f32 %v2212_v31, %v2077_v30  ;;  %v700_v46 = vor.u32 %v698_v40, %v697_v39  ;;  %v702_v47 = vrot.slane %v697_v39, 4  ;;  %v924_v48 = vsel %vm13007_vm11, %v692_v37, %v923_v35 }
  0xb4   : > { %v1193_v49 = vsel %vm1148_vm4, %v13286_v8, %v1192_v23  ;;  %v2494_v50 = vadd.f32 %v2406_v27, %v2302_v42  ;;  %925 = vst [vmem:[#allocation2 + $0x78] sm:$0xf] %v924_v48  ;;  %v1384_v10 = vsel %vm1341_vm10, %v1382_v44, %v13289_v12  ;;  %v1386_v8 = vsel %vm1341_vm10, %v13289_v12, %v1385_v45  ;;  %v934_v48 = vld [vmem:[#allocation2 + $0x8c] sm:$0x1] }
  0xb5   : > { %v2493_v55 = vadd.f32 %v2404_v16, %v2301_v41  ;;  %v1278_v52 = vadd.f32 %v13278_v62, %v1193_v49  ;;  %v701_v57 = vsel %vm12999_vm9, %v693_v51, %v700_v46  ;;  %v928_v59 = vsel %vm13014_vm12, %v702_v47, %v927_v43  ;;  %v1077_v49 = vld [vmem:[#allocation2 + $0x74] sm:$0x1] }
  0xb6   : > { %v1470_v60 = vadd.f32 %v1384_v10, %v1277_v32  ;;  %926 = vst.msk [vmem:[#allocation2 + $0x7c] sm:$0xf] %vm854_vm6, %v701_v57  ;;  %929 = vst [vmem:[#allocation2 + $0x80] sm:$0x1] %v928_v59  ;;  %v1534_v1 = vunpack.c.l.bf16 %v1502_v61  ;;  %v1535_v0 = vunpack.c.h.bf16 %v1502_v61  ;;  %v1606_v2 = vunpack.c.l.bf16 %v1590_v53  ;;  %v13360_v61 = vpop.permute.xlu0 %4854  ;;  %v1302_v59 = vld [vmem:[#allocation2 + $0x6c] sm:$0xe] }
  0xb7   : > { %v2518_v63 = vpack.c.bf16 %v2494_v50, %v2493_v55  ;;  %v1471_v62 = vadd.f32 %v1386_v8, %v1278_v52  ;;  %v1830_v3 = vunpack.c.l.bf16 %v1814_v54  ;;  %v704_v5 = vshrl.u32 %v518_v56, 16  ;;  %18164 = vst [vmem:[#allocation5_spill] sm:$0xff] %v13360_v61 }
  0xb8   : > { %v707_v6 = vshll.u32 %v518_v56, 16  ;;  %v1566_v18 = vadd.f32 %v1534_v1, %v1470_v60  ;;  %v1702_v7 = vrot.slane %v1534_v1, 1  ;;  %v1703_v9 = vrot.slane %v1535_v0, 1 }
  0xb9   : > { %2637 = vrot.lane.b32.xlu1 %v2518_v63, %s12836_s17  ;;  %v1567_v38 = vadd.f32 %v1535_v0, %v1471_v62  ;;  %v1705_v12 = vrot.slane %v1606_v2, 1  ;;  %v1894_v13 = vrot.slane %v1830_v3, 2  ;;  %v1895_v14 = vrot.slane %v1535_v0, 2 }
  0xba   : > { %v1897_v15 = vrot.slane %v1606_v2, 2  ;;  %v1704_v31 = vsel %vm1148_vm4, %v1702_v7, %v1703_v9  ;;  %v706_v16 = vrot.slane %v704_v5, 7  ;;  %v712_v17 = vshrl.u32 %v519_v4, 16 }
  0xbb   : > { %v715_v19 = vshll.u32 %v519_v4, 16  ;;  %v1706_v22 = vsel %vm1148_vm4, %v1703_v9, %v1705_v12  ;;  %v1790_v24 = vadd.f32 %v1704_v31, %v1566_v18  ;;  %v1896_v25 = vsel %vm1341_vm10, %v1894_v13, %v1895_v14  ;;  %v2327_v28 = vld [vmem:[#allocation2 + $0x78] sm:$0xe] }
  0xbc   : > { %v1898_v27 = vsel %vm1341_vm10, %v1895_v14, %v1897_v15  ;;  %v1791_v29 = vadd.f32 %v1706_v22, %v1567_v38  ;;  %v2343_v40 = vunpack.c.l.bf16 %v2327_v28  ;;  %v709_v58 = vor.u32 %v707_v6, %v706_v16  ;;  %v1815_v14 = vld [vmem:[#allocation2 + $0x78] sm:$0xe]  ;;  %v13387_v15 = vpop.permute.xlu0 %6580 }
  0xbd   : > { %v710_v30 = vrot.slane %v706_v16, 4  ;;  %v1982_v35 = vadd.f32 %v1896_v25, %v1790_v24  ;;  %v12196_v32 = vld [vmem:[#allocation2 + $0x78] sm:$0xff]   ;;  %v2103_v36 = vld [vmem:[#allocation2 + $0x80] sm:$0x1]  ;;  %v714_v37 = vrot.slane %v712_v17, 7  ;;  %v1022_v51 = vunpack.c.l.bf16 %v13347_v21  ;;  %18165 = vst [vmem:[#allocation6_spill] sm:$0xff] %v13387_v15 }
  0xbe   : > { %v1023_v39 = vunpack.c.h.bf16 %v13347_v21  ;;  %v1983_v23 = vadd.f32 %v1898_v27, %v1791_v29  ;;  %v13354_v41 = vunpack.c.l.bf16 %v12196_v32  ;;  %v13356_v42 = vunpack.c.h.bf16 %v12196_v32  ;;  %v1591_v1 = vld [vmem:[#allocation2 + $0x80] sm:$0x1] }
  0xbf   : > { %v2119_v43 = vunpack.c.l.bf16 %v2103_v36  ;;  %v2407_v44 = vrot.slane %v2343_v40, 2  ;;  %v717_v45 = vor.u32 %v715_v19, %v714_v37  ;;  %v719_v46 = vrot.slane %v714_v37, 4 }
  0xc0   : > { %v931_v47 = vsel %vm13007_vm11, %v709_v58, %v930_v34  ;;  %v2079_v55 = vadd.f32 %v13354_v41, %v1982_v35  ;;  %v2080_v50 = vadd.f32 %v13356_v42, %v1983_v23  ;;  %v2215_v52 = vrot.slane %v13354_v41, 1 }
  0xc1   : > { %v13366_v10 = vrot.slane %v13356_v42, 1  ;;  %932 = vst [vmem:[#allocation2 + $0x84] sm:$0xf] %v931_v47  ;;  %v2218_v53 = vrot.slane %v2119_v43, 1  ;;  %v13369_v54 = vrot.slane %v13356_v42, 2  ;;  %v2410_v56 = vrot.slane %v2119_v43, 2 }
  0xc2   : > { %v718_v57 = vsel %vm12999_vm9, %v710_v30, %v717_v45  ;;  %v935_v60 = vsel %vm13014_vm12, %v719_v46, %v934_v48  ;;  %v1093_v63 = vunpack.c.l.bf16 %v1077_v49  ;;  %v1194_v62 = vrot.slane %v1022_v51, 1  ;;  %v13400_v48 = vpop.permute.xlu0 %6451 }
  0xc3   : > { %v13375_v8 = vsel %vm1148_vm4, %v2215_v52, %v13366_v10  ;;  %933 = vst.msk [vmem:[#allocation2 + $0x88] sm:$0xf] %vm854_vm6, %v718_v57  ;;  %v2219_v0 = vsel %vm1148_vm4, %v13366_v10, %v2218_v53  ;;  %v2409_v3 = vsel %vm1341_vm10, %v2407_v44, %v13369_v54  ;;  %v2411_v4 = vsel %vm1341_vm10, %v13369_v54, %v2410_v56  ;;  %v2704_v53 = vld [vmem:[%s18057_s1] sm:$0xf] }
  0xc4   : > { %v2303_v2 = vadd.f32 %v13375_v8, %v2079_v55  ;;  %936 = vst [vmem:[#allocation2 + $0x8c] sm:$0x1] %v935_v60  ;;  %v2304_v5 = vadd.f32 %v2219_v0, %v2080_v50  ;;  %v1195_v6 = vrot.slane %v1023_v39, 1  ;;  %v1197_v18 = vrot.slane %v1093_v63, 1  ;;  %18166 = vst [vmem:[#allocation7_spill] sm:$0xff] %v13400_v48  ;;  %12434 = vmatprep.subr.msk.bf16.mxu0 %vm2738_vm13, %v2704_v53 }
  0xc5   : > { %v1318_v38 = vunpack.c.l.bf16 %v1302_v59  ;;  %v1388_v9 = vrot.slane %v1023_v39, 2  ;;  %v1390_v12 = vrot.slane %v1093_v63, 2  ;;  %v1607_v13 = vunpack.c.l.bf16 %v1591_v1  ;;  %v520_v1 = vld [vmem:[%s12988_s30 + $0x58] sm:$0xf] }
  0xc6   : > { %v2495_v7 = vadd.f32 %v2409_v3, %v2303_v2  ;;  %v2496_v31 = vadd.f32 %v2411_v4, %v2304_v5  ;;  %v1196_v16 = vsel %vm1148_vm4, %v1194_v62, %v1195_v6  ;;  %v1198_v17 = vsel %vm1148_vm4, %v1195_v6, %v1197_v18  ;;  %v2624_v4 = vpop.permute.xlu0 %2623  ;;  %v521_v5 = vld [vmem:[%s12988_s30 + $0x5c] sm:$0xf]  ;;  %v1078_v6 = vld [vmem:[#allocation2 + $0x80] sm:$0x1] }
  0xc7   : > { %v1387_v19 = vrot.slane %v1318_v38, 2  ;;  %v1279_v21 = vadd.f32 %v1196_v16, %v1022_v51  ;;  %v1280_v22 = vadd.f32 %v1198_v17, %v1023_v39  ;;  %v1391_v24 = vsel %vm1341_vm10, %v1388_v9, %v1390_v12  ;;  %v12792_v38 = vld [vmem:[%s12988_s30] sm:$0xf]  ;;  %v1303_v17 = vld [vmem:[#allocation2 + $0x78] sm:$0xe] }
  0xc8   : > { %v1710_v25 = vrot.slane %v1607_v13, 1  ;;  %v2328_v27 = vld [vmem:[#allocation2 + $0x84] sm:$0xe]  ;;  %v2519_v28 = vpack.c.bf16 %v2496_v31, %v2495_v7  ;;  %v1831_v40 = vunpack.c.l.bf16 %v1815_v14  ;;  %v1902_v58 = vrot.slane %v1607_v13, 2 }
  0xc9   : > { %v1389_v29 = vsel %vm1341_vm10, %v1387_v19, %v1388_v9  ;;  %v1473_v34 = vadd.f32 %v1391_v24, %v1280_v22  ;;  %v2344_v36 = vunpack.c.l.bf16 %v2328_v27  ;;  %v12793_v7 = vld [vmem:[%s12988_s30 + $0x4] sm:$0xf]  ;;  %v2740_v12 = vsel %vm2738_vm13, %v2704_v53, 0 }
  0xca   : > { %v1472_v30 = vadd.f32 %v1389_v29, %v1279_v21  ;;  %v1711_v35 = vsel %vm1148_vm4, %v13366_v10, %v1710_v25  ;;  %v2017_v32 = vld [vmem:[#allocation2 + $0x84] sm:$0xff]   ;;  %2639 = vrot.lane.b32.xlu0 %v2519_v28, %s12836_s17  ;;  %v1899_v37 = vrot.slane %v1831_v40, 2  ;;  %v1903_v51 = vsel %vm1341_vm10, %v13369_v54, %v1902_v58  ;;  %12279 = vmatpush3.bf16.msra.mxu0 %v2740_v12  ;;  %v937_v58 = vld [vmem:[#allocation2 + $0x90] sm:$0xf] }
  0xcb   : > { %v2049_v39 = vunpack.c.l.bf16 %v2017_v32  ;;  %v2050_v23 = vunpack.c.h.bf16 %v2017_v32  ;;  %v2104_v43 = vld [vmem:[#allocation2 + $0x8c] sm:$0x1]  ;;  %v1569_v45 = vadd.f32 %v13356_v42, %v1473_v34  ;;  %v2412_v47 = vrot.slane %v2344_v36, 2 }
  0xcc   : > { %v1568_v44 = vadd.f32 %v13354_v41, %v1472_v30  ;;  %v2120_v46 = vunpack.c.l.bf16 %v2104_v43  ;;  %v1901_v49 = vsel %vm1341_vm10, %v1899_v37, %v13369_v54  ;;  %v11481_v9 = vcombine.low %v12792_v38, %v12793_v7 }
  0xcd   : > { %v2220_v55 = vrot.slane %v2049_v39, 1  ;;  %v2221_v50 = vrot.slane %v2050_v23, 1  ;;  %v2413_v52 = vrot.slane %v2050_v23, 2  ;;  %v1793_v57 = vadd.f32 %v1711_v35, %v1569_v45 }
  0xce   : > { %v1792_v56 = vadd.f32 %v13375_v8, %v1568_v44  ;;  %v2223_v59 = vrot.slane %v2120_v46, 1  ;;  %v2415_v60 = vrot.slane %v2120_v46, 2  ;;  %v721_v31 = vshrl.u32 %v520_v1, 16 }
  0xcf   : > { %v2222_v63 = vsel %vm1148_vm4, %v2220_v55, %v2221_v50  ;;  %v2414_v62 = vsel %vm1341_vm10, %v2412_v47, %v2413_v52  ;;  %v1985_v2 = vadd.f32 %v1903_v51, %v1793_v57  ;;  %v724_v16 = vshll.u32 %v520_v1, 16  ;;  %v1592_v47 = vld [vmem:[#allocation2 + $0x8c] sm:$0x1] }
  0xd0   : > { %v1984_v0 = vadd.f32 %v1901_v49, %v1792_v56  ;;  %v2224_v3 = vsel %vm1148_vm4, %v2221_v50, %v2223_v59  ;;  %v2416_v18 = vsel %vm1341_vm10, %v2413_v52, %v2415_v60  ;;  %v2658_v19 = vsel %vm2655_vm15, %v11481_v9, %v2624_v4  ;;  %v1816_v50 = vld [vmem:[#allocation2 + $0x84] sm:$0xe]  ;;  %v13430_v52 = vld [vmem:[%s12988_s30 + $0x60] sm:$0xf] }
  0xd1   : > { %v2082_v14 = vadd.f32 %v2050_v23, %v1985_v2  ;;  %v729_v21 = vshrl.u32 %v521_v5, 16  ;;  %v732_v22 = vshll.u32 %v521_v5, 16  ;;  %v1094_v24 = vunpack.c.l.bf16 %v1078_v6  ;;  %12280 = vmatprep.mubr.msk.bf16.mxu0 %vm2705_vm14, %v2658_v19  ;;  %v1506_v23 = vld [vmem:[#allocation2 + $0x84] sm:$0xff]  }
  0xd2   : > { %v2081_v13 = vadd.f32 %v2049_v39, %v1984_v0  ;;  %v723_v28 = vrot.slane %v721_v31, 7  ;;  %v1281_v29 = vadd.f32 %v13354_v41, %v13375_v8  ;;  %v1319_v34 = vunpack.c.l.bf16 %v1303_v17  ;;  %v941_v39 = vld [vmem:[#allocation2 + $0x98] sm:$0x1]  ;;  %v12794_v2 = vld [vmem:[%s12988_s30 + $0x8] sm:$0xf] }
  0xd3   : > { %v2306_v27 = vadd.f32 %v2224_v3, %v2082_v14  ;;  %v731_v40 = vrot.slane %v729_v21, 7  ;;  %v1202_v30 = vrot.slane %v1094_v24, 1  ;;  %v1395_v35 = vrot.slane %v1094_v24, 2  ;;  %v12795_v3 = vld [vmem:[%s12988_s30 + $0xc] sm:$0xf]  ;;  %v994_v21 = vld [vmem:[#allocation2 + $0x84] sm:$0xff]  }
  0xd4   : > { %v2305_v25 = vadd.f32 %v2222_v63, %v2081_v13  ;;  %v726_v37 = vor.u32 %v724_v16, %v723_v28  ;;  %v727_v51 = vrot.slane %v723_v28, 4  ;;  %v1392_v46 = vrot.slane %v1319_v34, 2  ;;  %v13445_v14 = vld [vmem:[%s12988_s30 + $0x64] sm:$0xf]  ;;  %v944_v28 = vld [vmem:[#allocation2 + $0x9c] sm:$0xf] }
  0xd5   : > { %v2498_v36 = vadd.f32 %v2416_v18, %v2306_v27  ;;  %v734_v43 = vor.u32 %v732_v22, %v731_v40  ;;  %v736_v44 = vrot.slane %v731_v40, 4  ;;  %v1203_v45 = vsel %vm1148_vm4, %v13366_v10, %v1202_v30 }
  0xd6   : > { %v2497_v32 = vadd.f32 %v2414_v62, %v2305_v25  ;;  %v938_v8 = vsel %vm13007_vm11, %v726_v37, %v937_v58  ;;  %v1282_v49 = vadd.f32 %v13356_v42, %v1203_v45  ;;  %v1396_v55 = vsel %vm1341_vm10, %v13369_v54, %v1395_v35  ;;  %v2626_v62 = vpop.permute.xlu0 %2625 }
  0xd7   : > { %v735_v53 = vsel %vm12999_vm9, %v727_v51, %v734_v43  ;;  %939 = vst [vmem:[#allocation2 + $0x90] sm:$0xf] %v938_v8  ;;  %v942_v10 = vsel %vm13014_vm12, %v736_v44, %v941_v39  ;;  %v1394_v56 = vsel %vm1341_vm10, %v1392_v46, %v13369_v54  ;;  %v1538_v57 = vunpack.c.l.bf16 %v1506_v23 }
  0xd8   : > { %v2520_v41 = vpack.c.bf16 %v2498_v36, %v2497_v32  ;;  %940 = vst.msk [vmem:[#allocation2 + $0x94] sm:$0xf] %vm854_vm6, %v735_v53  ;;  %943 = vst [vmem:[#allocation2 + $0x98] sm:$0x1] %v942_v10  ;;  %v1474_v42 = vadd.f32 %v1394_v56, %v1281_v29  ;;  %v1475_v59 = vadd.f32 %v1396_v55, %v1282_v49  ;;  %v1539_v60 = vunpack.c.h.bf16 %v1506_v23  ;;  %v1079_v29 = vld [vmem:[#allocation2 + $0x8c] sm:$0x1] }
  0xd9   : > { %v1608_v63 = vunpack.c.l.bf16 %v1592_v47  ;;  %v1712_v1 = vrot.slane %v1538_v57, 1  ;;  %v1832_v0 = vunpack.c.l.bf16 %v1816_v50  ;;  %v11482_v4 = vcombine.low %v12794_v2, %v12795_v3  ;;  %v13459_v47 = vpop.permute.xlu1 %4856  ;;  %v1304_v3 = vld [vmem:[#allocation2 + $0x84] sm:$0xe] }
  0xda   : > { %2641 = vrot.lane.b32.xlu1 %v2520_v41, %s12836_s17  ;;  %v738_v5 = vshrl.u32 %v13430_v52, 16  ;;  %v1570_v54 = vadd.f32 %v1538_v57, %v1474_v42  ;;  %v1571_v6 = vadd.f32 %v1539_v60, %v1475_v59  ;;  %v1713_v18 = vrot.slane %v1539_v60, 1  ;;  %18167 = vst [vmem:[#allocation8_spill] sm:$0xff] %v13459_v47 }
  0xdb   : > { %v1715_v38 = vrot.slane %v1608_v63, 1  ;;  %v1904_v7 = vrot.slane %v1832_v0, 2  ;;  %v1905_v9 = vrot.slane %v1539_v60, 2  ;;  %v1907_v12 = vrot.slane %v1608_v63, 2  ;;  %v948_v63 = vld [vmem:[#allocation2 + $0xa4] sm:$0x1] }
  0xdc   : > { %v2661_v13 = vsel %vm2655_vm15, %v11482_v4, %v2626_v62  ;;  %v1714_v31 = vsel %vm1148_vm4, %v1712_v1, %v1713_v18  ;;  %v740_v17 = vrot.slane %v738_v5, 7  ;;  %v741_v19 = vshll.u32 %v13430_v52, 16 }
  0xdd   : > { %v1716_v16 = vsel %vm1148_vm4, %v1713_v18, %v1715_v38  ;;  %12281 = vmatmul.mubr.msk.bf16.vlgmr.msra.gmra.mrb[0].mxu0 %vm2705_vm14, %v2661_v13  ;;  %v1794_v22 = vadd.f32 %v1714_v31, %v1570_v54  ;;  %v1906_v25 = vsel %vm1341_vm10, %v1904_v7, %v1905_v9  ;;  %v1908_v27 = vsel %vm1341_vm10, %v1905_v9, %v1907_v12  ;;  %v2628_v31 = vpop.permute.xlu1 %2627 }
  0xde   : > { %v1795_v24 = vadd.f32 %v1716_v16, %v1571_v6  ;;  %v2329_v40 = vld [vmem:[#allocation2 + $0x90] sm:$0xe]  ;;  %v743_v58 = vor.u32 %v741_v19, %v740_v17  ;;  %v744_v30 = vrot.slane %v740_v17, 4  ;;  %v746_v34 = vshrl.u32 %v13445_v14, 16 }
  0xdf   : > { %v749_v35 = vshll.u32 %v13445_v14, 16  ;;  %v1986_v32 = vadd.f32 %v1906_v25, %v1794_v22  ;;  %v12197_v37 = vld [vmem:[#allocation2 + $0x90] sm:$0xff]   ;;  %v2105_v51 = vld [vmem:[#allocation2 + $0x98] sm:$0x1]  ;;  %v2345_v39 = vunpack.c.l.bf16 %v2329_v40  ;;  %v1026_v23 = vunpack.c.l.bf16 %v994_v21 }
  0xe0   : > { %v1987_v36 = vadd.f32 %v1908_v27, %v1795_v24  ;;  %v13455_v43 = vunpack.c.l.bf16 %v12197_v37  ;;  %v13457_v44 = vunpack.c.h.bf16 %v12197_v37  ;;  %v2121_v45 = vunpack.c.l.bf16 %v2105_v51  ;;  %v1593_v18 = vld [vmem:[#allocation2 + $0x98] sm:$0x1]  ;;  %v1817_v13 = vld [vmem:[#allocation2 + $0x90] sm:$0xe] }
  0xe1   : > { %v748_v46 = vrot.slane %v746_v34, 7  ;;  %v2417_v41 = vrot.slane %v2345_v39, 2  ;;  %v945_v8 = vsel %vm13007_vm11, %v743_v58, %v944_v28  ;;  %v1027_v49 = vunpack.c.h.bf16 %v994_v21  ;;  %v12797_v34 = vld [vmem:[%s12988_s30 + $0x14] sm:$0xf] }
  0xe2   : > { %v1095_v55 = vunpack.c.l.bf16 %v1079_v29  ;;  %v2083_v50 = vadd.f32 %v13455_v43, %v1986_v32  ;;  %v2084_v53 = vadd.f32 %v13457_v44, %v1987_v36  ;;  %v2225_v10 = vrot.slane %v13455_v43, 1  ;;  %946 = vst [vmem:[#allocation2 + $0x9c] sm:$0xf] %v945_v8 }
  0xe3   : > { %v13467_v56 = vrot.slane %v13457_v44, 1  ;;  %v2228_v57 = vrot.slane %v2121_v45, 1  ;;  %v13470_v42 = vrot.slane %v13457_v44, 2  ;;  %v2420_v59 = vrot.slane %v2121_v45, 2 }
  0xe4   : > { %v751_v60 = vor.u32 %v749_v35, %v748_v46  ;;  %v753_v1 = vrot.slane %v748_v46, 4  ;;  %v1204_v0 = vrot.slane %v1026_v23, 1  ;;  %v1205_v2 = vrot.slane %v1027_v49, 1 }
  0xe5   : > { %v13474_v62 = vsel %vm1148_vm4, %v2225_v10, %v13467_v56  ;;  %v2229_v4 = vsel %vm1148_vm4, %v13467_v56, %v2228_v57  ;;  %v2419_v54 = vsel %vm1341_vm10, %v2417_v41, %v13470_v42  ;;  %v2421_v6 = vsel %vm1341_vm10, %v13470_v42, %v2420_v59  ;;  %v13495_v41 = vld [vmem:[%s12988_s30 + $0x68] sm:$0xf] }
  0xe6   : > { %v2307_v5 = vadd.f32 %v13474_v62, %v2083_v50  ;;  %v2308_v38 = vadd.f32 %v2229_v4, %v2084_v53  ;;  %v752_v7 = vsel %vm12999_vm9, %v744_v30, %v751_v60  ;;  %v949_v9 = vsel %vm13014_vm12, %v753_v1, %v948_v63  ;;  %v12796_v30 = vld [vmem:[%s12988_s30 + $0x10] sm:$0xf]  ;;  %v12798_v60 = vld [vmem:[%s12988_s30 + $0x18] sm:$0xf]  ;;  %v12799_v63 = vld [vmem:[%s12988_s30 + $0x1c] sm:$0xf] }
  0xe7   : > { %v1206_v12 = vsel %vm1148_vm4, %v1204_v0, %v1205_v2  ;;  %947 = vst.msk [vmem:[#allocation2 + $0xa0] sm:$0xf] %vm854_vm6, %v752_v7  ;;  %950 = vst [vmem:[#allocation2 + $0xa4] sm:$0x1] %v949_v9  ;;  %v1207_v17 = vrot.slane %v1095_v55, 1  ;;  %v1320_v21 = vunpack.c.l.bf16 %v1304_v3  ;;  %v1398_v24 = vrot.slane %v1027_v49, 2 }
  0xe8   : > { %v2499_v16 = vadd.f32 %v2419_v54, %v2307_v5  ;;  %v1283_v19 = vadd.f32 %v1206_v12, %v1026_v23  ;;  %v2500_v22 = vadd.f32 %v2421_v6, %v2308_v38  ;;  %v1400_v25 = vrot.slane %v1095_v55, 2  ;;  %v13509_v0 = vld [vmem:[%s12988_s30 + $0x6c] sm:$0xf] }
  0xe9   : > { %v1609_v27 = vunpack.c.l.bf16 %v1593_v18  ;;  %v1208_v28 = vsel %vm1148_vm4, %v1205_v2, %v1207_v17  ;;  %v1397_v29 = vrot.slane %v1320_v21, 2  ;;  %v1833_v40 = vunpack.c.l.bf16 %v1817_v13  ;;  %v2330_v58 = vld [vmem:[#allocation2 + $0x9c] sm:$0xe]  ;;  %v2630_v53 = vpop.permute.xlu1 %2629 }
  0xea   : > { %v11483_v35 = vcombine.low %v12796_v30, %v12797_v34  ;;  %v2521_v32 = vpack.c.bf16 %v2500_v22, %v2499_v16  ;;  %v1284_v36 = vadd.f32 %v1208_v28, %v1027_v49  ;;  %v1401_v37 = vsel %vm1341_vm10, %v1398_v24, %v1400_v25 }
  0xeb   : > { %v1720_v51 = vrot.slane %v1609_v27, 1  ;;  %v1399_v39 = vsel %vm1341_vm10, %v1397_v29, %v1398_v24  ;;  %v1909_v23 = vrot.slane %v1833_v40, 2  ;;  %v1912_v45 = vrot.slane %v1609_v27, 2  ;;  %v951_v29 = vld [vmem:[#allocation2 + $0xa8] sm:$0xf] }
  0xec   : > { %v2346_v46 = vunpack.c.l.bf16 %v2330_v58  ;;  %2643 = vrot.lane.b32.xlu0 %v2521_v32, %s12836_s17  ;;  %v1476_v8 = vadd.f32 %v1399_v39, %v1283_v19  ;;  %v1477_v55 = vadd.f32 %v1401_v37, %v1284_v36  ;;  %v2664_v50 = vsel %vm2655_vm15, %v11483_v35, %v2628_v31  ;;  %v1080_v40 = vld [vmem:[#allocation2 + $0x98] sm:$0x1]  ;;  %v1305_v32 = vld [vmem:[#allocation2 + $0x90] sm:$0xe] }
  0xed   : > { %v1721_v49 = vsel %vm1148_vm4, %v13467_v56, %v1720_v51  ;;  %v1911_v10 = vsel %vm1341_vm10, %v1909_v23, %v13470_v42  ;;  %v1913_v57 = vsel %vm1341_vm10, %v13470_v42, %v1912_v45  ;;  %v11484_v1 = vcombine.low %v12798_v60, %v12799_v63  ;;  %12284 = vmatprep.mubr.msk.bf16.mxu0 %vm2705_vm14, %v2664_v50 }
  0xee   : > { %v2422_v59 = vrot.slane %v2346_v46, 2  ;;  %v1572_v2 = vadd.f32 %v13455_v43, %v1476_v8  ;;  %v1573_v3 = vadd.f32 %v13457_v44, %v1477_v55  ;;  %v2021_v4 = vld [vmem:[#allocation2 + $0x9c] sm:$0xff]   ;;  %v2106_v5 = vld [vmem:[#allocation2 + $0xa4] sm:$0x1]  ;;  %v755_v54 = vshrl.u32 %v13495_v41, 16 }
  0xef   : > { %v758_v6 = vshll.u32 %v13495_v41, 16  ;;  %v2053_v18 = vunpack.c.l.bf16 %v2021_v4  ;;  %v2054_v38 = vunpack.c.h.bf16 %v2021_v4  ;;  %v2122_v7 = vunpack.c.l.bf16 %v2106_v5  ;;  %v1510_v23 = vld [vmem:[#allocation2 + $0x9c] sm:$0xff]   ;;  %v955_v8 = vld [vmem:[#allocation2 + $0xb0] sm:$0x1] }
  0xf0   : > { %v2667_v9 = vsel %vm2655_vm15, %v11484_v1, %v2630_v53  ;;  %v1796_v12 = vadd.f32 %v13474_v62, %v1572_v2  ;;  %v1797_v13 = vadd.f32 %v1721_v49, %v1573_v3  ;;  %v757_v31 = vrot.slane %v755_v54, 7  ;;  %v1594_v2 = vld [vmem:[#allocation2 + $0xa4] sm:$0x1] }
  0xf1   : > { %12285 = vmatmul.mubr.msk.bf16.gmra.mrb[4].mxu0 %vm2705_vm14, %v2667_v9  ;;  %v763_v16 = vshrl.u32 %v13509_v0, 16  ;;  %v2230_v17 = vrot.slane %v2053_v18, 1  ;;  %v2231_v19 = vrot.slane %v2054_v38, 1  ;;  %v2233_v21 = vrot.slane %v2122_v7, 1 }
  0xf2   : > { %v2423_v22 = vrot.slane %v2054_v38, 2  ;;  %v1988_v24 = vadd.f32 %v1911_v10, %v1796_v12  ;;  %v1989_v25 = vadd.f32 %v1913_v57, %v1797_v13  ;;  %v2425_v27 = vrot.slane %v2122_v7, 2 }
  0xf3   : > { %v760_v28 = vor.u32 %v758_v6, %v757_v31  ;;  %v2232_v58 = vsel %vm1148_vm4, %v2230_v17, %v2231_v19  ;;  %v2234_v30 = vsel %vm1148_vm4, %v2231_v19, %v2233_v21  ;;  %v761_v35 = vrot.slane %v757_v31, 4  ;;  %v1818_v6 = vld [vmem:[#allocation2 + $0x9c] sm:$0xe]  ;;  %v13541_v31 = vld [vmem:[%s12988_s30 + $0x70] sm:$0xf] }
  0xf4   : > { %v2424_v34 = vsel %vm1341_vm10, %v2422_v59, %v2423_v22  ;;  %v2085_v36 = vadd.f32 %v2053_v18, %v1988_v24  ;;  %v2086_v37 = vadd.f32 %v2054_v38, %v1989_v25  ;;  %v2426_v51 = vsel %vm1341_vm10, %v2423_v22, %v2425_v27 }
  0xf5   : > { %v765_v39 = vrot.slane %v763_v16, 7  ;;  %v766_v45 = vshll.u32 %v13509_v0, 16  ;;  %v952_v46 = vsel %vm13007_vm11, %v760_v28, %v951_v29  ;;  %v1096_v55 = vunpack.c.l.bf16 %v1080_v40 }
  0xf6   : > { %v1285_v49 = vadd.f32 %v13455_v43, %v13474_v62  ;;  %v2309_v50 = vadd.f32 %v2232_v58, %v2085_v36  ;;  %v2310_v53 = vadd.f32 %v2234_v30, %v2086_v37  ;;  %953 = vst [vmem:[#allocation2 + $0xa8] sm:$0xf] %v952_v46  ;;  %v1321_v57 = vunpack.c.l.bf16 %v1305_v32 }
  0xf7   : > { %v770_v10 = vrot.slane %v765_v39, 4  ;;  %v768_v59 = vor.u32 %v766_v45, %v765_v39  ;;  %v1212_v60 = vrot.slane %v1096_v55, 1  ;;  %v1405_v63 = vrot.slane %v1096_v55, 2  ;;  %v958_v39 = vld [vmem:[#allocation2 + $0xb4] sm:$0xf] }
  0xf8   : > { %v1542_v1 = vunpack.c.l.bf16 %v1510_v23  ;;  %v2501_v3 = vadd.f32 %v2424_v34, %v2309_v50  ;;  %v2502_v4 = vadd.f32 %v2426_v51, %v2310_v53  ;;  %v1402_v54 = vrot.slane %v1321_v57, 2 }
  0xf9   : > { %v956_v5 = vsel %vm13014_vm12, %v770_v10, %v955_v8  ;;  %v769_v43 = vsel %vm12999_vm9, %v761_v35, %v768_v59  ;;  %v1213_v62 = vsel %vm1148_vm4, %v13467_v56, %v1212_v60  ;;  %v1406_v18 = vsel %vm1341_vm10, %v13470_v42, %v1405_v63 }
  0xfa   : > { %957 = vst [vmem:[#allocation2 + $0xb0] sm:$0x1] %v956_v5  ;;  %v1543_v38 = vunpack.c.h.bf16 %v1510_v23  ;;  %v2522_v7 = vpack.c.bf16 %v2502_v4, %v2501_v3  ;;  %954 = vst.msk [vmem:[#allocation2 + $0xac] sm:$0xf] %vm854_vm6, %v769_v43  ;;  %v1286_v9 = vadd.f32 %v13457_v44, %v1213_v62  ;;  %v1404_v12 = vsel %vm1341_vm10, %v1402_v54, %v13470_v42  ;;  %v13546_v42 = vld [vmem:[%s12988_s30 + $0x74] sm:$0xf] }
  0xfb   : > { %v1610_v13 = vunpack.c.l.bf16 %v1594_v2  ;;  %v1478_v16 = vadd.f32 %v1404_v12, %v1285_v49  ;;  %v1722_v17 = vrot.slane %v1542_v1, 1  ;;  %v1834_v56 = vunpack.c.l.bf16 %v1818_v6  ;;  %v998_v49 = vld [vmem:[#allocation2 + $0x9c] sm:$0xff]   ;;  %v1081_v6 = vld [vmem:[#allocation2 + $0xa4] sm:$0x1] }
  0xfc   : > { %v1723_v19 = vrot.slane %v1543_v38, 1  ;;  %2645 = vrot.lane.b32.xlu1 %v2522_v7, %s12836_s17  ;;  %v1479_v21 = vadd.f32 %v1406_v18, %v1286_v9  ;;  %v1915_v24 = vrot.slane %v1543_v38, 2  ;;  %v772_v40 = vshrl.u32 %v13541_v31, 16 }
  0xfd   : > { %v1725_v22 = vrot.slane %v1610_v13, 1  ;;  %v1917_v25 = vrot.slane %v1610_v13, 2  ;;  %v1574_v27 = vadd.f32 %v1542_v1, %v1478_v16  ;;  %v1914_v28 = vrot.slane %v1834_v56, 2  ;;  %v2331_v29 = vld [vmem:[#allocation2 + $0xa8] sm:$0xe] }
  0xfe   : > { %v1724_v44 = vsel %vm1148_vm4, %v1722_v17, %v1723_v19  ;;  %v1575_v58 = vadd.f32 %v1543_v38, %v1479_v21  ;;  %v2347_v35 = vunpack.c.l.bf16 %v2331_v29  ;;  %v774_v37 = vrot.slane %v772_v40, 7  ;;  %v962_v13 = vld [vmem:[#allocation2 + $0xbc] sm:$0x1] }
  0xff   : > { %v1726_v30 = vsel %vm1148_vm4, %v1723_v19, %v1725_v22  ;;  %v1918_v34 = vsel %vm1341_vm10, %v1915_v24, %v1917_v25  ;;  %v1798_v32 = vadd.f32 %v1724_v44, %v1574_v27  ;;  %v1916_v36 = vsel %vm1341_vm10, %v1914_v28, %v1915_v24  ;;  %v1306_v22 = vld [vmem:[#allocation2 + $0x9c] sm:$0xe] }
 0x100   : > { %v775_v51 = vshll.u32 %v13541_v31, 16  ;;  %v1799_v23 = vadd.f32 %v1726_v30, %v1575_v58  ;;  %v2427_v46 = vrot.slane %v2347_v35, 2  ;;  %v780_v8 = vshrl.u32 %v13546_v42, 16 }
 0x101   : > { %v2107_v45 = vld [vmem:[#allocation2 + $0xb0] sm:$0x1]  ;;  %v783_v55 = vshll.u32 %v13546_v42, 16  ;;  %v1990_v50 = vadd.f32 %v1916_v36, %v1798_v32  ;;  %v12198_v53 = vld [vmem:[#allocation2 + $0xa8] sm:$0xff]   ;;  %v778_v59 = vrot.slane %v774_v37, 4  ;;  %v1030_v54 = vunpack.c.l.bf16 %v998_v49 }
 0x102   : > { %v2123_v10 = vunpack.c.l.bf16 %v2107_v45  ;;  %v777_v57 = vor.u32 %v775_v51, %v774_v37  ;;  %v1991_v60 = vadd.f32 %v1918_v34, %v1799_v23  ;;  %v13555_v63 = vunpack.c.l.bf16 %v12198_v53  ;;  %v1595_v28 = vld [vmem:[#allocation2 + $0xb0] sm:$0x1]  ;;  %v1819_v37 = vld [vmem:[#allocation2 + $0xa8] sm:$0xe] }
 0x103   : > { %v13557_v1 = vunpack.c.h.bf16 %v12198_v53  ;;  %v782_v2 = vrot.slane %v780_v8, 7  ;;  %v1031_v16 = vunpack.c.h.bf16 %v998_v49  ;;  %v1097_v56 = vunpack.c.l.bf16 %v1081_v6 }
 0x104   : > { %v2238_v3 = vrot.slane %v2123_v10, 1  ;;  %v2430_v4 = vrot.slane %v2123_v10, 2  ;;  %v959_v5 = vsel %vm13007_vm11, %v777_v57, %v958_v39  ;;  %v2087_v43 = vadd.f32 %v13555_v63, %v1990_v50 }
 0x105   : > { %v2088_v62 = vadd.f32 %v13557_v1, %v1991_v60  ;;  %v2235_v18 = vrot.slane %v13555_v63, 1  ;;  %v13565_v38 = vrot.slane %v13557_v1, 1  ;;  %960 = vst [vmem:[#allocation2 + $0xb4] sm:$0xf] %v959_v5  ;;  %v13568_v7 = vrot.slane %v13557_v1, 2  ;;  %v2632_v60 = vpop.permute.xlu0 %2631 }
 0x106   : > { %v785_v9 = vor.u32 %v783_v55, %v782_v2  ;;  %v787_v12 = vrot.slane %v782_v2, 4  ;;  %v1214_v21 = vrot.slane %v1030_v54, 1  ;;  %v1215_v58 = vrot.slane %v1031_v16, 1  ;;  %v12800_v5 = vld [vmem:[%s12988_s30 + $0x20] sm:$0xf] }
 0x107   : > { %v13572_v17 = vsel %vm1148_vm4, %v2235_v18, %v13565_v38  ;;  %v2239_v19 = vsel %vm1148_vm4, %v13565_v38, %v2238_v3  ;;  %v2429_v27 = vsel %vm1341_vm10, %v2427_v46, %v13568_v7  ;;  %v2431_v44 = vsel %vm1341_vm10, %v13568_v7, %v2430_v4 }
 0x108   : > { %v2311_v24 = vadd.f32 %v13572_v17, %v2087_v43  ;;  %v2312_v25 = vadd.f32 %v2239_v19, %v2088_v62  ;;  %v786_v29 = vsel %vm12999_vm9, %v778_v59, %v785_v9  ;;  %v963_v40 = vsel %vm13014_vm12, %v787_v12, %v962_v13  ;;  %v13594_v43 = vld [vmem:[%s12988_s30 + $0x78] sm:$0xf] }
 0x109   : > { %v1217_v30 = vrot.slane %v1097_v56, 1  ;;  %961 = vst.msk [vmem:[#allocation2 + $0xb8] sm:$0xf] %vm854_vm6, %v786_v29  ;;  %964 = vst [vmem:[#allocation2 + $0xbc] sm:$0x1] %v963_v40  ;;  %v1322_v32 = vunpack.c.l.bf16 %v1306_v22  ;;  %v1408_v36 = vrot.slane %v1031_v16, 2  ;;  %v1216_v51 = vsel %vm1148_vm4, %v1214_v21, %v1215_v58 }
 0x10a   : > { %v2503_v34 = vadd.f32 %v2429_v27, %v2311_v24  ;;  %v2504_v35 = vadd.f32 %v2431_v44, %v2312_v25  ;;  %v1410_v23 = vrot.slane %v1097_v56, 2  ;;  %v1611_v45 = vunpack.c.l.bf16 %v1595_v28  ;;  %v12802_v56 = vld [vmem:[%s12988_s30 + $0x28] sm:$0xf]  ;;  %v12803_v21 = vld [vmem:[%s12988_s30 + $0x2c] sm:$0xf]  ;;  %v2634_v24 = vpop.permute.xlu1 %2633 }
 0x10b   : > { %v1218_v39 = vsel %vm1148_vm4, %v1215_v58, %v1217_v30  ;;  %v1287_v8 = vadd.f32 %v1216_v51, %v1030_v54  ;;  %v1407_v49 = vrot.slane %v1322_v32, 2  ;;  %v1835_v57 = vunpack.c.l.bf16 %v1819_v37  ;;  %v12801_v54 = vld [vmem:[%s12988_s30 + $0x24] sm:$0xf]  ;;  %v13605_v25 = vld [vmem:[%s12988_s30 + $0x7c] sm:$0xf] }
 0x10c   : > { %v2523_v46 = vpack.c.bf16 %v2504_v35, %v2503_v34  ;;  %v1288_v55 = vadd.f32 %v1218_v39, %v1031_v16  ;;  %v2332_v50 = vld [vmem:[#allocation2 + $0xb4] sm:$0xe]  ;;  %v1411_v53 = vsel %vm1341_vm10, %v1408_v36, %v1410_v23  ;;  %v1730_v10 = vrot.slane %v1611_v45, 1 }
 0x10d   : > { %v1922_v59 = vrot.slane %v1611_v45, 2  ;;  %v1409_v2 = vsel %vm1341_vm10, %v1407_v49, %v1408_v36  ;;  %v2348_v4 = vunpack.c.l.bf16 %v2332_v50  ;;  %v11485_v6 = vcombine.low %v12800_v5, %v12801_v54 }
 0x10e   : > { %2647 = vrot.lane.b32.xlu0 %v2523_v46, %s12836_s17  ;;  %v1481_v3 = vadd.f32 %v1411_v53, %v1288_v55  ;;  %v1480_v62 = vadd.f32 %v1409_v2, %v1287_v8  ;;  %v1731_v18 = vsel %vm1148_vm4, %v13565_v38, %v1730_v10  ;;  %v1919_v9 = vrot.slane %v1835_v57, 2  ;;  %v965_v10 = vld [vmem:[#allocation2 + $0xc0] sm:$0xf]  ;;  %v1082_v57 = vld [vmem:[#allocation2 + $0xb0] sm:$0x1] }
 0x10f   : > { %v1923_v12 = vsel %vm1341_vm10, %v13568_v7, %v1922_v59  ;;  %v2432_v16 = vrot.slane %v2348_v4, 2  ;;  %v2670_v19 = vsel %vm2655_vm15, %v11485_v6, %v2632_v60  ;;  %v11486_v22 = vcombine.low %v12802_v56, %v12803_v21  ;;  %v1307_v4 = vld [vmem:[#allocation2 + $0xa8] sm:$0xe] }
 0x110   : > { %v1577_v13 = vadd.f32 %v13557_v1, %v1481_v3  ;;  %v1576_v27 = vadd.f32 %v13555_v63, %v1480_v62  ;;  %v1921_v44 = vsel %vm1341_vm10, %v1919_v9, %v13568_v7  ;;  %v2025_v28 = vld [vmem:[#allocation2 + $0xb4] sm:$0xff]   ;;  %v2108_v29 = vld [vmem:[#allocation2 + $0xbc] sm:$0x1]  ;;  %12288 = vmatprep.mubr.msk.bf16.mxu0 %vm2705_vm14, %v2670_v19  ;;  %v789_v40 = vshrl.u32 %v13594_v43, 16 }
 0x111   : > { %v792_v58 = vshll.u32 %v13594_v43, 16  ;;  %v2057_v34 = vunpack.c.l.bf16 %v2025_v28  ;;  %v2058_v35 = vunpack.c.h.bf16 %v2025_v28  ;;  %v2124_v32 = vunpack.c.l.bf16 %v2108_v29  ;;  %v1514_v56 = vld [vmem:[#allocation2 + $0xb4] sm:$0xff]  }
 0x112   : > { %v1801_v30 = vadd.f32 %v1731_v18, %v1577_v13  ;;  %v1800_v36 = vadd.f32 %v13572_v17, %v1576_v27  ;;  %v2673_v37 = vsel %vm2655_vm15, %v11486_v22, %v2634_v24  ;;  %v791_v51 = vrot.slane %v789_v40, 7  ;;  %v969_v13 = vld [vmem:[#allocation2 + $0xc8] sm:$0x1]  ;;  %v1596_v40 = vld [vmem:[#allocation2 + $0xbc] sm:$0x1] }
 0x113   : > { %v797_v39 = vshrl.u32 %v13605_v25, 16  ;;  %v2240_v45 = vrot.slane %v2057_v34, 1  ;;  %v2241_v46 = vrot.slane %v2058_v35, 1  ;;  %v2243_v8 = vrot.slane %v2124_v32, 1  ;;  %12289 = vmatmul.mubr.msk.bf16.gmra.mrb[8].mxu0 %vm2705_vm14, %v2673_v37 }
 0x114   : > { %v1993_v23 = vadd.f32 %v1923_v12, %v1801_v30  ;;  %v1992_v55 = vadd.f32 %v1921_v44, %v1800_v36  ;;  %v2433_v49 = vrot.slane %v2058_v35, 2  ;;  %v2435_v50 = vrot.slane %v2124_v32, 2 }
 0x115   : > { %v794_v53 = vor.u32 %v792_v58, %v791_v51  ;;  %v2242_v60 = vsel %vm1148_vm4, %v2240_v45, %v2241_v46  ;;  %v2244_v2 = vsel %vm1148_vm4, %v2241_v46, %v2243_v8  ;;  %v795_v3 = vrot.slane %v791_v51, 4 }
 0x116   : > { %v2090_v59 = vadd.f32 %v2058_v35, %v1993_v23  ;;  %v2089_v5 = vadd.f32 %v2057_v34, %v1992_v55  ;;  %v2434_v54 = vsel %vm1341_vm10, %v2432_v16, %v2433_v49  ;;  %v2436_v6 = vsel %vm1341_vm10, %v2433_v49, %v2435_v50  ;;  %v1820_v35 = vld [vmem:[#allocation2 + $0xb4] sm:$0xe] }
 0x117   : > { %v799_v62 = vrot.slane %v797_v39, 7  ;;  %v800_v9 = vshll.u32 %v13605_v25, 16  ;;  %v966_v12 = vsel %vm13007_vm11, %v794_v53, %v965_v10  ;;  %v1098_v19 = vunpack.c.l.bf16 %v1082_v57  ;;  %v1002_v23 = vld [vmem:[#allocation2 + $0xb4] sm:$0xff]   ;;  %v1083_v10 = vld [vmem:[#allocation2 + $0xbc] sm:$0x1] }
 0x118   : > { %v2314_v18 = vadd.f32 %v2244_v2, %v2090_v59  ;;  %v2313_v21 = vadd.f32 %v2242_v60, %v2089_v5  ;;  %967 = vst [vmem:[#allocation2 + $0xc0] sm:$0xf] %v966_v12  ;;  %v1289_v24 = vadd.f32 %v13555_v63, %v13572_v17  ;;  %v1323_v27 = vunpack.c.l.bf16 %v1307_v4 }
 0x119   : > { %v804_v22 = vrot.slane %v799_v62, 4  ;;  %v802_v44 = vor.u32 %v800_v9, %v799_v62  ;;  %v1222_v28 = vrot.slane %v1098_v19, 1  ;;  %v1415_v29 = vrot.slane %v1098_v19, 2 }
 0x11a   : > { %v2506_v16 = vadd.f32 %v2436_v6, %v2314_v18  ;;  %v2505_v58 = vadd.f32 %v2434_v54, %v2313_v21  ;;  %v1412_v30 = vrot.slane %v1323_v27, 2  ;;  %v1546_v34 = vunpack.c.l.bf16 %v1514_v56 }
 0x11b   : > { %v970_v26 = vsel %vm13014_vm12, %v804_v22, %v969_v13  ;;  %v803_v32 = vsel %vm12999_vm9, %v795_v3, %v802_v44  ;;  %v1223_v63 = vsel %vm1148_vm4, %v13565_v38, %v1222_v28  ;;  %v1416_v17 = vsel %vm1341_vm10, %v13568_v7, %v1415_v29 }
 0x11c   : > { %971 = vst [vmem:[#allocation2 + $0xc8] sm:$0x1] %v970_v26  ;;  %v1547_v36 = vunpack.c.h.bf16 %v1514_v56  ;;  %v2524_v37 = vpack.c.bf16 %v2506_v16, %v2505_v58  ;;  %968 = vst.msk [vmem:[#allocation2 + $0xc4] sm:$0xf] %vm854_vm6, %v803_v32  ;;  %v1290_v33 = vadd.f32 %v13557_v1, %v1223_v63  ;;  %v1414_v51 = vsel %vm1341_vm10, %v1412_v30, %v13568_v7  ;;  %v1308_v7 = vld [vmem:[#allocation2 + $0xb4] sm:$0xe] }
 0x11d   : > { %v1612_v39 = vunpack.c.l.bf16 %v1596_v40  ;;  %v1482_v45 = vadd.f32 %v1414_v51, %v1289_v24  ;;  %v1732_v46 = vrot.slane %v1546_v34, 1  ;;  %v1836_v55 = vunpack.c.l.bf16 %v1820_v35 }
 0x11e   : > { %v1733_v8 = vrot.slane %v1547_v36, 1  ;;  %2649 = vrot.lane.b32.xlu1 %v2524_v37, %s12836_s17  ;;  %v1483_v38 = vadd.f32 %v1416_v17, %v1290_v33  ;;  %v1925_v50 = vrot.slane %v1547_v36, 2  ;;  %v1034_v2 = vunpack.c.l.bf16 %v1002_v23 }
 0x11f   : > { %v1735_v49 = vrot.slane %v1612_v39, 1  ;;  %v1927_v53 = vrot.slane %v1612_v39, 2  ;;  %v1578_v57 = vadd.f32 %v1546_v34, %v1482_v45  ;;  %v1924_v1 = vrot.slane %v1836_v55, 2  ;;  %v2333_v60 = vld [vmem:[#allocation2 + $0xc0] sm:$0xe] }
 0x120   : > { %v1734_v59 = vsel %vm1148_vm4, %v1732_v46, %v1733_v8  ;;  %v1579_v3 = vadd.f32 %v1547_v36, %v1483_v38  ;;  %v2349_v54 = vunpack.c.l.bf16 %v2333_v60  ;;  %v1035_v18 = vunpack.c.h.bf16 %v1002_v23  ;;  %v1821_v45 = vld [vmem:[#allocation2 + $0xc0] sm:$0xe] }
 0x121   : > { %v1736_v4 = vsel %vm1148_vm4, %v1733_v8, %v1735_v49  ;;  %v1928_v5 = vsel %vm1341_vm10, %v1925_v50, %v1927_v53  ;;  %v1802_v6 = vadd.f32 %v1734_v59, %v1578_v57  ;;  %v1926_v62 = vsel %vm1341_vm10, %v1924_v1, %v1925_v50  ;;  %v2029_v57 = vld [vmem:[#allocation2 + $0xcc] sm:$0xff]  }
 0x122   : > { %v1099_v9 = vunpack.c.l.bf16 %v1083_v10  ;;  %v1803_v12 = vadd.f32 %v1736_v4, %v1579_v3  ;;  %v2437_v19 = vrot.slane %v2349_v54, 2  ;;  %v1224_v56 = vrot.slane %v1034_v2, 1  ;;  %v2110_v54 = vld [vmem:[#allocation2 + $0xd4] sm:$0x1] }
 0x123   : > { %v2109_v13 = vld [vmem:[#allocation2 + $0xc8] sm:$0x1]  ;;  %v1324_v21 = vunpack.c.l.bf16 %v1308_v7  ;;  %v1994_v22 = vadd.f32 %v1926_v62, %v1802_v6  ;;  %v12199_v24 = vld [vmem:[#allocation2 + $0xc0] sm:$0xff]   ;;  %v1225_v16 = vrot.slane %v1035_v18, 1  ;;  %v1418_v23 = vrot.slane %v1035_v18, 2 }
 0x124   : > { %v2125_v27 = vunpack.c.l.bf16 %v2109_v13  ;;  %v1227_v44 = vrot.slane %v1099_v9, 1  ;;  %v1995_v28 = vadd.f32 %v1928_v5, %v1803_v12  ;;  %v12176_v29 = vunpack.c.l.bf16 %v12199_v24  ;;  %v1597_v32 = vld [vmem:[#allocation2 + $0xc8] sm:$0x1]  ;;  %v2334_v12 = vld [vmem:[#allocation2 + $0xcc] sm:$0xe] }
 0x125   : > { %v12177_v40 = vunpack.c.h.bf16 %v12199_v24  ;;  %v1417_v58 = vrot.slane %v1324_v21, 2  ;;  %v1226_v34 = vsel %vm1148_vm4, %v1224_v56, %v1225_v16  ;;  %v1420_v55 = vrot.slane %v1099_v9, 2 }
 0x126   : > { %v2248_v26 = vrot.slane %v2125_v27, 1  ;;  %v2440_v30 = vrot.slane %v2125_v27, 2  ;;  %v1228_v35 = vsel %vm1148_vm4, %v1225_v16, %v1227_v44  ;;  %v2091_v63 = vadd.f32 %v12176_v29, %v1994_v22 }
 0x127   : > { %v2092_v17 = vadd.f32 %v12177_v40, %v1995_v28  ;;  %v2245_v36 = vrot.slane %v12176_v29, 1  ;;  %v2246_v37 = vrot.slane %v12177_v40, 1  ;;  %v2438_v33 = vrot.slane %v12177_v40, 2 }
 0x128   : > { %v1291_v51 = vadd.f32 %v1226_v34, %v1034_v2  ;;  %v1292_v39 = vadd.f32 %v1228_v35, %v1035_v18  ;;  %v1613_v38 = vunpack.c.l.bf16 %v1597_v32  ;;  %v1419_v59 = vsel %vm1341_vm10, %v1417_v58, %v1418_v23  ;;  %v12804_v35 = vld [vmem:[%s12988_s30 + $0x30] sm:$0xf]  ;;  %v12805_v32 = vld [vmem:[%s12988_s30 + $0x34] sm:$0xf] }
 0x129   : > { %v2247_v46 = vsel %vm1148_vm4, %v2245_v36, %v2246_v37  ;;  %v2249_v8 = vsel %vm1148_vm4, %v2246_v37, %v2248_v26  ;;  %v2439_v53 = vsel %vm1341_vm10, %v2437_v19, %v2438_v33  ;;  %v2441_v10 = vsel %vm1341_vm10, %v2438_v33, %v2440_v30  ;;  %v2636_v30 = vpop.permute.xlu0 %2635 }
 0x12a   : > { %v2315_v49 = vadd.f32 %v2247_v46, %v2091_v63  ;;  %v2316_v50 = vadd.f32 %v2249_v8, %v2092_v17  ;;  %v1421_v1 = vsel %vm1341_vm10, %v1418_v23, %v1420_v55  ;;  %v1740_v60 = vrot.slane %v1613_v38, 1 }
 0x12b   : > { %v1837_v2 = vunpack.c.l.bf16 %v1821_v45  ;;  %v1484_v4 = vadd.f32 %v1419_v59, %v1291_v51  ;;  %v1485_v5 = vadd.f32 %v1421_v1, %v1292_v39  ;;  %v1932_v18 = vrot.slane %v1613_v38, 2  ;;  %v12806_v45 = vld [vmem:[%s12988_s30 + $0x38] sm:$0xf] }
 0x12c   : > { %v2507_v7 = vadd.f32 %v2439_v53, %v2315_v49  ;;  %v2508_v3 = vadd.f32 %v2441_v10, %v2316_v50  ;;  %v1741_v6 = vsel %vm1148_vm4, %v2246_v37, %v1740_v60  ;;  %v2061_v9 = vunpack.c.l.bf16 %v2029_v57 }
 0x12d   : > { %v1929_v62 = vrot.slane %v1837_v2, 2  ;;  %v1580_v19 = vadd.f32 %v12176_v29, %v1484_v4  ;;  %v1581_v56 = vadd.f32 %v12177_v40, %v1485_v5  ;;  %v2062_v21 = vunpack.c.h.bf16 %v2029_v57 }
 0x12e   : > { %v2525_v13 = vpack.c.bf16 %v2508_v3, %v2507_v7  ;;  %v1933_v24 = vsel %vm1341_vm10, %v2438_v33, %v1932_v18  ;;  %v2126_v27 = vunpack.c.l.bf16 %v2110_v54  ;;  %v2250_v16 = vrot.slane %v2061_v9, 1  ;;  %v12808_v7 = vld [vmem:[%s12988_s30 + $0x40] sm:$0xf]  ;;  %v12809_v3 = vld [vmem:[%s12988_s30 + $0x44] sm:$0xf] }
 0x12f   : > { %v1931_v22 = vsel %vm1341_vm10, %v1929_v62, %v2438_v33  ;;  %v1804_v44 = vadd.f32 %v2247_v46, %v1580_v19  ;;  %v1805_v28 = vadd.f32 %v1741_v6, %v1581_v56  ;;  %v2251_v58 = vrot.slane %v2062_v21, 1  ;;  %v2638_v33 = vpop.permute.xlu1 %2637  ;;  %v12807_v46 = vld [vmem:[%s12988_s30 + $0x3c] sm:$0xf]  ;;  %v12812_v18 = vld [vmem:[%s12988_s30 + $0x50] sm:$0xf] }
 0x130   : > { %2651 = vrot.lane.b32.xlu0 %v2525_v13, %s12836_s17  ;;  %v2350_v26 = vunpack.c.l.bf16 %v2334_v12  ;;  %v2253_v29 = vrot.slane %v2126_v27, 1  ;;  %v2443_v34 = vrot.slane %v2062_v21, 2  ;;  %v2445_v40 = vrot.slane %v2126_v27, 2  ;;  %v12814_v56 = vld [vmem:[%s12988_s30 + $0x58] sm:$0xf] }
 0x131   : > { %v11487_v63 = vcombine.low %v12804_v35, %v12805_v32  ;;  %v1996_v17 = vadd.f32 %v1931_v22, %v1804_v44  ;;  %v1997_v36 = vadd.f32 %v1933_v24, %v1805_v28  ;;  %v2252_v51 = vsel %vm1148_vm4, %v2250_v16, %v2251_v58 }
 0x132   : > { %v2442_v37 = vrot.slane %v2350_v26, 2  ;;  %v2254_v39 = vsel %vm1148_vm4, %v2251_v58, %v2253_v29  ;;  %v11488_v8 = vcombine.low %v12806_v45, %v12807_v46  ;;  %v2446_v50 = vsel %vm1341_vm10, %v2443_v34, %v2445_v40 }
 0x133   : > { %v2676_v23 = vsel %vm2655_vm15, %v11487_v63, %v2636_v30  ;;  %v2093_v55 = vadd.f32 %v2061_v9, %v1996_v17  ;;  %v2094_v38 = vadd.f32 %v2062_v21, %v1997_v36  ;;  %v11495_v59 = vcombine.low %v13541_v31, %v13546_v42  ;;  %v12810_v31 = vld [vmem:[%s12988_s30 + $0x48] sm:$0xf]  ;;  %v12811_v42 = vld [vmem:[%s12988_s30 + $0x4c] sm:$0xf]  ;;  %v12813_v9 = vld [vmem:[%s12988_s30 + $0x54] sm:$0xf] }
 0x134   : > { %12292 = vmatprep.mubr.msk.bf16.mxu0 %vm2705_vm14, %v2676_v23  ;;  %v2444_v49 = vsel %vm1341_vm10, %v2442_v37, %v2443_v34  ;;  %v2679_v53 = vsel %vm2655_vm15, %v11488_v8, %v2638_v33  ;;  %v11496_v1 = vcombine.low %v13594_v43, %v13605_v25  ;;  %v11489_v4 = vcombine.low %v12808_v7, %v12809_v3  ;;  %v12815_v21 = vld [vmem:[%s12988_s30 + $0x5c] sm:$0xf]  ;;  %s12841_s30 = smov 64  }
 0x135   : > { %v2317_v10 = vadd.f32 %v2252_v51, %v2093_v55  ;;  %v2318_v57 = vadd.f32 %v2254_v39, %v2094_v38  ;;  %12293 = vmatmul.mubr.msk.bf16.gmra.mrb[12].mxu0 %vm2705_vm14, %v2679_v53  ;;  %v11490_v43 = vcombine.low %v12810_v31, %v12811_v42  ;;  %v11491_v12 = vcombine.low %v12812_v18, %v12813_v9 }
 0x136   : > { %v11492_v22 = vcombine.low %v12814_v56, %v12815_v21  ;;  %v11493_v16 = vcombine.low %v13430_v52, %v13445_v14  ;;  %v11494_v58 = vcombine.low %v13495_v41, %v13509_v0  ;;  %v13701_v52 = vld [vmem:[%s18058_s2] ss:$0 sm:$0xff]  ;;  %vm3557_vm3 = vcmask 60416  }
 0x137   : > { %v2509_v60 = vadd.f32 %v2444_v49, %v2317_v10  ;;  %v2510_v2 = vadd.f32 %v2446_v50, %v2318_v57  ;;  %v13708_v0 = vld [vmem:[%s18059_s3] ss:$0 sm:$0xff]  ;;  %vm13896_vm6 = vmand %vm3557_vm3, %vm855_vm5  ;;  %vm3563_vm7 = vcmask 57344   ;;  %vm4954_vm11 = vcmask 130048  }
 0x138   : > { %vm13911_vm10 = vmand %vm3563_vm7, %vm530_vm2  ;;  %vm5019_vm12 = vcmask 195584   ;;  %vm18155_vm7 = vcmask 523264  }
 0x139   : > { %v2526_v5 = vpack.c.bf16 %v2510_v2, %v2509_v60 }
 0x13b   : > { %2653 = vrot.lane.b32.xlu1 %v2526_v5, %s12836_s17  ;;  %s12842_s17 = smov 40  }
 0x13c   : > { %v2640_v54 = vpop.permute.xlu0 %2639 }
 0x13d   : > { %v2682_v6 = vsel %vm2655_vm15, %v11489_v4, %v2640_v54 }
 0x13e   : > { %12296 = vmatprep.mubr.msk.bf16.mxu0 %vm2705_vm14, %v2682_v6 }
 0x14c   : > { %v2642_v25 = vpop.permute.xlu1 %2641 }
 0x14d   : > { %v2685_v62 = vsel %vm2655_vm15, %v11490_v43, %v2642_v25 }
 0x14e   : > { %12297 = vmatmul.mubr.msk.bf16.gmra.mrb[16].mxu0 %vm2705_vm14, %v2685_v62 }
 0x15e   : > { %v2644_v13 = vpop.permute.xlu0 %2643 }
 0x15f   : > { %v2688_v19 = vsel %vm2655_vm15, %v11491_v12, %v2644_v13 }
 0x160   : > { %12300 = vmatprep.mubr.msk.bf16.mxu0 %vm2705_vm14, %v2688_v19 }
 0x16e   : > { %v2646_v24 = vpop.permute.xlu1 %2645 }
 0x16f   : > { %v2691_v27 = vsel %vm2655_vm15, %v11492_v22, %v2646_v24 }
 0x170   : > { %12301 = vmatmul.mubr.msk.bf16.gmra.mrb[20].mxu0 %vm2705_vm14, %v2691_v27 }
 0x180   : > { %v2648_v44 = vpop.permute.xlu0 %2647 }
 0x181   : > { %v2694_v28 = vsel %vm2655_vm15, %v11493_v16, %v2648_v44 }
 0x182   : > { %12304 = vmatprep.mubr.msk.bf16.mxu0 %vm2705_vm14, %v2694_v28 }
 0x190   : > { %v2650_v26 = vpop.permute.xlu1 %2649 }
 0x191   : > { %v2697_v30 = vsel %vm2655_vm15, %v11494_v58, %v2650_v26 }
 0x192   : > { %12305 = vmatmul.mubr.msk.bf16.gmra.mrb[24].mxu0 %vm2705_vm14, %v2697_v30 }
 0x1a2   : > { %v2652_v29 = vpop.permute.xlu0 %2651 }
 0x1a3   : > { %v2700_v34 = vsel %vm2655_vm15, %v11495_v59, %v2652_v29 }
 0x1a4   : > { %12308 = vmatprep.mubr.msk.bf16.mxu0 %vm2705_vm14, %v2700_v34 }
 0x1ad   : > { %v2654_v40 = vpop.permute.xlu1 %2653 }
 0x1ae   : > { %v2703_v14 = vsel %vm2655_vm15, %v11496_v1, %v2654_v40  ;;  %vm5329_vm15 = vcmask 326656  }
 0x1af   : > { %12309 = vmatmul.mubr.msk.bf16.gmra.mrb[28].mxu0 %vm2705_vm14, %v2703_v14 }
 0x1b0   : > { %v12282_v41 = vpop.f32.mrb[0].mxu0 }
 0x1b1   : > { %v2912_v35 = vmul.f32 %v12282_v41, %v13701_v52  ;;  %v2776_v32 = vpop.f32.mrb[1].mxu0 }
 0x1b2   : > { %v2910_v63 = vmul.f32 %v13701_v52, %v2776_v32  ;;  %v12283_v17 = vpop.f32.mrb[2].mxu0 }
 0x1b3   : > { %v2951_v36 = vadd.f32 %v13708_v0, %v2912_v35  ;;  %v2913_v37 = vmul.f32 %v12283_v17, %v13701_v52  ;;  %v2779_v33 = vpop.f32.mrb[3].mxu0 }
 0x1b4   : > { %v2949_v51 = vadd.f32 %v13708_v0, %v2910_v63  ;;  %v2911_v39 = vmul.f32 %v13701_v52, %v2779_v33 }
 0x1b5   : > { %v2983_v23 = vmax.f32 %v2951_v36, 0.0  ;;  %v2952_v45 = vadd.f32 %v13708_v0, %v2913_v37 }
 0x1b6   : > { %v2981_v46 = vmax.f32 %v2949_v51, 0.0  ;;  %v2950_v8 = vadd.f32 %v13708_v0, %v2911_v39 }
 0x1b7   : > { %v13718_v55 = vmin.f32 %v2983_v23, 6.0  ;;  %v2984_v38 = vmax.f32 %v2952_v45, 0.0 }
 0x1b8   : > { %v13720_v49 = vmin.f32 %v2981_v46, 6.0  ;;  %v2982_v50 = vmax.f32 %v2950_v8, 0.0 }
 0x1b9   : > { %18168 = vst [vmem:[#allocation9_spill] sm:$0xff] %v13718_v55  ;;  %v13722_v53 = vmin.f32 %v2984_v38, 6.0  ;;  %v12020_v10 = vpack.c.bf16 %v13718_v55, %v13718_v55 }
 0x1ba   : > { %18169 = vst [vmem:[#allocation10_spill] sm:$0xff] %v13720_v49  ;;  %v13726_v57 = vmin.f32 %v2982_v50, 6.0  ;;  %v12018_v59 = vpack.c.bf16 %v13720_v49, %v13720_v49 }
 0x1bb   : > { %18170 = vst [vmem:[#allocation11_spill] sm:$0xff] %v13722_v53  ;;  %v12021_v1 = vpack.c.bf16 %v13722_v53, %v13722_v53  ;;  %v3159_v60 = vshrl.u32 %v12020_v10, 16  ;;  %v3162_v4 = vshll.u32 %v12020_v10, 16 }
 0x1bc   : > { %18171 = vst [vmem:[#allocation12_spill] sm:$0xff] %v13726_v57  ;;  %v12019_v2 = vpack.c.bf16 %v13726_v57, %v13726_v57  ;;  %v3142_v7 = vshrl.u32 %v12018_v59, 16  ;;  %v3145_v54 = vshll.u32 %v12018_v59, 16 }
 0x1bd   : > { %v3161_v3 = vrot.slane %v3159_v60, 7  ;;  %v3167_v31 = vshrl.u32 %v12021_v1, 16  ;;  %v3170_v27 = vshll.u32 %v12021_v1, 16 }
 0x1be   : > { %v3144_v5 = vrot.slane %v3142_v7, 7  ;;  %v3150_v43 = vshrl.u32 %v12019_v2, 16  ;;  %v3153_v40 = vshll.u32 %v12019_v2, 16 }
 0x1bf   : > { %v3164_v6 = vor.u32 %v3162_v4, %v3161_v3  ;;  %v3169_v25 = vrot.slane %v3167_v31, 7  ;;  %v3165_v41 = vrot.slane %v3161_v3, 4 }
 0x1c0   : > { %v3147_v42 = vor.u32 %v3145_v54, %v3144_v5  ;;  %v3152_v18 = vrot.slane %v3150_v43, 7  ;;  %v3148_v33 = vrot.slane %v3144_v5, 4 }
 0x1c1   : > { %3419 = vrot.lane.b32.xlu1 %v3164_v6, %s12837_s24  ;;  %v3174_v24 = vrot.slane %v3169_v25, 4  ;;  %v3172_v30 = vor.u32 %v3170_v27, %v3169_v25 }
 0x1c2   : > { %3413 = vrot.lane.b32.xlu0 %v3147_v42, %s12837_s24  ;;  %v3157_v28 = vrot.slane %v3152_v18, 4  ;;  %v3155_v32 = vor.u32 %v3153_v40, %v3152_v18 }
 0x1c3   : > { %v3173_v17 = vsel %vm12999_vm9, %v3165_v41, %v3172_v30 }
 0x1c4   : > { %v12286_v62 = vpop.f32.mrb[4].mxu0  ;;  %v3156_v23 = vsel %vm12999_vm9, %v3148_v33, %v3155_v32 }
 0x1c5   : > { %v2916_v9 = vmul.f32 %v12286_v62, %v13701_v52  ;;  %v2792_v12 = vpop.f32.mrb[5].mxu0  ;;  %5690 = vrot.lane.b32.xlu1 %v3164_v6, %s12838_s28 }
 0x1c6   : > { %v2914_v13 = vmul.f32 %v13701_v52, %v2792_v12  ;;  %v12287_v19 = vpop.f32.mrb[6].mxu0  ;;  %5684 = vrot.lane.b32.xlu0 %v3147_v42, %s12838_s28 }
 0x1c7   : > { %v2955_v56 = vadd.f32 %v13708_v0, %v2916_v9  ;;  %v2917_v21 = vmul.f32 %v12287_v19, %v13701_v52  ;;  %v2795_v22 = vpop.f32.mrb[7].mxu0 }
 0x1c8   : > { %v2953_v16 = vadd.f32 %v13708_v0, %v2914_v13  ;;  %v2915_v44 = vmul.f32 %v13701_v52, %v2795_v22 }
 0x1c9   : > { %v2987_v58 = vmax.f32 %v2955_v56, 0.0  ;;  %v2956_v26 = vadd.f32 %v13708_v0, %v2917_v21  ;;  %3423 = vrot.lane.b32.xlu1 %v3174_v24, %s12837_s24 }
 0x1ca   : > { %v2985_v29 = vmax.f32 %v2953_v16, 0.0  ;;  %v2954_v34 = vadd.f32 %v13708_v0, %v2915_v44  ;;  %3417 = vrot.lane.b32.xlu0 %v3157_v28, %s12837_s24 }
 0x1cb   : > { %v13748_v14 = vmin.f32 %v2987_v58, 6.0  ;;  %v2988_v63 = vmax.f32 %v2956_v26, 0.0 }
 0x1cc   : > { %v13750_v35 = vmin.f32 %v2985_v29, 6.0  ;;  %v2986_v37 = vmax.f32 %v2954_v34, 0.0 }
 0x1cd   : > { %18172 = vst [vmem:[#allocation13_spill] sm:$0xff] %v13748_v14  ;;  %5694 = vrot.lane.b32.xlu1 %v3174_v24, %s12838_s28  ;;  %v12024_v36 = vpack.c.bf16 %v13748_v14, %v13748_v14  ;;  %v13762_v46 = vmin.f32 %v2988_v63, 6.0 }
 0x1ce   : > { %18173 = vst [vmem:[#allocation14_spill] sm:$0xff] %v13750_v35  ;;  %3421 = vrot.lane.b32.xlu0 %v3173_v17, %s12837_s24  ;;  %v12022_v51 = vpack.c.bf16 %v13750_v35, %v13750_v35  ;;  %v13765_v8 = vmin.f32 %v2986_v37, 6.0  ;;  %v3589_v35 = vld [vmem:[#allocation2 + $0x3c] sm:$0xf] }
 0x1cf   : > { %v3193_v39 = vshrl.u32 %v12024_v36, 16  ;;  %18174 = vst [vmem:[#allocation15_spill] sm:$0xff] %v13762_v46  ;;  %v3196_v50 = vshll.u32 %v12024_v36, 16  ;;  %v12025_v1 = vpack.c.bf16 %v13762_v46, %v13762_v46 }
 0x1d0   : > { %v3176_v45 = vshrl.u32 %v12022_v51, 16  ;;  %18175 = vst [vmem:[#allocation16_spill] sm:$0xff] %v13765_v8  ;;  %v3179_v59 = vshll.u32 %v12022_v51, 16  ;;  %v12023_v60 = vpack.c.bf16 %v13765_v8, %v13765_v8  ;;  %v3596_v8 = vld [vmem:[#allocation2 + $0x48] sm:$0xf] }
 0x1d1   : > { %3415 = vrot.lane.b32.xlu1 %v3156_v23, %s12837_s24  ;;  %v3195_v38 = vrot.slane %v3193_v39, 7  ;;  %v3201_v3 = vshrl.u32 %v12025_v1, 16  ;;  %v3204_v54 = vshll.u32 %v12025_v1, 16 }
 0x1d2   : > { %5688 = vrot.lane.b32.xlu0 %v3157_v28, %s12838_s28  ;;  %v3178_v10 = vrot.slane %v3176_v45, 7  ;;  %v3184_v4 = vshrl.u32 %v12023_v60, 16  ;;  %v3187_v43 = vshll.u32 %v12023_v60, 16 }
 0x1d3   : > { %v3198_v2 = vor.u32 %v3196_v50, %v3195_v38  ;;  %v3203_v5 = vrot.slane %v3201_v3, 7  ;;  %v3199_v25 = vrot.slane %v3195_v38, 4 }
 0x1d4   : > { %v3181_v7 = vor.u32 %v3179_v59, %v3178_v10  ;;  %v3186_v6 = vrot.slane %v3184_v4, 7  ;;  %v3182_v18 = vrot.slane %v3178_v10, 4 }
 0x1d5   : > { %5686 = vrot.lane.b32.xlu1 %v3156_v23, %s12838_s28  ;;  %v3208_v31 = vrot.slane %v3203_v5, 4  ;;  %v3206_v62 = vor.u32 %v3204_v54, %v3203_v5 }
 0x1d6   : > { %5692 = vrot.lane.b32.xlu0 %v3173_v17, %s12838_s28  ;;  %v3191_v42 = vrot.slane %v3186_v6, 4  ;;  %v3189_v9 = vor.u32 %v3187_v43, %v3186_v6 }
 0x1d7   : > { %v3207_v12 = vsel %vm12999_vm9, %v3199_v25, %v3206_v62 }
 0x1d8   : > { %v3190_v21 = vsel %vm12999_vm9, %v3182_v18, %v3189_v9 }
 0x1d9   : > { %3431 = vrot.lane.b32.xlu1 %v3198_v2, %s12837_s24 }
 0x1da   : > { %3425 = vrot.lane.b32.xlu0 %v3181_v7, %s12837_s24 }
 0x1dd   : > { %5702 = vrot.lane.b32.xlu1 %v3198_v2, %s12838_s28 }
 0x1de   : > { %5696 = vrot.lane.b32.xlu0 %v3181_v7, %s12838_s28 }
 0x1e1   : > { %3435 = vrot.lane.b32.xlu1 %v3208_v31, %s12837_s24 }
 0x1e2   : > { %3429 = vrot.lane.b32.xlu0 %v3191_v42, %s12837_s24 }
 0x1e5   : > { %5706 = vrot.lane.b32.xlu1 %v3208_v31, %s12838_s28 }
 0x1e6   : > { %3433 = vrot.lane.b32.xlu0 %v3207_v12, %s12837_s24  ;;  %v12290_v13 = vpop.f32.mrb[8].mxu0 }
 0x1e7   : > { %v2920_v19 = vmul.f32 %v12290_v13, %v13701_v52  ;;  %v2808_v56 = vpop.f32.mrb[9].mxu0 }
 0x1e8   : > { %v2918_v22 = vmul.f32 %v13701_v52, %v2808_v56  ;;  %v12291_v24 = vpop.f32.mrb[10].mxu0 }
 0x1e9   : > { %3427 = vrot.lane.b32.xlu1 %v3190_v21, %s12837_s24  ;;  %v2959_v27 = vadd.f32 %v13708_v0, %v2920_v19  ;;  %v2921_v16 = vmul.f32 %v12291_v24, %v13701_v52  ;;  %v2811_v44 = vpop.f32.mrb[11].mxu0 }
 0x1ea   : > { %5700 = vrot.lane.b32.xlu0 %v3191_v42, %s12838_s28  ;;  %v2957_v28 = vadd.f32 %v13708_v0, %v2918_v22  ;;  %v2919_v58 = vmul.f32 %v13701_v52, %v2811_v44 }
 0x1eb   : > { %v2991_v26 = vmax.f32 %v2959_v27, 0.0  ;;  %v2960_v30 = vadd.f32 %v13708_v0, %v2921_v16 }
 0x1ec   : > { %v2989_v29 = vmax.f32 %v2957_v28, 0.0  ;;  %v2958_v34 = vadd.f32 %v13708_v0, %v2919_v58 }
 0x1ed   : > { %5698 = vrot.lane.b32.xlu1 %v3190_v21, %s12838_s28  ;;  %v13797_v40 = vmin.f32 %v2991_v26, 6.0  ;;  %v2992_v41 = vmax.f32 %v2960_v30, 0.0 }
 0x1ee   : > { %5704 = vrot.lane.b32.xlu0 %v3207_v12, %s12838_s28  ;;  %v13800_v32 = vmin.f32 %v2989_v29, 6.0  ;;  %v2990_v63 = vmax.f32 %v2958_v34, 0.0 }
 0x1ef   : > { %18176 = vst [vmem:[#allocation17_spill] sm:$0xff] %v13797_v40  ;;  %v13802_v17 = vmin.f32 %v2992_v41, 6.0  ;;  %v12028_v36 = vpack.c.bf16 %v13797_v40, %v13797_v40 }
 0x1f0   : > { %18177 = vst [vmem:[#allocation18_spill] sm:$0xff] %v13800_v32  ;;  %v13806_v37 = vmin.f32 %v2990_v63, 6.0  ;;  %v12026_v33 = vpack.c.bf16 %v13800_v32, %v13800_v32 }
 0x1f1   : > { %18178 = vst [vmem:[#allocation19_spill] sm:$0xff] %v13802_v17  ;;  %v3227_v51 = vshrl.u32 %v12028_v36, 16  ;;  %v3230_v39 = vshll.u32 %v12028_v36, 16  ;;  %v12029_v38 = vpack.c.bf16 %v13802_v17, %v13802_v17 }
 0x1f2   : > { %18179 = vst [vmem:[#allocation20_spill] sm:$0xff] %v13806_v37  ;;  %v3210_v23 = vshrl.u32 %v12026_v33, 16  ;;  %v3213_v45 = vshll.u32 %v12026_v33, 16  ;;  %v12027_v10 = vpack.c.bf16 %v13806_v37, %v13806_v37 }
 0x1f3   : > { %v3229_v50 = vrot.slane %v3227_v51, 7  ;;  %v3235_v2 = vshrl.u32 %v12029_v38, 16  ;;  %v3238_v4 = vshll.u32 %v12029_v38, 16 }
 0x1f4   : > { %v3212_v59 = vrot.slane %v3210_v23, 7  ;;  %v3218_v7 = vshrl.u32 %v12027_v10, 16  ;;  %v3221_v31 = vshll.u32 %v12027_v10, 16 }
 0x1f5   : > { %v3232_v1 = vor.u32 %v3230_v39, %v3229_v50  ;;  %v3237_v3 = vrot.slane %v3235_v2, 7  ;;  %v3233_v42 = vrot.slane %v3229_v50, 4 }
 0x1f6   : > { %v3215_v60 = vor.u32 %v3213_v45, %v3212_v59  ;;  %v3220_v5 = vrot.slane %v3218_v7, 7  ;;  %v3216_v25 = vrot.slane %v3212_v59, 4 }
 0x1f7   : > { %3443 = vrot.lane.b32.xlu1 %v3232_v1, %s12837_s24  ;;  %v3242_v54 = vrot.slane %v3237_v3, 4  ;;  %v3240_v43 = vor.u32 %v3238_v4, %v3237_v3 }
 0x1f8   : > { %3437 = vrot.lane.b32.xlu0 %v3215_v60, %s12837_s24  ;;  %v3225_v6 = vrot.slane %v3220_v5, 4  ;;  %v3223_v62 = vor.u32 %v3221_v31, %v3220_v5 }
 0x1f9   : > { %v3241_v18 = vsel %vm12999_vm9, %v3233_v42, %v3240_v43 }
 0x1fa   : > { %v3224_v9 = vsel %vm12999_vm9, %v3216_v25, %v3223_v62 }
 0x1fb   : > { %5714 = vrot.lane.b32.xlu1 %v3232_v1, %s12838_s28 }
 0x1fc   : > { %5708 = vrot.lane.b32.xlu0 %v3215_v60, %s12838_s28 }
 0x1ff   : > { %3447 = vrot.lane.b32.xlu1 %v3242_v54, %s12837_s24 }
 0x200   : > { %3441 = vrot.lane.b32.xlu0 %v3225_v6, %s12837_s24 }
 0x203   : > { %5718 = vrot.lane.b32.xlu1 %v3242_v54, %s12838_s28 }
 0x204   : > { %3445 = vrot.lane.b32.xlu0 %v3241_v18, %s12837_s24 }
 0x207   : > { %3439 = vrot.lane.b32.xlu1 %v3224_v9, %s12837_s24 }
 0x208   : > { %v12294_v12 = vpop.f32.mrb[12].mxu0  ;;  %5712 = vrot.lane.b32.xlu0 %v3225_v6, %s12838_s28 }
 0x209   : > { %v2924_v13 = vmul.f32 %v12294_v12, %v13701_v52  ;;  %v2824_v19 = vpop.f32.mrb[13].mxu0 }
 0x20a   : > { %v2922_v56 = vmul.f32 %v13701_v52, %v2824_v19  ;;  %v12295_v21 = vpop.f32.mrb[14].mxu0 }
 0x20b   : > { %v2963_v22 = vadd.f32 %v13708_v0, %v2924_v13  ;;  %v2925_v24 = vmul.f32 %v12295_v21, %v13701_v52  ;;  %v2827_v27 = vpop.f32.mrb[15].mxu0  ;;  %5710 = vrot.lane.b32.xlu1 %v3224_v9, %s12838_s28 }
 0x20c   : > { %v2961_v16 = vadd.f32 %v13708_v0, %v2922_v56  ;;  %v2923_v44 = vmul.f32 %v13701_v52, %v2827_v27  ;;  %5716 = vrot.lane.b32.xlu0 %v3241_v18, %s12838_s28 }
 0x20d   : > { %v2995_v28 = vmax.f32 %v2963_v22, 0.0  ;;  %v2964_v58 = vadd.f32 %v13708_v0, %v2925_v24 }
 0x20e   : > { %v2993_v26 = vmax.f32 %v2961_v16, 0.0  ;;  %v2962_v30 = vadd.f32 %v13708_v0, %v2923_v44 }
 0x20f   : > { %v13838_v29 = vmin.f32 %v2995_v28, 6.0  ;;  %v2996_v34 = vmax.f32 %v2964_v58, 0.0 }
 0x210   : > { %v13840_v41 = vmin.f32 %v2993_v26, 6.0  ;;  %v2994_v63 = vmax.f32 %v2962_v30, 0.0 }
 0x211   : > { %18180 = vst [vmem:[#allocation21_spill] sm:$0xff] %v13838_v29  ;;  %v13842_v36 = vmin.f32 %v2996_v34, 6.0  ;;  %v12032_v33 = vpack.c.bf16 %v13838_v29, %v13838_v29 }
 0x212   : > { %18181 = vst [vmem:[#allocation22_spill] sm:$0xff] %v13840_v41  ;;  %v13846_v51 = vmin.f32 %v2994_v63, 6.0  ;;  %v12030_v39 = vpack.c.bf16 %v13840_v41, %v13840_v41 }
 0x213   : > { %18182 = vst [vmem:[#allocation23_spill] sm:$0xff] %v13842_v36  ;;  %v3261_v23 = vshrl.u32 %v12032_v33, 16  ;;  %v3264_v45 = vshll.u32 %v12032_v33, 16  ;;  %v12033_v10 = vpack.c.bf16 %v13842_v36, %v13842_v36  ;;  %v3586_v36 = vld [vmem:[#allocation2 + $0x38] sm:$0x1] }
 0x214   : > { %18183 = vst [vmem:[#allocation24_spill] sm:$0xff] %v13846_v51  ;;  %v3244_v38 = vshrl.u32 %v12030_v39, 16  ;;  %v3247_v50 = vshll.u32 %v12030_v39, 16  ;;  %v12031_v1 = vpack.c.bf16 %v13846_v51, %v13846_v51 }
 0x215   : > { %v3263_v59 = vrot.slane %v3261_v23, 7  ;;  %v3269_v3 = vshrl.u32 %v12033_v10, 16  ;;  %v3272_v54 = vshll.u32 %v12033_v10, 16 }
 0x216   : > { %v3246_v60 = vrot.slane %v3244_v38, 7  ;;  %v3252_v4 = vshrl.u32 %v12031_v1, 16  ;;  %v3255_v18 = vshll.u32 %v12031_v1, 16 }
 0x217   : > { %v3266_v2 = vor.u32 %v3264_v45, %v3263_v59  ;;  %v3271_v5 = vrot.slane %v3269_v3, 7  ;;  %v3267_v13 = vrot.slane %v3263_v59, 4 }
 0x218   : > { %v3249_v7 = vor.u32 %v3247_v50, %v3246_v60  ;;  %v3254_v6 = vrot.slane %v3252_v4, 7  ;;  %v3250_v28 = vrot.slane %v3246_v60, 4 }
 0x219   : > { %3455 = vrot.lane.b32.xlu1 %v3266_v2, %s12837_s24  ;;  %v3276_v42 = vrot.slane %v3271_v5, 4  ;;  %v3274_v19 = vor.u32 %v3272_v54, %v3271_v5 }
 0x21a   : > { %3449 = vrot.lane.b32.xlu0 %v3249_v7, %s12837_s24  ;;  %v3259_v62 = vrot.slane %v3254_v6, 4  ;;  %v3257_v58 = vor.u32 %v3255_v18, %v3254_v6 }
 0x21b   : > { %v3275_v34 = vsel %vm12999_vm9, %v3267_v13, %v3274_v19  ;;  %v12816_v13 = vld [vmem:[#allocation2 + $0xc] sm:$0xf] }
 0x21c   : > { %v3258_v45 = vsel %vm12999_vm9, %v3250_v28, %v3257_v58 }
 0x21d   : > { %5726 = vrot.lane.b32.xlu1 %v3266_v2, %s12838_s28 }
 0x21e   : > { %5720 = vrot.lane.b32.xlu0 %v3249_v7, %s12838_s28 }
 0x221   : > { %v12298_v31 = vpop.f32.mrb[16].mxu0  ;;  %3459 = vrot.lane.b32.xlu1 %v3276_v42, %s12837_s24 }
 0x222   : > { %v2928_v43 = vmul.f32 %v12298_v31, %v13701_v52  ;;  %v2840_v25 = vpop.f32.mrb[17].mxu0  ;;  %3453 = vrot.lane.b32.xlu0 %v3259_v62, %s12837_s24 }
 0x223   : > { %v2926_v9 = vmul.f32 %v13701_v52, %v2840_v25  ;;  %v12299_v12 = vpop.f32.mrb[18].mxu0 }
 0x224   : > { %v2967_v56 = vadd.f32 %v13708_v0, %v2928_v43  ;;  %v2929_v21 = vmul.f32 %v12299_v12, %v13701_v52  ;;  %v2843_v22 = vpop.f32.mrb[19].mxu0  ;;  %v3568_v43 = vld [vmem:[#allocation2 + $0x18] sm:$0xf] }
 0x225   : > { %v2965_v24 = vadd.f32 %v13708_v0, %v2926_v9  ;;  %v2927_v27 = vmul.f32 %v13701_v52, %v2843_v22  ;;  %5730 = vrot.lane.b32.xlu1 %v3276_v42, %s12838_s28 }
 0x226   : > { %v2999_v16 = vmax.f32 %v2967_v56, 0.0  ;;  %v2968_v44 = vadd.f32 %v13708_v0, %v2929_v21  ;;  %3457 = vrot.lane.b32.xlu0 %v3275_v34, %s12837_s24 }
 0x227   : > { %v2997_v26 = vmax.f32 %v2965_v24, 0.0  ;;  %v2966_v30 = vadd.f32 %v13708_v0, %v2927_v27 }
 0x228   : > { %v13871_v63 = vmin.f32 %v2999_v16, 6.0  ;;  %v3000_v33 = vmax.f32 %v2968_v44, 0.0 }
 0x229   : > { %v13874_v39 = vmin.f32 %v2997_v26, 6.0  ;;  %v2998_v23 = vmax.f32 %v2966_v30, 0.0  ;;  %3451 = vrot.lane.b32.xlu1 %v3258_v45, %s12837_s24  ;;  %v3572_v26 = vld [vmem:[#allocation2 + $0x20] sm:$0x1] }
 0x22a   : > { %18184 = vst [vmem:[#allocation25_spill] sm:$0xff] %v13871_v63  ;;  %v12036_v38 = vpack.c.bf16 %v13871_v63, %v13871_v63  ;;  %v13880_v50 = vmin.f32 %v3000_v33, 6.0  ;;  %5724 = vrot.lane.b32.xlu0 %v3259_v62, %s12838_s28  ;;  %v3565_v33 = vld [vmem:[#allocation2 + $0x14] sm:$0x1] }
 0x22b   : > { %18185 = vst [vmem:[#allocation26_spill] sm:$0xff] %v13874_v39  ;;  %v12034_v10 = vpack.c.bf16 %v13874_v39, %v13874_v39  ;;  %v13885_v59 = vmin.f32 %v2998_v23, 6.0 }
 0x22c   : > { %18186 = vst [vmem:[#allocation27_spill] sm:$0xff] %v13880_v50  ;;  %v3295_v1 = vshrl.u32 %v12036_v38, 16  ;;  %v3298_v60 = vshll.u32 %v12036_v38, 16  ;;  %v12037_v4 = vpack.c.bf16 %v13880_v50, %v13880_v50 }
 0x22d   : > { %18187 = vst [vmem:[#allocation28_spill] sm:$0xff] %v13885_v59  ;;  %v3278_v2 = vshrl.u32 %v12034_v10, 16  ;;  %v3281_v3 = vshll.u32 %v12034_v10, 16  ;;  %5722 = vrot.lane.b32.xlu1 %v3258_v45, %s12838_s28  ;;  %v12035_v54 = vpack.c.bf16 %v13885_v59, %v13885_v59 }
 0x22e   : > { %v3297_v7 = vrot.slane %v3295_v1, 7  ;;  %5728 = vrot.lane.b32.xlu0 %v3275_v34, %s12838_s28  ;;  %v3303_v25 = vshrl.u32 %v12037_v4, 16  ;;  %v3306_v21 = vshll.u32 %v12037_v4, 16 }
 0x22f   : > { %v3280_v5 = vrot.slane %v3278_v2, 7  ;;  %v3286_v62 = vshrl.u32 %v12035_v54, 16  ;;  %v3289_v58 = vshll.u32 %v12035_v54, 16 }
 0x230   : > { %v3300_v6 = vor.u32 %v3298_v60, %v3297_v7  ;;  %v3305_v56 = vrot.slane %v3303_v25, 7  ;;  %v3301_v30 = vrot.slane %v3297_v7, 4 }
 0x231   : > { %v3283_v42 = vor.u32 %v3281_v3, %v3280_v5  ;;  %v3288_v22 = vrot.slane %v3286_v62, 7  ;;  %v3284_v45 = vrot.slane %v3280_v5, 4 }
 0x232   : > { %3467 = vrot.lane.b32.xlu1 %v3300_v6, %s12837_s24  ;;  %v3310_v27 = vrot.slane %v3305_v56, 4  ;;  %v3308_v34 = vor.u32 %v3306_v21, %v3305_v56 }
 0x233   : > { %3461 = vrot.lane.b32.xlu0 %v3283_v42, %s12837_s24  ;;  %v3420_v18 = vpop.permute.xlu1 %3419  ;;  %v3293_v28 = vrot.slane %v3288_v22, 4  ;;  %v3291_v1 = vor.u32 %v3289_v58, %v3288_v22 }
 0x234   : > { %v3569_v9 = vsel %vm13896_vm6, %v3420_v18, %v3568_v43  ;;  %v3414_v12 = vpop.permute.xlu0 %3413  ;;  %v3309_v7 = vsel %vm12999_vm9, %v3301_v30, %v3308_v34 }
 0x235   : > { %3570 = vst [vmem:[#allocation2 + $0x18] sm:$0xf] %v3569_v9  ;;  %v3559_v19 = vsel %vm13896_vm6, %v3414_v12, %v12816_v13 }
 0x236   : > { %5738 = vrot.lane.b32.xlu1 %v3300_v6, %s12838_s28  ;;  %3560 = vst [vmem:[#allocation2 + $0xc] sm:$0xf] %v3559_v19 }
 0x237   : > { %5732 = vrot.lane.b32.xlu0 %v3283_v42, %s12838_s28  ;;  %v13908_v24 = vpop.permute.xlu1 %5690  ;;  %v3292_v42 = vsel %vm12999_vm9, %v3284_v45, %v3291_v1 }
 0x238   : > { %v5685_v16 = vpop.permute.xlu0 %5684 }
 0x23a   : > { %3471 = vrot.lane.b32.xlu1 %v3310_v27, %s12837_s24 }
 0x23b   : > { %3465 = vrot.lane.b32.xlu0 %v3293_v28, %s12837_s24  ;;  %v3424_v23 = vpop.permute.xlu1 %3423 }
 0x23c   : > { %v3573_v38 = vsel %vm13911_vm10, %v3424_v23, %v3572_v26  ;;  %v3418_v10 = vpop.permute.xlu0 %3417  ;;  %v5834_v62 = vld [vmem:[#allocation2 + $0x18] sm:$0xf]  ;;  %v3582_v23 = vld [vmem:[#allocation2 + $0x30] sm:$0xf] }
 0x23d   : > { %v13919_v60 = vld [vmem:[#allocation2 + $0xc] sm:$0xf]  ;;  %3574 = vst [vmem:[#allocation2 + $0x20] sm:$0x1] %v3573_v38  ;;  %v3566_v3 = vsel %vm13911_vm10, %v3418_v10, %v3565_v33  ;;  %v13953_v34 = vld [vmem:[#allocation2 + $0x18] sm:$0xf] }
 0x23e   : > { %v13921_v2 = vld [vmem:[#allocation2 + $0xc] sm:$0xf]  ;;  %5742 = vrot.lane.b32.xlu1 %v3310_v27, %s12838_s28  ;;  %3567 = vst [vmem:[#allocation2 + $0x14] sm:$0x1] %v3566_v3  ;;  %18193 = vst [vmem:[#allocation30_spill] sm:$0xff] %v13953_v34 }
 0x23f   : > { %v5828_v4 = vsel %vm13896_vm6, %v5685_v16, %v13921_v2  ;;  %3469 = vrot.lane.b32.xlu0 %v3309_v7, %s12837_s24  ;;  %v5695_v5 = vpop.permute.xlu1 %5694  ;;  %v13932_v54 = vld [vmem:[#allocation2 + $0xc] sm:$0xe]  ;;  %v13956_v45 = vld [vmem:[#allocation2 + $0x18] sm:$0xf] }
 0x240   : > { %v3422_v6 = vpop.permute.xlu0 %3421  ;;  %5829 = vst [vmem:[#allocation2 + $0xc] sm:$0xf] %v5828_v4 }
 0x241   : > { %3571 = vst.msk [vmem:[#allocation2 + $0x1c] sm:$0xf] %vm3557_vm3, %v3422_v6 }
 0x242   : > { %3463 = vrot.lane.b32.xlu1 %v3292_v42, %s12837_s24 }
 0x243   : > { %5736 = vrot.lane.b32.xlu0 %v3293_v28, %s12838_s28  ;;  %v3416_v43 = vpop.permute.xlu1 %3415  ;;  %v12302_v25 = vpop.f32.mrb[20].mxu0 }
 0x244   : > { %v5838_v18 = vld [vmem:[#allocation2 + $0x20] sm:$0x1]  ;;  %3562 = vst.msk [vmem:[#allocation2 + $0x10] sm:$0xf] %vm3557_vm3, %v3416_v43  ;;  %v5689_v9 = vpop.permute.xlu0 %5688  ;;  %v2932_v12 = vmul.f32 %v12302_v25, %v13701_v52  ;;  %v2856_v13 = vpop.f32.mrb[21].mxu0  ;;  %v5835_v43 = vsel %vm13896_vm6, %v13908_v24, %v5834_v62 }
 0x245   : > { %v13941_v19 = vld [vmem:[#allocation2 + $0x20] sm:$0x1]  ;;  %v5839_v56 = vsel %vm13911_vm10, %v5695_v5, %v5838_v18  ;;  %v5831_v21 = vld [vmem:[#allocation2 + $0x14] sm:$0x1]  ;;  %v2930_v22 = vmul.f32 %v13701_v52, %v2856_v13  ;;  %v12303_v27 = vpop.f32.mrb[22].mxu0 }
 0x246   : > { %18192 = vst [vmem:[#allocation29_spill] sm:$0xff] %v13941_v19  ;;  %5734 = vrot.lane.b32.xlu1 %v3292_v42, %s12838_s28  ;;  %v13947_v16 = vld [vmem:[#allocation2 + $0x14] sm:$0x1]  ;;  %v13949_v28 = vld [vmem:[#allocation2 + $0x20] ss:$0 sps:$4 sm:$0x11]   ;;  %v2971_v58 = vadd.f32 %v13708_v0, %v2932_v12  ;;  %v2933_v26 = vmul.f32 %v12303_v27, %v13701_v52  ;;  %v5832_v4 = vsel %vm13911_vm10, %v5689_v9, %v5831_v21 }
 0x247   : > { %v2859_v30 = vpop.f32.mrb[23].mxu0  ;;  %5740 = vrot.lane.b32.xlu0 %v3309_v7, %s12838_s28  ;;  %v5687_v33 = vpop.permute.xlu1 %5686  ;;  %v13958_v38 = vld [vmem:[#allocation2 + $0x20] ss:$0 sps:$4 sm:$0x11]   ;;  %v2969_v10 = vadd.f32 %v13708_v0, %v2930_v22  ;;  %v13974_v18 = vld [vmem:[#allocation2 + $0x18] sm:$0xe] }
 0x248   : > { %v2931_v1 = vmul.f32 %v13701_v52, %v2859_v30  ;;  %v13962_v3 = vld [vmem:[#allocation2 + $0x1c] sm:$0xf]  ;;  %v5693_v5 = vpop.permute.xlu0 %5692  ;;  %5840 = vst [vmem:[#allocation2 + $0x20] sm:$0x1] %v5839_v56  ;;  %v3003_v7 = vmax.f32 %v2971_v58, 0.0  ;;  %v2972_v42 = vadd.f32 %v13708_v0, %v2933_v26 }
 0x249   : > { %18194 = vst [vmem:[#allocation31_spill] sm:$0xff] %v13962_v3  ;;  %v13966_v6 = vld [vmem:[#allocation2 + $0x1c] sm:$0xf]  ;;  %v3001_v12 = vmax.f32 %v2969_v10, 0.0  ;;  %v3575_v22 = vld [vmem:[#allocation2 + $0x24] sm:$0xf] }
 0x24a   : > { %v13972_v25 = vld [vmem:[#allocation2 + $0x18] sm:$0xff]   ;;  %v2970_v13 = vadd.f32 %v13708_v0, %v2931_v1  ;;  %v13978_v9 = vld [vmem:[#allocation2 + $0x14] ss:$0 sps:$4 sm:$0x11]   ;;  %v13980_v56 = vmin.f32 %v3003_v7, 6.0  ;;  %v3004_v21 = vmax.f32 %v2972_v42, 0.0 }
 0x24b   : > { %5837 = vst.msk [vmem:[#allocation2 + $0x1c] sm:$0xf] %vm3557_vm3, %v5693_v5  ;;  %5836 = vst [vmem:[#allocation2 + $0x18] sm:$0xf] %v5835_v43  ;;  %v3432_v27 = vpop.permute.xlu1 %3431  ;;  %v13982_v58 = vld [vmem:[#allocation2 + $0x10] sm:$0xf] }
 0x24c   : > { %18195 = vst [vmem:[#allocation32_spill] sm:$0xff] %v13980_v56  ;;  %5833 = vst [vmem:[#allocation2 + $0x14] sm:$0x1] %v5832_v4  ;;  %v13984_v24 = vld [vmem:[#allocation2 + $0x10] sm:$0xf]  ;;  %v13986_v62 = vmin.f32 %v3001_v12, 6.0  ;;  %v3583_v30 = vsel %vm13896_vm6, %v3432_v27, %v3582_v23  ;;  %v3426_v10 = vpop.permute.xlu0 %3425  ;;  %v12040_v5 = vpack.c.bf16 %v13980_v56, %v13980_v56 }
 0x24d   : > { %v3002_v26 = vmax.f32 %v2970_v13, 0.0  ;;  %5830 = vst.msk [vmem:[#allocation2 + $0x10] sm:$0xf] %vm3557_vm3, %v5687_v33  ;;  %v13991_v1 = vmin.f32 %v3004_v21, 6.0  ;;  %3584 = vst [vmem:[#allocation2 + $0x30] sm:$0xf] %v3583_v30  ;;  %v3576_v4 = vsel %vm13896_vm6, %v3426_v10, %v3575_v22 }
 0x24e   : > { %18196 = vst [vmem:[#allocation33_spill] sm:$0xff] %v13986_v62  ;;  %v12038_v42 = vpack.c.bf16 %v13986_v62, %v13986_v62  ;;  %3577 = vst [vmem:[#allocation2 + $0x24] sm:$0xf] %v3576_v4  ;;  %v3329_v43 = vshrl.u32 %v12040_v5, 16  ;;  %v3332_v23 = vshll.u32 %v12040_v5, 16 }
 0x24f   : > { %18197 = vst [vmem:[#allocation34_spill] sm:$0xff] %v13991_v1  ;;  %v13997_v7 = vmin.f32 %v3002_v26, 6.0  ;;  %v14001_v12 = vpop.permute.xlu1 %5702  ;;  %v12041_v27 = vpack.c.bf16 %v13991_v1, %v13991_v1  ;;  %v3579_v10 = vld [vmem:[#allocation2 + $0x2c] sm:$0x1] }
 0x250   : > { %v3312_v33 = vshrl.u32 %v12038_v42, 16  ;;  %v3315_v13 = vshll.u32 %v12038_v42, 16  ;;  %v14003_v21 = vpop.permute.xlu0 %5696  ;;  %v3331_v30 = vrot.slane %v3329_v43, 7 }
 0x251   : > { %18198 = vst [vmem:[#allocation35_spill] sm:$0xff] %v13997_v7  ;;  %v12039_v22 = vpack.c.bf16 %v13997_v7, %v13997_v7  ;;  %v3337_v42 = vshrl.u32 %v12041_v27, 16 }
 0x252   : > { %v3314_v26 = vrot.slane %v3312_v33, 7  ;;  %v3334_v29 = vor.u32 %v3332_v23, %v3331_v30 }
 0x253   : > { %v3436_v4 = vpop.permute.xlu1 %3435  ;;  %v3320_v17 = vshrl.u32 %v12039_v22, 16  ;;  %v3339_v23 = vrot.slane %v3337_v42, 7  ;;  %v3323_v32 = vshll.u32 %v12039_v22, 16 }
 0x254   : > { %v3317_v51 = vor.u32 %v3315_v13, %v3314_v26  ;;  %v3587_v5 = vsel %vm13911_vm10, %v3436_v4, %v3586_v36  ;;  %v3430_v41 = vpop.permute.xlu0 %3429  ;;  %3479 = vrot.lane.b32.xlu1 %v3334_v29, %s12837_s24  ;;  %v3340_v13 = vshll.u32 %v12041_v27, 16  ;;  %v3318_v22 = vrot.slane %v3314_v26, 4  ;;  %v14066_v62 = vld [vmem:[#allocation2 + $0x30] sm:$0xf] }
 0x255   : > { %3588 = vst [vmem:[#allocation2 + $0x38] sm:$0x1] %v3587_v5  ;;  %v3580_v43 = vsel %vm13911_vm10, %v3430_v41, %v3579_v10  ;;  %v3322_v36 = vrot.slane %v3320_v17, 7  ;;  %v3344_v4 = vrot.slane %v3339_v23, 4  ;;  %18203 = vst [vmem:[#allocation40_spill] sm:$0xff] %v14066_v62 }
 0x256   : > { %3473 = vrot.lane.b32.xlu0 %v3317_v51, %s12837_s24  ;;  %3581 = vst [vmem:[#allocation2 + $0x2c] sm:$0x1] %v3580_v43  ;;  %v3335_v43 = vrot.slane %v3331_v30, 4  ;;  %v3342_v46 = vor.u32 %v3340_v13, %v3339_v23  ;;  %v14075_v50 = vld [vmem:[#allocation2 + $0x30] sm:$0xf] }
 0x257   : > { %v5707_v33 = vpop.permute.xlu1 %5706  ;;  %v3327_v37 = vrot.slane %v3322_v36, 4 }
 0x258   : > { %v3434_v40 = vpop.permute.xlu0 %3433  ;;  %5750 = vrot.lane.b32.xlu1 %v3334_v29, %s12838_s28 }
 0x259   : > { %3585 = vst.msk [vmem:[#allocation2 + $0x34] sm:$0xf] %vm3557_vm3, %v3434_v40 }
 0x25a   : > { %5744 = vrot.lane.b32.xlu0 %v3317_v51, %s12838_s28 }
 0x25b   : > { %v3428_v5 = vpop.permute.xlu1 %3427 }
 0x25c   : > { %v5852_v41 = vld [vmem:[#allocation2 + $0x38] sm:$0x1]  ;;  %3578 = vst.msk [vmem:[#allocation2 + $0x28] sm:$0xf] %vm3557_vm3, %v3428_v5  ;;  %v5701_v10 = vpop.permute.xlu0 %5700  ;;  %3483 = vrot.lane.b32.xlu1 %v3344_v4, %s12837_s24  ;;  %v3325_v5 = vor.u32 %v3323_v32, %v3322_v36 }
 0x25d   : > { %v14020_v29 = vld [vmem:[#allocation2 + $0x38] sm:$0x1]  ;;  %v5853_v40 = vsel %vm13911_vm10, %v5707_v33, %v5852_v41  ;;  %v5845_v27 = vld [vmem:[#allocation2 + $0x2c] sm:$0x1]  ;;  %v3343_v33 = vsel %vm12999_vm9, %v3335_v43, %v3342_v46 }
 0x25e   : > { %18199 = vst [vmem:[#allocation36_spill] sm:$0xff] %v14020_v29  ;;  %3477 = vrot.lane.b32.xlu0 %v3327_v37, %s12837_s24  ;;  %v14025_v17 = vld [vmem:[#allocation2 + $0x2c] sm:$0x1]  ;;  %v14027_v51 = vld [vmem:[#allocation2 + $0x38] ss:$0 sps:$4 sm:$0x11]   ;;  %v5846_v30 = vsel %vm13911_vm10, %v5701_v10, %v5845_v27 }
 0x25f   : > { %18200 = vst [vmem:[#allocation37_spill] sm:$0xff] %v14025_v17  ;;  %v14029_v42 = vld [vmem:[#allocation2 + $0x38] ss:$0 sps:$4 sm:$0x11]   ;;  %v3603_v17 = vld [vmem:[#allocation2 + $0x54] sm:$0xf] }
 0x260   : > { %v14031_v1 = vld [vmem:[#allocation2 + $0x34] sm:$0xf]  ;;  %v5705_v23 = vpop.permute.xlu0 %5704  ;;  %5854 = vst [vmem:[#allocation2 + $0x38] sm:$0x1] %v5853_v40  ;;  %5754 = vrot.lane.b32.xlu1 %v3344_v4, %s12838_s28  ;;  %v3326_v4 = vsel %vm12999_vm9, %v3318_v22, %v3325_v5  ;;  %v5699_v40 = vpop.permute.xlu1 %5698 }
 0x261   : > { %18201 = vst [vmem:[#allocation38_spill] sm:$0xff] %v14031_v1  ;;  %v14035_v13 = vld [vmem:[#allocation2 + $0x34] sm:$0xf]  ;;  %v14042_v26 = vld [vmem:[#allocation2 + $0x2c] ss:$0 sps:$4 sm:$0x11]  }
 0x262   : > { %v14040_v41 = vld [vmem:[#allocation2 + $0x30] sm:$0xff]   ;;  %3481 = vrot.lane.b32.xlu0 %v3343_v33, %s12837_s24  ;;  %v14046_v32 = vld [vmem:[#allocation2 + $0x2c] ss:$0 sps:$4 sm:$0x11]  }
 0x263   : > { %5851 = vst.msk [vmem:[#allocation2 + $0x34] sm:$0xf] %vm3557_vm3, %v5705_v23  ;;  %v14048_v36 = vld [vmem:[#allocation2 + $0x28] sm:$0xf]  ;;  %5847 = vst [vmem:[#allocation2 + $0x2c] sm:$0x1] %v5846_v30 }
 0x264   : > { %18202 = vst [vmem:[#allocation39_spill] sm:$0xff] %v14048_v36  ;;  %v14050_v10 = vld [vmem:[#allocation2 + $0x28] sm:$0xf]  ;;  %3475 = vrot.lane.b32.xlu1 %v3326_v4, %s12837_s24  ;;  %v5848_v30 = vld [vmem:[#allocation2 + $0x30] sm:$0xf] }
 0x265   : > { %v14054_v46 = vld [vmem:[#allocation2 + $0x24] sm:$0xff]   ;;  %v12306_v43 = vpop.f32.mrb[24].mxu0 }
 0x266   : > { %5844 = vst.msk [vmem:[#allocation2 + $0x28] sm:$0xf] %vm3557_vm3, %v5699_v40  ;;  %5748 = vrot.lane.b32.xlu0 %v3327_v37, %s12838_s28  ;;  %v2936_v27 = vmul.f32 %v12306_v43, %v13701_v52  ;;  %v2872_v23 = vpop.f32.mrb[25].mxu0 }
 0x267   : > { %v2934_v14 = vmul.f32 %v13701_v52, %v2872_v23  ;;  %v12307_v56 = vpop.f32.mrb[26].mxu0 }
 0x268   : > { %v2975_v22 = vadd.f32 %v13708_v0, %v2936_v27  ;;  %v2937_v5 = vmul.f32 %v12307_v56, %v13701_v52  ;;  %v2875_v7 = vpop.f32.mrb[27].mxu0  ;;  %5746 = vrot.lane.b32.xlu1 %v3326_v4, %s12838_s28  ;;  %v5849_v56 = vsel %vm13896_vm6, %v14001_v12, %v5848_v30 }
 0x269   : > { %v2973_v40 = vadd.f32 %v13708_v0, %v2934_v14  ;;  %v2935_v37 = vmul.f32 %v13701_v52, %v2875_v7  ;;  %v3444_v43 = vpop.permute.xlu1 %3443  ;;  %v14077_v14 = vld [vmem:[#allocation2 + $0x30] sm:$0xe] }
 0x26a   : > { %5752 = vrot.lane.b32.xlu0 %v3343_v33, %s12838_s28  ;;  %v3007_v23 = vmax.f32 %v2975_v22, 0.0  ;;  %v2976_v53 = vadd.f32 %v13708_v0, %v2937_v5  ;;  %v3597_v4 = vsel %vm13896_vm6, %v3444_v43, %v3596_v8  ;;  %v3438_v27 = vpop.permute.xlu0 %3437  ;;  %v5841_v33 = vld [vmem:[#allocation2 + $0x24] sm:$0xf]  ;;  %5850 = vst [vmem:[#allocation2 + $0x30] sm:$0xf] %v5849_v56 }
 0x26b   : > { %v3005_v52 = vmax.f32 %v2973_v40, 0.0  ;;  %v2974_v7 = vadd.f32 %v13708_v0, %v2935_v37  ;;  %3598 = vst [vmem:[#allocation2 + $0x48] sm:$0xf] %v3597_v4  ;;  %v3590_v22 = vsel %vm13896_vm6, %v3438_v27, %v3589_v35  ;;  %v14086_v43 = vld [vmem:[#allocation2 + $0x24] sm:$0xf]  ;;  %v5842_v0 = vsel %vm13896_vm6, %v14003_v21, %v5841_v33 }
 0x26c   : > { %v14082_v5 = vmin.f32 %v3007_v23, 6.0  ;;  %v3008_v12 = vmax.f32 %v2976_v53, 0.0  ;;  %3591 = vst [vmem:[#allocation2 + $0x3c] sm:$0xf] %v3590_v22  ;;  %18206 = vst [vmem:[#allocation43_spill] sm:$0xff] %v14086_v43 }
 0x26d   : > { %v14084_v30 = vmin.f32 %v3005_v52, 6.0  ;;  %v3006_v8 = vmax.f32 %v2974_v7, 0.0  ;;  %v14088_v55 = vpop.permute.xlu1 %5714  ;;  %v14099_v53 = vld [vmem:[#allocation2 + $0x24] sm:$0xf]  ;;  %v3600_v27 = vld [vmem:[#allocation2 + $0x50] sm:$0x1] }
 0x26e   : > { %18204 = vst [vmem:[#allocation41_spill] sm:$0xff] %v14082_v5  ;;  %v14090_v40 = vmin.f32 %v3008_v12, 6.0  ;;  %v12044_v35 = vpack.c.bf16 %v14082_v5, %v14082_v5  ;;  %v14097_v37 = vpop.permute.xlu0 %5708  ;;  %v14101_v23 = vld [vmem:[#allocation2 + $0x24] sm:$0xe]  ;;  %v3593_v22 = vld [vmem:[#allocation2 + $0x44] sm:$0x1] }
 0x26f   : > { %18205 = vst [vmem:[#allocation42_spill] sm:$0xff] %v14084_v30  ;;  %v14103_v56 = vmin.f32 %v3006_v8, 6.0  ;;  %v12042_v4 = vpack.c.bf16 %v14084_v30, %v14084_v30  ;;  %5843 = vst [vmem:[#allocation2 + $0x24] sm:$0xf] %v5842_v0 }
 0x270   : > { %18207 = vst [vmem:[#allocation44_spill] sm:$0xff] %v14090_v40  ;;  %v3363_v52 = vshrl.u32 %v12044_v35, 16  ;;  %v3366_v7 = vshll.u32 %v12044_v35, 16  ;;  %v12045_v5 = vpack.c.bf16 %v14090_v40, %v14090_v40 }
 0x271   : > { %18208 = vst [vmem:[#allocation45_spill] sm:$0xff] %v14103_v56  ;;  %v3346_v21 = vshrl.u32 %v12042_v4, 16  ;;  %v3349_v33 = vshll.u32 %v12042_v4, 16  ;;  %v3448_v12 = vpop.permute.xlu1 %3447  ;;  %v12043_v59 = vpack.c.bf16 %v14103_v56, %v14103_v56 }
 0x272   : > { %v3365_v63 = vrot.slane %v3363_v52, 7  ;;  %v3601_v57 = vsel %vm13911_vm10, %v3448_v12, %v3600_v27  ;;  %v3442_v8 = vpop.permute.xlu0 %3441  ;;  %v3371_v40 = vshrl.u32 %v12045_v5, 16  ;;  %v14203_v34 = vld [vmem:[#allocation2 + $0x48] sm:$0xf] }
 0x273   : > { %v3348_v30 = vrot.slane %v3346_v21, 7  ;;  %3602 = vst [vmem:[#allocation2 + $0x50] sm:$0x1] %v3601_v57  ;;  %v3594_v0 = vsel %vm13911_vm10, %v3442_v8, %v3593_v22  ;;  %v3354_v27 = vshrl.u32 %v12043_v59, 16  ;;  %v3374_v21 = vshll.u32 %v12045_v5, 16  ;;  %18217 = vst [vmem:[#allocation54_spill] sm:$0xff] %v14203_v34 }
 0x274   : > { %v3368_v35 = vor.u32 %v3366_v7, %v3365_v63  ;;  %3595 = vst [vmem:[#allocation2 + $0x44] sm:$0x1] %v3594_v0  ;;  %v3373_v57 = vrot.slane %v3371_v40, 7  ;;  %v3369_v56 = vrot.slane %v3365_v63, 4  ;;  %v3357_v39 = vshll.u32 %v12043_v59, 16 }
 0x275   : > { %v3351_v4 = vor.u32 %v3349_v33, %v3348_v30  ;;  %v5719_v49 = vpop.permute.xlu1 %5718  ;;  %v3356_v22 = vrot.slane %v3354_v27, 7  ;;  %v3352_v59 = vrot.slane %v3348_v30, 4  ;;  %v5855_v15 = vld [vmem:[#allocation2 + $0x3c] sm:$0xf] }
 0x276   : > { %3491 = vrot.lane.b32.xlu1 %v3368_v35, %s12837_s24  ;;  %v3446_v52 = vpop.permute.xlu0 %3445  ;;  %v3378_v8 = vrot.slane %v3373_v57, 4  ;;  %v14221_v34 = vld [vmem:[#allocation2 + $0x3c] sm:$0xe] }
 0x277   : > { %3485 = vrot.lane.b32.xlu0 %v3351_v4, %s12837_s24  ;;  %3599 = vst.msk [vmem:[#allocation2 + $0x4c] sm:$0xf] %vm3557_vm3, %v3446_v52  ;;  %v3361_v0 = vrot.slane %v3356_v22, 4  ;;  %v3376_v52 = vor.u32 %v3374_v21, %v3373_v57 }
 0x279   : > { %v3440_v12 = vpop.permute.xlu1 %3439 }
 0x27a   : > { %5762 = vrot.lane.b32.xlu1 %v3368_v35, %s12838_s28  ;;  %3592 = vst.msk [vmem:[#allocation2 + $0x40] sm:$0xf] %vm3557_vm3, %v3440_v12  ;;  %v5713_v7 = vpop.permute.xlu0 %5712  ;;  %v5866_v33 = vld [vmem:[#allocation2 + $0x50] sm:$0x1]  ;;  %v3359_v12 = vor.u32 %v3357_v39, %v3356_v22 }
 0x27b   : > { %5756 = vrot.lane.b32.xlu0 %v3351_v4, %s12838_s28  ;;  %v14121_v47 = vld [vmem:[#allocation2 + $0x50] ss:$0 sps:$4 sm:$0x11]   ;;  %v5867_v5 = vsel %vm13911_vm10, %v5719_v49, %v5866_v33  ;;  %v5859_v57 = vld [vmem:[#allocation2 + $0x44] sm:$0x1]  ;;  %v3377_v49 = vsel %vm12999_vm9, %v3369_v56, %v3376_v52 }
 0x27c   : > { %v14124_v61 = vld [vmem:[#allocation2 + $0x50] sm:$0x1]  ;;  %v12817_v33 = vld [vmem:[%s18058_s2] ss:$0 sm:$0xff]  ;;  %v14145_v30 = vld [vmem:[#allocation2 + $0x44] sm:$0x1]  ;;  %v5860_v22 = vsel %vm13911_vm10, %v5713_v7, %v5859_v57 }
 0x27d   : > { %18209 = vst [vmem:[#allocation46_spill] sm:$0xff] %v14124_v61  ;;  %v14135_v63 = vld [vmem:[#allocation2 + $0x50] ss:$0 sps:$4 sm:$0x11]   ;;  %18211 = vst [vmem:[#allocation48_spill] sm:$0xff] %v14145_v30  ;;  %v5711_v1 = vpop.permute.xlu1 %5710 }
 0x27e   : > { %3495 = vrot.lane.b32.xlu1 %v3378_v8, %s12837_s24  ;;  %v14128_v40 = vld [vmem:[#allocation2 + $0x4c] sm:$0xf]  ;;  %v5717_v35 = vpop.permute.xlu0 %5716  ;;  %5868 = vst [vmem:[#allocation2 + $0x50] sm:$0x1] %v5867_v5  ;;  %v12818_v56 = vld [vmem:[%s18059_s3] ss:$0 sm:$0xff] }
 0x27f   : > { %18210 = vst [vmem:[#allocation47_spill] sm:$0xff] %v14128_v40  ;;  %v14130_v4 = vld [vmem:[#allocation2 + $0x4c] sm:$0xf]  ;;  %3489 = vrot.lane.b32.xlu0 %v3361_v0, %s12837_s24  ;;  %v14158_v29 = vld [vmem:[#allocation2 + $0x44] ss:$0 sps:$4 sm:$0x11]  }
 0x280   : > { %v14133_v27 = vld [vmem:[#allocation2 + $0x48] sm:$0xff]   ;;  %v14161_v7 = vld [vmem:[#allocation2 + $0x44] ss:$0 sps:$4 sm:$0x11]  }
 0x281   : > { %5865 = vst.msk [vmem:[#allocation2 + $0x4c] sm:$0xf] %vm3557_vm3, %v5717_v35  ;;  %v14147_v39 = vld [vmem:[#allocation2 + $0x40] sm:$0xf]  ;;  %5861 = vst [vmem:[#allocation2 + $0x44] sm:$0x1] %v5860_v22 }
 0x282   : > { %v12310_v21 = vpop.f32.mrb[28].mxu0  ;;  %5766 = vrot.lane.b32.xlu1 %v3378_v8, %s12838_s28  ;;  %18212 = vst [vmem:[#allocation49_spill] sm:$0xff] %v14147_v39  ;;  %v14151_v8 = vld [vmem:[#allocation2 + $0x3c] sm:$0xff]  }
 0x283   : > { %v2940_v40 = vmul.f32 %v12817_v33, %v12310_v21  ;;  %v2888_v61 = vpop.f32.mrb[29].mxu0  ;;  %3493 = vrot.lane.b32.xlu0 %v3377_v49, %s12837_s24  ;;  %v14163_v57 = vld [vmem:[#allocation2 + $0x40] sm:$0xf] }
 0x284   : > { %v2938_v62 = vmul.f32 %v12817_v33, %v2888_v61  ;;  %v12311_v35 = vpop.f32.mrb[30].mxu0  ;;  %v3360_v61 = vsel %vm12999_vm9, %v3352_v59, %v3359_v12  ;;  %5858 = vst.msk [vmem:[#allocation2 + $0x40] sm:$0xf] %vm3557_vm3, %v5711_v1 }
 0x285   : > { %v2979_v52 = vadd.f32 %v12818_v56, %v2940_v40  ;;  %v2941_v5 = vmul.f32 %v12817_v33, %v12311_v35  ;;  %v2891_v21 = vpop.f32.mrb[31].mxu0 }
 0x286   : > { %v2977_v30 = vadd.f32 %v12818_v56, %v2938_v62  ;;  %v2939_v39 = vmul.f32 %v12817_v33, %v2891_v21  ;;  %3487 = vrot.lane.b32.xlu1 %v3360_v61, %s12837_s24  ;;  %v3610_v62 = vld [vmem:[#allocation2 + $0x60] sm:$0xf] }
 0x287   : > { %v3011_v43 = vmax.f32 %v2979_v52, 0.0  ;;  %v2980_v36 = vadd.f32 %v12818_v56, %v2941_v5  ;;  %5760 = vrot.lane.b32.xlu0 %v3361_v0, %s12838_s28 }
 0x288   : > { %v3009_v40 = vmax.f32 %v2977_v30, 0.0  ;;  %v2978_v59 = vadd.f32 %v12818_v56, %v2939_v39 }
 0x289   : > { %v14167_v12 = vmin.f32 %v3011_v43, 6.0  ;;  %v3012_v35 = vmax.f32 %v2980_v36, 0.0 }
 0x28a   : > { %v14169_v33 = vmin.f32 %v3009_v40, 6.0  ;;  %v3010_v21 = vmax.f32 %v2978_v59, 0.0  ;;  %5758 = vrot.lane.b32.xlu1 %v3360_v61, %s12838_s28 }
 0x28b   : > { %18213 = vst [vmem:[#allocation50_spill] sm:$0xff] %v14167_v12  ;;  %v12048_v52 = vpack.c.bf16 %v14167_v12, %v14167_v12  ;;  %v14174_v5 = vmin.f32 %v3012_v35, 6.0  ;;  %5764 = vrot.lane.b32.xlu0 %v3377_v49, %s12838_s28  ;;  %v3456_v1 = vpop.permute.xlu1 %3455 }
 0x28c   : > { %18214 = vst [vmem:[#allocation51_spill] sm:$0xff] %v14169_v33  ;;  %v12046_v43 = vpack.c.bf16 %v14169_v33, %v14169_v33  ;;  %v14179_v0 = vmin.f32 %v3010_v21, 6.0  ;;  %v3611_v36 = vsel %vm13896_vm6, %v3456_v1, %v3610_v62  ;;  %v3450_v30 = vpop.permute.xlu0 %3449  ;;  %v3607_v33 = vld [vmem:[#allocation2 + $0x5c] sm:$0x1] }
 0x28d   : > { %18215 = vst [vmem:[#allocation52_spill] sm:$0xff] %v14174_v5  ;;  %v3397_v39 = vshrl.u32 %v12048_v52, 16  ;;  %v3400_v22 = vshll.u32 %v12048_v52, 16  ;;  %3612 = vst [vmem:[#allocation2 + $0x60] sm:$0xf] %v3611_v36  ;;  %v3604_v56 = vsel %vm13896_vm6, %v3450_v30, %v3603_v17  ;;  %v12049_v49 = vpack.c.bf16 %v14174_v5, %v14174_v5 }
 0x28e   : > { %18216 = vst [vmem:[#allocation53_spill] sm:$0xff] %v14179_v0  ;;  %v3380_v61 = vshrl.u32 %v12046_v43, 16  ;;  %v3383_v40 = vshll.u32 %v12046_v43, 16  ;;  %3605 = vst [vmem:[#allocation2 + $0x54] sm:$0xf] %v3604_v56  ;;  %v12047_v21 = vpack.c.bf16 %v14179_v0, %v14179_v0 }
 0x28f   : > { %v3399_v59 = vrot.slane %v3397_v39, 7  ;;  %v14187_v35 = vpop.permute.xlu1 %5726  ;;  %v3614_v36 = vld [vmem:[#allocation2 + $0x68] sm:$0x1]  ;;  %v3405_v17 = vshrl.u32 %v12049_v49, 16  ;;  %v3408_v5 = vshll.u32 %v12049_v49, 16 }
 0x290   : > { %v3382_v62 = vrot.slane %v3380_v61, 7  ;;  %v14191_v1 = vpop.permute.xlu0 %5720  ;;  %v3388_v30 = vshrl.u32 %v12047_v21, 16  ;;  %v3391_v49 = vshll.u32 %v12047_v21, 16 }
 0x291   : > { %v3402_v52 = vor.u32 %v3400_v22, %v3399_v59  ;;  %v5862_v22 = vld [vmem:[#allocation2 + $0x48] sm:$0xf] }
 0x292   : > { %v3385_v12 = vor.u32 %v3383_v40, %v3382_v62  ;;  %v3407_v40 = vrot.slane %v3405_v17, 7  ;;  %v3390_v11 = vrot.slane %v3388_v30, 7  ;;  %v14211_v17 = vld [vmem:[#allocation2 + $0x48] sm:$0xf]  ;;  %v3403_v30 = vrot.slane %v3399_v59, 4 }
 0x293   : > { %3503 = vrot.lane.b32.xlu1 %v3402_v52, %s12837_s24  ;;  %v3460_v43 = vpop.permute.xlu1 %3459  ;;  %v3386_v21 = vrot.slane %v3382_v62, 4  ;;  %v3624_v59 = vld [vmem:[#allocation2 + $0x78] sm:$0xf] }
 0x294   : > { %3497 = vrot.lane.b32.xlu0 %v3385_v12, %s12837_s24  ;;  %v3615_v39 = vsel %vm13911_vm10, %v3460_v43, %v3614_v36  ;;  %v3454_v56 = vpop.permute.xlu0 %3453  ;;  %v14205_v36 = vld [vmem:[#allocation2 + $0x3c] sm:$0xf]  ;;  %v3412_v43 = vrot.slane %v3407_v40, 4 }
 0x295   : > { %3616 = vst [vmem:[#allocation2 + $0x68] sm:$0x1] %v3615_v39  ;;  %v3608_v61 = vsel %vm13911_vm10, %v3454_v56, %v3607_v33  ;;  %18218 = vst [vmem:[#allocation55_spill] sm:$0xff] %v14205_v36  ;;  %v5863_v33 = vsel %vm13896_vm6, %v14088_v55, %v5862_v22  ;;  %v14213_v39 = vld [vmem:[#allocation2 + $0x48] sm:$0xe]  ;;  %v3410_v56 = vor.u32 %v3408_v5, %v3407_v40 }
 0x296   : > { %3609 = vst [vmem:[#allocation2 + $0x5c] sm:$0x1] %v3608_v61  ;;  %5864 = vst [vmem:[#allocation2 + $0x48] sm:$0xf] %v5863_v33  ;;  %v3393_v22 = vor.u32 %v3391_v49, %v3390_v11  ;;  %v3617_v33 = vld [vmem:[#allocation2 + $0x6c] sm:$0xf] }
 0x297   : > { %5774 = vrot.lane.b32.xlu1 %v3402_v52, %s12838_s28  ;;  %v14200_v0 = vpop.permute.xlu1 %5730  ;;  %v3395_v52 = vrot.slane %v3390_v11, 4 }
 0x298   : > { %5768 = vrot.lane.b32.xlu0 %v3385_v12, %s12838_s28  ;;  %v3458_v48 = vpop.permute.xlu0 %3457  ;;  %v5856_v12 = vsel %vm13896_vm6, %v14097_v37, %v5855_v15  ;;  %v3411_v15 = vsel %vm12999_vm9, %v3403_v30, %v3410_v56  ;;  %v3394_v40 = vsel %vm12999_vm9, %v3386_v21, %v3393_v22 }
 0x299   : > { %3613 = vst.msk [vmem:[#allocation2 + $0x64] sm:$0xf] %vm3557_vm3, %v3458_v48  ;;  %v14219_v48 = vld [vmem:[#allocation2 + $0x3c] sm:$0xf] }
 0x29a   : > { %5857 = vst [vmem:[#allocation2 + $0x3c] sm:$0xf] %v5856_v12 }
 0x29b   : > { %3507 = vrot.lane.b32.xlu1 %v3412_v43, %s12837_s24  ;;  %v3452_v61 = vpop.permute.xlu1 %3451 }
 0x29c   : > { %3501 = vrot.lane.b32.xlu0 %v3395_v52, %s12837_s24  ;;  %3606 = vst.msk [vmem:[#allocation2 + $0x58] sm:$0xf] %vm3557_vm3, %v3452_v61  ;;  %v5725_v55 = vpop.permute.xlu0 %5724 }
 0x29d   : > { %v5873_v61 = vld [vmem:[#allocation2 + $0x5c] sm:$0x1] }
 0x29e   : > { %v14241_v56 = vld [vmem:[#allocation2 + $0x5c] sm:$0x1]  ;;  %v5874_v21 = vsel %vm13911_vm10, %v5725_v55, %v5873_v61  ;;  %v3628_v55 = vld [vmem:[#allocation2 + $0x80] sm:$0x1]  ;;  %v3621_v61 = vld [vmem:[#allocation2 + $0x74] sm:$0x1] }
 0x29f   : > { %5778 = vrot.lane.b32.xlu1 %v3412_v43, %s12838_s28  ;;  %v5723_v37 = vpop.permute.xlu1 %5722  ;;  %18219 = vst [vmem:[#allocation56_spill] sm:$0xff] %v14241_v56  ;;  %v14245_v22 = vld [vmem:[#allocation2 + $0x5c] ss:$0 sps:$4 sm:$0x11]   ;;  %v4400_v56 = vshll.u32 %v13949_v28, 16 }
 0x2a0   : > { %3505 = vrot.lane.b32.xlu0 %v3411_v15, %s12837_s24  ;;  %v5729_v5 = vpop.permute.xlu0 %5728  ;;  %v14237_v49 = vld [vmem:[#allocation2 + $0x64] sm:$0xf] }
 0x2a1   : > { %v14239_v30 = vld [vmem:[#allocation2 + $0x60] sm:$0xff]  }
 0x2a3   : > { %3499 = vrot.lane.b32.xlu1 %v3394_v40, %s12837_s24 }
 0x2a4   : > { %v3468_v12 = vpop.permute.xlu1 %3467  ;;  %5772 = vrot.lane.b32.xlu0 %v3395_v52, %s12838_s28 }
 0x2a5   : > { %v3625_v11 = vsel %vm13896_vm6, %v3468_v12, %v3624_v59  ;;  %v3462_v62 = vpop.permute.xlu0 %3461  ;;  %v14250_v59 = vld [vmem:[#allocation2 + $0x60] sm:$0xff]  }
 0x2a6   : > { %3626 = vst [vmem:[#allocation2 + $0x78] sm:$0xf] %v3625_v11  ;;  %v3618_v43 = vsel %vm13896_vm6, %v3462_v62, %v3617_v33  ;;  %18220 = vst [vmem:[#allocation57_spill] sm:$0xff] %v14250_v59  ;;  %v14253_v33 = vld [vmem:[#allocation2 + $0x58] sm:$0xf] }
 0x2a7   : > { %3619 = vst [vmem:[#allocation2 + $0x6c] sm:$0xf] %v3618_v43  ;;  %5770 = vrot.lane.b32.xlu1 %v3394_v40, %s12838_s28  ;;  %18221 = vst [vmem:[#allocation58_spill] sm:$0xff] %v14253_v33  ;;  %v14257_v11 = vld [vmem:[#allocation2 + $0x5c] ss:$0 sps:$4 sm:$0x11]   ;;  %v11580_v40 = vcombine.low %v13956_v45, %v13966_v6  ;;  %v11579_v45 = vcombine.low %v13921_v2, %v13984_v24 }
 0x2a8   : > { %v14248_v52 = vpop.permute.xlu1 %5738  ;;  %5776 = vrot.lane.b32.xlu0 %v3411_v15, %s12838_s28  ;;  %18222 = vst [vmem:[#allocation59_spill] sm:$0xff] %v14257_v11  ;;  %v14259_v62 = vld [vmem:[#allocation2 + $0x54] sm:$0xff]   ;;  %5879 = vst.msk [vmem:[#allocation2 + $0x64] sm:$0xf] %vm3557_vm3, %v5729_v5  ;;  %v5988_v11 = vld [vmem:[#allocation2 + $0xc] sm:$0xe] }
 0x2a9   : > { %v14255_v12 = vpop.permute.xlu0 %5732  ;;  %18223 = vst [vmem:[#allocation60_spill] sm:$0xff] %v14259_v62  ;;  %5875 = vst [vmem:[#allocation2 + $0x5c] sm:$0x1] %v5874_v21  ;;  %v14264_v43 = vld [vmem:[#allocation2 + $0x58] sm:$0xf]  ;;  %v4049_v59 = vshrl.u32 %v11580_v40, 16 }
 0x2aa   : > { %5872 = vst.msk [vmem:[#allocation2 + $0x58] sm:$0xf] %vm3557_vm3, %v5723_v37  ;;  %v11612_v37 = vcombine.low %v13974_v18, %v13966_v6  ;;  %v4404_v6 = vshrl.u32 %v13949_v28, 16 }
 0x2ab   : > { %4271 = vrot.lane.b32.xlu1 %v13949_v28, %s12834_s15 }
 0x2ac   : > { %v3472_v15 = vpop.permute.xlu1 %3471  ;;  %4269 = vrot.lane.b32.xlu0 %v11580_v40, %s12834_s15  ;;  %v4395_v2 = vshll.u32 %v11612_v37, 16 }
 0x2ad   : > { %v3629_v20 = vsel %vm13911_vm10, %v3472_v15, %v3628_v55  ;;  %v3466_v5 = vpop.permute.xlu0 %3465 }
 0x2ae   : > { %3630 = vst [vmem:[#allocation2 + $0x80] sm:$0x1] %v3629_v20  ;;  %v3622_v21 = vsel %vm13911_vm10, %v3466_v5, %v3621_v61  ;;  %v4051_v20 = vrot.slane %v4049_v59, 7  ;;  %v4042_v61 = vshrl.u32 %v11579_v45, 16  ;;  %v11611_v59 = vcombine.low %v13932_v54, %v13984_v24  ;;  %v14300_v24 = vld [vmem:[#allocation2 + $0x60] sm:$0xf] }
 0x2af   : > { %3623 = vst [vmem:[#allocation2 + $0x74] sm:$0x1] %v3622_v21  ;;  %4796 = vrot.lane.b32.xlu1 %v13958_v38, %s12833_s14  ;;  %v4052_v38 = vshll.u32 %v11580_v40, 16  ;;  %v5876_v21 = vld [vmem:[#allocation2 + $0x60] sm:$0xf]  ;;  %v4390_v40 = vshrl.u32 %v13978_v9, 16 }
 0x2b0   : > { %v5743_v33 = vpop.permute.xlu1 %5742  ;;  %4794 = vrot.lane.b32.xlu0 %v13972_v25, %s12833_s14  ;;  %v4044_v5 = vrot.slane %v4042_v61, 7  ;;  %v4397_v25 = vrot.slane %v4395_v2, 1  ;;  %v5877_v61 = vsel %vm13896_vm6, %v14187_v35, %v5876_v21  ;;  %v4402_v35 = vrot.slane %v4400_v56, 1 }
 0x2b1   : > { %v3470_v55 = vpop.permute.xlu0 %3469  ;;  %v4054_v18 = vor.u32 %v4052_v38, %v4051_v20  ;;  %v4381_v38 = vshll.u32 %v11611_v59, 16 }
 0x2b2   : > { %3627 = vst.msk [vmem:[#allocation2 + $0x7c] sm:$0xf] %vm3557_vm3, %v3470_v55  ;;  %v4045_v55 = vshll.u32 %v11579_v45, 16 }
 0x2b3   : > { %4267 = vrot.lane.b32.xlu1 %v13978_v9, %s12834_s15 }
 0x2b4   : > { %v3464_v15 = vpop.permute.xlu1 %3463  ;;  %4265 = vrot.lane.b32.xlu0 %v11579_v45, %s12834_s15  ;;  %v4047_v3 = vor.u32 %v4045_v55, %v4044_v5  ;;  %v14302_v45 = vld [vmem:[#allocation2 + $0x60] sm:$0xe]  ;;  %v4383_v55 = vrot.slane %v4381_v38, 1 }
 0x2b5   : > { %3620 = vst.msk [vmem:[#allocation2 + $0x70] sm:$0xf] %vm3557_vm3, %v3464_v15  ;;  %v4393_v15 = vshrl.u32 %v11612_v37, 16  ;;  %v5894_v36 = vld [vmem:[#allocation2 + $0x80] sm:$0x1]  ;;  %v14298_v54 = vpop.permute.xlu0 %5736  ;;  %18224 = vst [vmem:[#allocation61_spill] sm:$0xff] %v14302_v45 }
 0x2b6   : > { %v14305_v28 = vld [vmem:[#allocation2 + $0x80] sm:$0x1]  ;;  %v5895_v37 = vsel %vm13911_vm10, %v5743_v33, %v5894_v36  ;;  %5878 = vst [vmem:[#allocation2 + $0x60] sm:$0xf] %v5877_v61  ;;  %v4386_v36 = vshll.u32 %v13978_v9, 16 }
 0x2b7   : > { %4608 = vrot.lane.b32.xlu1 %v4404_v6, %s12839_s19  ;;  %v4398_v2 = vor.u32 %v4397_v25, %v4393_v15  ;;  %18225 = vst [vmem:[#allocation62_spill] sm:$0xff] %v14305_v28  ;;  %v5869_v6 = vld [vmem:[#allocation2 + $0x54] sm:$0xf]  ;;  %v14311_v25 = vld [vmem:[#allocation2 + $0x80] ss:$0 sps:$4 sm:$0x11]  }
 0x2b8   : > { %4157 = vrot.lane.b32.xlu0 %v4054_v18, %s12835_s16  ;;  %v14309_v18 = vld [vmem:[#allocation2 + $0x80] ss:$0 sps:$4 sm:$0x11]   ;;  %18227 = vst [vmem:[#allocation64_spill] sm:$0xff] %v14311_v25  ;;  %v5735_v33 = vpop.permute.xlu1 %5734  ;;  %v5870_v56 = vsel %vm13896_vm6, %v14191_v1, %v5869_v6  ;;  %v14322_v61 = vld [vmem:[#allocation2 + $0x54] sm:$0xf] }
 0x2b9   : > { %18226 = vst [vmem:[#allocation63_spill] sm:$0xff] %v14309_v18  ;;  %v4403_v21 = vsel %vm4377_vm8, %v4398_v2, %v4402_v35  ;;  %5896 = vst [vmem:[#allocation2 + $0x80] sm:$0x1] %v5895_v37  ;;  %v5741_v15 = vpop.permute.xlu0 %5740  ;;  %v14328_v2 = vcombine.low %v14075_v50, %v14035_v13  ;;  %v14330_v38 = vld [vmem:[#allocation2 + $0x7c] sm:$0xf]  ;;  %v4388_v6 = vrot.slane %v4386_v36, 1 }
 0x2ba   : > { %18229 = vst [vmem:[#allocation66_spill] sm:$0xff] %v14322_v61  ;;  %18231 = vst [vmem:[#allocation68_spill] sm:$0xff] %v14330_v38  ;;  %v3638_v1 = vld [vmem:[#allocation2 + $0x90] sm:$0xf]  ;;  %v14337_v37 = vld [vmem:[#allocation2 + $0x78] sm:$0xff]  }
 0x2bb   : > { %4604 = vrot.lane.b32.xlu1 %v4390_v40, %s12839_s19  ;;  %v14315_v40 = vld [vmem:[#allocation2 + $0x54] sm:$0xf]  ;;  %18233 = vst [vmem:[#allocation70_spill] sm:$0xff] %v14337_v37  ;;  %v3631_v35 = vld [vmem:[#allocation2 + $0x84] sm:$0xf] }
 0x2bc   : > { %4153 = vrot.lane.b32.xlu0 %v4047_v3, %s12835_s16  ;;  %18228 = vst [vmem:[#allocation65_spill] sm:$0xff] %v14315_v40  ;;  %v4379_v3 = vshrl.u32 %v11611_v59, 16  ;;  %v14332_v59 = vld [vmem:[#allocation2 + $0x78] sm:$0xff]   ;;  %v14341_v50 = vld [vmem:[#allocation2 + $0x6c] sm:$0xff]   ;;  %v3652_v61 = vld [vmem:[#allocation2 + $0xa8] sm:$0xf] }
 0x2bd   : > { %18232 = vst [vmem:[#allocation69_spill] sm:$0xff] %v14332_v59  ;;  %18235 = vst [vmem:[#allocation72_spill] sm:$0xff] %v14341_v50  ;;  %v14352_v28 = vld [vmem:[#allocation2 + $0x70] sm:$0xf]  ;;  %v6005_v37 = vld [vmem:[#allocation2 + $0x18] sm:$0xf] }
 0x2be   : > { %v4384_v9 = vor.u32 %v4383_v55, %v4379_v3  ;;  %5893 = vst.msk [vmem:[#allocation2 + $0x7c] sm:$0xf] %vm3557_vm3, %v5741_v15  ;;  %18236 = vst [vmem:[#allocation73_spill] sm:$0xff] %v14352_v28  ;;  %v14358_v50 = vld [vmem:[#allocation2 + $0x1c] sm:$0xf] }
 0x2bf   : > { %4159 = vrot.lane.b32.xlu1 %v4051_v20, %s12835_s16  ;;  %v14324_v20 = vld [vmem:[#allocation2 + $0x54] sm:$0xe]  ;;  %v14376_v40 = vld [vmem:[#allocation2 + $0x78] sm:$0xe]  ;;  %v14383_v28 = vld [vmem:[#allocation2 + $0x6c] sm:$0xf] }
 0x2c0   : > { %4606 = vrot.lane.b32.xlu0 %v4403_v21, %s12839_s19  ;;  %18230 = vst [vmem:[#allocation67_spill] sm:$0xff] %v14324_v20  ;;  %5871 = vst [vmem:[#allocation2 + $0x54] sm:$0xf] %v5870_v56  ;;  %v14339_v21 = vld [vmem:[#allocation2 + $0x6c] sm:$0xff]   ;;  %v4389_v55 = vsel %vm4377_vm8, %v4384_v9, %v4388_v6  ;;  %v5890_v9 = vld [vmem:[#allocation2 + $0x78] sm:$0xf] }
 0x2c1   : > { %18234 = vst [vmem:[#allocation71_spill] sm:$0xff] %v14339_v21  ;;  %5886 = vst.msk [vmem:[#allocation2 + $0x70] sm:$0xf] %vm3557_vm3, %v5735_v33  ;;  %v3642_v33 = vld [vmem:[#allocation2 + $0x98] sm:$0x1] }
 0x2c2   : > { %18238 = vst [vmem:[#allocation75_spill] sm:$0xff] %v14376_v40  ;;  %18239 = vst [vmem:[#allocation76_spill] sm:$0xff] %v14383_v28  ;;  %v14385_v59 = vld [vmem:[#allocation2 + $0x6c] sm:$0xe] }
 0x2c3   : > { %4155 = vrot.lane.b32.xlu1 %v4044_v5, %s12835_s16  ;;  %v12516_v5 = vld [vmem:[%s18060_s4] sm:$0xff]   ;;  %18240 = vst [vmem:[#allocation77_spill] sm:$0xff] %v14385_v59  ;;  %v14415_v59 = vld [vmem:[#allocation2 + $0x1c] sm:$0xf] }
 0x2c4   : > { %4277 = vrot.lane.b32.xlu0 %v14328_v2, %s12834_s15  ;;  %12312 = vmatprep.subr.bf16.mxu1 %v12516_v5  ;;  %v14439_v18 = vld [vmem:[#allocation2 + $0x20] ss:$0 sps:$4 sm:$0x11]  }
 0x2c5   : > { %12313 = vmatpush3.bf16.msra.mxu1 %v12516_v5  ;;  %v14372_v5 = vcombine.low %v6005_v37, %v14358_v50 }
 0x2c6   : > { %v3480_v56 = vpop.permute.xlu1 %3479 }
 0x2c7   : > { %4279 = vrot.lane.b32.xlu1 %v14027_v51, %s12834_s15  ;;  %v3639_v3 = vsel %vm13896_vm6, %v3480_v56, %v3638_v1  ;;  %v5883_v1 = vld [vmem:[#allocation2 + $0x6c] sm:$0xf]  ;;  %v6067_v56 = vld [vmem:[#allocation2 + $0x18] sm:$0xf] }
 0x2c8   : > { %v3474_v36 = vpop.permute.xlu0 %3473  ;;  %4602 = vrot.lane.b32.xlu0 %v4389_v55, %s12839_s19  ;;  %3640 = vst [vmem:[#allocation2 + $0x90] sm:$0xf] %v3639_v3  ;;  %v6068_v55 = vld [vmem:[#allocation2 + $0x1c] sm:$0xf] }
 0x2c9   : > { %v3632_v15 = vsel %vm13896_vm6, %v3474_v36, %v3631_v35  ;;  %v5891_v35 = vsel %vm13896_vm6, %v14248_v52, %v5890_v9  ;;  %v3635_v36 = vld [vmem:[#allocation2 + $0x8c] sm:$0x1]  ;;  %v14381_v21 = vcombine.low %v6067_v56, %v6068_v55  ;;  %v14403_v56 = vcombine.low %v14099_v53, %v14050_v10 }
 0x2ca   : > { %3633 = vst [vmem:[#allocation2 + $0x84] sm:$0xf] %v3632_v15  ;;  %v14360_v6 = vpop.permute.xlu1 %5750  ;;  %v14374_v15 = vld [vmem:[#allocation2 + $0x78] sm:$0xf]  ;;  %v12518_v9 = vld [vmem:[%s18060_s4 + $0x8] sm:$0xff]  }
 0x2cb   : > { %4804 = vrot.lane.b32.xlu1 %v14029_v42, %s12833_s14  ;;  %18237 = vst [vmem:[#allocation74_spill] sm:$0xff] %v14374_v15  ;;  %v5884_v42 = vsel %vm13896_vm6, %v14255_v12, %v5883_v1  ;;  %5892 = vst [vmem:[#allocation2 + $0x78] sm:$0xf] %v5891_v35  ;;  %v12521_v1 = vld [vmem:[%s18060_s4 + $0x10] ss:$0 sps:$4 sm:$0xff]   ;;  %12314 = vmatprep.subr.bf16.mxu1 %v12518_v9  ;;  %v4056_v19 = vshrl.u32 %v14403_v56, 16 }
 0x2cc   : > { %v14364_v3 = vpop.permute.xlu0 %5744  ;;  %4802 = vrot.lane.b32.xlu0 %v14040_v41, %s12833_s14  ;;  %5885 = vst [vmem:[#allocation2 + $0x6c] sm:$0xf] %v5884_v42  ;;  %v6115_v42 = vld [vmem:[#allocation2 + $0x18] sm:$0xe]  ;;  %12315 = vmatpush3.bf16.msra.mxu1 %v12518_v9  ;;  %v5379_v53 = vsel %vm2738_vm13, %v12521_v1, 0 }
 0x2cd   : > { %12435 = vmatprep.subr.msk.bf16.mxu1 %vm2738_vm13, %v12521_v1  ;;  %v6003_v9 = vld [vmem:[#allocation2 + $0xc] sm:$0xf] }
 0x2ce   : > { %v3484_v41 = vpop.permute.xlu1 %3483 }
 0x2cf   : > { %6694 = vrot.lane.b32.xlu1 %v14372_v5, %s12839_s19  ;;  %v3643_v52 = vsel %vm13911_vm10, %v3484_v41, %v3642_v33  ;;  %v14405_v33 = vld [vmem:[#allocation2 + $0x20] ss:$0 sps:$4 sm:$0x11]  }
 0x2d0   : > { %v3478_v37 = vpop.permute.xlu0 %3477  ;;  %7204 = vrot.lane.b32.xlu0 %v14381_v21, %s12840_s22  ;;  %3644 = vst [vmem:[#allocation2 + $0x98] sm:$0x1] %v3643_v52  ;;  %v6051_v52 = vld [vmem:[#allocation2 + $0xc] sm:$0xe]  ;;  %12317 = vmatpush3.bf16.msra.mxu1 %v5379_v53 }
 0x2d1   : > { %v3636_v12 = vsel %vm13911_vm10, %v3478_v37, %v3635_v36  ;;  %v6004_v36 = vld [vmem:[#allocation2 + $0x10] sm:$0xf]  ;;  %v11808_v37 = vcombine.low %v6115_v42, %v6068_v55  ;;  %v4432_v55 = vshrl.u32 %v14027_v51, 16  ;;  %v5989_v42 = vld [vmem:[#allocation2 + $0x18] sm:$0xe] }
 0x2d2   : > { %3637 = vst [vmem:[#allocation2 + $0x8c] sm:$0x1] %v3636_v12  ;;  %v5755_v35 = vpop.permute.xlu1 %5754  ;;  %v7557_v12 = vrot.slane %v14405_v33, 1  ;;  %v11760_v28 = vcombine.low %v6051_v52, %v6004_v36  ;;  %v14460_v45 = vld [vmem:[#allocation2 + $0x84] sm:$0xf] }
 0x2d3   : > { %4275 = vrot.lane.b32.xlu1 %v14042_v26, %s12834_s15  ;;  %v7556_v38 = vrot.slane %v11808_v37, 1  ;;  %v5897_v37 = vld [vmem:[#allocation2 + $0x84] sm:$0xf]  ;;  %18246 = vst [vmem:[#allocation83_spill] sm:$0xff] %v14460_v45  ;;  %v5943_v45 = vld [vmem:[#allocation2 + $0x18] sm:$0xf] }
 0x2d4   : > { %v3482_v41 = vpop.permute.xlu0 %3481  ;;  %4273 = vrot.lane.b32.xlu0 %v14403_v56, %s12834_s15  ;;  %v14435_v53 = vrot.slane %v11760_v28, 1 }
 0x2d5   : > { %3641 = vst.msk [vmem:[#allocation2 + $0x94] sm:$0xf] %vm3557_vm3, %v3482_v41 }
 0x2d6   : > { %v3476_v40 = vpop.permute.xlu1 %3475 }
 0x2d7   : > { %4800 = vrot.lane.b32.xlu1 %v14046_v32, %s12833_s14  ;;  %v14420_v15 = vld [vmem:[#allocation2 + $0x98] sm:$0x1]  ;;  %3634 = vst.msk [vmem:[#allocation2 + $0x88] sm:$0xf] %vm3557_vm3, %v3476_v40  ;;  %v4063_v32 = vshrl.u32 %v14328_v2, 16 }
 0x2d8   : > { %18241 = vst [vmem:[#allocation78_spill] sm:$0xff] %v14420_v15  ;;  %v5908_v41 = vld [vmem:[#allocation2 + $0x98] sm:$0x1]  ;;  %4798 = vrot.lane.b32.xlu0 %v14054_v46, %s12833_s14  ;;  %v14433_v15 = vcombine.low %v6003_v9, %v6004_v36  ;;  %v6052_v40 = vld [vmem:[#allocation2 + $0x18] sm:$0xe]  ;;  %v4418_v46 = vshrl.u32 %v14042_v26, 16 }
 0x2d9   : > { %v5909_v1 = vsel %vm13911_vm10, %v5755_v35, %v5908_v41  ;;  %v14428_v52 = vld [vmem:[#allocation2 + $0x98] ss:$0 sps:$4 sm:$0x11]   ;;  %v11714_v35 = vcombine.low %v5989_v42, %v14415_v59  ;;  %v14444_v41 = vpop.permute.xlu0 %5748  ;;  %v14446_v36 = vld [vmem:[#allocation2 + $0x20] ss:$0 sps:$4 sm:$0x11]   ;;  %v11761_v28 = vcombine.low %v6052_v40, %v14358_v50  ;;  %v7558_v42 = vsel %vm1148_vm4, %v7556_v38, %v7557_v12 }
 0x2da   : > { %18242 = vst [vmem:[#allocation79_spill] sm:$0xff] %v14428_v52  ;;  %v14431_v25 = vld [vmem:[#allocation2 + $0x98] ss:$0 sps:$4 sm:$0x11]   ;;  %v14448_v9 = vrot.slane %v4063_v32, 7  ;;  %v5898_v50 = vsel %vm13896_vm6, %v14364_v3, %v5897_v37  ;;  %v6539_v32 = vrot.slane %v14439_v18, 1  ;;  %v5747_v40 = vpop.permute.xlu1 %5746 }
 0x2db   : > { %18243 = vst [vmem:[#allocation80_spill] sm:$0xff] %v14431_v25  ;;  %5910 = vst [vmem:[#allocation2 + $0x98] sm:$0x1] %v5909_v1  ;;  %4616 = vrot.lane.b32.xlu1 %v4432_v55, %s12839_s19  ;;  %v14451_v1 = vld [vmem:[#allocation2 + $0x14] ss:$0 sps:$4 sm:$0x11]  }
 0x2dc   : > { %6692 = vrot.lane.b32.xlu0 %v14433_v15, %s12839_s19  ;;  %v5887_v52 = vld [vmem:[#allocation2 + $0x74] sm:$0x1]  ;;  %v6538_v20 = vrot.slane %v11714_v35, 1  ;;  %v14471_v38 = vld [vmem:[#allocation2 + $0x84] sm:$0xe]  ;;  %v7048_v62 = vrot.slane %v14446_v36, 1 }
 0x2dd   : > { %18249 = vst [vmem:[#allocation86_spill] sm:$0xff] %v14471_v38  ;;  %v5904_v35 = vld [vmem:[#allocation2 + $0x90] sm:$0xf]  ;;  %v5888_v37 = vsel %vm13911_vm10, %v14298_v54, %v5887_v52  ;;  %v14483_v38 = vld [vmem:[#allocation2 + $0x94] sm:$0xf] }
 0x2de   : > { %v14453_v55 = vld [vmem:[#allocation2 + $0x88] sm:$0xf]  ;;  %v14476_v3 = vld [vmem:[#allocation2 + $0x10] sm:$0xf]  ;;  %18251 = vst [vmem:[#allocation88_spill] sm:$0xff] %v14483_v38  ;;  %v5905_v52 = vsel %vm13896_vm6, %v14360_v6, %v5904_v35 }
 0x2df   : > { %18244 = vst [vmem:[#allocation81_spill] sm:$0xff] %v14453_v55  ;;  %v14455_v25 = vld [vmem:[#allocation2 + $0x84] sm:$0xff]   ;;  %4612 = vrot.lane.b32.xlu1 %v4418_v46, %s12839_s19  ;;  %v14469_v46 = vld [vmem:[#allocation2 + $0x74] ss:$0 sps:$4 sm:$0x11]   ;;  %v7047_v55 = vrot.slane %v11761_v28, 1  ;;  %v6540_v28 = vsel %vm1148_vm4, %v6538_v20, %v6539_v32  ;;  %v11713_v6 = vcombine.low %v5988_v11, %v14476_v3 }
 0x2e0   : > { %18245 = vst [vmem:[#allocation82_spill] sm:$0xff] %v14455_v25  ;;  %7604 = vrot.lane.b32.xlu0 %v7558_v42, %s12841_s30  ;;  %v14467_v25 = vld [vmem:[#allocation2 + $0x74] ss:$0 sps:$4 sm:$0x11]   ;;  %18248 = vst [vmem:[#allocation85_spill] sm:$0xff] %v14469_v46  ;;  %v14473_v12 = vld [vmem:[#allocation2 + $0x84] sm:$0xff]   ;;  %v5753_v46 = vpop.permute.xlu0 %5752 }
 0x2e1   : > { %18247 = vst [vmem:[#allocation84_spill] sm:$0xff] %v14467_v25  ;;  %18250 = vst [vmem:[#allocation87_spill] sm:$0xff] %v14473_v12  ;;  %v7045_v42 = vrot.slane %v14451_v1, 1  ;;  %v14485_v12 = vld [vmem:[#allocation2 + $0x90] sm:$0xff]   ;;  %v5880_v25 = vld [vmem:[#allocation2 + $0x68] sm:$0x1]  ;;  %v7049_v20 = vsel %vm1148_vm4, %v7047_v55, %v7048_v62 }
 0x2e2   : > { %5900 = vst.msk [vmem:[#allocation2 + $0x88] sm:$0xf] %vm3557_vm3, %v5747_v40  ;;  %5899 = vst [vmem:[#allocation2 + $0x84] sm:$0xf] %v5898_v50  ;;  %v11614_v50 = vcombine.low %v14077_v14, %v14035_v13  ;;  %v14492_v40 = vld [vmem:[#allocation2 + $0x90] sm:$0xf]  ;;  %v5881_v13 = vsel %vm13911_vm10, %v14200_v0, %v5880_v25  ;;  %v14509_v14 = vcombine.low %v5943_v45, %v14415_v59 }
 0x2e3   : > { %18252 = vst [vmem:[#allocation89_spill] sm:$0xff] %v14485_v12  ;;  %4167 = vrot.lane.b32.xlu1 %v14448_v9, %s12835_s16  ;;  %v14494_v54 = vld [vmem:[#allocation2 + $0x90] sm:$0xe]  ;;  %v14500_v12 = vld [vmem:[#allocation2 + $0x74] ss:$0 sps:$4 sm:$0x11]  }
 0x2e4   : > { %18253 = vst [vmem:[#allocation90_spill] sm:$0xff] %v14494_v54  ;;  %6584 = vrot.lane.b32.xlu0 %v6540_v28, %s12834_s15  ;;  %18254 = vst [vmem:[#allocation91_spill] sm:$0xff] %v14500_v12  ;;  %v14502_v38 = vld [vmem:[#allocation2 + $0x90] sm:$0xff]   ;;  %v14513_v32 = vld [vmem:[#allocation2 + $0x68] ss:$0 sps:$4 sm:$0x11]  }
 0x2e5   : > { %18255 = vst [vmem:[#allocation92_spill] sm:$0xff] %v14502_v38  ;;  %5889 = vst [vmem:[#allocation2 + $0x74] sm:$0x1] %v5888_v37  ;;  %v14515_v35 = vld [vmem:[#allocation2 + $0x68] ss:$0 sps:$4 sm:$0x11]  }
 0x2e6   : > { %5907 = vst.msk [vmem:[#allocation2 + $0x94] sm:$0xf] %vm3557_vm3, %v5753_v46  ;;  %5906 = vst [vmem:[#allocation2 + $0x90] sm:$0xf] %v5905_v52  ;;  %v7046_v46 = vsel %vm1148_vm4, %v14435_v53, %v7045_v42  ;;  %v4066_v37 = vshll.u32 %v14328_v2, 16  ;;  %v4423_v25 = vshll.u32 %v11614_v50, 16 }
 0x2e7   : > { %7094 = vrot.lane.b32.xlu1 %v7049_v20, %s12842_s17  ;;  %v3645_v0 = vld [vmem:[#allocation2 + $0x9c] sm:$0xf]  ;;  %v14522_v62 = vld [vmem:[#allocation2 + $0x14] ss:$0 sps:$4 sm:$0x11]   ;;  %v4058_v59 = vrot.slane %v4056_v19, 7 }
 0x2e8   : > { %7092 = vrot.lane.b32.xlu0 %v7046_v46, %s12842_s17  ;;  %v3492_v45 = vpop.permute.xlu1 %3491  ;;  %v14524_v11 = vld [vmem:[#allocation2 + $0x68] ss:$0 sps:$4 sm:$0x11]   ;;  %v4068_v55 = vor.u32 %v4066_v37, %v14448_v9  ;;  %v6535_v53 = vrot.slane %v11713_v6, 1  ;;  %v18257_v42 = vshll.u32 %v14372_v5, 16  ;;  %v6286_v46 = vshll.u32 %v14509_v14, 16 }
 0x2e9   : > { %18256 = vst [vmem:[#allocation93_spill] sm:$0xff] %v14524_v11  ;;  %v3653_v28 = vsel %vm13896_vm6, %v3492_v45, %v3652_v61  ;;  %v3486_v52 = vpop.permute.xlu0 %3485  ;;  %5882 = vst [vmem:[#allocation2 + $0x68] sm:$0x1] %v5881_v13  ;;  %v4425_v19 = vrot.slane %v4423_v25, 1  ;;  %v7287_v9 = vshll.u32 %v14381_v21, 16  ;;  %v6536_v61 = vrot.slane %v14522_v62, 1 }
 0x2ea   : > { %3654 = vst [vmem:[#allocation2 + $0xa8] sm:$0xf] %v3653_v28  ;;  %v3646_v2 = vsel %vm13896_vm6, %v3486_v52, %v3645_v0  ;;  %v6789_v20 = vrot.slane %v18257_v42, 1  ;;  %v4059_v13 = vshll.u32 %v14403_v56, 16  ;;  %v6785_v6 = vshrl.u32 %v14372_v5, 16 }
 0x2eb   : > { %4163 = vrot.lane.b32.xlu1 %v4058_v59, %s12835_s16  ;;  %3647 = vst [vmem:[#allocation2 + $0x9c] sm:$0xf] %v3646_v2  ;;  %v6792_v0 = vshll.u32 %v14446_v36, 16  ;;  %v4421_v28 = vshrl.u32 %v11614_v50, 16  ;;  %v4428_v52 = vshll.u32 %v14027_v51, 16  ;;  %v6537_v25 = vsel %vm1148_vm4, %v6535_v53, %v6536_v61 }
 0x2ec   : > { %4165 = vrot.lane.b32.xlu0 %v4068_v55, %s12835_s16  ;;  %v14539_v37 = vpop.permute.xlu1 %5762  ;;  %v4061_v2 = vor.u32 %v4059_v13, %v4058_v59  ;;  %v6790_v42 = vor.u32 %v6789_v20, %v6785_v6  ;;  %v3656_v55 = vld [vmem:[#allocation2 + $0xb0] sm:$0x1]  ;;  %v6288_v38 = vrot.slane %v6286_v46, 1  ;;  %v5941_v12 = vld [vmem:[#allocation2 + $0xc] sm:$0xf]  ;;  %v7289_v54 = vrot.slane %v7287_v9, 1 }
 0x2ed   : > { %v14543_v45 = vpop.permute.xlu0 %5756  ;;  %v4426_v56 = vor.u32 %v4425_v19, %v4421_v28  ;;  %v3649_v11 = vld [vmem:[#allocation2 + $0xa4] sm:$0x1]  ;;  %v11613_v5 = vcombine.low %v14101_v23, %v14050_v10  ;;  %v6794_v36 = vrot.slane %v6792_v0, 1  ;;  %v6284_v51 = vshrl.u32 %v14509_v14, 16 }
 0x2ee   : > { %v6291_v59 = vshll.u32 %v14439_v18, 16  ;;  %v4430_v53 = vrot.slane %v4428_v52, 1  ;;  %v7285_v19 = vshrl.u32 %v14381_v21, 16  ;;  %v7292_v9 = vshll.u32 %v14405_v33, 16 }
 0x2ef   : > { %6582 = vrot.lane.b32.xlu1 %v6537_v25, %s12834_s15  ;;  %v14558_v61 = vcombine.low %v5941_v12, %v14476_v3  ;;  %v6795_v10 = vsel %vm4377_vm8, %v6790_v42, %v6794_v36  ;;  %v6289_v13 = vor.u32 %v6288_v38, %v6284_v51  ;;  %v4409_v0 = vshll.u32 %v11613_v5, 16 }
 0x2f0   : > { %4161 = vrot.lane.b32.xlu0 %v4061_v2, %s12835_s16  ;;  %v3496_v50 = vpop.permute.xlu1 %3495  ;;  %v4431_v18 = vsel %vm4377_vm8, %v4426_v56, %v4430_v53  ;;  %v7290_v6 = vor.u32 %v7289_v54, %v7285_v19  ;;  %v6293_v21 = vrot.slane %v6291_v59, 1  ;;  %v7294_v12 = vrot.slane %v7292_v9, 1 }
 0x2f1   : > { %v3657_v20 = vsel %vm13911_vm10, %v3496_v50, %v3656_v55  ;;  %v3490_v46 = vpop.permute.xlu0 %3489  ;;  %v4411_v52 = vrot.slane %v4409_v0, 1  ;;  %v4407_v42 = vshrl.u32 %v11613_v5, 16  ;;  %v4414_v55 = vshll.u32 %v14042_v26, 16 }
 0x2f2   : > { %3658 = vst [vmem:[#allocation2 + $0xb0] sm:$0x1] %v3657_v20  ;;  %v3650_v23 = vsel %vm13911_vm10, %v3490_v46, %v3649_v11  ;;  %v6294_v28 = vsel %vm4377_vm8, %v6289_v13, %v6293_v21  ;;  %v6274_v11 = vshll.u32 %v14558_v61, 16  ;;  %v7295_v38 = vsel %vm4377_vm8, %v7290_v6, %v7294_v12  ;;  %v5911_v19 = vld [vmem:[#allocation2 + $0x9c] sm:$0xf] }
 0x2f3   : > { %6966 = vrot.lane.b32.xlu1 %v6795_v10, %s12833_s14  ;;  %3651 = vst [vmem:[#allocation2 + $0xa4] sm:$0x1] %v3650_v23  ;;  %v14580_v36 = vcombine.low %v14211_v17, %v14130_v4  ;;  %v6775_v59 = vshll.u32 %v14433_v15, 16  ;;  %v4412_v53 = vor.u32 %v4411_v52, %v4407_v42  ;;  %v6272_v26 = vshrl.u32 %v14558_v61, 16  ;;  %v5918_v23 = vld [vmem:[#allocation2 + $0xa8] sm:$0xf] }
 0x2f4   : > { %4614 = vrot.lane.b32.xlu0 %v4431_v18, %s12839_s19  ;;  %v5767_v33 = vpop.permute.xlu1 %5766  ;;  %v6276_v51 = vrot.slane %v6274_v11, 1  ;;  %v6279_v17 = vshll.u32 %v14522_v62, 16  ;;  %v4416_v46 = vrot.slane %v4414_v55, 1  ;;  %v14600_v0 = vld [vmem:[#allocation2 + $0x9c] sm:$0xf]  ;;  %v5912_v52 = vsel %vm13896_vm6, %v14543_v45, %v5911_v19 }
 0x2f5   : > { %v3494_v3 = vpop.permute.xlu0 %3493  ;;  %v6777_v10 = vrot.slane %v6775_v59, 1  ;;  %18262 = vst [vmem:[#allocation98_spill] sm:$0xff] %v14600_v0  ;;  %v14603_v12 = vld [vmem:[#allocation2 + $0x34] sm:$0xf]  ;;  %v5901_v19 = vld [vmem:[#allocation2 + $0x8c] sm:$0x1] }
 0x2f6   : > { %3655 = vst.msk [vmem:[#allocation2 + $0xac] sm:$0xf] %vm3557_vm3, %v3494_v3  ;;  %v6277_v9 = vor.u32 %v6276_v51, %v6272_v26  ;;  %v4417_v13 = vsel %vm4377_vm8, %v4412_v53, %v4416_v46  ;;  %v6281_v62 = vrot.slane %v6279_v17, 1  ;;  %v6773_v3 = vshrl.u32 %v14433_v15, 16 }
 0x2f7   : > { %6455 = vrot.lane.b32.xlu1 %v6294_v28, %s12835_s16  ;;  %v14606_v28 = vld [vmem:[#allocation2 + $0xa8] sm:$0xf]  ;;  %v5919_v15 = vsel %vm13896_vm6, %v14539_v37, %v5918_v23  ;;  %v3659_v37 = vld [vmem:[#allocation2 + $0xb4] sm:$0xf] }
 0x2f8   : > { %7476 = vrot.lane.b32.xlu0 %v7295_v38, %s12843_s18  ;;  %v3488_v54 = vpop.permute.xlu1 %3487  ;;  %18263 = vst [vmem:[#allocation99_spill] sm:$0xff] %v14606_v28  ;;  %v6282_v55 = vsel %vm4377_vm8, %v6277_v9, %v6281_v62  ;;  %v6778_v45 = vor.u32 %v6777_v10, %v6773_v3  ;;  %v6071_v10 = vld [vmem:[#allocation2 + $0x30] sm:$0xf]  ;;  %v6072_v23 = vld [vmem:[#allocation2 + $0x34] sm:$0xf] }
 0x2f9   : > { %v14572_v25 = vld [vmem:[#allocation2 + $0xb0] sm:$0x1]  ;;  %3648 = vst.msk [vmem:[#allocation2 + $0xa0] sm:$0xf] %vm3557_vm3, %v3488_v54  ;;  %v14582_v50 = vpop.permute.xlu0 %5760  ;;  %v6780_v54 = vshll.u32 %v14451_v1, 16 }
 0x2fa   : > { %18258 = vst [vmem:[#allocation94_spill] sm:$0xff] %v14572_v25  ;;  %v5922_v2 = vld [vmem:[#allocation2 + $0xb0] sm:$0x1]  ;;  %v3666_v1 = vld [vmem:[#allocation2 + $0xc0] sm:$0xf] }
 0x2fb   : > { %v5923_v56 = vsel %vm13911_vm10, %v5767_v33, %v5922_v2  ;;  %4287 = vrot.lane.b32.xlu1 %v14121_v47, %s12834_s15  ;;  %v14587_v20 = vld [vmem:[#allocation2 + $0xb0] ss:$0 sps:$4 sm:$0x11]   ;;  %v14618_v2 = vld [vmem:[#allocation2 + $0x9c] sm:$0xe]  ;;  %v6782_v26 = vrot.slane %v6780_v54, 1 }
 0x2fc   : > { %18259 = vst [vmem:[#allocation95_spill] sm:$0xff] %v14587_v20  ;;  %v14589_v5 = vld [vmem:[#allocation2 + $0xb0] ss:$0 sps:$4 sm:$0x11]   ;;  %4285 = vrot.lane.b32.xlu0 %v14580_v36, %s12834_s15  ;;  %v5759_v18 = vpop.permute.xlu1 %5758  ;;  %18267 = vst [vmem:[#allocation103_spill] sm:$0xff] %v14618_v2 }
 0x2fd   : > { %18260 = vst [vmem:[#allocation96_spill] sm:$0xff] %v14589_v5  ;;  %5924 = vst [vmem:[#allocation2 + $0xb0] sm:$0x1] %v5923_v56  ;;  %v14598_v6 = vld [vmem:[#allocation2 + $0xac] sm:$0xf]  ;;  %v5765_v21 = vpop.permute.xlu0 %5764 }
 0x2fe   : > { %18261 = vst [vmem:[#allocation97_spill] sm:$0xff] %v14598_v6  ;;  %v6009_v33 = vld [vmem:[#allocation2 + $0x30] sm:$0xf]  ;;  %v14608_v11 = vld [vmem:[#allocation2 + $0xa8] sm:$0xff]   ;;  %v3663_v54 = vld [vmem:[#allocation2 + $0xbc] sm:$0x1] }
 0x2ff   : > { %4812 = vrot.lane.b32.xlu1 %v14135_v63, %s12833_s14  ;;  %18264 = vst [vmem:[#allocation100_spill] sm:$0xff] %v14608_v11  ;;  %v14626_v56 = vld [vmem:[#allocation2 + $0xa8] sm:$0xe]  ;;  %v14636_v53 = vcombine.low %v6009_v33, %v14603_v12  ;;  %v14655_v33 = vcombine.low %v6071_v10, %v6072_v23  ;;  %v14657_v3 = vld [vmem:[#allocation2 + $0x8c] ss:$0 sps:$4 sm:$0x11]  }
 0x300   : > { %4610 = vrot.lane.b32.xlu0 %v4417_v13, %s12839_s19  ;;  %v14610_v63 = vld [vmem:[#allocation2 + $0xa0] sm:$0xf]  ;;  %18269 = vst [vmem:[#allocation105_spill] sm:$0xff] %v14626_v56  ;;  %v14629_v51 = vld [vmem:[#allocation2 + $0xa8] sm:$0xff]  }
 0x301   : > { %18265 = vst [vmem:[#allocation101_spill] sm:$0xff] %v14610_v63  ;;  %v14612_v38 = vld [vmem:[#allocation2 + $0x9c] sm:$0xff]   ;;  %18270 = vst [vmem:[#allocation106_spill] sm:$0xff] %v14629_v51  ;;  %v14688_v10 = vld [vmem:[#allocation2 + $0x38] ss:$0 sps:$4 sm:$0x11]  }
 0x302   : > { %18266 = vst [vmem:[#allocation102_spill] sm:$0xff] %v14612_v38  ;;  %v14620_v42 = vld [vmem:[#allocation2 + $0x9c] sm:$0xff]   ;;  %5921 = vst.msk [vmem:[#allocation2 + $0xac] sm:$0xf] %vm3557_vm3, %v5765_v21  ;;  %v5902_v21 = vsel %vm13911_vm10, %v14444_v41, %v5901_v19  ;;  %v7311_v11 = vshll.u32 %v14655_v33, 16 }
 0x303   : > { %18268 = vst [vmem:[#allocation104_spill] sm:$0xff] %v14620_v42  ;;  %5914 = vst.msk [vmem:[#allocation2 + $0xa0] sm:$0xf] %vm3557_vm3, %v5759_v18  ;;  %6453 = vrot.lane.b32.xlu1 %v6282_v55, %s12835_s16  ;;  %v14648_v18 = vld [vmem:[#allocation2 + $0x8c] ss:$0 sps:$4 sm:$0x11]  }
 0x304   : > { %5913 = vst [vmem:[#allocation2 + $0x9c] sm:$0xf] %v5912_v52  ;;  %5920 = vst [vmem:[#allocation2 + $0xa8] sm:$0xf] %v5919_v15  ;;  %4810 = vrot.lane.b32.xlu0 %v14133_v27, %s12833_s14  ;;  %v6783_v27 = vsel %vm4377_vm8, %v6778_v45, %v6782_v26  ;;  %v3670_v52 = vld [vmem:[#allocation2 + $0xc8] sm:$0x1]  ;;  %v14669_v45 = vcombine.low %v14219_v48, %v14163_v57 }
 0x305   : > { %v3504_v59 = vpop.permute.xlu1 %3503  ;;  %v14663_v15 = vld [vmem:[#allocation2 + $0x8c] ss:$0 sps:$4 sm:$0x11]   ;;  %v14815_v20 = vld [vmem:[#allocation2 + $0xa4] ss:$0 sps:$4 sm:$0x11]  }
 0x306   : > { %v3667_v17 = vsel %vm13896_vm6, %v3504_v59, %v3666_v1  ;;  %v3498_v46 = vpop.permute.xlu0 %3497  ;;  %18271 = vst [vmem:[#allocation107_spill] sm:$0xff] %v14663_v15  ;;  %5903 = vst [vmem:[#allocation2 + $0x8c] sm:$0x1] %v5902_v21  ;;  %v14671_v59 = vld [vmem:[#allocation2 + $0x28] sm:$0xf] }
 0x307   : > { %3668 = vst [vmem:[#allocation2 + $0xc0] sm:$0xf] %v3667_v17  ;;  %v3660_v9 = vsel %vm13896_vm6, %v3498_v46, %v3659_v37  ;;  %6698 = vrot.lane.b32.xlu1 %v14636_v53, %s12839_s19  ;;  %v6069_v37 = vld [vmem:[#allocation2 + $0x24] sm:$0xf]  ;;  %v6117_v17 = vld [vmem:[#allocation2 + $0x30] sm:$0xe] }
 0x308   : > { %3661 = vst [vmem:[#allocation2 + $0xb4] sm:$0xf] %v3660_v9  ;;  %6964 = vrot.lane.b32.xlu0 %v6783_v27, %s12833_s14  ;;  %v14680_v19 = vcombine.low %v6069_v37, %v14671_v59  ;;  %v14682_v9 = vld [vmem:[#allocation2 + $0x28] sm:$0xf]  ;;  %v4460_v27 = vshrl.u32 %v14121_v47, 16  ;;  %v11810_v21 = vcombine.low %v6117_v17, %v6072_v23  ;;  %18284 = vst [vmem:[#allocation120_spill] sm:$0xff] %v14815_v20 }
 0x309   : > { %v14646_v13 = vpop.permute.xlu1 %5774  ;;  %v6054_v37 = vld [vmem:[#allocation2 + $0x30] sm:$0xe]  ;;  %v14702_v23 = vld [vmem:[#allocation2 + $0x38] ss:$0 sps:$4 sm:$0x11]  }
 0x30a   : > { %v14653_v62 = vpop.permute.xlu0 %5768  ;;  %v7562_v42 = vrot.slane %v11810_v21, 1  ;;  %v11763_v56 = vcombine.low %v6054_v37, %v14603_v12 }
 0x30b   : > { %4283 = vrot.lane.b32.xlu1 %v14158_v29, %s12834_s15 }
 0x30c   : > { %7208 = vrot.lane.b32.xlu0 %v14655_v33, %s12840_s22 }
 0x30d   : > { %v3508_v55 = vpop.permute.xlu1 %3507 }
 0x30e   : > { %v3671_v41 = vsel %vm13911_vm10, %v3508_v55, %v3670_v52  ;;  %v3502_v1 = vpop.permute.xlu0 %3501  ;;  %v14692_v52 = vld [vmem:[#allocation2 + $0x34] sm:$0xf]  ;;  %v5932_v17 = vld [vmem:[#allocation2 + $0xc0] sm:$0xf] }
 0x30f   : > { %3672 = vst [vmem:[#allocation2 + $0xc8] sm:$0x1] %v3671_v41  ;;  %v3664_v26 = vsel %vm13911_vm10, %v3502_v1, %v3663_v54  ;;  %4808 = vrot.lane.b32.xlu1 %v14161_v7, %s12833_s14  ;;  %v6007_v7 = vld [vmem:[#allocation2 + $0x24] sm:$0xf]  ;;  %v5991_v54 = vld [vmem:[#allocation2 + $0x30] sm:$0xe] }
 0x310   : > { %3665 = vst [vmem:[#allocation2 + $0xbc] sm:$0x1] %v3664_v26  ;;  %4281 = vrot.lane.b32.xlu0 %v14669_v45, %s12834_s15  ;;  %v4446_v41 = vshrl.u32 %v14158_v29, 16  ;;  %v4077_v1 = vshrl.u32 %v14580_v36, 16  ;;  %v14700_v51 = vcombine.low %v6007_v7, %v14682_v9  ;;  %v11716_v15 = vcombine.low %v5991_v54, %v14692_v52  ;;  %v14716_v5 = vld [vmem:[#allocation2 + $0xc0] sm:$0xf] }
 0x311   : > { %v5779_v46 = vpop.permute.xlu1 %5778  ;;  %v7563_v7 = vrot.slane %v14688_v10, 1  ;;  %18274 = vst [vmem:[#allocation110_spill] sm:$0xff] %v14716_v5 }
 0x312   : > { %v3506_v48 = vpop.permute.xlu0 %3505  ;;  %v14723_v54 = vrot.slane %v4077_v1, 7  ;;  %v6544_v37 = vrot.slane %v11716_v15, 1  ;;  %v5947_v1 = vld [vmem:[#allocation2 + $0x30] sm:$0xf] }
 0x313   : > { %3669 = vst.msk [vmem:[#allocation2 + $0xc4] sm:$0xf] %vm3557_vm3, %v3506_v48  ;;  %7206 = vrot.lane.b32.xlu1 %v14680_v19, %s12840_s22  ;;  %v7564_v12 = vsel %vm1148_vm4, %v7562_v42, %v7563_v7  ;;  %v7053_v42 = vrot.slane %v11763_v56, 1 }
 0x314   : > { %4806 = vrot.lane.b32.xlu0 %v14151_v8, %s12833_s14  ;;  %v6116_v8 = vld [vmem:[#allocation2 + $0x24] sm:$0xe] }
 0x315   : > { %v3500_v55 = vpop.permute.xlu1 %3499 }
 0x316   : > { %v5936_v26 = vld [vmem:[#allocation2 + $0xc8] sm:$0x1]  ;;  %3662 = vst.msk [vmem:[#allocation2 + $0xb8] sm:$0xf] %vm3557_vm3, %v3500_v55  ;;  %v14697_v48 = vpop.permute.xlu0 %5772 }
 0x317   : > { %v5937_v25 = vsel %vm13911_vm10, %v5779_v46, %v5936_v26  ;;  %4624 = vrot.lane.b32.xlu1 %v4460_v27, %s12839_s19  ;;  %v14708_v2 = vld [vmem:[#allocation2 + $0xc8] ss:$0 sps:$4 sm:$0x11]   ;;  %v14718_v46 = vld [vmem:[#allocation2 + $0xc0] sm:$0xe]  ;;  %v5933_v27 = vsel %vm13896_vm6, %v14646_v13, %v5932_v17  ;;  %v6545_v17 = vrot.slane %v14702_v23, 1 }
 0x318   : > { %18272 = vst [vmem:[#allocation108_spill] sm:$0xff] %v14708_v2  ;;  %6696 = vrot.lane.b32.xlu0 %v14700_v51, %s12839_s19  ;;  %v14713_v55 = vld [vmem:[#allocation2 + $0xc8] ss:$0 sps:$4 sm:$0x11]   ;;  %18275 = vst [vmem:[#allocation111_spill] sm:$0xff] %v14718_v46 }
 0x319   : > { %18273 = vst [vmem:[#allocation109_spill] sm:$0xff] %v14713_v55  ;;  %v5771_v38 = vpop.permute.xlu1 %5770  ;;  %5938 = vst [vmem:[#allocation2 + $0xc8] sm:$0x1] %v5937_v25  ;;  %v14731_v55 = vld [vmem:[#allocation2 + $0x38] ss:$0 sps:$4 sm:$0x11]   ;;  %v11809_v25 = vcombine.low %v6116_v8, %v14671_v59  ;;  %v6546_v56 = vsel %vm1148_vm4, %v6544_v37, %v6545_v17  ;;  %v14770_v37 = vcombine.low %v5947_v1, %v14692_v52 }
 0x31a   : > { %v5777_v21 = vpop.permute.xlu0 %5776  ;;  %v14725_v26 = vld [vmem:[#allocation2 + $0xc4] sm:$0xf]  ;;  %v5925_v13 = vld [vmem:[#allocation2 + $0xb4] sm:$0xf]  ;;  %v14747_v8 = vld [vmem:[#allocation2 + $0x28] sm:$0xf]  ;;  %v11616_v1 = vcombine.low %v14213_v39, %v14130_v4 }
 0x31b   : > { %18276 = vst [vmem:[#allocation112_spill] sm:$0xff] %v14725_v26  ;;  %v14727_v2 = vld [vmem:[#allocation2 + $0xc0] sm:$0xff]   ;;  %4620 = vrot.lane.b32.xlu1 %v4446_v41, %s12839_s19  ;;  %v7559_v5 = vrot.slane %v11809_v25, 1  ;;  %v14761_v26 = vld [vmem:[#allocation2 + $0xb4] sm:$0xe]  ;;  %v7054_v31 = vrot.slane %v14731_v55, 1 }
 0x31c   : > { %18277 = vst [vmem:[#allocation113_spill] sm:$0xff] %v14727_v2  ;;  %v6053_v46 = vld [vmem:[#allocation2 + $0x24] sm:$0xe]  ;;  %5935 = vst.msk [vmem:[#allocation2 + $0xc4] sm:$0xf] %vm3557_vm3, %v5777_v21  ;;  %7608 = vrot.lane.b32.xlu0 %v7564_v12, %s12841_s30  ;;  %v5926_v12 = vsel %vm13896_vm6, %v14653_v62, %v5925_v13  ;;  %v4070_v62 = vshrl.u32 %v14669_v45, 16 }
 0x31d   : > { %5934 = vst [vmem:[#allocation2 + $0xc0] sm:$0xf] %v5933_v27  ;;  %v14737_v2 = vld [vmem:[#allocation2 + $0x2c] ss:$0 sps:$4 sm:$0x11]   ;;  %v14739_v41 = vpop.permute.xlu1 %4271  ;;  %v14743_v7 = vld [vmem:[#allocation2 + $0xb4] sm:$0xff]   ;;  %v7055_v17 = vsel %vm1148_vm4, %v7053_v42, %v7054_v31 }
 0x31e   : > { %v14741_v15 = vld [vmem:[#allocation2 + $0xb8] sm:$0xf]  ;;  %18279 = vst [vmem:[#allocation115_spill] sm:$0xff] %v14743_v7  ;;  %v14745_v59 = vpop.permute.xlu0 %4269  ;;  %v5990_v27 = vld [vmem:[#allocation2 + $0x24] sm:$0xe]  ;;  %18281 = vst [vmem:[#allocation117_spill] sm:$0xff] %v14761_v26 }
 0x31f   : > { %18278 = vst [vmem:[#allocation114_spill] sm:$0xff] %v14741_v15  ;;  %v14749_v21 = vld [vmem:[#allocation2 + $0xb4] sm:$0xf]  ;;  %4175 = vrot.lane.b32.xlu1 %v14723_v54, %s12835_s16  ;;  %v11762_v15 = vcombine.low %v6053_v46, %v14682_v9  ;;  %v12549_v7 = vld [vmem:[%s18063_s7] sm:$0xff]   ;;  %18283 = vst [vmem:[#allocation119_spill] sm:$0xff] %v14770_v37  ;;  %v7560_v46 = vrot.slane %v14737_v2, 1 }
 0x320   : > { %18280 = vst [vmem:[#allocation116_spill] sm:$0xff] %v14749_v21  ;;  %v14763_v0 = vld [vmem:[#allocation2 + $0xb4] sm:$0xff]   ;;  %6588 = vrot.lane.b32.xlu0 %v6546_v56, %s12834_s15  ;;  %v14775_v25 = vld [vmem:[#allocation2 + $0x2c] ss:$0 sps:$4 sm:$0x11]   ;;  %12350 = vmatprep.subr.bf16.mxu0 %v12549_v7  ;;  %v11715_v56 = vcombine.low %v5990_v27, %v14747_v8  ;;  %v4072_v31 = vrot.slane %v4070_v62, 7 }
 0x321   : > { %18282 = vst [vmem:[#allocation118_spill] sm:$0xff] %v14763_v0  ;;  %5928 = vst.msk [vmem:[#allocation2 + $0xb8] sm:$0xf] %vm3557_vm3, %v5771_v38  ;;  %v14772_v9 = vpop.permute.xlu1 %4796  ;;  %v6811_v0 = vshll.u32 %v14636_v53, 16  ;;  %12351 = vmatpush3.bf16.msra.mxu0 %v12549_v7  ;;  %v7561_v38 = vsel %vm1148_vm4, %v7559_v5, %v7560_v46  ;;  %v7050_v52 = vrot.slane %v11762_v15, 1  ;;  %v7051_v7 = vrot.slane %v14775_v25, 1 }
 0x322   : > { %5927 = vst [vmem:[#allocation2 + $0xb4] sm:$0xf] %v5926_v12  ;;  %v14777_v13 = vpop.permute.xlu0 %4794  ;;  %v12552_v12 = vld [vmem:[%s18063_s7 + $0x8] sm:$0xff]   ;;  %v6541_v15 = vrot.slane %v11715_v56, 1  ;;  %v4080_v46 = vshll.u32 %v14580_v36, 16  ;;  %v4451_v26 = vshll.u32 %v11616_v1, 16 }
 0x323   : > { %7098 = vrot.lane.b32.xlu1 %v7055_v17, %s12842_s17  ;;  %v14790_v42 = vld [vmem:[#allocation2 + $0x2c] ss:$0 sps:$4 sm:$0x11]   ;;  %v6310_v17 = vshll.u32 %v14770_v37, 16  ;;  %12352 = vmatprep.subr.bf16.mxu0 %v12552_v12  ;;  %v6813_v4 = vrot.slane %v6811_v0, 1  ;;  %v7052_v39 = vsel %vm1148_vm4, %v7050_v52, %v7051_v7  ;;  %v12555_v62 = vld [vmem:[%s18063_s7 + $0x10] sm:$0xff]  }
 0x324   : > { %7606 = vrot.lane.b32.xlu0 %v7561_v38, %s12841_s30  ;;  %v6809_v38 = vshrl.u32 %v14636_v53, 16  ;;  %v5915_v21 = vld [vmem:[#allocation2 + $0xa4] sm:$0x1]  ;;  %v6542_v56 = vrot.slane %v14790_v42, 1  ;;  %v6816_v0 = vshll.u32 %v14731_v55, 16  ;;  %v4082_v53 = vor.u32 %v4080_v46, %v14723_v54 }
 0x325   : > { %v14792_v27 = vpop.permute.xlu1 %4267  ;;  %12353 = vmatpush3.bf16.msra.mxu0 %v12552_v12  ;;  %v6312_v63 = vrot.slane %v6310_v17, 1  ;;  %v5916_v55 = vsel %vm13911_vm10, %v14582_v50, %v5915_v21  ;;  %v4073_v17 = vshll.u32 %v14669_v45, 16  ;;  %v14825_v54 = vld [vmem:[#allocation2 + $0xa4] ss:$0 sps:$4 sm:$0x11]   ;;  %v6308_v46 = vshrl.u32 %v14770_v37, 16 }
 0x326   : > { %v14796_v5 = vpop.permute.xlu0 %4265  ;;  %12354 = vmatprep.subr.bf16.mxu0 %v12555_v62  ;;  %v6543_v36 = vsel %vm1148_vm4, %v6541_v15, %v6542_v56  ;;  %v6814_v7 = vor.u32 %v6813_v4, %v6809_v38  ;;  %v12557_v15 = vld [vmem:[%s18063_s7 + $0x18] sm:$0xff]   ;;  %18285 = vst [vmem:[#allocation121_spill] sm:$0xff] %v14825_v54  ;;  %v6818_v4 = vrot.slane %v6816_v0, 1  ;;  %v6315_v38 = vshll.u32 %v14702_v23, 16  ;;  %v12561_v23 = vld [vmem:[%s18063_s7 + $0x20] ss:$0 sps:$4 sm:$0xff]  }
 0x327   : > { %4171 = vrot.lane.b32.xlu1 %v4072_v31, %s12835_s16  ;;  %v4456_v50 = vshll.u32 %v14121_v47, 16  ;;  %v4449_v56 = vshrl.u32 %v11616_v1, 16  ;;  %v14831_v45 = vld [vmem:[#allocation2 + $0xa4] ss:$0 sps:$4 sm:$0x11]   ;;  %v6313_v20 = vor.u32 %v6312_v63, %v6308_v46  ;;  %v7313_v54 = vrot.slane %v7311_v11, 1 }
 0x328   : > { %7096 = vrot.lane.b32.xlu0 %v7052_v39, %s12842_s17  ;;  %v4453_v39 = vrot.slane %v4451_v26, 1  ;;  %18286 = vst [vmem:[#allocation122_spill] sm:$0xff] %v14831_v45  ;;  %v11615_v0 = vcombine.low %v14221_v34, %v14163_v57  ;;  %5917 = vst [vmem:[#allocation2 + $0xa4] sm:$0x1] %v5916_v55  ;;  %v6317_v1 = vrot.slane %v6315_v38, 1  ;;  %v7316_v11 = vshll.u32 %v14688_v10, 16 }
 0x329   : > { %v14808_v12 = vpop.permute.xlu1 %4608  ;;  %12355 = vmatpush3.bf16.msra.mxu0 %v12555_v62  ;;  %v4075_v62 = vor.u32 %v4073_v17, %v4072_v31  ;;  %v7309_v31 = vshrl.u32 %v14655_v33, 16  ;;  %v4458_v34 = vrot.slane %v4456_v50, 1  ;;  %v7299_v57 = vshll.u32 %v14680_v19, 16  ;;  %v12510_v10 = vld [vmem:[#allocation2] sm:$0xff]  }
 0x32a   : > { %v14810_v52 = vpop.permute.xlu0 %4157  ;;  %12356 = vmatprep.subr.bf16.mxu0 %v12557_v15  ;;  %v4454_v47 = vor.u32 %v4453_v39, %v4449_v56  ;;  %v6318_v39 = vsel %vm4377_vm8, %v6313_v20, %v6317_v1  ;;  %v7318_v38 = vrot.slane %v7316_v11, 1  ;;  %v7297_v1 = vshrl.u32 %v14680_v19, 16  ;;  %v15033_v37 = vld [vmem:[#allocation2 + $0x44] ss:$0 sps:$4 sm:$0x11]  }
 0x32b   : > { %6586 = vrot.lane.b32.xlu1 %v6543_v36, %s12834_s15  ;;  %v6819_v36 = vsel %vm4377_vm8, %v6814_v7, %v6818_v4  ;;  %v7965_v7 = vsel %vm2738_vm13, %v12561_v23, 0  ;;  %v7314_v33 = vor.u32 %v7313_v54, %v7309_v31  ;;  %v4437_v4 = vshll.u32 %v11615_v0, 16 }
 0x32c   : > { %4173 = vrot.lane.b32.xlu0 %v4082_v53, %s12835_s16  ;;  %v5945_v53 = vld [vmem:[#allocation2 + $0x24] sm:$0xf]  ;;  %v4459_v46 = vsel %vm4377_vm8, %v4454_v47, %v4458_v34  ;;  %v7304_v31 = vshll.u32 %v14737_v2, 16  ;;  %v4435_v34 = vshrl.u32 %v11615_v0, 16  ;;  %vm7796_vm3 = vcmask 392192  }
 0x32d   : > { %v4605_v21 = vpop.permute.xlu1 %4604  ;;  %12357 = vmatpush3.bf16.msra.mxu0 %v12557_v15  ;;  %v14849_v55 = vcombine.low %v5945_v53, %v14747_v8  ;;  %v12511_v15 = vld [vmem:[#allocation2 + $0x8] ss:$0 sps:$4 sm:$0x11]   ;;  %v7301_v8 = vrot.slane %v7299_v57, 1  ;;  %v7319_v20 = vsel %vm4377_vm8, %v7314_v33, %v7318_v38  ;;  %v4439_v54 = vrot.slane %v4437_v4, 1 }
 0x32e   : > { %v4154_v26 = vpop.permute.xlu0 %4153  ;;  %12436 = vmatprep.subr.msk.bf16.mxu0 %vm2738_vm13, %v12561_v23  ;;  %vm5084_vm13 = vcmask 261120   ;;  %v6303_v33 = vshll.u32 %v14790_v42, 16  ;;  %v11550_v42 = vcombine.low %v13947_v16, %v13947_v16  ;;  %vm7829_vm6 = vcmask 457728  }
 0x32f   : > { %6970 = vrot.lane.b32.xlu1 %v6819_v36, %s12833_s14  ;;  %18287 = vst [vmem:[#allocation123_spill] sm:$0xff] %v14849_v55  ;;  %v6298_v36 = vshll.u32 %v14849_v55, 16  ;;  %v4860_v53 = vsel %vm2705_vm14, %v12510_v10, %v4154_v26  ;;  %v14875_v26 = vcombine.low %v14300_v24, %v14237_v49  ;;  %v6799_v24 = vshll.u32 %v14700_v51, 16 }
 0x330   : > { %4169 = vrot.lane.b32.xlu0 %v4075_v62, %s12835_s16  ;;  %v4956_v57 = vsel %vm4954_vm11, %v4860_v53, %v14796_v5  ;;  %v7306_v5 = vrot.slane %v7304_v31, 1  ;;  %v6296_v0 = vshrl.u32 %v14849_v55, 16  ;;  %v6797_v53 = vshrl.u32 %v14700_v51, 16 }
 0x331   : > { %v14843_v63 = vpop.permute.xlu1 %4159  ;;  %12359 = vmatpush3.bf16.msra.mxu0 %v7965_v7  ;;  %v6804_v31 = vshll.u32 %v14775_v25, 16  ;;  %v14918_v25 = vld [vmem:[#allocation2 + $0xbc] ss:$0 sps:$4 sm:$0x11]  }
 0x332   : > { %v14851_v17 = vpop.permute.xlu0 %4606  ;;  %v4869_v51 = vsel %vm2705_vm14, %v11550_v42, %v14843_v63  ;;  %18288 = vst [vmem:[#allocation124_spill] sm:$0xff] %v14918_v25  ;;  %v6074_v42 = vld [vmem:[#allocation2 + $0x40] sm:$0xf] }
 0x333   : > { %6459 = vrot.lane.b32.xlu1 %v6318_v39, %s12835_s16  ;;  %v6300_v39 = vrot.slane %v6298_v36, 1  ;;  %v6305_v36 = vrot.slane %v6303_v33, 1  ;;  %v6806_v63 = vrot.slane %v6804_v31, 1 }
 0x334   : > { %4622 = vrot.lane.b32.xlu0 %v4459_v46, %s12839_s19 }
 0x335   : > { %v4156_v50 = vpop.permute.xlu1 %4155 }
 0x336   : > { %v4863_v62 = vsel %vm2705_vm14, %v12511_v15, %v4156_v50  ;;  %v14858_v56 = vpop.permute.xlu0 %4277  ;;  %v4440_v15 = vor.u32 %v4439_v54, %v4435_v34  ;;  %v6301_v50 = vor.u32 %v6300_v39, %v6296_v0  ;;  %v5929_v54 = vld [vmem:[#allocation2 + $0xbc] sm:$0x1] }
 0x337   : > { %v4958_v47 = vsel %vm4954_vm11, %v4863_v62, %v14792_v27  ;;  %4295 = vrot.lane.b32.xlu1 %v14513_v32, %s12834_s15  ;;  %v4442_v27 = vshll.u32 %v14158_v29, 16  ;;  %v5930_v16 = vsel %vm13911_vm10, %v14697_v48, %v5929_v54  ;;  %v6073_v54 = vld [vmem:[#allocation2 + $0x3c] sm:$0xf]  ;;  %vm7931_vm10 = vcmask 588800  }
 0x338   : > { %v5023_v23 = vsel %vm5019_vm12, %v4958_v47, %v4605_v21  ;;  %7480 = vrot.lane.b32.xlu0 %v7319_v20, %s12843_s18  ;;  %v7302_v21 = vor.u32 %v7301_v8, %v7297_v1  ;;  %v6801_v20 = vrot.slane %v6799_v24, 1 }
 0x339   : > { %v14871_v11 = vpop.permute.xlu1 %4279  ;;  %v5088_v19 = vsel %vm5084_vm13, %v5023_v23, %v14772_v9  ;;  %v4444_v10 = vrot.slane %v4442_v27, 1  ;;  %v6306_v27 = vsel %vm4377_vm8, %v6301_v50, %v6305_v36  ;;  %v18292_v36 = vld [vmem:[#allocation59_spill] sm:$0xff] }
 0x33a   : > { %v4603_v7 = vpop.permute.xlu0 %4602  ;;  %v5155_v46 = vshll.u32 %v5088_v19, 16  ;;  %v7307_v38 = vsel %vm4377_vm8, %v7302_v21, %v7306_v5  ;;  %v6802_v39 = vor.u32 %v6801_v20, %v6797_v53  ;;  %v14920_v19 = vld [vmem:[#allocation2 + $0xbc] ss:$0 sps:$4 sm:$0x11]   ;;  %v6076_v5 = vld [vmem:[#allocation2 + $0x4c] sm:$0xf] }
 0x33b   : > { %v5021_v2 = vsel %vm5019_vm12, %v4956_v57, %v4603_v7  ;;  %4820 = vrot.lane.b32.xlu1 %v14515_v35, %s12833_s14  ;;  %v4445_v62 = vsel %vm4377_vm8, %v4440_v15, %v4444_v10  ;;  %v6013_v57 = vld [vmem:[#allocation2 + $0x48] sm:$0xf]  ;;  %v14909_v7 = vld [vmem:[#allocation2 + $0x4c] sm:$0xf]  ;;  %18289 = vst [vmem:[#allocation125_spill] sm:$0xff] %v14920_v19 }
 0x33c   : > { %v5086_v29 = vsel %vm5084_vm13, %v5021_v2, %v14777_v13  ;;  %4293 = vrot.lane.b32.xlu0 %v14875_v26, %s12834_s15  ;;  %v5157_v1 = vrot.slane %v5155_v46, 1  ;;  %v11549_v2 = vcombine.low %v13919_v60, %v13982_v58  ;;  %v14930_v48 = vcombine.low %v6013_v57, %v14909_v7  ;;  %v14932_v15 = vld [vmem:[#allocation2 + $0xbc] ss:$0 sps:$4 sm:$0x11]  }
 0x33d   : > { %v5151_v9 = vshll.u32 %v5086_v29, 16  ;;  %v14892_v4 = vpop.permute.xlu1 %4804  ;;  %v5149_v8 = vshrl.u32 %v5086_v29, 16  ;;  %18290 = vst [vmem:[#allocation126_spill] sm:$0xff] %v14932_v15  ;;  %v4962_v29 = vsel %vm4954_vm11, %v4869_v51, %v14739_v41  ;;  %5931 = vst [vmem:[#allocation2 + $0xbc] sm:$0x1] %v5930_v16  ;;  %v6807_v58 = vsel %vm4377_vm8, %v6802_v39, %v6806_v63 }
 0x33e   : > { %v14894_v35 = vpop.permute.xlu0 %4802  ;;  %v4866_v24 = vsel %vm2705_vm14, %v11549_v2, %v14810_v52  ;;  %v5027_v52 = vsel %vm5019_vm12, %v4962_v29, %v14808_v12  ;;  %v6011_v51 = vld [vmem:[#allocation2 + $0x3c] sm:$0xf]  ;;  %v5952_v2 = vld [vmem:[#allocation2 + $0x4c] sm:$0xf]  ;;  %v5993_v63 = vld [vmem:[#allocation2 + $0x48] sm:$0xe] }
 0x33f   : > { %v5153_v13 = vrot.slane %v5151_v9, 1  ;;  %7478 = vrot.lane.b32.xlu1 %v7307_v38, %s12843_s18  ;;  %v4960_v0 = vsel %vm4954_vm11, %v4866_v24, %v14745_v59  ;;  %v18293_v24 = vld [vmem:[#allocation60_spill] sm:$0xff] }
 0x340   : > { %4618 = vrot.lane.b32.xlu0 %v4445_v62, %s12839_s19  ;;  %v5025_v41 = vsel %vm5019_vm12, %v4960_v0, %v14851_v17  ;;  %v18291_v62 = vld [vmem:[#allocation66_spill] sm:$0xff]  ;;  %v15021_v15 = vld [vmem:[#allocation2 + $0x44] ss:$0 sps:$4 sm:$0x11]  }
 0x341   : > { %v14903_v47 = vpop.permute.xlu1 %6694  ;;  %v5154_v23 = vor.u32 %v5153_v13, %v5149_v8  ;;  %v14964_v20 = vcombine.low %v18291_v62, %v14264_v43 }
 0x342   : > { %v14906_v34 = vpop.permute.xlu0 %7204 }
 0x343   : > { %6457 = vrot.lane.b32.xlu1 %v6306_v27, %s12835_s16  ;;  %v5158_v21 = vsel %vm4377_vm8, %v5154_v23, %v5157_v1  ;;  %v6119_v1 = vld [vmem:[#allocation2 + $0x48] sm:$0xe]  ;;  %v14972_v27 = vcombine.low %v6073_v54, %v6074_v42 }
 0x344   : > { %4818 = vrot.lane.b32.xlu0 %v14239_v30, %s12833_s14  ;;  %12318 = vmatprep.mubr.msk.bf16.mxu1 %vm5329_vm15, %v5158_v21  ;;  %v6075_v30 = vld [vmem:[#allocation2 + $0x48] sm:$0xf]  ;;  %v6012_v21 = vld [vmem:[#allocation2 + $0x40] sm:$0xf]  ;;  %v11812_v39 = vcombine.low %v6119_v1, %v6076_v5  ;;  %v6055_v1 = vld [vmem:[#allocation2 + $0x3c] sm:$0xe] }
 0x345   : > { %v14927_v44 = vpop.permute.xlu1 %4275  ;;  %v14951_v46 = vcombine.low %v6075_v30, %v6076_v5  ;;  %v14985_v30 = vld [vmem:[#allocation2 + $0x50] ss:$0 sps:$4 sm:$0x11]   ;;  %v6056_v5 = vld [vmem:[#allocation2 + $0x48] sm:$0xe] }
 0x346   : > { %v14938_v60 = vpop.permute.xlu0 %4273  ;;  %v11765_v62 = vcombine.low %v6056_v5, %v14909_v7  ;;  %v15014_v5 = vld [vmem:[#allocation2 + $0x40] sm:$0xf] }
 0x347   : > { %6702 = vrot.lane.b32.xlu1 %v14930_v48, %s12839_s19 }
 0x348   : > { %6968 = vrot.lane.b32.xlu0 %v6807_v58, %s12833_s14  ;;  %v4488_v58 = vshrl.u32 %v14513_v32, 16  ;;  %v7059_v7 = vrot.slane %v11765_v62, 1 }
 0x349   : > { %v4801_v33 = vpop.permute.xlu1 %4800 }
 0x34a   : > { %v5092_v9 = vsel %vm5084_vm13, %v5027_v52, %v4801_v33  ;;  %v4799_v10 = vpop.permute.xlu0 %4798  ;;  %v14989_v52 = vcombine.low %v6011_v51, %v6012_v21  ;;  %v7568_v33 = vrot.slane %v11812_v39, 1 }
 0x34b   : > { %v5090_v38 = vsel %vm5084_vm13, %v5025_v41, %v4799_v10  ;;  %4291 = vrot.lane.b32.xlu1 %v14245_v22, %s12834_s15  ;;  %v5165_v50 = vshll.u32 %v5092_v9, 16  ;;  %v11718_v41 = vcombine.low %v5993_v63, %v5952_v2  ;;  %v6118_v9 = vld [vmem:[#allocation2 + $0x3c] sm:$0xe]  ;;  %v15008_v63 = vld [vmem:[#allocation2 + $0x44] ss:$0 sps:$4 sm:$0x11]  }
 0x34c   : > { %v5161_v8 = vshll.u32 %v5090_v38, 16  ;;  %7212 = vrot.lane.b32.xlu0 %v14951_v46, %s12840_s22  ;;  %v5159_v12 = vshrl.u32 %v5090_v38, 16  ;;  %v4474_v38 = vshrl.u32 %v14245_v22, 16 }
 0x34d   : > { %v14958_v59 = vpop.permute.xlu1 %4616  ;;  %v5167_v53 = vrot.slane %v5165_v50, 1  ;;  %v7569_v50 = vrot.slane %v14985_v30, 1 }
 0x34e   : > { %v5163_v13 = vrot.slane %v5161_v8, 1  ;;  %v14960_v17 = vpop.permute.xlu0 %6692  ;;  %v4091_v8 = vshrl.u32 %v14875_v26, 16 }
 0x34f   : > { %4816 = vrot.lane.b32.xlu1 %v18292_v36, %s12833_s14  ;;  %v7570_v54 = vsel %vm1148_vm4, %v7568_v33, %v7569_v50  ;;  %v6550_v36 = vrot.slane %v11718_v41, 1 }
 0x350   : > { %v5164_v23 = vor.u32 %v5163_v13, %v5159_v12  ;;  %4289 = vrot.lane.b32.xlu0 %v14964_v20, %s12834_s15  ;;  %v14999_v12 = vld [vmem:[#allocation2 + $0x50] ss:$0 sps:$4 sm:$0x11]   ;;  %v4093_v51 = vrot.slane %v4091_v8, 7  ;;  %v7566_v8 = vrot.slane %v15008_v63, 1 }
 0x351   : > { %v14970_v31 = vpop.permute.xlu1 %4612  ;;  %v6551_v39 = vrot.slane %v14999_v12, 1 }
 0x352   : > { %v14974_v57 = vpop.permute.xlu0 %7604  ;;  %v5168_v16 = vsel %vm4377_vm8, %v5164_v23, %v5167_v53  ;;  %v11811_v53 = vcombine.low %v6118_v9, %v6074_v42  ;;  %v12531_v23 = vld [vmem:[#allocation2 + $0x50] ss:$0 sps:$4 sm:$0x11]   ;;  %v11764_v42 = vcombine.low %v6055_v1, %v6012_v21  ;;  %v5992_v9 = vld [vmem:[#allocation2 + $0x3c] sm:$0xe] }
 0x353   : > { %7210 = vrot.lane.b32.xlu1 %v14972_v27, %s12840_s22  ;;  %12319 = vmatmul.mubr.msk.bf16.vlgmr.msra.gmra.mrb[0].mxu1 %vm5329_vm15, %v5168_v16  ;;  %v6552_v33 = vsel %vm1148_vm4, %v6550_v36, %v6551_v39  ;;  %v11717_v21 = vcombine.low %v5992_v9, %v15014_v5 }
 0x354   : > { %4814 = vrot.lane.b32.xlu0 %v18293_v24, %s12833_s14  ;;  %v7565_v41 = vrot.slane %v11811_v53, 1  ;;  %v6835_v53 = vshll.u32 %v14930_v48, 16  ;;  %v7056_v39 = vrot.slane %v11764_v42, 1 }
 0x355   : > { %v14982_v29 = vpop.permute.xlu1 %4167 }
 0x356   : > { %v14987_v0 = vpop.permute.xlu0 %6584  ;;  %v7567_v1 = vsel %vm1148_vm4, %v7565_v41, %v7566_v8  ;;  %v6837_v25 = vrot.slane %v6835_v53, 1  ;;  %v18296_v41 = vld [vmem:[#allocation29_spill] sm:$0xff] }
 0x357   : > { %18294 = vst [vmem:[#allocation66_spill] sm:$0xff] %v14987_v0  ;;  %4632 = vrot.lane.b32.xlu1 %v4488_v58, %s12839_s19  ;;  %v5951_v58 = vld [vmem:[#allocation2 + $0x48] sm:$0xf]  ;;  %v11552_v42 = vcombine.low %v18296_v41, %v18296_v41 }
 0x358   : > { %6700 = vrot.lane.b32.xlu0 %v14989_v52, %s12839_s19  ;;  %v15023_v62 = vcombine.low %v5951_v58, %v5952_v2 }
 0x359   : > { %v14994_v10 = vpop.permute.xlu1 %7094 }
 0x35a   : > { %v15001_v13 = vpop.permute.xlu0 %7092 }
 0x35b   : > { %4628 = vrot.lane.b32.xlu1 %v4474_v38, %s12839_s19  ;;  %v7060_v38 = vrot.slane %v12531_v23, 1 }
 0x35c   : > { %7612 = vrot.lane.b32.xlu0 %v7570_v54, %s12841_s30  ;;  %v4084_v54 = vshrl.u32 %v14964_v20, 16 }
 0x35d   : > { %v4164_v16 = vpop.permute.xlu1 %4163  ;;  %v7061_v36 = vsel %vm1148_vm4, %v7059_v7, %v7060_v38  ;;  %v7057_v7 = vrot.slane %v15021_v15, 1  ;;  %v6547_v38 = vrot.slane %v11717_v21, 1  ;;  %v6840_v21 = vshll.u32 %v12531_v23, 16 }
 0x35e   : > { %v15010_v24 = vpop.permute.xlu0 %4165  ;;  %v4086_v58 = vrot.slane %v4084_v54, 7  ;;  %v6548_v54 = vrot.slane %v15033_v37, 1  ;;  %v4875_v53 = vsel %vm2705_vm14, %v11552_v42, %v4164_v16  ;;  %v6332_v16 = vshrl.u32 %v15023_v62, 16  ;;  %v5949_v42 = vld [vmem:[#allocation2 + $0x3c] sm:$0xf] }
 0x35f   : > { %4183 = vrot.lane.b32.xlu1 %v4093_v51, %s12835_s16  ;;  %v6842_v23 = vrot.slane %v6840_v21, 1  ;;  %v18299_v21 = vld [vmem:[#allocation67_spill] sm:$0xff] }
 0x360   : > { %6592 = vrot.lane.b32.xlu0 %v6552_v33, %s12834_s15  ;;  %v18295_v33 = vld [vmem:[#allocation61_spill] sm:$0xff]  ;;  %v6549_v41 = vsel %vm1148_vm4, %v6547_v38, %v6548_v54  ;;  %v6339_v38 = vshll.u32 %v14999_v12, 16 }
 0x361   : > { %v15017_v50 = vpop.permute.xlu1 %6582  ;;  %v11618_v19 = vcombine.low %v18295_v33, %v14237_v49  ;;  %v7058_v49 = vsel %vm1148_vm4, %v7056_v39, %v7057_v7  ;;  %v6833_v33 = vshrl.u32 %v14930_v48, 16  ;;  %v4966_v48 = vsel %vm4954_vm11, %v4875_v53, %v14927_v44 }
 0x362   : > { %v4162_v45 = vpop.permute.xlu0 %4161  ;;  %v11617_v53 = vcombine.low %v18299_v21, %v14264_v43  ;;  %v5031_v12 = vsel %vm5019_vm12, %v4966_v48, %v14970_v31  ;;  %v7333_v43 = vshrl.u32 %v14951_v46, 16  ;;  %v7323_v31 = vshll.u32 %v14972_v27, 16 }
 0x363   : > { %7102 = vrot.lane.b32.xlu1 %v7061_v36, %s12842_s17  ;;  %v6334_v36 = vshll.u32 %v15023_v62, 16  ;;  %v4479_v8 = vshll.u32 %v11618_v19, 16  ;;  %v6838_v39 = vor.u32 %v6837_v25, %v6833_v33  ;;  %v18298_v25 = vld [vmem:[#allocation30_spill] sm:$0xff] }
 0x364   : > { %7610 = vrot.lane.b32.xlu0 %v7567_v1, %s12841_s30  ;;  %v4094_v1 = vshll.u32 %v14875_v26, 16  ;;  %v7335_v26 = vshll.u32 %v14951_v46, 16  ;;  %v4465_v48 = vshll.u32 %v11617_v53, 16 }
 0x365   : > { %v15035_v2 = vpop.permute.xlu1 %6966  ;;  %v6336_v7 = vrot.slane %v6334_v36, 1  ;;  %v4481_v0 = vrot.slane %v4479_v8, 1  ;;  %v4484_v8 = vshll.u32 %v14513_v32, 16  ;;  %v6843_v44 = vsel %vm4377_vm8, %v6838_v39, %v6842_v23  ;;  %v18300_v23 = vld [vmem:[#allocation7_spill] sm:$0xff] }
 0x366   : > { %v15038_v9 = vpop.permute.xlu0 %4614  ;;  %v4096_v6 = vor.u32 %v4094_v1, %v4093_v51  ;;  %v18297_v51 = vld [vmem:[#allocation31_spill] sm:$0xff]  ;;  %v15078_v32 = vcombine.low %v5949_v42, %v15014_v5  ;;  %v6341_v39 = vrot.slane %v6339_v38, 1 }
 0x367   : > { %4179 = vrot.lane.b32.xlu1 %v4086_v58, %s12835_s16  ;;  %v11551_v36 = vcombine.low %v18298_v25, %v18297_v51 }
 0x368   : > { %7100 = vrot.lane.b32.xlu0 %v7058_v49, %s12842_s17  ;;  %v4087_v49 = vshll.u32 %v14964_v20, 16  ;;  %v4477_v20 = vshrl.u32 %v11618_v19, 16  ;;  %v7337_v19 = vrot.slane %v7335_v26, 1 }
 0x369   : > { %v15050_v55 = vpop.permute.xlu1 %6455 }
 0x36a   : > { %v15052_v28 = vpop.permute.xlu0 %7476  ;;  %v4089_v33 = vor.u32 %v4087_v49, %v4086_v58  ;;  %v4482_v51 = vor.u32 %v4481_v0, %v4477_v20  ;;  %v7340_v49 = vshll.u32 %v14985_v30, 16  ;;  %v7338_v25 = vor.u32 %v7337_v19, %v7333_v43  ;;  %v18303_v19 = vld [vmem:[#allocation63_spill] sm:$0xff] }
 0x36b   : > { %6590 = vrot.lane.b32.xlu1 %v6549_v41, %s12834_s15  ;;  %v4872_v41 = vsel %vm2705_vm14, %v11551_v36, %v4162_v45  ;;  %v5096_v45 = vsel %vm5084_vm13, %v5031_v12, %v14892_v4  ;;  %v4467_v12 = vrot.slane %v4465_v48, 1 }
 0x36c   : > { %4181 = vrot.lane.b32.xlu0 %v4096_v6, %s12835_s16  ;;  %v6337_v6 = vor.u32 %v6336_v7, %v6332_v16  ;;  %v4486_v7 = vrot.slane %v4484_v8, 1  ;;  %v4964_v0 = vsel %vm4954_vm11, %v4872_v41, %v14938_v60  ;;  %v18301_v16 = vld [vmem:[#allocation3_spill] sm:$0xff]  ;;  %v7328_v60 = vshll.u32 %v15008_v63, 16 }
 0x36d   : > { %v15065_v54 = vpop.permute.xlu1 %4287  ;;  %v7637_v38 = vsel %vm2705_vm14, %v18301_v16, %v18300_v23  ;;  %v7342_v20 = vrot.slane %v7340_v49, 1  ;;  %v5175_v8 = vshll.u32 %v5096_v45, 16  ;;  %v6322_v41 = vshll.u32 %v15078_v32, 16  ;;  %v18305_v49 = vld [vmem:[#allocation68_spill] sm:$0xff] }
 0x36e   : > { %v15068_v1 = vpop.permute.xlu0 %4285  ;;  %v6342_v26 = vsel %vm4377_vm8, %v6337_v6, %v6341_v39  ;;  %v4487_v30 = vsel %vm4377_vm8, %v4482_v51, %v4486_v7  ;;  %v7321_v39 = vshrl.u32 %v14972_v27, 16  ;;  %v18304_v7 = vld [vmem:[#allocation37_spill] sm:$0xff] }
 0x36f   : > { %6974 = vrot.lane.b32.xlu1 %v6843_v44, %s12833_s14  ;;  %v7325_v44 = vrot.slane %v7323_v31, 1  ;;  %v7343_v63 = vsel %vm4377_vm8, %v7338_v25, %v7342_v20  ;;  %v11554_v43 = vcombine.low %v18304_v7, %v18304_v7  ;;  %v18306_v31 = vld [vmem:[#allocation74_spill] sm:$0xff]  ;;  %v5177_v23 = vrot.slane %v5175_v8, 1 }
 0x370   : > { %4177 = vrot.lane.b32.xlu0 %v4089_v33, %s12835_s16  ;;  %v18302_v33 = vld [vmem:[#allocation6_spill] sm:$0xff]  ;;  %v15117_v45 = vcombine.low %v18306_v31, %v18305_v49  ;;  %v6324_v25 = vrot.slane %v6322_v41, 1  ;;  %v6327_v20 = vshll.u32 %v15033_v37, 16  ;;  %v6821_v31 = vshrl.u32 %v14989_v52, 16 }
 0x371   : > { %v15081_v58 = vpop.permute.xlu1 %4812  ;;  %v7669_v6 = vsel %vm4954_vm11, %v7637_v38, %v18302_v33  ;;  %v7326_v16 = vor.u32 %v7325_v44, %v7321_v39  ;;  %v4470_v38 = vshll.u32 %v14245_v22, 16  ;;  %v18309_v39 = vld [vmem:[#allocation43_spill] sm:$0xff] }
 0x372   : > { %v4611_v5 = vpop.permute.xlu0 %4610  ;;  %v7701_v27 = vsel %vm5019_vm12, %v7669_v6, %v14960_v17  ;;  %v6320_v17 = vshrl.u32 %v15078_v32, 16 }
 0x373   : > { %v5029_v46 = vsel %vm5019_vm12, %v4964_v0, %v4611_v5  ;;  %6463 = vrot.lane.b32.xlu1 %v6342_v26, %s12835_s16  ;;  %v7330_v0 = vrot.slane %v7328_v60, 1  ;;  %v4463_v5 = vshrl.u32 %v11617_v53, 16  ;;  %v6823_v60 = vshll.u32 %v14989_v52, 16 }
 0x374   : > { %v5094_v4 = vsel %vm5084_vm13, %v5029_v46, %v14894_v35  ;;  %4630 = vrot.lane.b32.xlu0 %v4487_v30, %s12839_s19  ;;  %v4472_v33 = vrot.slane %v4470_v38, 1 }
 0x375   : > { %v5171_v36 = vshll.u32 %v5094_v4, 16  ;;  %v15101_v42 = vpop.permute.xlu1 %6453  ;;  %v5169_v51 = vshrl.u32 %v5094_v4, 16  ;;  %v4468_v30 = vor.u32 %v4467_v12, %v4463_v5  ;;  %v7331_v12 = vsel %vm4377_vm8, %v7326_v16, %v7330_v0 }
 0x376   : > { %v15105_v21 = vpop.permute.xlu0 %4810  ;;  %v6828_v0 = vshll.u32 %v15021_v15, 16 }
 0x377   : > { %v5173_v35 = vrot.slane %v5171_v36, 1  ;;  %4303 = vrot.lane.b32.xlu1 %v18303_v19, %s12834_s15  ;;  %v18307_v36 = vld [vmem:[#allocation64_spill] sm:$0xff]  ;;  %v4473_v37 = vsel %vm4377_vm8, %v4468_v30, %v4472_v33 }
 0x378   : > { %7484 = vrot.lane.b32.xlu0 %v7343_v63, %s12843_s18  ;;  %v18308_v63 = vld [vmem:[#allocation39_spill] sm:$0xff] }
 0x379   : > { %v5174_v26 = vor.u32 %v5173_v35, %v5169_v51  ;;  %v15119_v48 = vpop.permute.xlu1 %6698  ;;  %v6325_v51 = vor.u32 %v6324_v25, %v6320_v17  ;;  %v6825_v35 = vrot.slane %v6823_v60, 1  ;;  %v11553_v7 = vcombine.low %v18309_v39, %v18308_v63  ;;  %v18311_v25 = vld [vmem:[#allocation84_spill] sm:$0xff]  ;;  %v15194_v63 = vld [vmem:[#allocation2 + $0x5c] ss:$0 sps:$4 sm:$0x11]  }
 0x37a   : > { %v6965_v46 = vpop.permute.xlu0 %6964 }
 0x37b   : > { %v7733_v4 = vsel %vm5084_vm13, %v7701_v27, %v6965_v46  ;;  %4828 = vrot.lane.b32.xlu1 %v18307_v36, %s12833_s14  ;;  %v5178_v53 = vsel %vm4377_vm8, %v5174_v26, %v5177_v23  ;;  %v6826_v23 = vor.u32 %v6825_v35, %v6821_v31 }
 0x37c   : > { %v7765_v22 = vsel %vm5329_vm15, %v7733_v4, %v15001_v13  ;;  %4301 = vrot.lane.b32.xlu0 %v15117_v45, %s12834_s15  ;;  %12322 = vmatprep.mubr.msk.bf16.mxu1 %vm5329_vm15, %v5178_v53  ;;  %v4881_v13 = vsel %vm2705_vm14, %v11554_v43, %v14982_v29  ;;  %v6329_v29 = vrot.slane %v6327_v20, 1  ;;  %v6120_v53 = vld [vmem:[#allocation2 + $0x54] sm:$0xe] }
 0x37d   : > { %v7798_v8 = vsel %vm7796_vm3, %v7765_v22, %v14906_v34  ;;  %v15138_v44 = vpop.permute.xlu1 %4283 }
 0x37e   : > { %v15142_v6 = vpop.permute.xlu0 %7208  ;;  %v7831_v41 = vsel %vm7829_vm6, %v7798_v8, %v15052_v28  ;;  %v4970_v28 = vsel %vm4954_vm11, %v4881_v13, %v14871_v11  ;;  %v6330_v26 = vsel %vm4377_vm8, %v6325_v51, %v6329_v29  ;;  %v18310_v11 = vld [vmem:[#allocation69_spill] sm:$0xff]  ;;  %v18313_v8 = vld [vmem:[#allocation76_spill] sm:$0xff]  ;;  %v6077_v13 = vld [vmem:[#allocation2 + $0x54] sm:$0xf]  ;;  %v4105_v29 = vshrl.u32 %v15117_v45, 16 }
 0x37f   : > { %7482 = vrot.lane.b32.xlu1 %v7331_v12, %s12843_s18  ;;  %v7864_v34 = vsel %vm18155_vm7, %v7831_v41, %v14974_v57  ;;  %v4878_v57 = vsel %vm2705_vm14, %v11553_v7, %v15010_v24  ;;  %v5035_v16 = vsel %vm5019_vm12, %v4970_v28, %v14958_v59  ;;  %v6830_v24 = vrot.slane %v6828_v0, 1  ;;  %v18314_v12 = vld [vmem:[#allocation85_spill] sm:$0xff]  ;;  %v18316_v0 = vld [vmem:[#allocation71_spill] sm:$0xff] }
 0x380   : > { %4626 = vrot.lane.b32.xlu0 %v4473_v37, %s12839_s19  ;;  %12360 = vmatprep.mubr.msk.bf16.mxu0 %vm7931_vm10, %v7864_v34  ;;  %v4968_v52 = vsel %vm4954_vm11, %v4878_v57, %v14858_v56  ;;  %v6078_v56 = vld [vmem:[#allocation2 + $0x58] sm:$0xf] }
 0x381   : > { %v4809_v43 = vpop.permute.xlu1 %4808  ;;  %v5033_v27 = vsel %vm5019_vm12, %v4968_v52, %v15038_v9  ;;  %v6831_v59 = vsel %vm4377_vm8, %v6826_v23, %v6830_v24  ;;  %v18312_v9 = vld [vmem:[#allocation73_spill] sm:$0xff]  ;;  %v11813_v41 = vcombine.low %v6120_v53, %v6078_v56  ;;  %v15192_v35 = vcombine.low %v6077_v13, %v6078_v56 }
 0x382   : > { %v15161_v5 = vpop.permute.xlu0 %4281  ;;  %v5100_v15 = vsel %vm5084_vm13, %v5035_v16, %v4809_v43  ;;  %v11587_v33 = vcombine.low %v18313_v8, %v18312_v9  ;;  %v18315_v43 = vld [vmem:[#allocation75_spill] sm:$0xff]  ;;  %v7572_v23 = vrot.slane %v15194_v63, 1  ;;  %v18317_v56 = vld [vmem:[#allocation77_spill] sm:$0xff] }
 0x383   : > { %6461 = vrot.lane.b32.xlu1 %v6330_v26, %s12835_s16  ;;  %v5185_v4 = vshll.u32 %v5100_v15, 16  ;;  %v7571_v28 = vrot.slane %v11813_v41, 1  ;;  %v11620_v31 = vcombine.low %v18315_v43, %v18305_v49  ;;  %v4516_v26 = vshrl.u32 %v18303_v19, 16 }
 0x384   : > { %4826 = vrot.lane.b32.xlu0 %v18310_v11, %s12833_s14  ;;  %v4107_v11 = vrot.slane %v4105_v29, 7  ;;  %v4098_v52 = vshrl.u32 %v11587_v33, 16  ;;  %v4108_v49 = vshll.u32 %v15117_v45, 16  ;;  %v11619_v53 = vcombine.low %v18317_v56, %v18312_v9 }
 0x385   : > { %v15172_v38 = vpop.permute.xlu1 %7206  ;;  %v5187_v51 = vrot.slane %v5185_v4, 1  ;;  %v7573_v15 = vsel %vm1148_vm4, %v7571_v28, %v7572_v23  ;;  %v4507_v24 = vshll.u32 %v11620_v31, 16  ;;  %v4505_v8 = vshrl.u32 %v11620_v31, 16 }
 0x386   : > { %v4807_v46 = vpop.permute.xlu0 %4806  ;;  %v4100_v4 = vrot.slane %v4098_v52, 7  ;;  %v4512_v45 = vshll.u32 %v18303_v19, 16  ;;  %v7347_v28 = vshll.u32 %v15192_v35, 16  ;;  %v4498_v23 = vshll.u32 %v18311_v25, 16  ;;  %v18318_v52 = vld [vmem:[#allocation88_spill] sm:$0xff] }
 0x387   : > { %v5098_v30 = vsel %vm5084_vm13, %v5033_v27, %v4807_v46  ;;  %4299 = vrot.lane.b32.xlu1 %v18311_v25, %s12834_s15  ;;  %v4502_v46 = vshrl.u32 %v18311_v25, 16  ;;  %v7345_v25 = vshrl.u32 %v15192_v35, 16 }
 0x388   : > { %v5181_v36 = vshll.u32 %v5098_v30, 16  ;;  %6972 = vrot.lane.b32.xlu0 %v6831_v59, %s12833_s14  ;;  %v5179_v22 = vshrl.u32 %v5098_v30, 16  ;;  %v4110_v59 = vor.u32 %v4108_v49, %v4107_v11  ;;  %v4514_v29 = vrot.slane %v4512_v45, 1 }
 0x389   : > { %v15181_v60 = vpop.permute.xlu1 %4624 }
 0x38a   : > { %v5183_v17 = vrot.slane %v5181_v36, 1  ;;  %v15183_v20 = vpop.permute.xlu0 %6696  ;;  %v4509_v36 = vrot.slane %v4507_v24, 1  ;;  %v7349_v24 = vrot.slane %v7347_v28, 1 }
 0x38b   : > { %4824 = vrot.lane.b32.xlu1 %v18314_v12, %s12833_s14 }
 0x38c   : > { %v5184_v37 = vor.u32 %v5183_v17, %v5179_v22  ;;  %4297 = vrot.lane.b32.xlu0 %v11587_v33, %s12834_s15  ;;  %v4101_v22 = vshll.u32 %v11587_v33, 16  ;;  %v4510_v41 = vor.u32 %v4509_v36, %v4505_v8  ;;  %v7352_v36 = vshll.u32 %v15194_v63, 16 }
 0x38d   : > { %v15190_v34 = vpop.permute.xlu1 %4620  ;;  %v7350_v8 = vor.u32 %v7349_v24, %v7345_v25  ;;  %v18322_v24 = vld [vmem:[#allocation89_spill] sm:$0xff] }
 0x38e   : > { %v15196_v39 = vpop.permute.xlu0 %7608  ;;  %v5188_v7 = vsel %vm4377_vm8, %v5184_v37, %v5187_v51  ;;  %v4103_v12 = vor.u32 %v4101_v22, %v4100_v4  ;;  %v4493_v51 = vshll.u32 %v11619_v53, 16  ;;  %v5953_v37 = vld [vmem:[#allocation2 + $0x54] sm:$0xf]  ;;  %v4515_v43 = vsel %vm4377_vm8, %v4510_v41, %v4514_v29  ;;  %v18321_v41 = vld [vmem:[#allocation80_spill] sm:$0xff] }
 0x38f   : > { %7214 = vrot.lane.b32.xlu1 %v15192_v35, %s12840_s22  ;;  %12323 = vmatmul.mubr.msk.bf16.gmra.mrb[4].mxu1 %vm5329_vm15, %v5188_v7  ;;  %v15230_v7 = vld [vmem:[#allocation2 + $0x58] sm:$0xf]  ;;  %v7354_v63 = vrot.slane %v7352_v36, 1 }
 0x390   : > { %4822 = vrot.lane.b32.xlu0 %v18316_v0, %s12833_s14  ;;  %v15239_v19 = vcombine.low %v5953_v37, %v15230_v7  ;;  %v4495_v31 = vrot.slane %v4493_v51, 1 }
 0x391   : > { %v15207_v57 = vpop.permute.xlu1 %4175 }
 0x392   : > { %v15211_v16 = vpop.permute.xlu0 %6588  ;;  %v6346_v49 = vshll.u32 %v15239_v19, 16  ;;  %v6344_v51 = vshrl.u32 %v15239_v19, 16 }
 0x393   : > { %4640 = vrot.lane.b32.xlu1 %v4516_v26, %s12839_s19  ;;  %v4491_v26 = vshrl.u32 %v11619_v53, 16  ;;  %v4500_v53 = vrot.slane %v4498_v23, 1 }
 0x394   : > { %7614 = vrot.lane.b32.xlu0 %v7573_v15, %s12841_s30  ;;  %v15249_v15 = vcombine.low %v14492_v40, %v18318_v52  ;;  %v15261_v40 = vld [vmem:[#allocation2 + $0x5c] ss:$0 sps:$4 sm:$0x11]   ;;  %v6348_v45 = vrot.slane %v6346_v49, 1 }
 0x395   : > { %v15217_v27 = vpop.permute.xlu1 %7098  ;;  %v6351_v37 = vshll.u32 %v15261_v40, 16 }
 0x396   : > { %v15220_v30 = vpop.permute.xlu0 %7606  ;;  %v4119_v36 = vshrl.u32 %v15249_v15, 16 }
 0x397   : > { %4636 = vrot.lane.b32.xlu1 %v4502_v46, %s12839_s19  ;;  %v18319_v46 = vld [vmem:[#allocation79_spill] sm:$0xff]  ;;  %v6353_v49 = vrot.slane %v6351_v37, 1 }
 0x398   : > { %4189 = vrot.lane.b32.xlu0 %v4110_v59, %s12835_s16  ;;  %v4496_v59 = vor.u32 %v4495_v31, %v4491_v26  ;;  %v7355_v31 = vsel %vm4377_vm8, %v7350_v8, %v7354_v63  ;;  %v6349_v26 = vor.u32 %v6348_v45, %v6344_v51  ;;  %v18325_v45 = vld [vmem:[#allocation81_spill] sm:$0xff]  ;;  %v15313_v37 = vrot.slane %v4119_v36, 7 }
 0x399   : > { %v4172_v17 = vpop.permute.xlu1 %4171 }
 0x39a   : > { %v15227_v13 = vpop.permute.xlu0 %7096  ;;  %v4501_v35 = vsel %vm4377_vm8, %v4496_v59, %v4500_v53  ;;  %v18323_v59 = vld [vmem:[#allocation38_spill] sm:$0xff]  ;;  %v6354_v8 = vsel %vm4377_vm8, %v6349_v26, %v6353_v49  ;;  %v7641_v49 = vsel %vm2705_vm14, %v14509_v14, %v15050_v55  ;;  %v4540_v14 = vshll.u32 %v18319_v46, 16 }
 0x39b   : > { %4191 = vrot.lane.b32.xlu1 %v4107_v11, %s12835_s16  ;;  %v18330_v55 = vld [vmem:[#allocation66_spill] sm:$0xff] }
 0x39c   : > { %4185 = vrot.lane.b32.xlu0 %v4103_v12, %s12835_s16 }
 0x39d   : > { %v15233_v9 = vpop.permute.xlu1 %6586 }
 0x39e   : > { %v15235_v33 = vpop.permute.xlu0 %4173 }
 0x39f   : > { %4187 = vrot.lane.b32.xlu1 %v4100_v4, %s12835_s16  ;;  %v7639_v4 = vsel %vm2705_vm14, %v14558_v61, %v15101_v42  ;;  %v18320_v61 = vld [vmem:[#allocation36_spill] sm:$0xff] }
 0x3a0   : > { %4638 = vrot.lane.b32.xlu0 %v4515_v43, %s12839_s19  ;;  %v7671_v12 = vsel %vm4954_vm11, %v7639_v4, %v15017_v50  ;;  %v11556_v42 = vcombine.low %v18320_v61, %v18320_v61  ;;  %v18324_v4 = vld [vmem:[#allocation40_spill] sm:$0xff] }
 0x3a1   : > { %v15244_v0 = vpop.permute.xlu1 %6970  ;;  %v7703_v50 = vsel %vm5019_vm12, %v7671_v12, %v14903_v47  ;;  %v11555_v47 = vcombine.low %v18324_v4, %v18323_v59 }
 0x3a2   : > { %v4170_v11 = vpop.permute.xlu0 %4169  ;;  %v4887_v29 = vsel %vm2705_vm14, %v11556_v42, %v4172_v17  ;;  %v7735_v17 = vsel %vm5084_vm13, %v7703_v50, %v15035_v2  ;;  %v18327_v2 = vld [vmem:[#allocation90_spill] sm:$0xff] }
 0x3a3   : > { %4311 = vrot.lane.b32.xlu1 %v18319_v46, %s12834_s15  ;;  %v4974_v23 = vsel %vm4954_vm11, %v4887_v29, %v15138_v44  ;;  %v18326_v44 = vld [vmem:[#allocation83_spill] sm:$0xff]  ;;  %v4884_v42 = vsel %vm2705_vm14, %v11555_v47, %v4170_v11 }
 0x3a4   : > { %4309 = vrot.lane.b32.xlu0 %v15249_v15, %s12834_s15  ;;  %v11589_v12 = vcombine.low %v18326_v44, %v18325_v45  ;;  %v5039_v61 = vsel %vm5019_vm12, %v4974_v23, %v15190_v34  ;;  %v4972_v29 = vsel %vm4954_vm11, %v4884_v42, %v15161_v5  ;;  %v4122_v5 = vshll.u32 %v15249_v15, 16  ;;  %v18329_v15 = vld [vmem:[#allocation86_spill] sm:$0xff] }
 0x3a5   : > { %v15263_v56 = vpop.permute.xlu1 %6459  ;;  %v5104_v34 = vsel %vm5084_vm13, %v5039_v61, %v15081_v58  ;;  %v18328_v58 = vld [vmem:[#allocation82_spill] sm:$0xff]  ;;  %v4544_v44 = vshrl.u32 %v18319_v46, 16  ;;  %v7673_v42 = vsel %vm4954_vm11, %v7641_v49, %v18330_v55  ;;  %v18333_v49 = vld [vmem:[#allocation55_spill] sm:$0xff] }
 0x3a6   : > { %v15265_v22 = vpop.permute.xlu0 %4622  ;;  %v4112_v50 = vshrl.u32 %v11589_v12, 16  ;;  %v4124_v59 = vor.u32 %v4122_v5, %v15313_v37  ;;  %v4115_v61 = vshll.u32 %v11589_v12, 16 }
 0x3a7   : > { %4836 = vrot.lane.b32.xlu1 %v18321_v41, %s12833_s14  ;;  %v11622_v41 = vcombine.low %v18327_v2, %v18318_v52 }
 0x3a8   : > { %4634 = vrot.lane.b32.xlu0 %v4501_v35, %s12839_s19  ;;  %v7767_v35 = vsel %vm5329_vm15, %v7735_v17, %v14994_v10 }
 0x3a9   : > { %v15278_v28 = vpop.permute.xlu1 %4295  ;;  %v7800_v63 = vsel %vm7796_vm3, %v7767_v35, %v15172_v38  ;;  %v4535_v38 = vshll.u32 %v11622_v41, 16 }
 0x3aa   : > { %v15282_v43 = vpop.permute.xlu0 %7480 }
 0x3ab   : > { %7486 = vrot.lane.b32.xlu1 %v7355_v31, %s12843_s18  ;;  %v4537_v36 = vrot.slane %v4535_v38, 1  ;;  %v4542_v38 = vrot.slane %v4540_v14, 1 }
 0x3ac   : > { %4834 = vrot.lane.b32.xlu0 %v18322_v24, %s12833_s14 }
 0x3ad   : > { %v15294_v25 = vpop.permute.xlu1 %4820 }
 0x3ae   : > { %v15297_v53 = vpop.permute.xlu0 %4293 }
 0x3af   : > { %6465 = vrot.lane.b32.xlu1 %v6354_v8, %s12835_s16  ;;  %v11621_v8 = vcombine.low %v18329_v15, %v18325_v45 }
 0x3b0   : > { %4305 = vrot.lane.b32.xlu0 %v11589_v12, %s12834_s15 }
 0x3b1   : > { %v7479_v51 = vpop.permute.xlu1 %7478 }
 0x3b2   : > { %v7833_v11 = vsel %vm7829_vm6, %v7800_v63, %v7479_v51  ;;  %v4619_v52 = vpop.permute.xlu0 %4618  ;;  %v4533_v51 = vshrl.u32 %v11622_v41, 16 }
 0x3b3   : > { %v7866_v10 = vsel %vm18155_vm7, %v7833_v11, %v15220_v30  ;;  %v5037_v31 = vsel %vm5019_vm12, %v4972_v29, %v4619_v52  ;;  %4307 = vrot.lane.b32.xlu1 %v14648_v18, %s12834_s15  ;;  %v5195_v30 = vshll.u32 %v5104_v34, 16  ;;  %v4521_v29 = vshll.u32 %v11621_v8, 16  ;;  %v18331_v52 = vld [vmem:[#allocation48_spill] sm:$0xff] }
 0x3b4   : > { %v5102_v26 = vsel %vm5084_vm13, %v5037_v31, %v15105_v21  ;;  %4830 = vrot.lane.b32.xlu0 %v18328_v58, %s12833_s14  ;;  %12361 = vmatmul.mubr.msk.bf16.vlgmr.msra.gmra.mrb[32].mxu0 %vm7931_vm10, %v7866_v10  ;;  %v4114_v21 = vrot.slane %v4112_v50, 7  ;;  %v4538_v46 = vor.u32 %v4537_v36, %v4533_v51  ;;  %v11558_v50 = vcombine.low %v18331_v52, %v18331_v52 }
 0x3b5   : > { %v5191_v23 = vshll.u32 %v5102_v26, 16  ;;  %v15331_v24 = vpop.permute.xlu1 %6457  ;;  %v5189_v4 = vshrl.u32 %v5102_v26, 16  ;;  %v5197_v63 = vrot.slane %v5195_v30, 1  ;;  %v4530_v31 = vshrl.u32 %v14648_v18, 16  ;;  %v18332_v30 = vld [vmem:[#allocation49_spill] sm:$0xff] }
 0x3b6   : > { %v15336_v17 = vpop.permute.xlu0 %4818  ;;  %v4117_v45 = vor.u32 %v4115_v61, %v4114_v21  ;;  %v4893_v26 = vsel %vm2705_vm14, %v11558_v50, %v15207_v57  ;;  %v4543_v5 = vsel %vm4377_vm8, %v4538_v46, %v4542_v38  ;;  %v18337_v46 = vld [vmem:[#allocation100_spill] sm:$0xff]  ;;  %v18338_v50 = vld [vmem:[#allocation101_spill] sm:$0xff] }
 0x3b7   : > { %v5193_v47 = vrot.slane %v5191_v23, 1  ;;  %4832 = vrot.lane.b32.xlu1 %v14657_v3, %s12833_s14  ;;  %v7705_v3 = vsel %vm5019_vm12, %v7673_v42, %v15183_v20  ;;  %v4523_v23 = vrot.slane %v4521_v29, 1  ;;  %v4978_v57 = vsel %vm4954_vm11, %v4893_v26, %v15065_v54  ;;  %v18340_v38 = vld [vmem:[#allocation96_spill] sm:$0xff]  ;;  %v18341_v26 = vld [vmem:[#allocation105_spill] sm:$0xff] }
 0x3b8   : > { %4197 = vrot.lane.b32.xlu0 %v4124_v59, %s12835_s16  ;;  %v11557_v59 = vcombine.low %v18333_v49, %v18332_v30  ;;  %v5043_v55 = vsel %vm5019_vm12, %v4978_v57, %v15181_v60  ;;  %v18342_v49 = vld [vmem:[#allocation120_spill] sm:$0xff]  ;;  %v18343_v57 = vld [vmem:[#allocation102_spill] sm:$0xff] }
 0x3b9   : > { %v5194_v2 = vor.u32 %v5193_v47, %v5189_v4  ;;  %v15348_v35 = vpop.permute.xlu1 %6702  ;;  %v4526_v47 = vshll.u32 %v14648_v18, 16 }
 0x3ba   : > { %v6969_v34 = vpop.permute.xlu0 %6968  ;;  %v4890_v36 = vsel %vm2705_vm14, %v11557_v59, %v15235_v33 }
 0x3bb   : > { %v7737_v11 = vsel %vm5084_vm13, %v7705_v3, %v6969_v34  ;;  %4648 = vrot.lane.b32.xlu1 %v4544_v44, %s12839_s19  ;;  %v5198_v12 = vsel %vm4377_vm8, %v5194_v2, %v5197_v63  ;;  %v18335_v44 = vld [vmem:[#allocation99_spill] sm:$0xff]  ;;  %v4976_v18 = vsel %vm4954_vm11, %v4890_v36, %v15068_v1 }
 0x3bc   : > { %v7769_v10 = vsel %vm5329_vm15, %v7737_v11, %v15227_v13  ;;  %4193 = vrot.lane.b32.xlu0 %v4117_v45, %s12835_s16  ;;  %12326 = vmatprep.mubr.msk.bf16.mxu1 %vm5329_vm15, %v5198_v12  ;;  %v5041_v42 = vsel %vm5019_vm12, %v4976_v18, %v15265_v22  ;;  %v18336_v11 = vld [vmem:[#allocation95_spill] sm:$0xff] }
 0x3bd   : > { %v7802_v20 = vsel %vm7796_vm3, %v7769_v10, %v15142_v6  ;;  %v15363_v41 = vpop.permute.xlu1 %4291  ;;  %v18339_v10 = vld [vmem:[#allocation98_spill] sm:$0xff] }
 0x3be   : > { %v15368_v58 = vpop.permute.xlu0 %7212  ;;  %v7835_v13 = vsel %vm7829_vm6, %v7802_v20, %v15282_v43  ;;  %v4519_v43 = vshrl.u32 %v11621_v8, 16  ;;  %v4528_v8 = vrot.slane %v4526_v47, 1  ;;  %v11591_v20 = vcombine.low %v18339_v10, %v18338_v50 }
 0x3bf   : > { %4644 = vrot.lane.b32.xlu1 %v4530_v31, %s12839_s19  ;;  %v7868_v6 = vsel %vm18155_vm7, %v7835_v13, %v15196_v39  ;;  %v18334_v39 = vld [vmem:[#allocation97_spill] sm:$0xff]  ;;  %v4554_v10 = vshll.u32 %v18342_v49, 16 }
 0x3c0   : > { %4646 = vrot.lane.b32.xlu0 %v4543_v5, %s12839_s19  ;;  %12364 = vmatprep.mubr.msk.bf16.mxu0 %vm7931_vm10, %v7868_v6  ;;  %v11592_v61 = vcombine.low %v18335_v44, %v18334_v39  ;;  %v4524_v14 = vor.u32 %v4523_v23, %v4519_v43  ;;  %v11624_v13 = vcombine.low %v18341_v26, %v18334_v39  ;;  %v4126_v30 = vshrl.u32 %v11591_v20, 16  ;;  %v18344_v44 = vld [vmem:[#allocation121_spill] sm:$0xff] }
 0x3c1   : > { %v4817_v4 = vpop.permute.xlu1 %4816 }
 0x3c2   : > { %v15385_v15 = vpop.permute.xlu0 %4289  ;;  %v5108_v54 = vsel %vm5084_vm13, %v5043_v55, %v4817_v4  ;;  %v4529_v60 = vsel %vm4377_vm8, %v4524_v14, %v4528_v8  ;;  %v4133_v31 = vshrl.u32 %v11592_v61, 16  ;;  %v4563_v59 = vshll.u32 %v11624_v13, 16  ;;  %v18345_v55 = vld [vmem:[#allocation103_spill] sm:$0xff] }
 0x3c3   : > { %4199 = vrot.lane.b32.xlu1 %v15313_v37, %s12835_s16  ;;  %v5205_v63 = vshll.u32 %v5108_v54, 16  ;;  %v4136_v4 = vshll.u32 %v11592_v61, 16  ;;  %v4128_v39 = vrot.slane %v4126_v30, 7  ;;  %v11623_v18 = vcombine.low %v18345_v55, %v18338_v50  ;;  %v18348_v30 = vld [vmem:[#allocation123_spill] sm:$0xff] }
 0x3c4   : > { %4317 = vrot.lane.b32.xlu0 %v11592_v61, %s12834_s15  ;;  %v4135_v23 = vrot.slane %v4133_v31, 7  ;;  %v4565_v14 = vrot.slane %v4563_v59, 1  ;;  %v4129_v54 = vshll.u32 %v11591_v20, 16  ;;  %v4561_v61 = vshrl.u32 %v11624_v13, 16  ;;  %v18346_v31 = vld [vmem:[#allocation112_spill] sm:$0xff] }
 0x3c5   : > { %v15397_v33 = vpop.permute.xlu1 %7210  ;;  %v5207_v22 = vrot.slane %v5205_v63, 1  ;;  %v4547_v50 = vshrl.u32 %v11623_v18, 16  ;;  %v7643_v59 = vsel %vm2705_vm14, %v18348_v30, %v15331_v24 }
 0x3c6   : > { %v4815_v2 = vpop.permute.xlu0 %4814  ;;  %v4138_v36 = vor.u32 %v4136_v4, %v4135_v23  ;;  %v4566_v63 = vor.u32 %v4565_v14, %v4561_v61  ;;  %v4556_v4 = vrot.slane %v4554_v10, 1 }
 0x3c7   : > { %v5106_v37 = vsel %vm5084_vm13, %v5041_v42, %v4815_v2  ;;  %4195 = vrot.lane.b32.xlu1 %v4114_v21, %s12835_s16  ;;  %v4572_v42 = vshrl.u32 %v18336_v11, 16  ;;  %v4568_v2 = vshll.u32 %v18336_v11, 16 }
 0x3c8   : > { %v5201_v51 = vshll.u32 %v5106_v37, 16  ;;  %4642 = vrot.lane.b32.xlu0 %v4529_v60, %s12839_s19  ;;  %v5199_v3 = vshrl.u32 %v5106_v37, 16  ;;  %v4131_v60 = vor.u32 %v4129_v54, %v4128_v39 }
 0x3c9   : > { %v15405_v1 = vpop.permute.xlu1 %4632 }
 0x3ca   : > { %v5203_v34 = vrot.slane %v5201_v51, 1  ;;  %v15407_v45 = vpop.permute.xlu0 %6700  ;;  %v4549_v51 = vshll.u32 %v11623_v18, 16 }
 0x3cb   : > { %4319 = vrot.lane.b32.xlu1 %v18336_v11, %s12834_s15 }
 0x3cc   : > { %v5204_v12 = vor.u32 %v5203_v34, %v5199_v3  ;;  %4842 = vrot.lane.b32.xlu0 %v18337_v46, %s12833_s14  ;;  %v4558_v34 = vshrl.u32 %v18342_v49, 16  ;;  %v4551_v46 = vrot.slane %v4549_v51, 1 }
 0x3cd   : > { %v15413_v21 = vpop.permute.xlu1 %4628 }
 0x3ce   : > { %v15415_v29 = vpop.permute.xlu0 %7612  ;;  %v5208_v52 = vsel %vm4377_vm8, %v5204_v12, %v5207_v22  ;;  %v4570_v22 = vrot.slane %v4568_v2, 1  ;;  %v4552_v13 = vor.u32 %v4551_v46, %v4547_v50  ;;  %v18353_v2 = vld [vmem:[#allocation54_spill] sm:$0xff]  ;;  %v18356_v50 = vld [vmem:[#allocation109_spill] sm:$0xff] }
 0x3cf   : > { %4844 = vrot.lane.b32.xlu1 %v18340_v38, %s12833_s14  ;;  %12327 = vmatmul.mubr.msk.bf16.gmra.mrb[8].mxu1 %vm5329_vm15, %v5208_v52  ;;  %v18347_v38 = vld [vmem:[#allocation110_spill] sm:$0xff] }
 0x3d0   : > { %4313 = vrot.lane.b32.xlu0 %v11591_v20, %s12834_s15  ;;  %v4571_v11 = vsel %vm4377_vm8, %v4566_v63, %v4570_v22  ;;  %v11594_v26 = vcombine.low %v18347_v38, %v18346_v31  ;;  %v18355_v22 = vld [vmem:[#allocation116_spill] sm:$0xff] }
 0x3d1   : > { %v15426_v5 = vpop.permute.xlu1 %4183 }
 0x3d2   : > { %v15428_v6 = vpop.permute.xlu0 %6592 }
 0x3d3   : > { %4315 = vrot.lane.b32.xlu1 %v18342_v49, %s12834_s15  ;;  %v7675_v49 = vsel %vm4954_vm11, %v7643_v59, %v15233_v9  ;;  %v18350_v9 = vld [vmem:[#allocation108_spill] sm:$0xff] }
 0x3d4   : > { %4838 = vrot.lane.b32.xlu0 %v18343_v57, %s12833_s14  ;;  %v7707_v18 = vsel %vm5019_vm12, %v7675_v49, %v15119_v48  ;;  %v4147_v48 = vshrl.u32 %v11594_v26, 16 }
 0x3d5   : > { %v15434_v43 = vpop.permute.xlu1 %7102  ;;  %v7739_v61 = vsel %vm5084_vm13, %v7707_v18, %v15244_v0  ;;  %v18357_v0 = vld [vmem:[#allocation111_spill] sm:$0xff] }
 0x3d6   : > { %v15436_v47 = vpop.permute.xlu0 %7610  ;;  %v11626_v10 = vcombine.low %v18357_v0, %v18346_v31  ;;  %v7771_v38 = vsel %vm5329_vm15, %v7739_v61, %v15217_v27  ;;  %v15513_v59 = vrot.slane %v4147_v48, 7  ;;  %v18360_v18 = vld [vmem:[#allocation115_spill] sm:$0xff]  ;;  %v18363_v0 = vld [vmem:[#allocation56_spill] sm:$0xff] }
 0x3d7   : > { %4840 = vrot.lane.b32.xlu1 %v18344_v44, %s12833_s14  ;;  %v18349_v44 = vld [vmem:[#allocation46_spill] sm:$0xff] }
 0x3d8   : > { %4205 = vrot.lane.b32.xlu0 %v4138_v36, %s12835_s16  ;;  %v11560_v14 = vcombine.low %v18349_v44, %v18349_v44  ;;  %v18358_v44 = vld [vmem:[#allocation124_spill] sm:$0xff] }
 0x3d9   : > { %v4180_v8 = vpop.permute.xlu1 %4179 }
 0x3da   : > { %v15445_v37 = vpop.permute.xlu0 %7100  ;;  %v4899_v24 = vsel %vm2705_vm14, %v11560_v14, %v4180_v8  ;;  %v18352_v8 = vld [vmem:[#allocation47_spill] sm:$0xff]  ;;  %v4591_v14 = vshll.u32 %v11626_v10, 16 }
 0x3db   : > { %4656 = vrot.lane.b32.xlu1 %v4572_v42, %s12839_s19  ;;  %v4982_v42 = vsel %vm4954_vm11, %v4899_v24, %v15363_v41 }
 0x3dc   : > { %4201 = vrot.lane.b32.xlu0 %v4131_v60, %s12835_s16  ;;  %v11559_v60 = vcombine.low %v18353_v2, %v18352_v8  ;;  %v5047_v41 = vsel %vm5019_vm12, %v4982_v42, %v15413_v21  ;;  %v18361_v8 = vld [vmem:[#allocation119_spill] sm:$0xff] }
 0x3dd   : > { %v15449_v3 = vpop.permute.xlu1 %6590  ;;  %v5112_v21 = vsel %vm5084_vm13, %v5047_v41, %v15294_v25  ;;  %v18362_v41 = vld [vmem:[#allocation125_spill] sm:$0xff] }
 0x3de   : > { %v15452_v12 = vpop.permute.xlu0 %4181  ;;  %v5215_v61 = vshll.u32 %v5112_v21, 16 }
 0x3df   : > { %4652 = vrot.lane.b32.xlu1 %v4558_v34, %s12839_s19  ;;  %v18354_v34 = vld [vmem:[#allocation114_spill] sm:$0xff] }
 0x3e0   : > { %4654 = vrot.lane.b32.xlu0 %v4571_v11, %s12839_s19  ;;  %v11593_v11 = vcombine.low %v18355_v22, %v18354_v34 }
 0x3e1   : > { %v15457_v52 = vpop.permute.xlu1 %6974 }
 0x3e2   : > { %v4178_v20 = vpop.permute.xlu0 %4177  ;;  %v4140_v49 = vshrl.u32 %v11593_v11, 16 }
 0x3e3   : > { %4207 = vrot.lane.b32.xlu1 %v4135_v23, %s12835_s16  ;;  %v4557_v23 = vsel %vm4377_vm8, %v4552_v13, %v4556_v4  ;;  %v4896_v46 = vsel %vm2705_vm14, %v11559_v60, %v4178_v20  ;;  %v7804_v13 = vsel %vm7796_vm3, %v7771_v38, %v15397_v33  ;;  %v11562_v38 = vcombine.low %v18363_v0, %v18363_v0  ;;  %v15589_v0 = vld [vmem:[#allocation2 + $0x64] sm:$0xf] }
 0x3e4   : > { %4325 = vrot.lane.b32.xlu0 %v11594_v26, %s12834_s15  ;;  %v4980_v4 = vsel %vm4954_vm11, %v4896_v46, %v15385_v15  ;;  %v4150_v15 = vshll.u32 %v11594_v26, 16  ;;  %v15540_v48 = vrot.slane %v4140_v49, 7  ;;  %v4593_v26 = vrot.slane %v4591_v14, 1 }
 0x3e5   : > { %v15467_v57 = vpop.permute.xlu1 %6463  ;;  %v4589_v49 = vshrl.u32 %v11626_v10, 16 }
 0x3e6   : > { %v15469_v36 = vpop.permute.xlu0 %4630  ;;  %v4152_v60 = vor.u32 %v4150_v15, %v15513_v59  ;;  %v18365_v15 = vld [vmem:[#allocation65_spill] sm:$0xff] }
 0x3e7   : > { %4203 = vrot.lane.b32.xlu1 %v4128_v39, %s12835_s16  ;;  %v18351_v39 = vld [vmem:[#allocation113_spill] sm:$0xff] }
 0x3e8   : > { %4650 = vrot.lane.b32.xlu0 %v4557_v23, %s12839_s19  ;;  %v18359_v23 = vld [vmem:[#allocation117_spill] sm:$0xff] }
 0x3e9   : > { %v15479_v55 = vpop.permute.xlu1 %4303  ;;  %v11625_v24 = vcombine.low %v18359_v23, %v18354_v34 }
 0x3ea   : > { %v15483_v54 = vpop.permute.xlu0 %7484 }
 0x3eb   : > { %4327 = vrot.lane.b32.xlu1 %v18350_v9, %s12834_s15  ;;  %v4577_v46 = vshll.u32 %v11625_v24, 16 }
 0x3ec   : > { %4850 = vrot.lane.b32.xlu0 %v18351_v39, %s12833_s14 }
 0x3ed   : > { %v15495_v63 = vpop.permute.xlu1 %4828  ;;  %v4579_v10 = vrot.slane %v4577_v46, 1 }
 0x3ee   : > { %v15497_v51 = vpop.permute.xlu0 %4301 }
 0x3ef   : > { %4852 = vrot.lane.b32.xlu1 %v18356_v50, %s12833_s14  ;;  %v15544_v50 = vld [vmem:[#allocation2 + $0x58] sm:$0xf] }
 0x3f0   : > { %4321 = vrot.lane.b32.xlu0 %v11593_v11, %s12834_s15 }
 0x3f1   : > { %v7483_v30 = vpop.permute.xlu1 %7482 }
 0x3f2   : > { %v7837_v20 = vsel %vm7829_vm6, %v7804_v13, %v7483_v30  ;;  %v4627_v31 = vpop.permute.xlu0 %4626  ;;  %v4143_v13 = vshll.u32 %v11593_v11, 16  ;;  %v4596_v30 = vshll.u32 %v18350_v9, 16 }
 0x3f3   : > { %v5045_v27 = vsel %vm5019_vm12, %v4980_v4, %v4627_v31  ;;  %4323 = vrot.lane.b32.xlu1 %v18358_v44, %s12834_s15  ;;  %v7870_v33 = vsel %vm18155_vm7, %v7837_v20, %v15436_v47  ;;  %v7645_v47 = vsel %vm2705_vm14, %v18361_v8, %v15263_v56  ;;  %v4600_v56 = vshrl.u32 %v18350_v9, 16 }
 0x3f4   : > { %v5110_v25 = vsel %vm5084_vm13, %v5045_v27, %v15336_v17  ;;  %4846 = vrot.lane.b32.xlu0 %v18360_v18, %s12833_s14  ;;  %12365 = vmatmul.mubr.msk.bf16.gmra.mrb[36].mxu0 %vm7931_vm10, %v7870_v33  ;;  %v6015_v17 = vld [vmem:[#allocation2 + $0x54] sm:$0xf]  ;;  %v7677_v21 = vsel %vm4954_vm11, %v7645_v47, %v15211_v16  ;;  %v5217_v31 = vrot.slane %v5215_v61, 1  ;;  %v4905_v33 = vsel %vm2705_vm14, %v11562_v38, %v15426_v5 }
 0x3f5   : > { %v5211_v42 = vshll.u32 %v5110_v25, 16  ;;  %v15532_v39 = vpop.permute.xlu1 %6461  ;;  %v5209_v34 = vshrl.u32 %v5110_v25, 16  ;;  %v7709_v27 = vsel %vm5019_vm12, %v7677_v21, %v15407_v45  ;;  %v4145_v23 = vor.u32 %v4143_v13, %v15540_v48  ;;  %v18364_v18 = vld [vmem:[#allocation58_spill] sm:$0xff]  ;;  %v12589_v13 = vld [vmem:[#allocation2 + $0x5c] ss:$0 sps:$4 sm:$0x11]  }
 0x3f6   : > { %v15537_v2 = vpop.permute.xlu0 %4826  ;;  %v15561_v11 = vcombine.low %v6015_v17, %v15544_v50  ;;  %v4594_v25 = vor.u32 %v4593_v26, %v4589_v49  ;;  %v11561_v45 = vcombine.low %v18365_v15, %v18364_v18  ;;  %v4582_v61 = vshll.u32 %v18358_v44, 16  ;;  %v5994_v26 = vld [vmem:[#allocation2 + $0x54] sm:$0xe] }
 0x3f7   : > { %v5213_v22 = vrot.slane %v5211_v42, 1  ;;  %4848 = vrot.lane.b32.xlu1 %v18362_v41, %s12833_s14  ;;  %v4586_v42 = vshrl.u32 %v18358_v44, 16  ;;  %v4986_v8 = vsel %vm4954_vm11, %v4905_v33, %v15278_v28  ;;  %v4598_v17 = vrot.slane %v4596_v30, 1 }
 0x3f8   : > { %4213 = vrot.lane.b32.xlu0 %v4152_v60, %s12835_s16  ;;  %v6847_v46 = vshll.u32 %v15561_v11, 16 }
 0x3f9   : > { %v5214_v20 = vor.u32 %v5213_v22, %v5209_v34  ;;  %v15553_v4 = vpop.permute.xlu1 %4299  ;;  %v4575_v34 = vshrl.u32 %v11625_v24, 16  ;;  %v4599_v44 = vsel %vm4377_vm8, %v4594_v25, %v4598_v17  ;;  %v6017_v24 = vld [vmem:[#allocation2 + $0x60] sm:$0xf] }
 0x3fa   : > { %v6973_v14 = vpop.permute.xlu0 %6972  ;;  %v6849_v49 = vrot.slane %v6847_v46, 1 }
 0x3fb   : > { %v7741_v9 = vsel %vm5084_vm13, %v7709_v27, %v6973_v14  ;;  %4664 = vrot.lane.b32.xlu1 %v4600_v56, %s12839_s19  ;;  %v5218_v16 = vsel %vm4377_vm8, %v5214_v20, %v5217_v31  ;;  %v11719_v20 = vcombine.low %v5994_v26, %v15230_v7  ;;  %v6057_v27 = vld [vmem:[#allocation2 + $0x54] sm:$0xe]  ;;  %v6845_v7 = vshrl.u32 %v15561_v11, 16  ;;  %v6081_v26 = vld [vmem:[#allocation2 + $0x6c] sm:$0xf] }
 0x3fc   : > { %v7773_v5 = vsel %vm5329_vm15, %v7741_v9, %v15445_v37  ;;  %4209 = vrot.lane.b32.xlu0 %v4145_v23, %s12835_s16  ;;  %12330 = vmatprep.mubr.msk.bf16.mxu1 %vm5329_vm15, %v5218_v16  ;;  %v4902_v37 = vsel %vm2705_vm14, %v11561_v45, %v15452_v12  ;;  %v5051_v12 = vsel %vm5019_vm12, %v4986_v8, %v15405_v1  ;;  %v6079_v23 = vld [vmem:[#allocation2 + $0x60] sm:$0xf]  ;;  %v6852_v16 = vshll.u32 %v12589_v13, 16 }
 0x3fd   : > { %v7806_v47 = vsel %vm7796_vm3, %v7773_v5, %v15368_v58  ;;  %v4825_v60 = vpop.permute.xlu1 %4824  ;;  %v4580_v58 = vor.u32 %v4579_v10, %v4575_v34  ;;  %v11735_v1 = vcombine.low %v6017_v24, %v15589_v0  ;;  %v6850_v45 = vor.u32 %v6849_v49, %v6845_v7  ;;  %v6122_v7 = vld [vmem:[#allocation2 + $0x6c] sm:$0xe] }
 0x3fe   : > { %v15580_v22 = vpop.permute.xlu0 %4297  ;;  %v7839_v41 = vsel %vm7829_vm6, %v7806_v47, %v15483_v54  ;;  %v4984_v54 = vsel %vm4954_vm11, %v4902_v37, %v15297_v53  ;;  %v5116_v38 = vsel %vm5084_vm13, %v5051_v12, %v4825_v60  ;;  %v11766_v5 = vcombine.low %v6057_v27, %v15544_v50  ;;  %v15623_v60 = vld [vmem:[#allocation2 + $0x68] ss:$0 sps:$4 sm:$0x11]   ;;  %v5955_v27 = vld [vmem:[#allocation2 + $0x60] sm:$0xf] }
 0x3ff   : > { %4660 = vrot.lane.b32.xlu1 %v4586_v42, %s12839_s19  ;;  %v7872_v28 = vsel %vm18155_vm7, %v7839_v41, %v15415_v29  ;;  %v4584_v29 = vrot.slane %v4582_v61, 1  ;;  %v5049_v30 = vsel %vm5019_vm12, %v4984_v54, %v15469_v36  ;;  %v5225_v33 = vshll.u32 %v5116_v38, 16  ;;  %v15609_v36 = vld [vmem:[#allocation2 + $0x64] sm:$0xf] }
 0x400   : > { %4662 = vrot.lane.b32.xlu0 %v4599_v44, %s12839_s19  ;;  %12368 = vmatprep.mubr.msk.bf16.mxu0 %vm7931_vm10, %v7872_v28  ;;  %v6859_v15 = vshll.u32 %v11735_v1, 16  ;;  %v11782_v42 = vcombine.low %v6079_v23, %v15609_v36  ;;  %v6554_v47 = vrot.slane %v15261_v40, 1  ;;  %v6854_v34 = vrot.slane %v6852_v16, 1  ;;  %v15631_v44 = vld [vmem:[#allocation2 + $0x70] sm:$0xf] }
 0x401   : > { %v15598_v56 = vpop.permute.xlu1 %7214  ;;  %v4585_v53 = vsel %vm4377_vm8, %v4580_v58, %v4584_v29  ;;  %v5227_v61 = vrot.slane %v5225_v33, 1  ;;  %v6058_v28 = vld [vmem:[#allocation2 + $0x60] sm:$0xe]  ;;  %v6857_v46 = vshrl.u32 %v11735_v1, 16  ;;  %v6864_v24 = vshll.u32 %v15623_v60, 16 }
 0x402   : > { %v4823_v21 = vpop.permute.xlu0 %4822  ;;  %v6861_v41 = vrot.slane %v6859_v15, 1  ;;  %v6855_v40 = vsel %vm4377_vm8, %v6850_v45, %v6854_v34  ;;  %v7359_v58 = vshll.u32 %v11782_v42, 16  ;;  %v7063_v54 = vrot.slane %v12589_v13, 1  ;;  %v15640_v38 = vld [vmem:[#allocation2 + $0x68] ss:$0 sps:$4 sm:$0x11]  }
 0x403   : > { %v5114_v31 = vsel %vm5084_vm13, %v5049_v30, %v4823_v21  ;;  %4215 = vrot.lane.b32.xlu1 %v15513_v59, %s12835_s16  ;;  %v6553_v59 = vrot.slane %v11719_v20, 1  ;;  %v15643_v29 = vcombine.low %v6081_v26, %v15631_v44  ;;  %v11767_v20 = vcombine.low %v6058_v28, %v15589_v0  ;;  %v15648_v33 = vld [vmem:[#allocation2 + $0x64] sm:$0xf]  ;;  %v12600_v23 = vld [vmem:[#allocation2 + $0x74] ss:$0 sps:$4 sm:$0x11]  }
 0x404   : > { %v5221_v14 = vshll.u32 %v5114_v31, 16  ;;  %4658 = vrot.lane.b32.xlu0 %v4585_v53, %s12839_s19  ;;  %v5219_v25 = vshrl.u32 %v5114_v31, 16  ;;  %v6862_v21 = vor.u32 %v6861_v41, %v6857_v46  ;;  %v6121_v31 = vld [vmem:[#allocation2 + $0x60] sm:$0xe]  ;;  %v7361_v49 = vrot.slane %v7359_v58, 1 }
 0x405   : > { %v15611_v9 = vpop.permute.xlu1 %4640  ;;  %v7647_v13 = vsel %vm2705_vm14, %v15078_v32, %v15532_v39  ;;  %v7357_v0 = vshrl.u32 %v11782_v42, 16  ;;  %v7065_v39 = vrot.slane %v11767_v20, 1  ;;  %v15669_v34 = vld [vmem:[#allocation2 + $0x70] sm:$0xf]  ;;  %v7376_v41 = vshll.u32 %v12600_v23, 16 }
 0x406   : > { %v5223_v10 = vrot.slane %v5221_v14, 1  ;;  %v15614_v18 = vpop.permute.xlu0 %7614  ;;  %v6866_v14 = vrot.slane %v6864_v24, 1  ;;  %v18367_v24 = vld [vmem:[#allocation57_spill] sm:$0xff] }
 0x407   : > { %4211 = vrot.lane.b32.xlu1 %v15540_v48, %s12835_s16  ;;  %v6555_v48 = vsel %vm1148_vm4, %v6553_v59, %v6554_v47  ;;  %v18366_v59 = vld [vmem:[#allocation93_spill] sm:$0xff] }
 0x408   : > { %v5224_v8 = vor.u32 %v5223_v10, %v5219_v25  ;;  %6704 = vrot.lane.b32.xlu0 %v15561_v11, %s12839_s19  ;;  %v7062_v11 = vrot.slane %v11766_v5, 1  ;;  %v7364_v25 = vshll.u32 %v15640_v38, 16  ;;  %v7371_v10 = vshll.u32 %v15643_v29, 16  ;;  %v5957_v47 = vld [vmem:[#allocation2 + $0x6c] sm:$0xf] }
 0x409   : > { %v15625_v17 = vpop.permute.xlu1 %4636  ;;  %v6867_v32 = vsel %vm4377_vm8, %v6862_v21, %v6866_v14  ;;  %v15663_v5 = vcombine.low %v5955_v27, %v15648_v33  ;;  %v6019_v27 = vld [vmem:[#allocation2 + $0x6c] sm:$0xf] }
 0x40a   : > { %v15627_v37 = vpop.permute.xlu0 %4189  ;;  %v5228_v50 = vsel %vm4377_vm8, %v5224_v8, %v5227_v61  ;;  %v7064_v53 = vsel %vm1148_vm4, %v7062_v11, %v7063_v54  ;;  %v7679_v61 = vsel %vm4954_vm11, %v7647_v13, %v15449_v3  ;;  %v7362_v8 = vor.u32 %v7361_v49, %v7357_v0  ;;  %v15696_v13 = vld [vmem:[#allocation2 + $0x70] sm:$0xf] }
 0x40b   : > { %6594 = vrot.lane.b32.xlu1 %v6555_v48, %s12834_s15  ;;  %12331 = vmatmul.mubr.msk.bf16.gmra.mrb[12].mxu1 %vm5329_vm15, %v5228_v50  ;;  %v7066_v50 = vrot.slane %v15623_v60, 1  ;;  %v7369_v11 = vshrl.u32 %v15643_v29, 16  ;;  %v7373_v28 = vrot.slane %v7371_v10, 1  ;;  %v15685_v60 = vcombine.low %v5957_v47, %v15669_v34 }
 0x40c   : > { %6976 = vrot.lane.b32.xlu0 %v6855_v40, %s12833_s14  ;;  %v7366_v40 = vrot.slane %v7364_v25, 1  ;;  %v7578_v49 = vrot.slane %v12600_v23, 1 }
 0x40d   : > { %v15638_v12 = vpop.permute.xlu1 %4191  ;;  %v7067_v46 = vsel %vm1148_vm4, %v7065_v39, %v7066_v50  ;;  %v6370_v10 = vshll.u32 %v15685_v60, 16 }
 0x40e   : > { %v4186_v30 = vpop.permute.xlu0 %4185 }
 0x40f   : > { %6706 = vrot.lane.b32.xlu1 %v11735_v1, %s12839_s19  ;;  %v11814_v1 = vcombine.low %v6121_v31, %v15609_v36  ;;  %v11815_v36 = vcombine.low %v6122_v7, %v15631_v44  ;;  %v7711_v44 = vsel %vm5019_vm12, %v7679_v61, %v15348_v35  ;;  %v4908_v54 = vsel %vm2705_vm14, %v18367_v24, %v4186_v30  ;;  %v15693_v31 = vld [vmem:[#allocation2 + $0x68] ss:$0 sps:$4 sm:$0x11]  }
 0x410   : > { %7104 = vrot.lane.b32.xlu0 %v7064_v53, %s12842_s17  ;;  %v7367_v35 = vsel %vm4377_vm8, %v7362_v8, %v7366_v40  ;;  %v7378_v53 = vrot.slane %v7376_v41, 1  ;;  %v7743_v30 = vsel %vm5084_vm13, %v7711_v44, %v15457_v52  ;;  %v7374_v7 = vor.u32 %v7373_v28, %v7369_v11 }
 0x411   : > { %v4188_v16 = vpop.permute.xlu1 %4187  ;;  %v7574_v3 = vrot.slane %v11814_v1, 1  ;;  %v7577_v20 = vrot.slane %v11815_v36, 1  ;;  %v4988_v25 = vsel %vm4954_vm11, %v4908_v54, %v15580_v22  ;;  %v6372_v40 = vrot.slane %v6370_v10, 1 }
 0x412   : > { %v4911_v15 = vsel %vm2705_vm14, %v18366_v59, %v4188_v16  ;;  %v15659_v45 = vpop.permute.xlu0 %4638  ;;  %v7379_v36 = vsel %vm4377_vm8, %v7374_v7, %v7378_v53  ;;  %v15746_v53 = vld [vmem:[#allocation2 + $0x74] ss:$0 sps:$4 sm:$0x11]  }
 0x413   : > { %6978 = vrot.lane.b32.xlu1 %v6867_v32, %s12833_s14  ;;  %v4990_v48 = vsel %vm4954_vm11, %v4911_v15, %v15553_v4  ;;  %v6358_v4 = vshll.u32 %v15663_v5, 16  ;;  %v6356_v15 = vshrl.u32 %v15663_v5, 16  ;;  %v6363_v32 = vshll.u32 %v15693_v31, 16 }
 0x414   : > { %7216 = vrot.lane.b32.xlu0 %v11782_v42, %s12840_s22  ;;  %v5995_v42 = vld [vmem:[#allocation2 + $0x60] sm:$0xe]  ;;  %v5055_v21 = vsel %vm5019_vm12, %v4990_v48, %v15625_v17  ;;  %v7575_v17 = vrot.slane %v15640_v38, 1  ;;  %v7579_v38 = vsel %vm1148_vm4, %v7577_v20, %v7578_v49 }
 0x415   : > { %v15675_v26 = vpop.permute.xlu1 %4311  ;;  %v11720_v16 = vcombine.low %v5995_v42, %v15648_v33  ;;  %v5120_v0 = vsel %vm5084_vm13, %v5055_v21, %v15495_v63  ;;  %v6360_v1 = vrot.slane %v6358_v4, 1  ;;  %v15715_v33 = vcombine.low %v6019_v27, %v15696_v13  ;;  %v18368_v49 = vld [vmem:[#allocation72_spill] sm:$0xff] }
 0x416   : > { %v15680_v58 = vpop.permute.xlu0 %4309  ;;  %v7576_v52 = vsel %vm1148_vm4, %v7574_v3, %v7575_v17  ;;  %v7775_v63 = vsel %vm5329_vm15, %v7743_v30, %v15434_v43  ;;  %v5235_v47 = vshll.u32 %v5120_v0, 16  ;;  %v5996_v43 = vld [vmem:[#allocation2 + $0x6c] sm:$0xe]  ;;  %v6021_v3 = vld [vmem:[#allocation2 + $0x78] sm:$0xf]  ;;  %v6365_v4 = vrot.slane %v6363_v32, 1 }
 0x417   : > { %7106 = vrot.lane.b32.xlu1 %v7067_v46, %s12842_s17  ;;  %v7808_v39 = vsel %vm7796_vm3, %v7775_v63, %v15598_v56  ;;  %v6361_v50 = vor.u32 %v6360_v1, %v6356_v15  ;;  %v6556_v41 = vrot.slane %v11720_v16, 1  ;;  %v6871_v44 = vshll.u32 %v15715_v33, 16  ;;  %v15736_v46 = vld [vmem:[#allocation2 + $0x7c] sm:$0xf] }
 0x418   : > { %7488 = vrot.lane.b32.xlu0 %v7367_v35, %s12843_s18  ;;  %v6368_v42 = vshrl.u32 %v15685_v60, 16  ;;  %v11721_v54 = vcombine.low %v5996_v43, %v15669_v34  ;;  %v5237_v20 = vrot.slane %v5235_v47, 1  ;;  %v4914_v27 = vsel %vm2705_vm14, %v18368_v49, %v15627_v37  ;;  %v6059_v34 = vld [vmem:[#allocation2 + $0x6c] sm:$0xe]  ;;  %v18369_v0 = vld [vmem:[#allocation91_spill] sm:$0xff] }
 0x419   : > { %v15700_v14 = vpop.permute.xlu1 %4836  ;;  %v6366_v17 = vsel %vm4377_vm8, %v6361_v50, %v6365_v4  ;;  %v15755_v16 = vcombine.low %v6021_v3, %v15736_v46  ;;  %v6873_v37 = vrot.slane %v6871_v44, 1  ;;  %v6869_v63 = vshrl.u32 %v15715_v33, 16  ;;  %v15794_v3 = vld [vmem:[#allocation2 + $0x88] sm:$0xf] }
 0x41a   : > { %v4635_v23 = vpop.permute.xlu0 %4634  ;;  %v6373_v7 = vor.u32 %v6372_v40, %v6368_v42  ;;  %v6559_v10 = vrot.slane %v11721_v54, 1  ;;  %v11768_v15 = vcombine.low %v6059_v34, %v15696_v13  ;;  %v6085_v40 = vld [vmem:[#allocation2 + $0x84] sm:$0xf] }
 0x41b   : > { %v5053_v59 = vsel %vm5019_vm12, %v4988_v25, %v4635_v23  ;;  %7218 = vrot.lane.b32.xlu1 %v15643_v29, %s12840_s22  ;;  %v15724_v29 = vld [vmem:[#allocation2 + $0x74] ss:$0 sps:$4 sm:$0x11]  }
 0x41c   : > { %v5118_v22 = vsel %vm5084_vm13, %v5053_v59, %v15537_v2  ;;  %7616 = vrot.lane.b32.xlu0 %v7576_v52, %s12841_s30  ;;  %v6375_v24 = vshll.u32 %v15724_v29, 16  ;;  %v6083_v59 = vld [vmem:[#allocation2 + $0x78] sm:$0xf]  ;;  %v15765_v52 = vld [vmem:[#allocation2 + $0x7c] sm:$0xf]  ;;  %v6560_v13 = vrot.slane %v15724_v29, 1 }
 0x41d   : > { %v5231_v61 = vshll.u32 %v5118_v22, 16  ;;  %v7487_v8 = vpop.permute.xlu1 %7486  ;;  %v5229_v11 = vshrl.u32 %v5118_v22, 16  ;;  %v6876_v22 = vshll.u32 %v15746_v53, 16  ;;  %v7068_v4 = vrot.slane %v11768_v15, 1 }
 0x41e   : > { %v7841_v48 = vsel %vm7829_vm6, %v7808_v39, %v7487_v8  ;;  %v15730_v2 = vpop.permute.xlu0 %4834  ;;  %v6377_v1 = vrot.slane %v6375_v24, 1  ;;  %v6561_v29 = vsel %vm1148_vm4, %v6559_v10, %v6560_v13 }
 0x41f   : > { %v5233_v28 = vrot.slane %v5231_v61, 1  ;;  %7490 = vrot.lane.b32.xlu1 %v7379_v36, %s12843_s18  ;;  %v7874_v56 = vsel %vm18155_vm7, %v7841_v48, %v15614_v18  ;;  %v6557_v18 = vrot.slane %v15693_v31, 1  ;;  %v4917_v31 = vsel %vm2705_vm14, %v18369_v0, %v15638_v12  ;;  %v12616_v0 = vld [vmem:[#allocation2 + $0x80] ss:$0 sps:$4 sm:$0x11]  }
 0x420   : > { %7618 = vrot.lane.b32.xlu0 %v7579_v38, %s12841_s30  ;;  %12369 = vmatmul.mubr.msk.bf16.gmra.mrb[40].mxu0 %vm7931_vm10, %v7874_v56  ;;  %v4992_v38 = vsel %vm4954_vm11, %v4914_v27, %v15497_v51  ;;  %v4994_v32 = vsel %vm4954_vm11, %v4917_v31, %v15479_v55  ;;  %v6378_v36 = vsel %vm4377_vm8, %v6373_v7, %v6377_v1  ;;  %v6883_v51 = vshll.u32 %v15755_v16, 16  ;;  %v15787_v55 = vld [vmem:[#allocation2 + $0x80] ss:$0 sps:$4 sm:$0x11]  }
 0x421   : > { %v5234_v21 = vor.u32 %v5233_v28, %v5229_v11  ;;  %v15743_v35 = vpop.permute.xlu1 %6465  ;;  %v6558_v25 = vsel %vm1148_vm4, %v6556_v41, %v6557_v18  ;;  %v5057_v39 = vsel %vm5019_vm12, %v4992_v38, %v15659_v45  ;;  %v6874_v48 = vor.u32 %v6873_v37, %v6869_v63  ;;  %v6123_v37 = vld [vmem:[#allocation2 + $0x78] sm:$0xe]  ;;  %v15816_v63 = vld [vmem:[#allocation2 + $0x7c] sm:$0xf] }
 0x422   : > { %v15751_v30 = vpop.permute.xlu0 %4305  ;;  %v11784_v45 = vcombine.low %v6083_v59, %v15765_v52  ;;  %v5059_v11 = vsel %vm5019_vm12, %v4994_v32, %v15611_v9  ;;  %v6878_v44 = vrot.slane %v6876_v22, 1  ;;  %v6060_v9 = vld [vmem:[#allocation2 + $0x78] sm:$0xe]  ;;  %v15807_v27 = vcombine.low %v6085_v40, %v15794_v3  ;;  %v6124_v40 = vld [vmem:[#allocation2 + $0x84] sm:$0xe] }
 0x423   : > { %6467 = vrot.lane.b32.xlu1 %v6366_v17, %s12835_s16  ;;  %v5238_v23 = vsel %vm4377_vm8, %v5234_v21, %v5237_v20  ;;  %v6881_v7 = vshrl.u32 %v15755_v16, 16  ;;  %v6888_v34 = vshll.u32 %v15787_v55, 16  ;;  %v11769_v59 = vcombine.low %v6060_v9, %v15736_v46  ;;  %v5959_v38 = vld [vmem:[#allocation2 + $0x78] sm:$0xf] }
 0x424   : > { %6596 = vrot.lane.b32.xlu0 %v6558_v25, %s12834_s15  ;;  %12334 = vmatprep.mubr.msk.bf16.mxu1 %vm5329_vm15, %v5238_v23  ;;  %v6879_v20 = vsel %vm4377_vm8, %v6874_v48, %v6878_v44  ;;  %v7383_v49 = vshll.u32 %v11784_v45, 16  ;;  %v7069_v23 = vrot.slane %v15746_v53, 1  ;;  %v11816_v46 = vcombine.low %v6123_v37, %v15765_v52  ;;  %v15835_v44 = vld [vmem:[#allocation2 + $0x88] sm:$0xf]  ;;  %v5997_v9 = vld [vmem:[#allocation2 + $0x78] sm:$0xe] }
 0x425   : > { %v15769_v12 = vpop.permute.xlu1 %4307  ;;  %v6890_v53 = vrot.slane %v6888_v34, 1  ;;  %v7072_v52 = vrot.slane %v15787_v55, 1  ;;  %v15855_v37 = vld [vmem:[#allocation2 + $0x88] sm:$0xf] }
 0x426   : > { %v15778_v61 = vpop.f32.mrb[0].mxu1  ;;  %v4831_v8 = vpop.permute.xlu0 %4830  ;;  %v7070_v22 = vsel %vm1148_vm4, %v7068_v4, %v7069_v23  ;;  %v7385_v32 = vrot.slane %v7383_v49, 1 }
 0x427   : > { %v5122_v47 = vsel %vm5084_vm13, %v5057_v39, %v4831_v8  ;;  %6469 = vrot.lane.b32.xlu1 %v6378_v36, %s12835_s16  ;;  %v15784_v43 = vpop.f32.mrb[1].mxu1  ;;  %v7395_v39 = vshll.u32 %v15807_v27, 16  ;;  %v7388_v8 = vshll.u32 %v12616_v0, 16 }
 0x428   : > { %v5241_v50 = vshll.u32 %v5122_v47, 16  ;;  %v15790_v41 = vpop.f32.mrb[2].mxu1  ;;  %6708 = vrot.lane.b32.xlu0 %v15715_v33, %s12839_s19  ;;  %v5239_v42 = vshrl.u32 %v5122_v47, 16  ;;  %v6885_v33 = vrot.slane %v6883_v51, 1  ;;  %v7381_v51 = vshrl.u32 %v11784_v45, 16 }
 0x429   : > { %v4833_v28 = vpop.permute.xlu1 %4832  ;;  %v15798_v56 = vpop.f32.mrb[3].mxu1  ;;  %v15826_v47 = vld [vmem:[#allocation2 + $0x8c] ss:$0 sps:$4 sm:$0x11]   ;;  %v7390_v4 = vrot.slane %v7388_v8, 1 }
 0x42a   : > { %v5243_v24 = vrot.slane %v5241_v50, 1  ;;  %v5124_v54 = vsel %vm5084_vm13, %v5059_v11, %v4833_v28  ;;  %v15802_v21 = vpop.permute.xlu0 %4197  ;;  %v6886_v10 = vor.u32 %v6885_v33, %v6881_v7  ;;  %v7071_v50 = vrot.slane %v11769_v59, 1  ;;  %v18370_v7 = vld [vmem:[#allocation70_spill] sm:$0xff] }
 0x42b   : > { %v5245_v18 = vshll.u32 %v5124_v54, 16  ;;  %6598 = vrot.lane.b32.xlu1 %v6561_v29, %s12834_s15  ;;  %v7386_v11 = vor.u32 %v7385_v32, %v7381_v51  ;;  %v7397_v28 = vrot.slane %v7395_v39, 1  ;;  %v5961_v29 = vld [vmem:[#allocation2 + $0x84] sm:$0xf]  ;;  %v7393_v54 = vshrl.u32 %v15807_v27, 16 }
 0x42c   : > { %v5244_v17 = vor.u32 %v5243_v24, %v5239_v42  ;;  %6980 = vrot.lane.b32.xlu0 %v6879_v20, %s12833_s14  ;;  %v6891_v48 = vsel %vm4377_vm8, %v6886_v10, %v6890_v53  ;;  %v7580_v42 = vrot.slane %v11816_v46, 1  ;;  %v7400_v33 = vshll.u32 %v15826_v47, 16  ;;  %v18371_v10 = vld [vmem:[#allocation62_spill] sm:$0xff] }
 0x42d   : > { %v5247_v31 = vrot.slane %v5245_v18, 1  ;;  %v15812_v25 = vpop.permute.xlu1 %4648  ;;  %v11817_v18 = vcombine.low %v6124_v40, %v15794_v3  ;;  %v15849_v55 = vcombine.low %v5961_v29, %v15835_v44  ;;  %v7398_v23 = vor.u32 %v7397_v28, %v7393_v54  ;;  %v6023_v3 = vld [vmem:[#allocation2 + $0x84] sm:$0xf] }
 0x42e   : > { %v4194_v1 = vpop.permute.xlu0 %4193  ;;  %v11568_v59 = vcombine.low %v18371_v10, %v18371_v10  ;;  %v7584_v39 = vrot.slane %v15826_v47, 1  ;;  %v15870_v40 = vcombine.low %v6023_v3, %v15855_v37 }
 0x42f   : > { %6710 = vrot.lane.b32.xlu1 %v15755_v16, %s12839_s19  ;;  %v5248_v15 = vsel %vm4377_vm8, %v5244_v17, %v5247_v31  ;;  %v15829_v16 = vcombine.low %v5959_v38, %v15816_v63  ;;  %v7073_v17 = vsel %vm1148_vm4, %v7071_v50, %v7072_v52  ;;  %v4920_v34 = vsel %vm2705_vm14, %v18370_v7, %v4194_v1  ;;  %v12622_v38 = vld [vmem:[#allocation2 + $0x80] ss:$0 sps:$4 sm:$0x11]  }
 0x430   : > { %7108 = vrot.lane.b32.xlu0 %v7070_v22, %s12842_s17  ;;  %12335 = vmatmul.mubr.msk.bf16.gmra.mrb[16].mxu1 %vm5329_vm15, %v5248_v15  ;;  %v7391_v31 = vsel %vm4377_vm8, %v7386_v11, %v7390_v4  ;;  %v11722_v22 = vcombine.low %v5997_v9, %v15816_v63  ;;  %v7402_v1 = vrot.slane %v7400_v33, 1  ;;  %v7583_v32 = vrot.slane %v11817_v18, 1 }
 0x431   : > { %v4645_v36 = vpop.permute.xlu1 %4644  ;;  %v6382_v20 = vshll.u32 %v15829_v16, 16  ;;  %v4996_v46 = vsel %vm4954_vm11, %v4920_v34, %v15751_v30  ;;  %v6394_v50 = vshll.u32 %v15849_v55, 16  ;;  %v6380_v30 = vshrl.u32 %v15829_v16, 16  ;;  %v6025_v34 = vld [vmem:[#allocation2 + $0x90] sm:$0xf] }
 0x432   : > { %v15831_v13 = vpop.permute.xlu0 %4646  ;;  %v7403_v47 = vsel %vm4377_vm8, %v7398_v23, %v7402_v1  ;;  %v6387_v52 = vshll.u32 %v12622_v38, 16  ;;  %v6562_v4 = vrot.slane %v11722_v22, 1  ;;  %v6563_v33 = vrot.slane %v12622_v38, 1  ;;  %v15902_v1 = vld [vmem:[#allocation2 + $0x8c] ss:$0 sps:$4 sm:$0x11]  }
 0x433   : > { %6982 = vrot.lane.b32.xlu1 %v6891_v48, %s12833_s14  ;;  %v6384_v53 = vrot.slane %v6382_v20, 1  ;;  %v15866_v48 = vld [vmem:[#allocation2 + $0x8c] ss:$0 sps:$4 sm:$0x11]   ;;  %v6396_v9 = vrot.slane %v6394_v50, 1  ;;  %v6392_v10 = vshrl.u32 %v15849_v55, 16 }
 0x434   : > { %7220 = vrot.lane.b32.xlu0 %v11784_v45, %s12840_s22  ;;  %v7581_v45 = vrot.slane %v12616_v0, 1  ;;  %v6389_v23 = vrot.slane %v6387_v52, 1  ;;  %v6564_v38 = vsel %vm1148_vm4, %v6562_v4, %v6563_v33  ;;  %v18373_v50 = vld [vmem:[#allocation107_spill] sm:$0xff]  ;;  %v6893_v52 = vshrl.u32 %v15870_v40, 16 }
 0x435   : > { %v15839_v24 = vpop.permute.xlu1 %4199  ;;  %v6900_v4 = vshll.u32 %v15902_v1, 16 }
 0x436   : > { %v15845_v49 = vpop.permute.xlu0 %4317  ;;  %v7582_v0 = vsel %vm1148_vm4, %v7580_v42, %v7581_v45 }
 0x437   : > { %7110 = vrot.lane.b32.xlu1 %v7073_v17, %s12842_s17  ;;  %v5998_v17 = vld [vmem:[#allocation2 + $0x84] sm:$0xe] }
 0x438   : > { %7492 = vrot.lane.b32.xlu0 %v7391_v31, %s12843_s18  ;;  %v15893_v31 = vld [vmem:[#allocation2 + $0x94] sm:$0xf]  ;;  %v11723_v22 = vcombine.low %v5998_v17, %v15835_v44 }
 0x439   : > { %v4196_v15 = vpop.permute.xlu1 %4195 }
 0x43a   : > { %v4923_v8 = vsel %vm2705_vm14, %v11568_v59, %v4196_v15  ;;  %v4643_v51 = vpop.permute.xlu0 %4642  ;;  %v6566_v15 = vrot.slane %v15866_v48, 1 }
 0x43b   : > { %v4998_v63 = vsel %vm4954_vm11, %v4923_v8, %v15769_v12  ;;  %v5061_v11 = vsel %vm5019_vm12, %v4996_v46, %v4643_v51  ;;  %7222 = vrot.lane.b32.xlu1 %v15807_v27, %s12840_s22  ;;  %v6385_v27 = vor.u32 %v6384_v53, %v6380_v30  ;;  %v6397_v46 = vor.u32 %v6396_v9, %v6392_v10  ;;  %v15918_v30 = vld [vmem:[#allocation2 + $0x94] sm:$0xf] }
 0x43c   : > { %v5063_v28 = vsel %vm5019_vm12, %v4998_v63, %v4645_v36  ;;  %v5126_v29 = vsel %vm5084_vm13, %v5061_v11, %v15730_v2  ;;  %7620 = vrot.lane.b32.xlu0 %v7582_v0, %s12841_s30  ;;  %v6399_v36 = vshll.u32 %v15866_v48, 16  ;;  %v6895_v2 = vshll.u32 %v15870_v40, 16 }
 0x43d   : > { %v5128_v12 = vsel %vm5084_vm13, %v5063_v28, %v15700_v14  ;;  %v5251_v42 = vshll.u32 %v5126_v29, 16  ;;  %v15885_v54 = vpop.permute.xlu1 %4319  ;;  %v5249_v45 = vshrl.u32 %v5126_v29, 16  ;;  %v7585_v14 = vsel %vm1148_vm4, %v7583_v32, %v7584_v39  ;;  %v18372_v32 = vld [vmem:[#allocation87_spill] sm:$0xff] }
 0x43e   : > { %v15887_v18 = vpop.permute.xlu0 %4842  ;;  %v5255_v20 = vshll.u32 %v5128_v12, 16  ;;  %v4926_v39 = vsel %vm2705_vm14, %v18372_v32, %v15802_v21  ;;  %v6390_v8 = vsel %vm4377_vm8, %v6385_v27, %v6389_v23  ;;  %v11739_v51 = vcombine.low %v6025_v34, %v15893_v31  ;;  %v6061_v21 = vld [vmem:[#allocation2 + $0x84] sm:$0xe]  ;;  %v6089_v23 = vld [vmem:[#allocation2 + $0x9c] sm:$0xf] }
 0x43f   : > { %v5253_v7 = vrot.slane %v5251_v42, 1  ;;  %7494 = vrot.lane.b32.xlu1 %v7403_v47, %s12843_s18  ;;  %v4929_v63 = vsel %vm2705_vm14, %v18373_v50, %v15839_v24  ;;  %v6401_v48 = vrot.slane %v6399_v36, 1  ;;  %v6897_v11 = vrot.slane %v6895_v2, 1  ;;  %v6087_v47 = vld [vmem:[#allocation2 + $0x90] sm:$0xf] }
 0x440   : > { %7622 = vrot.lane.b32.xlu0 %v7585_v14, %s12841_s30  ;;  %v5257_v3 = vrot.slane %v5255_v20, 1  ;;  %v5000_v28 = vsel %vm4954_vm11, %v4926_v39, %v15680_v58  ;;  %v6565_v24 = vrot.slane %v11723_v22, 1  ;;  %v5002_v42 = vsel %vm4954_vm11, %v4929_v63, %v15675_v26 }
 0x441   : > { %v5254_v59 = vor.u32 %v5253_v7, %v5249_v45  ;;  %v15897_v0 = vpop.permute.xlu1 %4844  ;;  %v5065_v12 = vsel %vm5019_vm12, %v5000_v28, %v15831_v13  ;;  %v6402_v33 = vsel %vm4377_vm8, %v6397_v46, %v6401_v48  ;;  %v6907_v20 = vshll.u32 %v11739_v51, 16  ;;  %v15937_v13 = vld [vmem:[#allocation2 + $0x98] ss:$0 sps:$4 sm:$0x11]  }
 0x442   : > { %v15907_v53 = vpop.permute.xlu0 %4313  ;;  %v6898_v58 = vor.u32 %v6897_v11, %v6893_v52  ;;  %v11770_v36 = vcombine.low %v6061_v21, %v15855_v37  ;;  %v11786_v17 = vcombine.low %v6087_v47, %v15918_v30  ;;  %v5067_v26 = vsel %vm5019_vm12, %v5002_v42, %v15812_v25  ;;  %v12635_v48 = vld [vmem:[#allocation2 + $0x98] ss:$0 sps:$4 sm:$0x11]   ;;  %v6125_v11 = vld [vmem:[#allocation2 + $0x90] sm:$0xe] }
 0x443   : > { %6471 = vrot.lane.b32.xlu1 %v6390_v8, %s12835_s16  ;;  %v5258_v44 = vsel %vm4377_vm8, %v5254_v59, %v5257_v3  ;;  %v6567_v7 = vsel %vm1148_vm4, %v6565_v24, %v6566_v15  ;;  %v6902_v14 = vrot.slane %v6900_v4, 1  ;;  %v7075_v34 = vrot.slane %v15902_v1, 1  ;;  %v15943_v3 = vld [vmem:[#allocation2 + $0xa0] sm:$0xf]  ;;  %v6062_v15 = vld [vmem:[#allocation2 + $0x90] sm:$0xe] }
 0x444   : > { %6600 = vrot.lane.b32.xlu0 %v6564_v38, %s12834_s15  ;;  %12338 = vmatprep.mubr.msk.bf16.mxu1 %vm5329_vm15, %v5258_v44  ;;  %v7074_v32 = vrot.slane %v11770_v36, 1  ;;  %v7407_v39 = vshll.u32 %v11786_v17, 16  ;;  %v6905_v1 = vshrl.u32 %v11739_v51, 16  ;;  %v6912_v46 = vshll.u32 %v15937_v13, 16  ;;  %v5963_v24 = vld [vmem:[#allocation2 + $0x90] sm:$0xf] }
 0x445   : > { %v15922_v29 = vpop.permute.xlu1 %4315  ;;  %v6903_v25 = vsel %vm4377_vm8, %v6898_v58, %v6902_v14  ;;  %v15953_v50 = vcombine.low %v6089_v23, %v15943_v3  ;;  %v11771_v28 = vcombine.low %v6062_v15, %v15893_v31  ;;  %v15958_v52 = vld [vmem:[#allocation2 + $0x94] sm:$0xf]  ;;  %v6126_v31 = vld [vmem:[#allocation2 + $0x9c] sm:$0xe]  ;;  %v7405_v58 = vshrl.u32 %v11786_v17, 16 }
 0x446   : > { %v4839_v27 = vpop.permute.xlu0 %4838  ;;  %v7076_v4 = vsel %vm1148_vm4, %v7074_v32, %v7075_v34  ;;  %v7409_v42 = vrot.slane %v7407_v39, 1  ;;  %v7412_v36 = vshll.u32 %v12635_v48, 16  ;;  %v5965_v34 = vld [vmem:[#allocation2 + $0x9c] sm:$0xf]  ;;  %v15975_v23 = vld [vmem:[#allocation2 + $0xa0] sm:$0xf] }
 0x447   : > { %v5130_v9 = vsel %vm5084_vm13, %v5065_v12, %v4839_v27  ;;  %6473 = vrot.lane.b32.xlu1 %v6402_v33, %s12835_s16  ;;  %v6914_v27 = vrot.slane %v6912_v46, 1  ;;  %v11818_v33 = vcombine.low %v6125_v11, %v15918_v30  ;;  %v11819_v30 = vcombine.low %v6126_v31, %v15943_v3  ;;  %v15981_v15 = vld [vmem:[#allocation2 + $0x98] ss:$0 sps:$4 sm:$0x11]   ;;  %v6027_v46 = vld [vmem:[#allocation2 + $0x9c] sm:$0xf] }
 0x448   : > { %v5261_v2 = vshll.u32 %v5130_v9, 16  ;;  %6712 = vrot.lane.b32.xlu0 %v15870_v40, %s12839_s19  ;;  %v5259_v37 = vshrl.u32 %v5130_v9, 16  ;;  %v6909_v40 = vrot.slane %v6907_v20, 1  ;;  %v7419_v20 = vshll.u32 %v15953_v50, 16  ;;  %v18374_v11 = vld [vmem:[#allocation92_spill] sm:$0xff] }
 0x449   : > { %v4841_v45 = vpop.permute.xlu1 %4840  ;;  %v7410_v14 = vor.u32 %v7409_v42, %v7405_v58 }
 0x44a   : > { %v5263_v10 = vrot.slane %v5261_v2, 1  ;;  %v5132_v59 = vsel %vm5084_vm13, %v5067_v26, %v4841_v45  ;;  %v15946_v38 = vpop.permute.xlu0 %4205  ;;  %v6910_v47 = vor.u32 %v6909_v40, %v6905_v1  ;;  %v12638_v2 = vld [vmem:[#allocation2 + $0xa4] ss:$0 sps:$4 sm:$0x11]   ;;  %v5999_v40 = vld [vmem:[#allocation2 + $0x90] sm:$0xe] }
 0x44b   : > { %v5265_v22 = vshll.u32 %v5132_v59, 16  ;;  %6602 = vrot.lane.b32.xlu1 %v6567_v7, %s12834_s15  ;;  %v7077_v7 = vrot.slane %v11771_v28, 1  ;;  %v7421_v59 = vrot.slane %v7419_v20, 1  ;;  %v7424_v32 = vshll.u32 %v12638_v2, 16 }
 0x44c   : > { %v5264_v8 = vor.u32 %v5263_v10, %v5259_v37  ;;  %6984 = vrot.lane.b32.xlu0 %v6903_v25, %s12833_s14  ;;  %v6915_v45 = vsel %vm4377_vm8, %v6910_v47, %v6914_v27  ;;  %v7078_v37 = vrot.slane %v15937_v13, 1  ;;  %v7586_v10 = vrot.slane %v11818_v33, 1 }
 0x44d   : > { %v5267_v63 = vrot.slane %v5265_v22, 1  ;;  %v15955_v44 = vpop.permute.xlu1 %4656  ;;  %v7414_v25 = vrot.slane %v7412_v36, 1  ;;  %v7587_v1 = vrot.slane %v12635_v48, 1  ;;  %v15989_v13 = vcombine.low %v5965_v34, %v15975_v23  ;;  %v18375_v48 = vld [vmem:[#allocation78_spill] sm:$0xff] }
 0x44e   : > { %v4202_v21 = vpop.permute.xlu0 %4201  ;;  %v7079_v3 = vsel %vm1148_vm4, %v7077_v7, %v7078_v37  ;;  %v7590_v33 = vrot.slane %v12638_v2, 1  ;;  %v7426_v31 = vrot.slane %v7424_v32, 1  ;;  %v6569_v32 = vrot.slane %v15981_v15, 1 }
 0x44f   : > { %6714 = vrot.lane.b32.xlu1 %v11739_v51, %s12839_s19  ;;  %v5268_v12 = vsel %vm4377_vm8, %v5264_v8, %v5267_v63  ;;  %v15968_v51 = vcombine.low %v5963_v24, %v15958_v52  ;;  %v15991_v63 = vld [vmem:[#allocation2 + $0xa0] sm:$0xf]  ;;  %v4932_v47 = vsel %vm2705_vm14, %v18374_v11, %v4202_v21  ;;  %v7415_v28 = vsel %vm4377_vm8, %v7410_v14, %v7414_v25 }
 0x450   : > { %7112 = vrot.lane.b32.xlu0 %v7076_v4, %s12842_s17  ;;  %12339 = vmatmul.mubr.msk.bf16.gmra.mrb[20].mxu1 %vm5329_vm15, %v5268_v12  ;;  %v7589_v24 = vrot.slane %v11819_v30, 1  ;;  %v11724_v4 = vcombine.low %v5999_v40, %v15958_v52  ;;  %v11572_v12 = vcombine.low %v18375_v48, %v18375_v48  ;;  %v7588_v42 = vsel %vm1148_vm4, %v7586_v10, %v7587_v1  ;;  %v6000_v40 = vld [vmem:[#allocation2 + $0x9c] sm:$0xe] }
 0x451   : > { %v4653_v9 = vpop.permute.xlu1 %4652  ;;  %v6406_v39 = vshll.u32 %v15968_v51, 16  ;;  %v6404_v21 = vshrl.u32 %v15968_v51, 16  ;;  %v16004_v36 = vcombine.low %v6027_v46, %v15991_v63  ;;  %v5004_v52 = vsel %vm4954_vm11, %v4932_v47, %v15907_v53 }
 0x452   : > { %v15970_v26 = vpop.permute.xlu0 %4654  ;;  %v6411_v14 = vshll.u32 %v15981_v15, 16  ;;  %v6418_v30 = vshll.u32 %v15989_v13, 16  ;;  %v7591_v37 = vsel %vm1148_vm4, %v7589_v24, %v7590_v33  ;;  %v6568_v10 = vrot.slane %v11724_v4, 1 }
 0x453   : > { %6986 = vrot.lane.b32.xlu1 %v6915_v45, %s12833_s14  ;;  %v6408_v58 = vrot.slane %v6406_v39, 1  ;;  %v6029_v39 = vld [vmem:[#allocation2 + $0xa8] sm:$0xf]  ;;  %v11725_v15 = vcombine.low %v6000_v40, %v15975_v23  ;;  %v16047_v23 = vld [vmem:[#allocation2 + $0xac] sm:$0xf] }
 0x454   : > { %7224 = vrot.lane.b32.xlu0 %v11786_v17, %s12840_s22  ;;  %v7417_v17 = vshrl.u32 %v15953_v50, 16  ;;  %v6413_v47 = vrot.slane %v6411_v14, 1  ;;  %v6420_v24 = vrot.slane %v6418_v30, 1  ;;  %v6063_v14 = vld [vmem:[#allocation2 + $0x9c] sm:$0xe]  ;;  %v18376_v30 = vld [vmem:[#allocation104_spill] sm:$0xff] }
 0x455   : > { %v15979_v22 = vpop.permute.xlu1 %4207  ;;  %v6409_v46 = vor.u32 %v6408_v58, %v6404_v21  ;;  %v6571_v40 = vrot.slane %v11725_v15, 1 }
 0x456   : > { %v15984_v8 = vpop.permute.xlu0 %4325  ;;  %v7422_v27 = vor.u32 %v7421_v59, %v7417_v17  ;;  %v16017_v59 = vld [vmem:[#allocation2 + $0xa4] ss:$0 sps:$4 sm:$0x11]  }
 0x457   : > { %7114 = vrot.lane.b32.xlu1 %v7079_v3, %s12842_s17  ;;  %v16025_v3 = vld [vmem:[#allocation2 + $0xac] sm:$0xf] }
 0x458   : > { %7496 = vrot.lane.b32.xlu0 %v7415_v28, %s12843_s18 }
 0x459   : > { %v4204_v20 = vpop.permute.xlu1 %4203 }
 0x45a   : > { %v4935_v45 = vsel %vm2705_vm14, %v11572_v12, %v4204_v20  ;;  %v4651_v7 = vpop.permute.xlu0 %4650  ;;  %v16040_v12 = vcombine.low %v6029_v39, %v16025_v3  ;;  %v6416_v20 = vshrl.u32 %v15989_v13, 16 }
 0x45b   : > { %v5006_v2 = vsel %vm4954_vm11, %v4935_v45, %v15922_v29  ;;  %v5069_v34 = vsel %vm5019_vm12, %v5004_v52, %v4651_v7  ;;  %7226 = vrot.lane.b32.xlu1 %v15953_v50, %s12840_s22  ;;  %v7427_v29 = vsel %vm4377_vm8, %v7422_v27, %v7426_v31  ;;  %v6570_v27 = vsel %vm1148_vm4, %v6568_v10, %v6569_v32  ;;  %v6091_v31 = vld [vmem:[#allocation2 + $0xa8] sm:$0xf] }
 0x45c   : > { %v5071_v53 = vsel %vm5019_vm12, %v5006_v2, %v4653_v9  ;;  %v5134_v25 = vsel %vm5084_vm13, %v5069_v34, %v15887_v18  ;;  %7624 = vrot.lane.b32.xlu0 %v7588_v42, %s12841_s30  ;;  %v16031_v9 = vld [vmem:[#allocation2 + $0xa4] ss:$0 sps:$4 sm:$0x11]   ;;  %v6919_v18 = vshll.u32 %v16004_v36, 16  ;;  %v6414_v45 = vsel %vm4377_vm8, %v6409_v46, %v6413_v47 }
 0x45d   : > { %v5136_v50 = vsel %vm5084_vm13, %v5071_v53, %v15897_v0  ;;  %v5271_v1 = vshll.u32 %v5134_v25, 16  ;;  %v16029_v17 = vpop.permute.xlu1 %4327  ;;  %v5269_v4 = vshrl.u32 %v5134_v25, 16  ;;  %v6423_v0 = vshll.u32 %v16017_v59, 16  ;;  %v16042_v42 = vld [vmem:[#allocation2 + $0xb0] ss:$0 sps:$4 sm:$0x11]  }
 0x45e   : > { %v16034_v11 = vpop.permute.xlu0 %4850  ;;  %v5275_v28 = vshll.u32 %v5136_v50, 16  ;;  %v6921_v52 = vrot.slane %v6919_v18, 1  ;;  %v6924_v7 = vshll.u32 %v16031_v9, 16  ;;  %v4938_v2 = vsel %vm2705_vm14, %v18376_v30, %v15946_v38  ;;  %v18377_v25 = vld [vmem:[#allocation122_spill] sm:$0xff] }
 0x45f   : > { %v5273_v48 = vrot.slane %v5271_v1, 1  ;;  %7498 = vrot.lane.b32.xlu1 %v7427_v29, %s12843_s18  ;;  %v6421_v10 = vor.u32 %v6420_v24, %v6416_v20  ;;  %v6917_v53 = vshrl.u32 %v16004_v36, 16  ;;  %v4941_v29 = vsel %vm2705_vm14, %v18377_v25, %v15979_v22  ;;  %v6064_v20 = vld [vmem:[#allocation2 + $0xa8] sm:$0xe] }
 0x460   : > { %7626 = vrot.lane.b32.xlu0 %v7591_v37, %s12841_s30  ;;  %v5277_v33 = vrot.slane %v5275_v28, 1  ;;  %v6931_v38 = vshll.u32 %v16040_v12, 16  ;;  %v16070_v50 = vcombine.low %v6091_v31, %v16047_v23  ;;  %v6425_v46 = vrot.slane %v6423_v0, 1  ;;  %v6093_v31 = vld [vmem:[#allocation2 + $0xb4] sm:$0xf] }
 0x461   : > { %v5274_v21 = vor.u32 %v5273_v48, %v5269_v4  ;;  %v16049_v58 = vpop.permute.xlu1 %4852  ;;  %v6572_v22 = vrot.slane %v16017_v59, 1  ;;  %v11772_v18 = vcombine.low %v6063_v14, %v15991_v63  ;;  %v6936_v47 = vshll.u32 %v16042_v42, 16 }
 0x462   : > { %v16056_v34 = vpop.f32.mrb[4].mxu1  ;;  %v16058_v37 = vpop.permute.xlu0 %4321  ;;  %v5008_v28 = vsel %vm4954_vm11, %v4938_v2, %v15845_v49  ;;  %v6922_v4 = vor.u32 %v6921_v52, %v6917_v53  ;;  %v6926_v48 = vrot.slane %v6924_v7, 1  ;;  %v5010_v0 = vsel %vm4954_vm11, %v4941_v29, %v15885_v54  ;;  %v16091_v49 = vld [vmem:[#allocation2 + $0xb8] sm:$0xf]  ;;  %v6127_v29 = vld [vmem:[#allocation2 + $0xa8] sm:$0xe] }
 0x463   : > { %6475 = vrot.lane.b32.xlu1 %v6414_v45, %s12835_s16  ;;  %v16065_v32 = vpop.f32.mrb[5].mxu1  ;;  %v5278_v39 = vsel %vm4377_vm8, %v5274_v21, %v5277_v33  ;;  %v6426_v63 = vsel %vm4377_vm8, %v6421_v10, %v6425_v46  ;;  %v6573_v33 = vsel %vm1148_vm4, %v6571_v40, %v6572_v22  ;;  %v7081_v45 = vrot.slane %v16031_v9, 1 }
 0x464   : > { %v16072_v1 = vpop.f32.mrb[6].mxu1  ;;  %6604 = vrot.lane.b32.xlu0 %v6570_v27, %s12834_s15  ;;  %12342 = vmatprep.mubr.msk.bf16.mxu1 %vm5329_vm15, %v5278_v39  ;;  %v5073_v27 = vsel %vm5019_vm12, %v5008_v28, %v15970_v26  ;;  %v6933_v52 = vrot.slane %v6931_v38, 1  ;;  %v16096_v26 = vld [vmem:[#allocation2 + $0xb0] ss:$0 sps:$4 sm:$0x11]   ;;  %v7431_v54 = vshll.u32 %v16070_v50, 16  ;;  %v5075_v10 = vsel %vm5019_vm12, %v5010_v0, %v15955_v44 }
 0x465   : > { %v16081_v24 = vpop.permute.xlu1 %4323  ;;  %v16083_v15 = vpop.f32.mrb[7].mxu1  ;;  %v7080_v14 = vrot.slane %v11772_v18, 1  ;;  %v6929_v30 = vshrl.u32 %v16040_v12, 16  ;;  %v6938_v2 = vrot.slane %v6936_v47, 1  ;;  %v6927_v53 = vsel %vm4377_vm8, %v6922_v4, %v6926_v48  ;;  %v5967_v39 = vld [vmem:[#allocation2 + $0xa8] sm:$0xf] }
 0x466   : > { %v4847_v59 = vpop.permute.xlu0 %4846  ;;  %v11773_v9 = vcombine.low %v6064_v20, %v16025_v3  ;;  %v16107_v25 = vcombine.low %v6093_v31, %v16091_v49  ;;  %v16109_v38 = vld [vmem:[#allocation2 + $0xac] sm:$0xf]  ;;  %v7429_v47 = vshrl.u32 %v16070_v50, 16  ;;  %v6128_v44 = vld [vmem:[#allocation2 + $0xb4] sm:$0xe]  ;;  %v7433_v3 = vrot.slane %v7431_v54, 1 }
 0x467   : > { %v5138_v21 = vsel %vm5084_vm13, %v5073_v27, %v4847_v59  ;;  %6477 = vrot.lane.b32.xlu1 %v6426_v63, %s12835_s16  ;;  %v6934_v4 = vor.u32 %v6933_v52, %v6929_v30  ;;  %v7436_v48 = vshll.u32 %v16096_v26, 16  ;;  %v11820_v0 = vcombine.low %v6127_v29, %v16047_v23  ;;  %v12657_v59 = vld [vmem:[#allocation2 + $0xbc] ss:$0 sps:$4 sm:$0x11]   ;;  %v5969_v30 = vld [vmem:[#allocation2 + $0xb4] sm:$0xf] }
 0x468   : > { %v5281_v7 = vshll.u32 %v5138_v21, 16  ;;  %6716 = vrot.lane.b32.xlu0 %v16004_v36, %s12839_s19  ;;  %v5279_v36 = vshrl.u32 %v5138_v21, 16  ;;  %v16118_v63 = vcombine.low %v5967_v39, %v16109_v38  ;;  %v16120_v20 = vld [vmem:[#allocation2 + $0xb0] ss:$0 sps:$4 sm:$0x11]   ;;  %v7443_v52 = vshll.u32 %v16107_v25, 16 }
 0x469   : > { %v4849_v40 = vpop.permute.xlu1 %4848  ;;  %v11821_v54 = vcombine.low %v6128_v44, %v16091_v49  ;;  %v7084_v29 = vrot.slane %v16042_v42, 1  ;;  %v7593_v39 = vrot.slane %v16096_v26, 1  ;;  %v6939_v49 = vsel %vm4377_vm8, %v6934_v4, %v6938_v2 }
 0x46a   : > { %v5283_v46 = vrot.slane %v5281_v7, 1  ;;  %v5140_v22 = vsel %vm5084_vm13, %v5075_v10, %v4849_v40  ;;  %v4214_v18 = vpop.permute.xlu0 %4213  ;;  %v18378_v7 = vld [vmem:[#allocation94_spill] sm:$0xff]  ;;  %v16128_v10 = vld [vmem:[#allocation2 + $0xb8] sm:$0xf]  ;;  %v7082_v40 = vsel %vm1148_vm4, %v7080_v14, %v7081_v45  ;;  %v7434_v44 = vor.u32 %v7433_v3, %v7429_v47 }
 0x46b   : > { %v5285_v28 = vshll.u32 %v5140_v22, 16  ;;  %6606 = vrot.lane.b32.xlu1 %v6573_v33, %s12834_s15  ;;  %v11576_v33 = vcombine.low %v18378_v7, %v18378_v7  ;;  %v7438_v45 = vrot.slane %v7436_v48, 1  ;;  %v7592_v42 = vrot.slane %v11820_v0, 1 }
 0x46c   : > { %v5284_v27 = vor.u32 %v5283_v46, %v5279_v36  ;;  %6988 = vrot.lane.b32.xlu0 %v6927_v53, %s12833_s14  ;;  %v7083_v53 = vrot.slane %v11773_v9, 1  ;;  %v18379_v36 = vld [vmem:[#allocation118_spill] sm:$0xff]  ;;  %v6430_v26 = vshll.u32 %v16118_v63, 16  ;;  %v16143_v14 = vcombine.low %v5969_v30, %v16128_v10 }
 0x46d   : > { %v5287_v31 = vrot.slane %v5285_v28, 1  ;;  %v16122_v21 = vpop.permute.xlu1 %4664  ;;  %v4950_v46 = vsel %vm2705_vm14, %v18379_v36, %v4214_v18  ;;  %v6001_v28 = vld [vmem:[#allocation2 + $0xa8] sm:$0xe]  ;;  %v7448_v18 = vshll.u32 %v12657_v59, 16  ;;  %v6435_v2 = vshll.u32 %v16120_v20, 16 }
 0x46e   : > { %v4210_v23 = vpop.permute.xlu0 %4209  ;;  %v5016_v47 = vsel %vm4954_vm11, %v4950_v46, %v15984_v8  ;;  %v7085_v3 = vsel %vm1148_vm4, %v7083_v53, %v7084_v29  ;;  %v7441_v48 = vshrl.u32 %v16107_v25, 16  ;;  %v11726_v0 = vcombine.low %v6001_v28, %v16109_v38  ;;  %v16158_v36 = vld [vmem:[#allocation2 + $0xbc] ss:$0 sps:$4 sm:$0x11]  }
 0x46f   : > { %6718 = vrot.lane.b32.xlu1 %v16040_v12, %s12839_s19  ;;  %v5288_v22 = vsel %vm4377_vm8, %v5284_v27, %v5287_v31  ;;  %v7445_v12 = vrot.slane %v7443_v52, 1  ;;  %v7595_v27 = vrot.slane %v11821_v54, 1  ;;  %v18380_v31 = vld [vmem:[#allocation106_spill] sm:$0xff]  ;;  %v7439_v52 = vsel %vm4377_vm8, %v7434_v44, %v7438_v45 }
 0x470   : > { %7116 = vrot.lane.b32.xlu0 %v7082_v40, %s12842_s17  ;;  %12343 = vmatmul.mubr.msk.bf16.gmra.mrb[24].mxu1 %vm5329_vm15, %v5288_v22  ;;  %v4944_v30 = vsel %vm2705_vm14, %v18380_v31, %v4210_v23  ;;  %v7596_v54 = vrot.slane %v12657_v59, 1  ;;  %v7594_v8 = vsel %vm1148_vm4, %v7592_v42, %v7593_v39  ;;  %v6428_v53 = vshrl.u32 %v16118_v63, 16  ;;  %v18381_v59 = vld [vmem:[#allocation5_spill] sm:$0xff]  ;;  %v18382_v45 = vld [vmem:[#allocation126_spill] sm:$0xff]  ;;  %v16184_v31 = vld [vmem:[#allocation2 + $0xb8] sm:$0xf] }
 0x471   : > { %v16145_v9 = vpop.permute.xlu1 %4660  ;;  %v6432_v38 = vrot.slane %v6430_v26, 1  ;;  %v6442_v29 = vshll.u32 %v16143_v14, 16  ;;  %v7446_v46 = vor.u32 %v7445_v12, %v7441_v48  ;;  %v7450_v22 = vrot.slane %v7448_v18, 1  ;;  %v6031_v48 = vld [vmem:[#allocation2 + $0xb4] sm:$0xf] }
 0x472   : > { %v4663_v4 = vpop.permute.xlu0 %4662  ;;  %v6437_v44 = vrot.slane %v6435_v2, 1  ;;  %v5012_v39 = vsel %vm4954_vm11, %v4944_v30, %v16058_v37  ;;  %v6574_v26 = vrot.slane %v11726_v0, 1  ;;  %v6447_v2 = vshll.u32 %v16158_v36, 16 }
 0x473   : > { %v5081_v40 = vsel %vm5019_vm12, %v5016_v47, %v4663_v4  ;;  %6990 = vrot.lane.b32.xlu1 %v6939_v49, %s12833_s14  ;;  %v16166_v49 = vsel %vm1148_vm4, %v7595_v27, %v7596_v54  ;;  %v6033_v47 = vld [vmem:[#allocation2 + $0xc0] sm:$0xf]  ;;  %v16176_v4 = vld [vmem:[#allocation2 + $0xc4] sm:$0xf]  ;;  %v6575_v27 = vrot.slane %v16120_v20, 1  ;;  %v6444_v30 = vrot.slane %v6442_v29, 1 }
 0x474   : > { %7228 = vrot.lane.b32.xlu0 %v16070_v50, %s12840_s22  ;;  %v16170_v28 = vsel %vm5084_vm13, %v5081_v40, %v18381_v59  ;;  %v16195_v59 = vcombine.low %v6033_v47, %v16176_v4  ;;  %v16210_v29 = vld [vmem:[#allocation2 + $0xc8] ss:$0 sps:$4 sm:$0x11]  }
 0x475   : > { %v4216_v23 = vpop.permute.xlu1 %4215  ;;  %v5301_v40 = vshll.u32 %v16170_v28, 16  ;;  %v16217_v47 = vld [vmem:[#allocation2 + $0xc8] ss:$0 sps:$4 sm:$0x11]  }
 0x476   : > { %v4953_v50 = vsel %vm2705_vm14, %v18382_v45, %v4216_v23  ;;  %v4659_v42 = vpop.permute.xlu0 %4658  ;;  %v6095_v45 = vld [vmem:[#allocation2 + $0xc0] sm:$0xf] }
 0x477   : > { %v5018_v12 = vsel %vm4954_vm11, %v4953_v50, %v16029_v17  ;;  %v5077_v18 = vsel %vm5019_vm12, %v5012_v39, %v4659_v42  ;;  %7118 = vrot.lane.b32.xlu1 %v7085_v3, %s12842_s17  ;;  %v6433_v17 = vor.u32 %v6432_v38, %v6428_v53  ;;  %v18383_v3 = vld [vmem:[#allocation8_spill] sm:$0xff]  ;;  %v6576_v53 = vsel %vm1148_vm4, %v6574_v26, %v6575_v27 }
 0x478   : > { %v5083_v37 = vsel %vm5019_vm12, %v5018_v12, %v16122_v21  ;;  %v5142_v0 = vsel %vm5084_vm13, %v5077_v18, %v16034_v11  ;;  %7500 = vrot.lane.b32.xlu0 %v7439_v52, %s12843_s18  ;;  %v16197_v50 = vld [vmem:[#allocation2 + $0xc4] sm:$0xf]  ;;  %v7451_v52 = vsel %vm4377_vm8, %v7446_v46, %v7450_v22  ;;  %v16208_v38 = vcombine.low %v6031_v48, %v16184_v31  ;;  %v6002_v12 = vld [vmem:[#allocation2 + $0xb4] sm:$0xe] }
 0x479   : > { %v5148_v20 = vsel %vm5084_vm13, %v5083_v37, %v18383_v3  ;;  %v5291_v54 = vshll.u32 %v5142_v0, 16  ;;  %v4212_v23 = vpop.permute.xlu1 %4211  ;;  %v6449_v42 = vrot.slane %v6447_v2, 1  ;;  %v6438_v26 = vsel %vm4377_vm8, %v6433_v17, %v6437_v44  ;;  %v16223_v18 = vld [vmem:[#allocation2 + $0xbc] ss:$0 sps:$4 sm:$0x11]  }
 0x47a   : > { %v4947_v11 = vsel %vm2705_vm14, %v11576_v33, %v4212_v23  ;;  %v16203_v21 = vpop.permute.xlu0 %6704  ;;  %v5305_v7 = vshll.u32 %v5148_v20, 16  ;;  %v6440_v33 = vshrl.u32 %v16143_v14, 16  ;;  %v5303_v27 = vrot.slane %v5301_v40, 1  ;;  %v6066_v3 = vld [vmem:[#allocation2 + $0xc0] sm:$0xe] }
 0x47b   : > { %v5014_v39 = vsel %vm4954_vm11, %v4947_v11, %v16081_v24  ;;  %7230 = vrot.lane.b32.xlu1 %v16107_v25, %s12840_s22  ;;  %v5293_v46 = vrot.slane %v5291_v54, 1  ;;  %v6065_v24 = vld [vmem:[#allocation2 + $0xb4] sm:$0xe]  ;;  %v16226_v25 = vcombine.low %v6095_v45, %v16197_v50  ;;  %v6943_v17 = vshll.u32 %v16208_v38, 16 }
 0x47c   : > { %v5079_v22 = vsel %vm5019_vm12, %v5014_v39, %v16145_v9  ;;  %7628 = vrot.lane.b32.xlu0 %v7594_v8, %s12841_s30  ;;  %v6445_v37 = vor.u32 %v6444_v30, %v6440_v33  ;;  %v6955_v9 = vshll.u32 %v16195_v59, 16  ;;  %v5289_v8 = vshrl.u32 %v5142_v0, 16 }
 0x47d   : > { %v5144_v2 = vsel %vm5084_vm13, %v5079_v22, %v16049_v58  ;;  %v16230_v48 = vpop.permute.xlu1 %6594  ;;  %v6960_v54 = vshll.u32 %v16210_v29, 16  ;;  %v5299_v23 = vshrl.u32 %v16170_v28, 16  ;;  %v5307_v40 = vrot.slane %v5305_v7, 1 }
 0x47e   : > { %v16233_v20 = vpop.permute.xlu0 %6976  ;;  %v5295_v44 = vshll.u32 %v5144_v2, 16  ;;  %v11727_v58 = vcombine.low %v6002_v12, %v16128_v10  ;;  %v11774_v30 = vcombine.low %v6065_v24, %v16184_v31  ;;  %v5294_v45 = vor.u32 %v5293_v46, %v5289_v8  ;;  %v6129_v24 = vld [vmem:[#allocation2 + $0xc0] sm:$0xe] }
 0x47f   : > { %7502 = vrot.lane.b32.xlu1 %v7451_v52, %s12843_s18  ;;  %v11775_v11 = vcombine.low %v6066_v3, %v16176_v4  ;;  %v7455_v39 = vshll.u32 %v16226_v25, 16  ;;  %v5304_v33 = vor.u32 %v5303_v27, %v5299_v23  ;;  %v6957_v28 = vrot.slane %v6955_v9, 1  ;;  %v16264_v23 = vld [vmem:[%s18064_s8] ss:$0 sm:$0xff] }
 0x480   : > { %7630 = vrot.lane.b32.xlu0 %v16166_v49, %s12841_s30  ;;  %v5297_v0 = vrot.slane %v5295_v44, 1  ;;  %v7090_v52 = vrot.slane %v16210_v29, 1  ;;  %v7460_v7 = vshll.u32 %v16217_v47, 16  ;;  %v6945_v46 = vrot.slane %v6943_v17, 1  ;;  %v6097_v44 = vld [vmem:[#allocation2 + $0xcc] sm:$0xf] }
 0x481   : > { %v16245_v22 = vpop.permute.xlu1 %6706  ;;  %v6948_v12 = vshll.u32 %v16223_v18, 16  ;;  %v6953_v49 = vshrl.u32 %v16195_v59, 16  ;;  %v5308_v4 = vsel %vm4377_vm8, %v5304_v33, %v5307_v40  ;;  %v6577_v27 = vrot.slane %v11727_v58, 1  ;;  %v16259_v17 = vld [vmem:[#allocation2 + $0xd0] sm:$0xf] }
 0x482   : > { %v7105_v10 = vpop.permute.xlu0 %7104  ;;  %v5298_v31 = vsel %vm4377_vm8, %v5294_v45, %v5297_v0  ;;  %v6941_v29 = vshrl.u32 %v16208_v38, 16  ;;  %v7086_v2 = vrot.slane %v11774_v30, 1  ;;  %v6450_v9 = vsel %vm4377_vm8, %v6445_v37, %v6449_v42 }
 0x483   : > { %6479 = vrot.lane.b32.xlu1 %v6438_v26, %s12835_s16  ;;  %12346 = vmatprep.mubr.msk.bf16.mxu1 %vm5329_vm15, %v5298_v31  ;;  %v7089_v3 = vrot.slane %v11775_v11, 1  ;;  %v7457_v8 = vrot.slane %v7455_v39, 1  ;;  %v6578_v40 = vrot.slane %v16158_v36, 1  ;;  %v7087_v58 = vrot.slane %v16223_v18, 1  ;;  %v16277_v36 = vld [vmem:[%s18065_s9] ss:$0 sm:$0xff] }
 0x484   : > { %6608 = vrot.lane.b32.xlu0 %v6576_v53, %s12834_s15  ;;  %12347 = vmatmul.mubr.msk.bf16.gmra.mrb[28].mxu1 %vm5329_vm15, %v5308_v4  ;;  %v6958_v53 = vor.u32 %v6957_v28, %v6953_v49  ;;  %v11822_v30 = vcombine.low %v6129_v24, %v16197_v50  ;;  %v7649_v42 = vsel %vm2705_vm14, %v15023_v62, %v15467_v57  ;;  %v6962_v0 = vrot.slane %v6960_v54, 1 }
 0x485   : > { %v6979_v26 = vpop.permute.xlu1 %6978  ;;  %v6946_v45 = vor.u32 %v6945_v46, %v6941_v29  ;;  %v7453_v11 = vshrl.u32 %v16226_v25, 16  ;;  %v6579_v18 = vsel %vm1148_vm4, %v6577_v27, %v6578_v40  ;;  %v6950_v50 = vrot.slane %v6948_v12, 1 }
 0x486   : > { %v7217_v37 = vpop.permute.xlu0 %7216  ;;  %v16280_v33 = vrot.slane %v7460_v7, 1  ;;  %v16283_v62 = vcombine.low %v6097_v44, %v16259_v17  ;;  %v7088_v28 = vsel %vm1148_vm4, %v7086_v2, %v7087_v58  ;;  %v16290_v31 = vsel %vm1148_vm4, %v7089_v3, %v7090_v52 }
 0x487   : > { %6481 = vrot.lane.b32.xlu1 %v6450_v9, %s12835_s16  ;;  %v12362_v39 = vpop.f32.mrb[32].mxu0  ;;  %v16292_v46 = vor.u32 %v7457_v8, %v7453_v11  ;;  %v7681_v7 = vsel %vm4954_vm11, %v7649_v42, %v15428_v6  ;;  %v6963_v4 = vsel %vm4377_vm8, %v6958_v53, %v6962_v0  ;;  %v16298_v27 = vrot.slane %v11822_v30, 1 }
 0x488   : > { %v8137_v57 = vmul.f32 %v12362_v39, %v16264_v23  ;;  %v8001_v54 = vpop.f32.mrb[33].mxu0  ;;  %6720 = vrot.lane.b32.xlu0 %v16208_v38, %s12839_s19  ;;  %v7713_v38 = vsel %vm5019_vm12, %v7681_v7, %v16203_v21  ;;  %v6951_v3 = vsel %vm4377_vm8, %v6946_v45, %v6950_v50  ;;  %v7467_v40 = vshll.u32 %v16283_v62, 16  ;;  %v16324_v50 = vld [vmem:[#allocation2 + $0xd4] ss:$0 sps:$4 sm:$0x11]  }
 0x489   : > { %v8135_v12 = vmul.f32 %v16264_v23, %v8001_v54  ;;  %v7107_v49 = vpop.permute.xlu1 %7106  ;;  %v12363_v24 = vpop.f32.mrb[34].mxu0  ;;  %v7745_v6 = vsel %vm5084_vm13, %v7713_v38, %v16233_v20  ;;  %v7651_v21 = vsel %vm2705_vm14, %v15239_v19, %v15743_v35 }
 0x48a   : > { %v8176_v29 = vadd.f32 %v16277_v36, %v8137_v57  ;;  %v8138_v52 = vmul.f32 %v12363_v24, %v16264_v23  ;;  %v8004_v2 = vpop.f32.mrb[35].mxu0  ;;  %v7489_v9 = vpop.permute.xlu0 %7488  ;;  %v7777_v58 = vsel %vm5329_vm15, %v7745_v6, %v7105_v10  ;;  %v7683_v20 = vsel %vm4954_vm11, %v7651_v21, %v16230_v48 }
 0x48b   : > { %v8174_v8 = vadd.f32 %v16277_v36, %v8135_v12  ;;  %v8136_v44 = vmul.f32 %v16264_v23, %v8004_v2  ;;  %6610 = vrot.lane.b32.xlu1 %v6579_v18, %s12834_s15  ;;  %v7810_v42 = vsel %vm7796_vm3, %v7777_v58, %v7217_v37  ;;  %v7715_v39 = vsel %vm5019_vm12, %v7683_v20, %v16245_v22  ;;  %v6130_v20 = vld [vmem:[#allocation2 + $0xcc] sm:$0xe] }
 0x48c   : > { %v8208_v53 = vmax.f32 %v8176_v29, 0.0  ;;  %v8177_v30 = vadd.f32 %v16277_v36, %v8138_v52  ;;  %6992 = vrot.lane.b32.xlu0 %v6951_v3, %s12833_s14  ;;  %v7843_v10 = vsel %vm7829_vm6, %v7810_v42, %v7489_v9  ;;  %v7747_v57 = vsel %vm5084_vm13, %v7715_v39, %v6979_v26 }
 0x48d   : > { %v8206_v45 = vmax.f32 %v8174_v8, 0.0  ;;  %v8175_v0 = vadd.f32 %v16277_v36, %v8136_v44  ;;  %v7219_v11 = vpop.permute.xlu1 %7218  ;;  %v7779_v12 = vsel %vm5329_vm15, %v7747_v57, %v7107_v49  ;;  %v7465_v24 = vshrl.u32 %v16283_v62, 16 }
 0x48e   : > { %v8240_v19 = vmin.f32 %v8208_v53, 6.0  ;;  %v8209_v35 = vmax.f32 %v8177_v30, 0.0  ;;  %v7617_v18 = vpop.permute.xlu0 %7616  ;;  %v7812_v26 = vsel %vm7796_vm3, %v7779_v12, %v7219_v11  ;;  %v7469_v2 = vrot.slane %v7467_v40, 1 }
 0x48f   : > { %v8238_v54 = vmin.f32 %v8206_v45, 6.0  ;;  %v8207_v48 = vmax.f32 %v8175_v0, 0.0  ;;  %v7876_v37 = vsel %vm18155_vm7, %v7843_v10, %v7617_v18  ;;  %6722 = vrot.lane.b32.xlu1 %v16195_v59, %s12839_s19  ;;  %v7472_v49 = vshll.u32 %v16324_v50, 16 }
 0x490   : > { %v12052_v7 = vpack.c.bf16 %v8240_v19, %v8240_v19  ;;  %v8241_v22 = vmin.f32 %v8209_v35, 6.0  ;;  %7120 = vrot.lane.b32.xlu0 %v7088_v28, %s12842_s17  ;;  %12372 = vmatprep.mubr.msk.bf16.mxu0 %vm7931_vm10, %v7876_v37  ;;  %v7599_v21 = vrot.slane %v16217_v47, 1  ;;  %v7463_v40 = vsel %vm4377_vm8, %v16292_v46, %v16280_v33  ;;  %v8696_v33 = vld [vmem:[#allocation2 + $0x18] sm:$0xf] }
 0x491   : > { %v12050_v38 = vpack.c.bf16 %v8238_v54, %v8238_v54  ;;  %v8239_v29 = vmin.f32 %v8207_v48, 6.0  ;;  %v7491_v52 = vpop.permute.xlu1 %7490  ;;  %v7470_v11 = vor.u32 %v7469_v2, %v7465_v24  ;;  %v7474_v10 = vrot.slane %v7472_v49, 1 }
 0x492   : > { %v8384_v9 = vshrl.u32 %v12052_v7, 16  ;;  %v12053_v3 = vpack.c.bf16 %v8241_v22, %v8241_v22  ;;  %v7845_v59 = vsel %vm7829_vm6, %v7812_v26, %v7491_v52  ;;  %v7619_v6 = vpop.permute.xlu0 %7618  ;;  %v8387_v53 = vshll.u32 %v12052_v7, 16  ;;  %v8700_v26 = vld [vmem:[#allocation2 + $0x20] sm:$0x1] }
 0x493   : > { %v8367_v8 = vshrl.u32 %v12050_v38, 16  ;;  %v12051_v44 = vpack.c.bf16 %v8239_v29, %v8239_v29  ;;  %v7878_v28 = vsel %vm18155_vm7, %v7845_v59, %v7619_v6  ;;  %6994 = vrot.lane.b32.xlu1 %v6963_v4, %s12833_s14  ;;  %vm16348_vm7 = vmand %vm442_vm0, %vm855_vm5  ;;  %v8370_v4 = vshll.u32 %v12050_v38, 16  ;;  %v12819_v38 = vld [vmem:[#allocation2 + $0xc] sm:$0xf]  ;;  %v8693_v59 = vld [vmem:[#allocation2 + $0x14] sm:$0x1] }
 0x494   : > { %v8386_v58 = vrot.slane %v8384_v9, 7  ;;  %v8392_v30 = vshrl.u32 %v12053_v3, 16  ;;  %7232 = vrot.lane.b32.xlu0 %v16226_v25, %s12840_s22  ;;  %12373 = vmatmul.mubr.msk.bf16.gmra.mrb[44].mxu0 %vm7931_vm10, %v7878_v28  ;;  %v8395_v19 = vshll.u32 %v12053_v3, 16  ;;  %vm16358_vm5 = vmand %vm445_vm1, %vm530_vm2  ;;  %v11823_v48 = vcombine.low %v6130_v20, %v16259_v17 }
 0x495   : > { %v8369_v47 = vrot.slane %v8367_v8, 7  ;;  %v8375_v45 = vshrl.u32 %v12051_v44, 16  ;;  %v16352_v0 = vpop.permute.xlu1 %6467  ;;  %v8378_v54 = vshll.u32 %v12051_v44, 16  ;;  %v7600_v44 = vsel %vm1148_vm4, %v16298_v27, %v7599_v21 }
 0x496   : > { %v8389_v25 = vor.u32 %v8387_v53, %v8386_v58  ;;  %v8394_v39 = vrot.slane %v8392_v30, 7  ;;  %v16354_v35 = vpop.permute.xlu0 %6596  ;;  %v8390_v37 = vrot.slane %v8386_v58, 4  ;;  %v7475_v28 = vsel %vm4377_vm8, %v7470_v11, %v7474_v10 }
 0x497   : > { %v8372_v46 = vor.u32 %v8370_v4, %v8369_v47  ;;  %v8377_v57 = vrot.slane %v8375_v45, 7  ;;  %7122 = vrot.lane.b32.xlu1 %v16290_v31, %s12842_s17  ;;  %v8373_v24 = vrot.slane %v8369_v47, 4  ;;  %v7601_v58 = vrot.slane %v11823_v48, 1 }
 0x498   : > { %v8697_v7 = vsel %vm16348_vm7, %v8389_v25, %v8696_v33  ;;  %v8397_v12 = vor.u32 %v8395_v19, %v8394_v39  ;;  %v8399_v22 = vrot.slane %v8394_v39, 4  ;;  %7504 = vrot.lane.b32.xlu0 %v7463_v40, %s12843_s18  ;;  %v7602_v53 = vrot.slane %v16324_v50, 1 }
 0x499   : > { %8698 = vst [vmem:[#allocation2 + $0x18] sm:$0xf] %v8697_v7  ;;  %v8688_v29 = vsel %vm16348_vm7, %v8372_v46, %v12819_v38  ;;  %v8380_v52 = vor.u32 %v8378_v54, %v8377_v57  ;;  %v8382_v2 = vrot.slane %v8377_v57, 4  ;;  %v6470_v31 = vpop.permute.xlu1 %6469  ;;  %v7653_v46 = vsel %vm2705_vm14, %v15663_v5, %v16352_v0 }
 0x49a   : > { %8689 = vst [vmem:[#allocation2 + $0xc] sm:$0xf] %v8688_v29  ;;  %v8398_v9 = vsel %vm12999_vm9, %v8390_v37, %v8397_v12  ;;  %v8701_v3 = vsel %vm16358_vm5, %v8399_v22, %v8700_v26  ;;  %v6709_v6 = vpop.permute.xlu0 %6708  ;;  %v7603_v20 = vsel %vm1148_vm4, %v7601_v58, %v7602_v53  ;;  %v7685_v22 = vsel %vm4954_vm11, %v7653_v46, %v16354_v35 }
 0x49b   : > { %8699 = vst.msk [vmem:[#allocation2 + $0x1c] sm:$0xf] %vm442_vm0, %v8398_v9  ;;  %8702 = vst [vmem:[#allocation2 + $0x20] sm:$0x1] %v8701_v3  ;;  %v8381_v49 = vsel %vm12999_vm9, %v8373_v24, %v8380_v52  ;;  %v8694_v8 = vsel %vm16358_vm5, %v8382_v2, %v8693_v59  ;;  %7234 = vrot.lane.b32.xlu1 %v16283_v62, %s12840_s22  ;;  %v7717_v29 = vsel %vm5019_vm12, %v7685_v22, %v6709_v6  ;;  %vm18389_vm1 = vcmask 523264  }
 0x49c   : > { %8690 = vst.msk [vmem:[#allocation2 + $0x10] sm:$0xf] %vm442_vm0, %v8381_v49  ;;  %8695 = vst [vmem:[#allocation2 + $0x14] sm:$0x1] %v8694_v8  ;;  %7632 = vrot.lane.b32.xlu0 %v7600_v44, %s12841_s30  ;;  %v7655_v3 = vsel %vm2705_vm14, %v15685_v60, %v6470_v31 }
 0x49d   : > { %v6599_v30 = vpop.permute.xlu1 %6598  ;;  %vm18390_vm2 = vmmov %vm18389_vm1 }
 0x49e   : > { %v6981_v40 = vpop.permute.xlu0 %6980  ;;  %v7687_v6 = vsel %vm4954_vm11, %v7655_v3, %v6599_v30  ;;  %vm18391_vm4 = vmmov %vm18389_vm1 }
 0x49f   : > { %7506 = vrot.lane.b32.xlu1 %v7475_v28, %s12843_s18  ;;  %v7749_v2 = vsel %vm5084_vm13, %v7717_v29, %v6981_v40 }
 0x4a0   : > { %v8851_v47 = vld [vmem:[#allocation2 + $0x18] sm:$0xf] }
 0x4a1   : > { %v6711_v62 = vpop.permute.xlu1 %6710  ;;  %v8849_v39 = vld [vmem:[#allocation2 + $0xc] sm:$0xf]  ;;  %v8898_v37 = vld [vmem:[#allocation2 + $0x18] sm:$0xe] }
 0x4a2   : > { %v16389_v4 = vpop.f32.mrb[8].mxu1  ;;  %v7109_v27 = vpop.permute.xlu0 %7108  ;;  %v16391_v21 = vld [vmem:[#allocation2 + $0x20] ss:$0 sps:$4 sm:$0x11]   ;;  %v8852_v11 = vld [vmem:[#allocation2 + $0x1c] sm:$0xf]  ;;  %v7719_v58 = vsel %vm5019_vm12, %v7687_v6, %v6711_v62 }
 0x4a3   : > { %7634 = vrot.lane.b32.xlu1 %v7603_v20, %s12841_s30  ;;  %v16394_v45 = vpop.f32.mrb[9].mxu1  ;;  %9399 = vrot.lane.b32.xlu0 %v16391_v21, %s12833_s14  ;;  %v11912_v50 = vcombine.low %v8851_v47, %v8852_v11  ;;  %v8850_v33 = vld [vmem:[#allocation2 + $0x10] sm:$0xf]  ;;  %v12678_v54 = vld [vmem:[#allocation2 + $0x20] ss:$0 sps:$4 sm:$0x11]   ;;  %v11944_v7 = vcombine.low %v8898_v37, %v8852_v11  ;;  %v7781_v59 = vsel %vm5329_vm15, %v7749_v2, %v7109_v27 }
 0x4a4   : > { %v16396_v25 = vpop.f32.mrb[10].mxu1  ;;  %v11911_v48 = vcombine.low %v8849_v39, %v8850_v33  ;;  %v12679_v38 = vld [vmem:[#allocation2 + $0x18] sm:$0xff]   ;;  %v8897_v52 = vld [vmem:[#allocation2 + $0xc] sm:$0xe] }
 0x4a5   : > { %v6983_v19 = vpop.permute.xlu1 %6982  ;;  %v16400_v10 = vpop.f32.mrb[11].mxu1  ;;  %v9177_v12 = vshrl.u32 %v11912_v50, 16  ;;  %v11943_v9 = vcombine.low %v8897_v52, %v8850_v33  ;;  %v9180_v35 = vshll.u32 %v11912_v50, 16  ;;  %v9522_v49 = vshll.u32 %v11944_v7, 16 }
 0x4a6   : > { %v7221_v57 = vpop.permute.xlu0 %7220  ;;  %v9170_v0 = vshrl.u32 %v11911_v48, 16  ;;  %v12682_v28 = vld [vmem:[#allocation2 + $0x14] ss:$0 sps:$4 sm:$0x11]   ;;  %v7751_v60 = vsel %vm5084_vm13, %v7719_v58, %v6983_v19  ;;  %v9173_v62 = vshll.u32 %v11911_v48, 16  ;;  %v9531_v33 = vshrl.u32 %v16391_v21, 16 }
 0x4a7   : > { %9397 = vrot.lane.b32.xlu1 %v11912_v50, %s12833_s14  ;;  %9923 = vrot.lane.b32.xlu0 %v12678_v54, %s12841_s30  ;;  %v9179_v5 = vrot.slane %v9177_v12, 7  ;;  %v7814_v8 = vsel %vm7796_vm3, %v7781_v59, %v7221_v57  ;;  %v9524_v27 = vrot.slane %v9522_v49, 1  ;;  %v9508_v11 = vshll.u32 %v11943_v9, 16 }
 0x4a8   : > { %v9172_v47 = vrot.slane %v9170_v0, 7  ;;  %v9520_v46 = vshrl.u32 %v11944_v7, 16  ;;  %v9527_v19 = vshll.u32 %v16391_v21, 16  ;;  %v9506_v7 = vshrl.u32 %v11943_v9, 16 }
 0x4a9   : > { %v7111_v24 = vpop.permute.xlu1 %7110  ;;  %v9182_v20 = vor.u32 %v9180_v35, %v9179_v5 }
 0x4aa   : > { %v7493_v26 = vpop.permute.xlu0 %7492  ;;  %v7783_v30 = vsel %vm5329_vm15, %v7751_v60, %v7111_v24  ;;  %v9175_v37 = vor.u32 %v9173_v62, %v9172_v47  ;;  %v9525_v22 = vor.u32 %v9524_v27, %v9520_v46  ;;  %v9510_v24 = vrot.slane %v9508_v11, 1 }
 0x4ab   : > { %9921 = vrot.lane.b32.xlu1 %v12679_v38, %s12841_s30  ;;  %9393 = vrot.lane.b32.xlu0 %v11911_v48, %s12833_s14  ;;  %v7847_v53 = vsel %vm7829_vm6, %v7814_v8, %v7493_v26  ;;  %v9517_v38 = vshrl.u32 %v12682_v28, 16  ;;  %v9529_v29 = vrot.slane %v9527_v19, 1  ;;  %v9513_v26 = vshll.u32 %v12682_v28, 16 }
 0x4ac   : > { %v9511_v0 = vor.u32 %v9510_v24, %v9506_v7 }
 0x4ad   : > { %v7223_v44 = vpop.permute.xlu1 %7222  ;;  %v9530_v52 = vsel %vm4377_vm8, %v9525_v22, %v9529_v29  ;;  %v9515_v3 = vrot.slane %v9513_v26, 1 }
 0x4ae   : > { %v7621_v40 = vpop.permute.xlu0 %7620  ;;  %v7816_v50 = vsel %vm7796_vm3, %v7783_v30, %v7223_v44 }
 0x4af   : > { %v7880_v31 = vsel %vm18389_vm1, %v7847_v53, %v7621_v40  ;;  %9395 = vrot.lane.b32.xlu1 %v12682_v28, %s12833_s14  ;;  %9285 = vrot.lane.b32.xlu0 %v9182_v20, %s12834_s15  ;;  %v9516_v35 = vsel %vm4377_vm8, %v9511_v0, %v9515_v3 }
 0x4b0   : > { %12376 = vmatprep.mubr.msk.bf16.mxu0 %vm7931_vm10, %v7880_v31 }
 0x4b1   : > { %v7495_v39 = vpop.permute.xlu1 %7494 }
 0x4b2   : > { %v7849_v57 = vsel %vm7829_vm6, %v7816_v50, %v7495_v39  ;;  %v7623_v54 = vpop.permute.xlu0 %7622 }
 0x4b3   : > { %v7882_v12 = vsel %vm18390_vm2, %v7849_v57, %v7623_v54  ;;  %9735 = vrot.lane.b32.xlu1 %v9531_v33, %s12840_s22  ;;  %9281 = vrot.lane.b32.xlu0 %v9175_v37, %s12834_s15  ;;  %vm18392_vm2 = vmmov %vm18389_vm1 }
 0x4b4   : > { %12377 = vmatmul.mubr.msk.bf16.gmra.mrb[48].mxu0 %vm7931_vm10, %v7882_v12 }
 0x4b5   : > { %v6472_v48 = vpop.permute.xlu1 %6471 }
 0x4b6   : > { %v6601_v21 = vpop.permute.xlu0 %6600  ;;  %v7657_v28 = vsel %vm2705_vm14, %v15829_v16, %v6472_v48 }
 0x4b7   : > { %9731 = vrot.lane.b32.xlu1 %v9517_v38, %s12840_s22  ;;  %9733 = vrot.lane.b32.xlu0 %v9530_v52, %s12840_s22  ;;  %v12707_v38 = vld [vmem:[%s18066_s10] sm:$0xff]  }
 0x4b8   : > { %12392 = vmatprep.subr.bf16.mxu1 %v12707_v38 }
 0x4b9   : > { %v6474_v2 = vpop.permute.xlu1 %6473  ;;  %12393 = vmatpush3.bf16.msra.mxu1 %v12707_v38 }
 0x4ba   : > { %v6713_v59 = vpop.permute.xlu0 %6712  ;;  %v7659_v46 = vsel %vm2705_vm14, %v15849_v55, %v6474_v2 }
 0x4bb   : > { %9287 = vrot.lane.b32.xlu1 %v9179_v5, %s12834_s15  ;;  %9729 = vrot.lane.b32.xlu0 %v9516_v35, %s12840_s22  ;;  %v7689_v5 = vsel %vm4954_vm11, %v7657_v28, %v6601_v21 }
 0x4bc   : > { %v7721_v11 = vsel %vm5019_vm12, %v7689_v5, %v6713_v59 }
 0x4bd   : > { %v6603_v49 = vpop.permute.xlu1 %6602 }
 0x4be   : > { %v6985_v9 = vpop.permute.xlu0 %6984  ;;  %v7691_v37 = vsel %vm4954_vm11, %v7659_v46, %v6603_v49 }
 0x4bf   : > { %9283 = vrot.lane.b32.xlu1 %v9172_v47, %s12834_s15  ;;  %v7753_v16 = vsel %vm5084_vm13, %v7721_v11, %v6985_v9 }
 0x4c1   : > { %v6715_v6 = vpop.permute.xlu1 %6714 }
 0x4c2   : > { %v7113_v8 = vpop.permute.xlu0 %7112  ;;  %v7723_v29 = vsel %vm5019_vm12, %v7691_v37, %v6715_v6 }
 0x4c3   : > { %v7785_v19 = vsel %vm5329_vm15, %v7753_v16, %v7113_v8 }
 0x4c5   : > { %v6987_v44 = vpop.permute.xlu1 %6986 }
 0x4c6   : > { %v7225_v58 = vpop.permute.xlu0 %7224  ;;  %v7755_v52 = vsel %vm5084_vm13, %v7723_v29, %v6987_v44 }
 0x4c7   : > { %v12366_v53 = vpop.f32.mrb[36].mxu0  ;;  %v7818_v12 = vsel %vm7796_vm3, %v7785_v19, %v7225_v58  ;;  %v8710_v19 = vld [vmem:[#allocation2 + $0x30] sm:$0xf] }
 0x4c8   : > { %v8141_v40 = vmul.f32 %v12366_v53, %v16264_v23  ;;  %v8017_v20 = vpop.f32.mrb[37].mxu0 }
 0x4c9   : > { %v8139_v60 = vmul.f32 %v16264_v23, %v8017_v20  ;;  %v7115_v31 = vpop.permute.xlu1 %7114  ;;  %v12367_v27 = vpop.f32.mrb[38].mxu0 }
 0x4ca   : > { %v8180_v47 = vadd.f32 %v16277_v36, %v8141_v40  ;;  %v8142_v30 = vmul.f32 %v12367_v27, %v16264_v23  ;;  %v8020_v62 = vpop.f32.mrb[39].mxu0  ;;  %v7497_v50 = vpop.permute.xlu0 %7496  ;;  %v7787_v35 = vsel %vm5329_vm15, %v7755_v52, %v7115_v31 }
 0x4cb   : > { %v8178_v39 = vadd.f32 %v16277_v36, %v8139_v60  ;;  %v8140_v33 = vmul.f32 %v16264_v23, %v8020_v62  ;;  %v7851_v26 = vsel %vm7829_vm6, %v7818_v12, %v7497_v50 }
 0x4cc   : > { %v8212_v57 = vmax.f32 %v8180_v47, 0.0  ;;  %v8181_v54 = vadd.f32 %v16277_v36, %v8142_v30 }
 0x4cd   : > { %v8210_v22 = vmax.f32 %v8178_v39, 0.0  ;;  %v8179_v24 = vadd.f32 %v16277_v36, %v8140_v33  ;;  %v7227_v48 = vpop.permute.xlu1 %7226 }
 0x4ce   : > { %v8244_v55 = vmin.f32 %v8212_v57, 6.0  ;;  %v8213_v7 = vmax.f32 %v8181_v54, 0.0  ;;  %v7625_v21 = vpop.permute.xlu0 %7624  ;;  %v7820_v8 = vsel %vm7796_vm3, %v7787_v35, %v7227_v48 }
 0x4cf   : > { %v8242_v0 = vmin.f32 %v8210_v22, 6.0  ;;  %v8211_v2 = vmax.f32 %v8179_v24, 0.0  ;;  %v7884_v3 = vsel %vm18391_vm4, %v7851_v26, %v7625_v21  ;;  %v8703_v24 = vld [vmem:[#allocation2 + $0x24] sm:$0xf]  ;;  %vm18393_vm4 = vmmov %vm18389_vm1 }
 0x4d0   : > { %v12056_v59 = vpack.c.bf16 %v8244_v55, %v8244_v55  ;;  %v8245_v49 = vmin.f32 %v8213_v7, 6.0  ;;  %12380 = vmatprep.mubr.msk.bf16.mxu0 %vm7931_vm10, %v7884_v3  ;;  %v8714_v7 = vld [vmem:[#allocation2 + $0x38] sm:$0x1]  ;;  %v8707_v3 = vld [vmem:[#allocation2 + $0x2c] sm:$0x1] }
 0x4d1   : > { %v12054_v9 = vpack.c.bf16 %v8242_v0, %v8242_v0  ;;  %v8243_v6 = vmin.f32 %v8211_v2, 6.0  ;;  %v7499_v28 = vpop.permute.xlu1 %7498 }
 0x4d2   : > { %v8418_v58 = vshrl.u32 %v12056_v59, 16  ;;  %v12057_v53 = vpack.c.bf16 %v8245_v49, %v8245_v49  ;;  %v7853_v44 = vsel %vm7829_vm6, %v7820_v8, %v7499_v28  ;;  %v7627_v40 = vpop.permute.xlu0 %7626  ;;  %v8421_v31 = vshll.u32 %v12056_v59, 16 }
 0x4d3   : > { %v8401_v20 = vshrl.u32 %v12054_v9, 16  ;;  %v12055_v5 = vpack.c.bf16 %v8243_v6, %v8243_v6  ;;  %v7886_v60 = vsel %vm18389_vm1, %v7853_v44, %v7627_v40  ;;  %v8404_v30 = vshll.u32 %v12054_v9, 16 }
 0x4d4   : > { %v8420_v27 = vrot.slane %v8418_v58, 7  ;;  %v8426_v11 = vshrl.u32 %v12057_v53, 16  ;;  %12381 = vmatmul.mubr.msk.bf16.gmra.mrb[52].mxu0 %vm7931_vm10, %v7886_v60  ;;  %v8429_v33 = vshll.u32 %v12057_v53, 16  ;;  %v12708_v58 = vld [vmem:[%s18066_s10 + $0x8] sm:$0xff]  }
 0x4d5   : > { %v8403_v47 = vrot.slane %v8401_v20, 7  ;;  %v8409_v62 = vshrl.u32 %v12055_v5, 16  ;;  %v6476_v50 = vpop.permute.xlu1 %6475  ;;  %v8412_v37 = vshll.u32 %v12055_v5, 16  ;;  %12394 = vmatprep.subr.bf16.mxu1 %v12708_v58  ;;  %v12709_v5 = vld [vmem:[%s18066_s10 + $0x10] sm:$0xff]  }
 0x4d6   : > { %v8423_v16 = vor.u32 %v8421_v31, %v8420_v27  ;;  %v8428_v39 = vrot.slane %v8426_v11, 7  ;;  %v6605_v46 = vpop.permute.xlu0 %6604  ;;  %v8424_v12 = vrot.slane %v8420_v27, 4  ;;  %12395 = vmatpush3.bf16.msra.mxu1 %v12708_v58 }
 0x4d7   : > { %v8406_v57 = vor.u32 %v8404_v30, %v8403_v47  ;;  %v8411_v54 = vrot.slane %v8409_v62, 7  ;;  %v8407_v29 = vrot.slane %v8403_v47, 4  ;;  %12396 = vmatprep.subr.bf16.mxu1 %v12709_v5  ;;  %v7661_v30 = vsel %vm2705_vm14, %v15968_v51, %v6476_v50 }
 0x4d8   : > { %v8711_v22 = vsel %vm16348_vm7, %v8423_v16, %v8710_v19  ;;  %v8431_v48 = vor.u32 %v8429_v33, %v8428_v39  ;;  %v8433_v38 = vrot.slane %v8428_v39, 4  ;;  %v7693_v19 = vsel %vm4954_vm11, %v7661_v30, %v6605_v46 }
 0x4d9   : > { %8712 = vst [vmem:[#allocation2 + $0x30] sm:$0xf] %v8711_v22  ;;  %v8704_v55 = vsel %vm16348_vm7, %v8406_v57, %v8703_v24  ;;  %v8414_v26 = vor.u32 %v8412_v37, %v8411_v54  ;;  %v8416_v21 = vrot.slane %v8411_v54, 4  ;;  %v6478_v52 = vpop.permute.xlu1 %6477  ;;  %v12711_v24 = vld [vmem:[%s18066_s10 + $0x20] sm:$0xff]  }
 0x4da   : > { %8705 = vst [vmem:[#allocation2 + $0x24] sm:$0xf] %v8704_v55  ;;  %v8432_v0 = vsel %vm12999_vm9, %v8424_v12, %v8431_v48  ;;  %v8715_v2 = vsel %vm16358_vm5, %v8433_v38, %v8714_v7  ;;  %v6717_v59 = vpop.permute.xlu0 %6716  ;;  %12397 = vmatpush3.bf16.msra.mxu1 %v12709_v5  ;;  %v12710_v12 = vld [vmem:[%s18066_s10 + $0x18] sm:$0xff]   ;;  %v7663_v55 = vsel %vm2705_vm14, %v15989_v13, %v6478_v52 }
 0x4db   : > { %8713 = vst.msk [vmem:[#allocation2 + $0x34] sm:$0xf] %vm442_vm0, %v8432_v0  ;;  %8716 = vst [vmem:[#allocation2 + $0x38] sm:$0x1] %v8715_v2  ;;  %v8415_v35 = vsel %vm12999_vm9, %v8407_v29, %v8414_v26  ;;  %v8708_v49 = vsel %vm16358_vm5, %v8416_v21, %v8707_v3  ;;  %v7725_v51 = vsel %vm5019_vm12, %v7693_v19, %v6717_v59  ;;  %12398 = vmatprep.subr.bf16.mxu1 %v12710_v12 }
 0x4dc   : > { %8706 = vst.msk [vmem:[#allocation2 + $0x28] sm:$0xf] %vm442_vm0, %v8415_v35  ;;  %8709 = vst [vmem:[#allocation2 + $0x2c] sm:$0x1] %v8708_v49 }
 0x4dd   : > { %v6607_v9 = vpop.permute.xlu1 %6606 }
 0x4de   : > { %v16486_v6 = vpop.f32.mrb[12].mxu1  ;;  %v6989_v8 = vpop.permute.xlu0 %6988  ;;  %12399 = vmatpush3.bf16.msra.mxu1 %v12710_v12  ;;  %v7695_v21 = vsel %vm4954_vm11, %v7663_v55, %v6607_v9 }
 0x4df   : > { %v16488_v28 = vpop.f32.mrb[13].mxu1  ;;  %v7757_v46 = vsel %vm5084_vm13, %v7725_v51, %v6989_v8  ;;  %12400 = vmatprep.subr.bf16.mxu1 %v12711_v24 }
 0x4e0   : > { %v16493_v53 = vpop.f32.mrb[14].mxu1  ;;  %v8855_v44 = vld [vmem:[#allocation2 + $0x30] sm:$0xf] }
 0x4e1   : > { %v6719_v40 = vpop.permute.xlu1 %6718  ;;  %v16495_v20 = vpop.f32.mrb[15].mxu1  ;;  %v8900_v57 = vld [vmem:[#allocation2 + $0x30] sm:$0xe]  ;;  %v8853_v22 = vld [vmem:[#allocation2 + $0x24] sm:$0xf] }
 0x4e2   : > { %v7117_v60 = vpop.permute.xlu0 %7116  ;;  %v8856_v27 = vld [vmem:[#allocation2 + $0x34] sm:$0xf]  ;;  %v16502_v11 = vld [vmem:[#allocation2 + $0x38] ss:$0 sps:$4 sm:$0x11]   ;;  %v7727_v59 = vsel %vm5019_vm12, %v7695_v21, %v6719_v40  ;;  %12401 = vmatpush3.bf16.msra.mxu1 %v12711_v24 }
 0x4e3   : > { %v16500_v31 = vcombine.low %v8855_v44, %v8856_v27  ;;  %9407 = vrot.lane.b32.xlu0 %v16502_v11, %s12833_s14  ;;  %v12686_v16 = vld [vmem:[#allocation2 + $0x30] sm:$0xff]   ;;  %v12687_v39 = vld [vmem:[#allocation2 + $0x38] ss:$0 sps:$4 sm:$0x11]   ;;  %v8854_v33 = vld [vmem:[#allocation2 + $0x28] sm:$0xf]  ;;  %v7789_v7 = vsel %vm5329_vm15, %v7757_v46, %v7117_v60  ;;  %v11946_v26 = vcombine.low %v8900_v57, %v8856_v27 }
 0x4e4   : > { %v12689_v37 = vld [vmem:[#allocation2 + $0x24] sm:$0xff]   ;;  %v12688_v48 = vld [vmem:[#allocation2 + $0x2c] ss:$0 sps:$4 sm:$0x11]   ;;  %v11913_v38 = vcombine.low %v8853_v22, %v8854_v33  ;;  %v9555_v21 = vshll.u32 %v16502_v11, 16 }
 0x4e5   : > { %v6991_v47 = vpop.permute.xlu1 %6990  ;;  %9405 = vrot.lane.b32.xlu1 %v16500_v31, %s12833_s14  ;;  %v9191_v29 = vshrl.u32 %v16500_v31, 16  ;;  %v16529_v3 = vld [vmem:[#allocation2 + $0x2c] ss:$0 sps:$4 sm:$0x11]   ;;  %v8899_v9 = vld [vmem:[#allocation2 + $0x24] sm:$0xe] }
 0x4e6   : > { %v7229_v62 = vpop.permute.xlu0 %7228  ;;  %v7759_v52 = vsel %vm5084_vm13, %v7727_v59, %v6991_v47  ;;  %v9184_v58 = vshrl.u32 %v11913_v38, 16  ;;  %v11945_v5 = vcombine.low %v8899_v9, %v8854_v33  ;;  %v9550_v60 = vshll.u32 %v11946_v26, 16 }
 0x4e7   : > { %9931 = vrot.lane.b32.xlu0 %v12687_v39, %s12841_s30  ;;  %v7822_v0 = vsel %vm7796_vm3, %v7789_v7, %v7229_v62  ;;  %v16535_v8 = vrot.slane %v9191_v29, 7  ;;  %v9194_v47 = vshll.u32 %v16500_v31, 16  ;;  %v9559_v33 = vshrl.u32 %v16502_v11, 16 }
 0x4e8   : > { %v9186_v57 = vrot.slane %v9184_v58, 7  ;;  %v9552_v12 = vrot.slane %v9550_v60, 1  ;;  %v9536_v51 = vshll.u32 %v11945_v5, 16  ;;  %v9187_v24 = vshll.u32 %v11913_v38, 16 }
 0x4e9   : > { %v7119_v54 = vpop.permute.xlu1 %7118  ;;  %9929 = vrot.lane.b32.xlu1 %v12686_v16, %s12841_s30  ;;  %v9196_v19 = vor.u32 %v9194_v47, %v16535_v8  ;;  %v9548_v7 = vshrl.u32 %v11946_v26, 16  ;;  %v9545_v59 = vshrl.u32 %v16529_v3, 16  ;;  %v9534_v11 = vshrl.u32 %v11945_v5, 16 }
 0x4ea   : > { %v7501_v50 = vpop.permute.xlu0 %7500  ;;  %v7791_v44 = vsel %vm5329_vm15, %v7759_v52, %v7119_v54 }
 0x4eb   : > { %9925 = vrot.lane.b32.xlu0 %v12689_v37, %s12841_s30  ;;  %v7855_v35 = vsel %vm7829_vm6, %v7822_v0, %v7501_v50  ;;  %v9553_v52 = vor.u32 %v9552_v12, %v9548_v7 }
 0x4ed   : > { %v7231_v2 = vpop.permute.xlu1 %7230  ;;  %9927 = vrot.lane.b32.xlu1 %v12688_v48, %s12841_s30 }
 0x4ee   : > { %v7629_v13 = vpop.permute.xlu0 %7628  ;;  %v7824_v40 = vsel %vm7796_vm3, %v7791_v44, %v7231_v2 }
 0x4ef   : > { %v7888_v49 = vsel %vm18392_vm2, %v7855_v35, %v7629_v13  ;;  %9401 = vrot.lane.b32.xlu0 %v11913_v38, %s12833_s14  ;;  %v9189_v35 = vor.u32 %v9187_v24, %v9186_v57  ;;  %vm18395_vm2 = vmmov %vm18389_vm1 }
 0x4f0   : > { %12384 = vmatprep.mubr.msk.bf16.mxu0 %vm7931_vm10, %v7888_v49  ;;  %v9538_v49 = vrot.slane %v9536_v51, 1 }
 0x4f1   : > { %v7503_v27 = vpop.permute.xlu1 %7502  ;;  %9403 = vrot.lane.b32.xlu1 %v16529_v3, %s12833_s14 }
 0x4f2   : > { %v7857_v30 = vsel %vm7829_vm6, %v7824_v40, %v7503_v27  ;;  %v7631_v62 = vpop.permute.xlu0 %7630  ;;  %v9557_v40 = vrot.slane %v9555_v21, 1  ;;  %v9541_v27 = vshll.u32 %v16529_v3, 16 }
 0x4f3   : > { %v7890_v16 = vsel %vm18393_vm4, %v7857_v30, %v7631_v62  ;;  %v12370_v39 = vpop.f32.mrb[40].mxu0  ;;  %9293 = vrot.lane.b32.xlu0 %v9196_v19, %s12834_s15  ;;  %vm10473_vm4 = vcmask 654336  }
 0x4f4   : > { %v8145_v54 = vmul.f32 %v12370_v39, %v16264_v23  ;;  %v8033_v37 = vpop.f32.mrb[41].mxu0  ;;  %12385 = vmatmul.mubr.msk.bf16.gmra.mrb[56].mxu0 %vm7931_vm10, %v7890_v16  ;;  %v9539_v39 = vor.u32 %v9538_v49, %v9534_v11  ;;  %v9543_v3 = vrot.slane %v9541_v27, 1 }
 0x4f5   : > { %v8143_v31 = vmul.f32 %v16264_v23, %v8033_v37  ;;  %v16551_v50 = vpop.permute.xlu1 %6479  ;;  %9743 = vrot.lane.b32.xlu1 %v9559_v33, %s12840_s22  ;;  %v12371_v22 = vpop.f32.mrb[42].mxu0 }
 0x4f6   : > { %v8184_v46 = vadd.f32 %v16277_v36, %v8145_v54  ;;  %v8146_v48 = vmul.f32 %v12371_v22, %v16264_v23  ;;  %v8036_v29 = vpop.f32.mrb[43].mxu0  ;;  %v16557_v55 = vpop.permute.xlu0 %6608 }
 0x4f7   : > { %v8182_v0 = vadd.f32 %v16277_v36, %v8143_v31  ;;  %v8144_v2 = vmul.f32 %v16264_v23, %v8036_v29  ;;  %9289 = vrot.lane.b32.xlu0 %v9189_v35, %s12834_s15 }
 0x4f8   : > { %v8216_v13 = vmax.f32 %v8184_v46, 0.0  ;;  %v8185_v38 = vadd.f32 %v16277_v36, %v8146_v48  ;;  %v9544_v48 = vsel %vm4377_vm8, %v9539_v39, %v9543_v3 }
 0x4f9   : > { %v8214_v9 = vmax.f32 %v8182_v0, 0.0  ;;  %v8183_v58 = vadd.f32 %v16277_v36, %v8144_v2  ;;  %v16565_v44 = vpop.permute.xlu1 %6481  ;;  %9739 = vrot.lane.b32.xlu1 %v9545_v59, %s12840_s22  ;;  %v9558_v36 = vsel %vm4377_vm8, %v9553_v52, %v9557_v40 }
 0x4fa   : > { %v8248_v26 = vmin.f32 %v8216_v13, 6.0  ;;  %v8217_v23 = vmax.f32 %v8185_v38, 0.0  ;;  %v16569_v60 = vpop.permute.xlu0 %6720  ;;  %v8724_v13 = vld [vmem:[#allocation2 + $0x48] sm:$0xf] }
 0x4fb   : > { %v8246_v47 = vmin.f32 %v8214_v9, 6.0  ;;  %v8215_v30 = vmax.f32 %v8183_v58, 0.0  ;;  %9741 = vrot.lane.b32.xlu0 %v9558_v36, %s12840_s22 }
 0x4fc   : > { %v12060_v62 = vpack.c.bf16 %v8248_v26, %v8248_v26  ;;  %v8249_v16 = vmin.f32 %v8217_v23, 6.0  ;;  %v8717_v26 = vld [vmem:[#allocation2 + $0x3c] sm:$0xf] }
 0x4fd   : > { %v12058_v33 = vpack.c.bf16 %v8246_v47, %v8246_v47  ;;  %v8247_v19 = vmin.f32 %v8215_v30, 6.0  ;;  %v16573_v54 = vpop.permute.xlu1 %6610  ;;  %9295 = vrot.lane.b32.xlu1 %v16535_v8, %s12834_s15  ;;  %v8728_v30 = vld [vmem:[#allocation2 + $0x50] sm:$0x1] }
 0x4fe   : > { %v8452_v5 = vshrl.u32 %v12060_v62, 16  ;;  %v12061_v37 = vpack.c.bf16 %v8249_v16, %v8249_v16  ;;  %v6993_v12 = vpop.permute.xlu0 %6992  ;;  %v8455_v24 = vshll.u32 %v12060_v62, 16 }
 0x4ff   : > { %v8435_v51 = vshrl.u32 %v12058_v33, 16  ;;  %v12059_v31 = vpack.c.bf16 %v8247_v19, %v8247_v19  ;;  %v8438_v7 = vshll.u32 %v12058_v33, 16  ;;  %9737 = vrot.lane.b32.xlu0 %v9544_v48, %s12840_s22  ;;  %v7665_v33 = vsel %vm2705_vm14, %v16118_v63, %v16551_v50 }
 0x500   : > { %v8454_v22 = vrot.slane %v8452_v5, 7  ;;  %v8460_v46 = vshrl.u32 %v12061_v37, 16  ;;  %v8463_v59 = vshll.u32 %v12061_v37, 16  ;;  %v8721_v37 = vld [vmem:[#allocation2 + $0x44] sm:$0x1]  ;;  %v7697_v63 = vsel %vm4954_vm11, %v7665_v33, %v16557_v55 }
 0x501   : > { %v8437_v29 = vrot.slane %v8435_v51, 7  ;;  %v8443_v21 = vshrl.u32 %v12059_v31, 16  ;;  %v6723_v0 = vpop.permute.xlu1 %6722  ;;  %9291 = vrot.lane.b32.xlu1 %v9186_v57, %s12834_s15  ;;  %v8446_v49 = vshll.u32 %v12059_v31, 16  ;;  %v7667_v55 = vsel %vm2705_vm14, %v16143_v14, %v16565_v44 }
 0x502   : > { %v8457_v8 = vor.u32 %v8455_v24, %v8454_v22  ;;  %v8462_v2 = vrot.slane %v8460_v46, 7  ;;  %v7121_v35 = vpop.permute.xlu0 %7120  ;;  %v8458_v58 = vrot.slane %v8454_v22, 4  ;;  %v7729_v24 = vsel %vm5019_vm12, %v7697_v63, %v16569_v60 }
 0x503   : > { %v8440_v38 = vor.u32 %v8438_v7, %v8437_v29  ;;  %v8445_v52 = vrot.slane %v8443_v21, 7  ;;  %v16581_v9 = vpop.f32.mrb[16].mxu1  ;;  %v8441_v27 = vrot.slane %v8437_v29, 4  ;;  %v7761_v48 = vsel %vm5084_vm13, %v7729_v24, %v6993_v12 }
 0x504   : > { %18394 = vst [vmem:[#allocation59_spill] sm:$0xff] %v16581_v9  ;;  %v8725_v11 = vsel %vm16348_vm7, %v8457_v8, %v8724_v13  ;;  %v8465_v23 = vor.u32 %v8463_v59, %v8462_v2  ;;  %v8467_v40 = vrot.slane %v8462_v2, 4  ;;  %v16585_v57 = vpop.f32.mrb[17].mxu1  ;;  %v7793_v29 = vsel %vm5329_vm15, %v7761_v48, %v7121_v35 }
 0x505   : > { %8726 = vst [vmem:[#allocation2 + $0x48] sm:$0xf] %v8725_v11  ;;  %v8718_v47 = vsel %vm16348_vm7, %v8440_v38, %v8717_v26  ;;  %v8448_v62 = vor.u32 %v8446_v49, %v8445_v52  ;;  %v8450_v16 = vrot.slane %v8445_v52, 4  ;;  %v6995_v36 = vpop.permute.xlu1 %6994  ;;  %v16589_v39 = vpop.f32.mrb[18].mxu1  ;;  %v7699_v12 = vsel %vm4954_vm11, %v7667_v55, %v16573_v54 }
 0x506   : > { %8719 = vst [vmem:[#allocation2 + $0x3c] sm:$0xf] %v8718_v47  ;;  %v8466_v19 = vsel %vm12999_vm9, %v8458_v58, %v8465_v23  ;;  %v8729_v5 = vsel %vm16358_vm5, %v8467_v40, %v8728_v30  ;;  %v16598_v3 = vpop.f32.mrb[19].mxu1  ;;  %v7233_v51 = vpop.permute.xlu0 %7232  ;;  %v7731_v35 = vsel %vm5019_vm12, %v7699_v12, %v6723_v0 }
 0x507   : > { %8727 = vst.msk [vmem:[#allocation2 + $0x4c] sm:$0xf] %vm442_vm0, %v8466_v19  ;;  %8730 = vst [vmem:[#allocation2 + $0x50] sm:$0x1] %v8729_v5  ;;  %v8449_v31 = vsel %vm12999_vm9, %v8441_v27, %v8448_v62  ;;  %v8722_v22 = vsel %vm16358_vm5, %v8450_v16, %v8721_v37  ;;  %v7826_v7 = vsel %vm7796_vm3, %v7793_v29, %v7233_v51 }
 0x508   : > { %8720 = vst.msk [vmem:[#allocation2 + $0x40] sm:$0xf] %vm442_vm0, %v8449_v31  ;;  %8723 = vst [vmem:[#allocation2 + $0x44] sm:$0x1] %v8722_v22  ;;  %v7763_v14 = vsel %vm5084_vm13, %v7731_v35, %v6995_v36 }
 0x509   : > { %v7123_v50 = vpop.permute.xlu1 %7122 }
 0x50a   : > { %v7505_v46 = vpop.permute.xlu0 %7504  ;;  %v7795_v44 = vsel %vm5329_vm15, %v7763_v14, %v7123_v50  ;;  %vm18400_vm15 = vmmov %vm18389_vm1 }
 0x50b   : > { %v7859_v8 = vsel %vm7829_vm6, %v7826_v7, %v7505_v46 }
 0x50c   : > { %v8859_v59 = vld [vmem:[#allocation2 + $0x48] sm:$0xf] }
 0x50d   : > { %v7235_v21 = vpop.permute.xlu1 %7234  ;;  %v8902_v40 = vld [vmem:[#allocation2 + $0x48] sm:$0xe]  ;;  %v8857_v62 = vld [vmem:[#allocation2 + $0x3c] sm:$0xf] }
 0x50e   : > { %v7633_v2 = vpop.permute.xlu0 %7632  ;;  %v8860_v13 = vld [vmem:[#allocation2 + $0x4c] sm:$0xf]  ;;  %v16618_v52 = vld [vmem:[#allocation2 + $0x50] ss:$0 sps:$4 sm:$0x11]   ;;  %v7828_v26 = vsel %vm7796_vm3, %v7795_v44, %v7235_v21 }
 0x50f   : > { %v7892_v38 = vsel %vm18389_vm1, %v7859_v8, %v7633_v2  ;;  %v11916_v60 = vcombine.low %v8859_v59, %v8860_v13  ;;  %9415 = vrot.lane.b32.xlu0 %v16618_v52, %s12833_s14  ;;  %v12696_v58 = vld [vmem:[#allocation2 + $0x48] sm:$0xff]   ;;  %v12697_v11 = vld [vmem:[#allocation2 + $0x50] ss:$0 sps:$4 sm:$0x11]   ;;  %v8858_v23 = vld [vmem:[#allocation2 + $0x40] sm:$0xf]  ;;  %v11948_v19 = vcombine.low %v8902_v40, %v8860_v13 }
 0x510   : > { %12388 = vmatprep.mubr.msk.bf16.mxu0 %vm7931_vm10, %v7892_v38  ;;  %v12699_v30 = vld [vmem:[#allocation2 + $0x3c] sm:$0xff]   ;;  %v12698_v16 = vld [vmem:[#allocation2 + $0x44] ss:$0 sps:$4 sm:$0x11]   ;;  %v11915_v36 = vcombine.low %v8857_v62, %v8858_v23  ;;  %v9587_v7 = vshrl.u32 %v16618_v52, 16  ;;  %v9583_v35 = vshll.u32 %v16618_v52, 16 }
 0x511   : > { %v7507_v49 = vpop.permute.xlu1 %7506  ;;  %9413 = vrot.lane.b32.xlu1 %v11916_v60, %s12833_s14  ;;  %v9205_v33 = vshrl.u32 %v11916_v60, 16  ;;  %v12700_v51 = vld [vmem:[#allocation2 + $0x44] ss:$0 sps:$4 sm:$0x11]   ;;  %v8901_v31 = vld [vmem:[#allocation2 + $0x3c] sm:$0xe] }
 0x512   : > { %v7861_v54 = vsel %vm7829_vm6, %v7828_v26, %v7507_v49  ;;  %v9198_v63 = vshrl.u32 %v11915_v36, 16  ;;  %v11947_v50 = vcombine.low %v8901_v31, %v8858_v23  ;;  %v9578_v24 = vshll.u32 %v11948_v19, 16 }
 0x513   : > { %9939 = vrot.lane.b32.xlu0 %v12697_v11, %s12841_s30  ;;  %v9207_v22 = vrot.slane %v9205_v33, 7  ;;  %v9208_v48 = vshll.u32 %v11916_v60, 16  ;;  %v9201_v55 = vshll.u32 %v11915_v36, 16  ;;  %v9576_v12 = vshrl.u32 %v11948_v19, 16 }
 0x514   : > { %v9200_v8 = vrot.slane %v9198_v63, 7  ;;  %v9580_v2 = vrot.slane %v9578_v24, 1  ;;  %v9564_v59 = vshll.u32 %v11947_v50, 16  ;;  %v9573_v60 = vshrl.u32 %v12700_v51, 16 }
 0x515   : > { %v7635_v27 = vpop.permute.xlu1 %7634  ;;  %9937 = vrot.lane.b32.xlu1 %v12696_v58, %s12841_s30  ;;  %v16634_v47 = vpop.permute.xlu0 %9399  ;;  %v9210_v21 = vor.u32 %v9208_v48, %v9207_v22  ;;  %v9562_v52 = vshrl.u32 %v11947_v50, 16  ;;  %v12706_v48 = vld [vmem:[#allocation2 + $0x8] ss:$0 sps:$4 sm:$0x11]  }
 0x516   : > { %v7894_v0 = vsel %vm18395_vm2, %v7861_v54, %v7635_v27  ;;  %v9203_v14 = vor.u32 %v9201_v55, %v9200_v8  ;;  %v9581_v58 = vor.u32 %v9580_v2, %v9576_v12  ;;  %v9566_v11 = vrot.slane %v9564_v59, 1  ;;  %vm18410_vm2 = vmmov %vm18389_vm1 }
 0x517   : > { %12389 = vmatmul.mubr.msk.bf16.gmra.mrb[60].mxu0 %vm7931_vm10, %v7894_v0  ;;  %9933 = vrot.lane.b32.xlu0 %v12699_v30, %s12841_s30  ;;  %v9585_v27 = vrot.slane %v9583_v35, 1  ;;  %v9569_v0 = vshll.u32 %v12700_v51, 16  ;;  %v12704_v30 = vld [vmem:[#allocation2] sm:$0xff]   ;;  %vm18401_vm10 = vmmov %vm18389_vm1 }
 0x519   : > { %v16637_v5 = vpop.permute.xlu1 %9397  ;;  %9935 = vrot.lane.b32.xlu1 %v12698_v16, %s12841_s30  ;;  %v16641_v37 = vpop.permute.xlu0 %9923  ;;  %v9586_v62 = vsel %vm4377_vm8, %v9581_v58, %v9585_v27  ;;  %v9567_v16 = vor.u32 %v9566_v11, %v9562_v52  ;;  %v9571_v19 = vrot.slane %v9569_v0, 1  ;;  %v12705_v52 = vld [vmem:[#allocation2 + $0x14] ss:$0 sps:$4 sm:$0x11]  }
 0x51b   : > { %9409 = vrot.lane.b32.xlu0 %v11915_v36, %s12833_s14  ;;  %v9572_v63 = vsel %vm4377_vm8, %v9567_v16, %v9571_v19  ;;  %v12703_v19 = vld [vmem:[#allocation2 + $0xc] sm:$0xff]  }
 0x51d   : > { %v9922_v46 = vpop.permute.xlu1 %9921  ;;  %9411 = vrot.lane.b32.xlu1 %v12700_v51, %s12833_s14  ;;  %v9394_v29 = vpop.permute.xlu0 %9393 }
 0x51f   : > { %9301 = vrot.lane.b32.xlu0 %v9210_v21, %s12834_s15 }
 0x521   : > { %v9396_v13 = vpop.permute.xlu1 %9395  ;;  %9751 = vrot.lane.b32.xlu1 %v9587_v7, %s12840_s22  ;;  %v16648_v38 = vpop.permute.xlu0 %9285 }
 0x523   : > { %v16651_v49 = vpop.f32.mrb[20].mxu1  ;;  %9297 = vrot.lane.b32.xlu0 %v9203_v14, %s12834_s15 }
 0x524   : > { %18396 = vst [vmem:[#allocation60_spill] sm:$0xff] %v16651_v49  ;;  %v16653_v44 = vpop.f32.mrb[21].mxu1 }
 0x525   : > { %18397 = vst [vmem:[#allocation61_spill] sm:$0xff] %v16653_v44  ;;  %v9736_v26 = vpop.permute.xlu1 %9735  ;;  %9747 = vrot.lane.b32.xlu1 %v9573_v60, %s12840_s22  ;;  %v16656_v23 = vpop.f32.mrb[22].mxu1 }
 0x526   : > { %18398 = vst [vmem:[#allocation29_spill] sm:$0xff] %v16656_v23  ;;  %v16659_v54 = vpop.f32.mrb[23].mxu1  ;;  %v9282_v40 = vpop.permute.xlu0 %9281 }
 0x527   : > { %18399 = vst [vmem:[#allocation31_spill] sm:$0xff] %v16659_v54  ;;  %9749 = vrot.lane.b32.xlu0 %v9586_v62, %s12840_s22  ;;  %v9987_v31 = vsel %vm4954_vm11, %v12704_v30, %v9282_v40 }
 0x528   : > { %v10082_v51 = vsel %vm5084_vm13, %v9987_v31, %v9394_v29 }
 0x529   : > { %v9732_v36 = vpop.permute.xlu1 %9731  ;;  %9303 = vrot.lane.b32.xlu1 %v9207_v22, %s12834_s15 }
 0x52a   : > { %v9734_v33 = vpop.permute.xlu0 %9733 }
 0x52b   : > { %9745 = vrot.lane.b32.xlu0 %v9572_v63, %s12840_s22 }
 0x52d   : > { %v9288_v24 = vpop.permute.xlu1 %9287  ;;  %9299 = vrot.lane.b32.xlu1 %v9200_v8, %s12834_s15 }
 0x52e   : > { %v9730_v50 = vpop.permute.xlu0 %9729  ;;  %v9996_v16 = vsel %vm4954_vm11, %v12705_v52, %v9288_v24 }
 0x52f   : > { %v10146_v7 = vsel %vm7796_vm3, %v10082_v51, %v9730_v50  ;;  %v9993_v51 = vsel %vm4954_vm11, %v12703_v19, %v16648_v38  ;;  %v10088_v50 = vsel %vm5084_vm13, %v9996_v16, %v16634_v47 }
 0x530   : > { %v10210_v22 = vsel %vm18400_vm15, %v10146_v7, %v9922_v46  ;;  %v10086_v7 = vsel %vm5084_vm13, %v9993_v51, %v16637_v5  ;;  %v10152_v24 = vsel %vm7796_vm3, %v10088_v50, %v9736_v26  ;;  %v16718_v26 = vld [vmem:[%s18064_s8] ss:$0 sm:$0xff]  ;;  %vm18411_vm15 = vmmov %vm18389_vm1 }
 0x531   : > { %v10275_v21 = vshll.u32 %v10210_v22, 16  ;;  %v9284_v2 = vpop.permute.xlu1 %9283  ;;  %v10273_v60 = vshrl.u32 %v10210_v22, 16  ;;  %v16729_v50 = vld [vmem:[%s18065_s9] ss:$0 sm:$0xff] }
 0x532   : > { %v9990_v59 = vsel %vm4954_vm11, %v12706_v48, %v9284_v2 }
 0x533   : > { %v10084_v55 = vsel %vm5084_vm13, %v9990_v59, %v9396_v13  ;;  %v10277_v12 = vrot.slane %v10275_v21, 1  ;;  %v10150_v21 = vsel %vm7796_vm3, %v10086_v7, %v9734_v33 }
 0x534   : > { %v10148_v35 = vsel %vm7796_vm3, %v10084_v55, %v9732_v36 }
 0x535   : > { %v10212_v8 = vsel %vm18401_vm10, %v10148_v35, %v16641_v37  ;;  %v10278_v14 = vor.u32 %v10277_v12, %v10273_v60  ;;  %vm18412_vm10 = vmmov %vm18389_vm1 }
 0x536   : > { %v10279_v29 = vshll.u32 %v10212_v8, 16 }
 0x538   : > { %v10281_v58 = vrot.slane %v10279_v29, 1 }
 0x53a   : > { %v10282_v11 = vsel %vm4377_vm8, %v10278_v14, %v10281_v58 }
 0x53b   : > { %12402 = vmatprep.mubr.msk.bf16.mxu1 %vm10473_vm4, %v10282_v11 }
 0x543   : > { %v16678_v46 = vpop.f32.mrb[24].mxu1 }
 0x544   : > { %18402 = vst [vmem:[#allocation30_spill] sm:$0xff] %v16678_v46  ;;  %v16680_v40 = vpop.f32.mrb[25].mxu1 }
 0x545   : > { %18403 = vst [vmem:[#allocation67_spill] sm:$0xff] %v16680_v40  ;;  %v16682_v13 = vpop.f32.mrb[26].mxu1 }
 0x546   : > { %18404 = vst [vmem:[#allocation7_spill] sm:$0xff] %v16682_v13  ;;  %v16684_v27 = vpop.f32.mrb[27].mxu1 }
 0x547   : > { %18405 = vst [vmem:[#allocation3_spill] sm:$0xff] %v16684_v27 }
 0x555   : > { %v16690_v30 = vpop.permute.xlu0 %9407 }
 0x557   : > { %v16686_v0 = vpop.permute.xlu1 %9405  ;;  %v16688_v37 = vpop.f32.mrb[28].mxu1 }
 0x558   : > { %18406 = vst [vmem:[#allocation6_spill] sm:$0xff] %v16688_v37  ;;  %v16692_v62 = vpop.f32.mrb[29].mxu1 }
 0x559   : > { %18407 = vst [vmem:[#allocation63_spill] sm:$0xff] %v16692_v62  ;;  %v16695_v36 = vpop.f32.mrb[30].mxu1  ;;  %v16705_v48 = vpop.permute.xlu0 %9931 }
 0x55a   : > { %18408 = vst [vmem:[#allocation37_spill] sm:$0xff] %v16695_v36  ;;  %v16697_v31 = vpop.f32.mrb[31].mxu1 }
 0x55b   : > { %18409 = vst [vmem:[#allocation68_spill] sm:$0xff] %v16697_v31  ;;  %v16699_v63 = vpop.permute.xlu1 %9929 }
 0x55d   : > { %v9926_v59 = vpop.permute.xlu0 %9925 }
 0x55e   : > { %v10214_v12 = vsel %vm18410_vm2, %v10150_v21, %v9926_v59  ;;  %vm18413_vm2 = vmmov %vm18389_vm1 }
 0x55f   : > { %v9928_v22 = vpop.permute.xlu1 %9927  ;;  %v10285_v38 = vshll.u32 %v10214_v12, 16  ;;  %v10283_v47 = vshrl.u32 %v10214_v12, 16 }
 0x560   : > { %v10216_v2 = vsel %vm18389_vm1, %v10152_v24, %v9928_v22 }
 0x561   : > { %v10289_v55 = vshll.u32 %v10216_v2, 16  ;;  %v10287_v60 = vrot.slane %v10285_v38, 1  ;;  %v9402_v29 = vpop.permute.xlu0 %9401 }
 0x563   : > { %v9404_v35 = vpop.permute.xlu1 %9403  ;;  %v10291_v8 = vrot.slane %v10289_v55, 1  ;;  %v10288_v14 = vor.u32 %v10287_v60, %v10283_v47  ;;  %v12713_v60 = vld [vmem:[#allocation2 + $0x18] sm:$0xff]  }
 0x565   : > { %v16721_v11 = vpop.permute.xlu0 %9293  ;;  %v10292_v16 = vsel %vm4377_vm8, %v10288_v14, %v10291_v8 }
 0x566   : > { %12403 = vmatmul.mubr.msk.bf16.vlgmr.msra.gmra.mrb[32].mxu1 %vm10473_vm4, %v10292_v16 }
 0x567   : > { %v16713_v58 = vpop.permute.xlu1 %9743  ;;  %v12374_v5 = vpop.f32.mrb[44].mxu0 }
 0x568   : > { %v8149_v33 = vmul.f32 %v16718_v26, %v12374_v5  ;;  %v8049_v52 = vpop.f32.mrb[45].mxu0 }
 0x569   : > { %v8147_v19 = vmul.f32 %v16718_v26, %v8049_v52  ;;  %v12375_v51 = vpop.f32.mrb[46].mxu0  ;;  %v9290_v38 = vpop.permute.xlu0 %9289 }
 0x56a   : > { %v8188_v7 = vadd.f32 %v16729_v50, %v8149_v33  ;;  %v8150_v22 = vmul.f32 %v16718_v26, %v12375_v51  ;;  %v8052_v24 = vpop.f32.mrb[47].mxu0  ;;  %v9999_v16 = vsel %vm4954_vm11, %v12713_v60, %v9290_v38 }
 0x56b   : > { %v8186_v21 = vadd.f32 %v16729_v50, %v8147_v19  ;;  %v8148_v2 = vmul.f32 %v16718_v26, %v8052_v24  ;;  %v9740_v59 = vpop.permute.xlu1 %9739 }
 0x56c   : > { %v8220_v55 = vmax.f32 %v8188_v7, 0.0  ;;  %v8189_v12 = vadd.f32 %v16729_v50, %v8150_v22 }
 0x56d   : > { %v8218_v8 = vmax.f32 %v8186_v21, 0.0  ;;  %v8187_v47 = vadd.f32 %v16729_v50, %v8148_v2  ;;  %v16740_v24 = vpop.permute.xlu0 %9741  ;;  %v12715_v21 = vld [vmem:[#allocation2 + $0x20] ss:$0 sps:$4 sm:$0x11]   ;;  %v10090_v2 = vsel %vm5084_vm13, %v9999_v16, %v9402_v29 }
 0x56e   : > { %v8252_v14 = vmin.f32 %v8220_v55, 6.0  ;;  %v8221_v5 = vmax.f32 %v8189_v12, 0.0  ;;  %v8738_v16 = vld [vmem:[#allocation2 + $0x60] sm:$0xf] }
 0x56f   : > { %v8250_v52 = vmin.f32 %v8218_v8, 6.0  ;;  %v8219_v33 = vmax.f32 %v8187_v47, 0.0  ;;  %v16738_v51 = vpop.permute.xlu1 %9295 }
 0x570   : > { %v12064_v19 = vpack.c.bf16 %v8252_v14, %v8252_v14  ;;  %v8253_v37 = vmin.f32 %v8221_v5, 6.0 }
 0x571   : > { %v12062_v7 = vpack.c.bf16 %v8250_v52, %v8250_v52  ;;  %v8251_v36 = vmin.f32 %v8219_v33, 6.0  ;;  %v9738_v33 = vpop.permute.xlu0 %9737 }
 0x572   : > { %v8486_v22 = vshrl.u32 %v12064_v19, 16  ;;  %v12065_v62 = vpack.c.bf16 %v8253_v37, %v8253_v37  ;;  %v8489_v31 = vshll.u32 %v12064_v19, 16 }
 0x573   : > { %v8469_v55 = vshrl.u32 %v12062_v7, 16  ;;  %v8472_v12 = vshll.u32 %v12062_v7, 16  ;;  %v12063_v8 = vpack.c.bf16 %v8251_v36, %v8251_v36  ;;  %v9292_v47 = vpop.permute.xlu1 %9291 }
 0x574   : > { %v8488_v46 = vrot.slane %v8486_v22, 7  ;;  %v8494_v38 = vshrl.u32 %v12065_v62, 16  ;;  %v8497_v60 = vshll.u32 %v12065_v62, 16  ;;  %v10002_v14 = vsel %vm4954_vm11, %v12715_v21, %v9292_v47  ;;  %v8731_v21 = vld [vmem:[#allocation2 + $0x54] sm:$0xf] }
 0x575   : > { %v8471_v5 = vrot.slane %v8469_v55, 7  ;;  %v8477_v13 = vshrl.u32 %v12063_v8, 16  ;;  %v8480_v40 = vshll.u32 %v12063_v8, 16  ;;  %v10092_v52 = vsel %vm5084_vm13, %v10002_v14, %v9404_v35 }
 0x576   : > { %v8491_v37 = vor.u32 %v8489_v31, %v8488_v46  ;;  %v8492_v27 = vrot.slane %v8488_v46, 4  ;;  %v8496_v49 = vrot.slane %v8494_v38, 7  ;;  %v10156_v29 = vsel %vm7796_vm3, %v10092_v52, %v9740_v59  ;;  %v8742_v31 = vld [vmem:[#allocation2 + $0x68] sm:$0x1] }
 0x577   : > { %v8474_v19 = vor.u32 %v8472_v12, %v8471_v5  ;;  %v8475_v36 = vrot.slane %v8471_v5, 4  ;;  %v8479_v7 = vrot.slane %v8477_v13, 7  ;;  %v10220_v62 = vsel %vm18411_vm15, %v10156_v29, %v16705_v48  ;;  %v12714_v52 = vld [vmem:[#allocation2 + $0x2c] ss:$0 sps:$4 sm:$0x11]   ;;  %vm18416_vm15 = vmmov %vm18389_vm1 }
 0x578   : > { %v8739_v22 = vsel %vm16348_vm7, %v8491_v37, %v8738_v16  ;;  %v8499_v55 = vor.u32 %v8497_v60, %v8496_v49  ;;  %v8501_v8 = vrot.slane %v8496_v49, 4  ;;  %v10154_v35 = vsel %vm7796_vm3, %v10090_v2, %v9738_v33  ;;  %v8735_v49 = vld [vmem:[#allocation2 + $0x5c] sm:$0x1]  ;;  %v12712_v37 = vld [vmem:[#allocation2 + $0x24] sm:$0xff]  }
 0x579   : > { %8740 = vst [vmem:[#allocation2 + $0x60] sm:$0xf] %v8739_v22  ;;  %v8732_v46 = vsel %vm16348_vm7, %v8474_v19, %v8731_v21  ;;  %v8482_v59 = vor.u32 %v8480_v40, %v8479_v7  ;;  %v8484_v12 = vrot.slane %v8479_v7, 4  ;;  %v10218_v13 = vsel %vm18412_vm10, %v10154_v35, %v16699_v63  ;;  %vm18417_vm10 = vmmov %vm18389_vm1 }
 0x57a   : > { %8733 = vst [vmem:[#allocation2 + $0x54] sm:$0xf] %v8732_v46  ;;  %v8500_v48 = vsel %vm12999_vm9, %v8492_v27, %v8499_v55  ;;  %v8743_v47 = vsel %vm16358_vm5, %v8501_v8, %v8742_v31  ;;  %v10295_v38 = vshll.u32 %v10218_v13, 16  ;;  %v10299_v60 = vshll.u32 %v10220_v62, 16 }
 0x57b   : > { %8741 = vst.msk [vmem:[#allocation2 + $0x64] sm:$0xf] %vm442_vm0, %v8500_v48  ;;  %8744 = vst [vmem:[#allocation2 + $0x68] sm:$0x1] %v8743_v47  ;;  %v8483_v2 = vsel %vm12999_vm9, %v8475_v36, %v8482_v59  ;;  %v8736_v40 = vsel %vm16358_vm5, %v8484_v12, %v8735_v49  ;;  %v10293_v63 = vshrl.u32 %v10218_v13, 16  ;;  %v10008_v16 = vsel %vm4954_vm11, %v12714_v52, %v16738_v51 }
 0x57c   : > { %8734 = vst.msk [vmem:[#allocation2 + $0x58] sm:$0xf] %vm442_vm0, %v8483_v2  ;;  %8737 = vst [vmem:[#allocation2 + $0x5c] sm:$0x1] %v8736_v40  ;;  %v10297_v27 = vrot.slane %v10295_v38, 1  ;;  %v10301_v14 = vrot.slane %v10299_v60, 1  ;;  %v10005_v21 = vsel %vm4954_vm11, %v12712_v37, %v16721_v11  ;;  %v10096_v8 = vsel %vm5084_vm13, %v10008_v16, %v16690_v30 }
 0x57d   : > { %v10094_v31 = vsel %vm5084_vm13, %v10005_v21, %v16686_v0  ;;  %v10160_v40 = vsel %vm7796_vm3, %v10096_v8, %v16713_v58 }
 0x57e   : > { %v10298_v5 = vor.u32 %v10297_v27, %v10293_v63  ;;  %v10158_v47 = vsel %vm7796_vm3, %v10094_v31, %v16740_v24 }
 0x580   : > { %v10302_v33 = vsel %vm4377_vm8, %v10298_v5, %v10301_v14  ;;  %v8863_v29 = vld [vmem:[#allocation2 + $0x60] sm:$0xf] }
 0x581   : > { %12406 = vmatprep.mubr.msk.bf16.mxu1 %vm10473_vm4, %v10302_v33  ;;  %v16771_v7 = vpop.permute.xlu0 %9415  ;;  %v8904_v55 = vld [vmem:[#allocation2 + $0x60] sm:$0xe]  ;;  %v8861_v13 = vld [vmem:[#allocation2 + $0x54] sm:$0xf] }
 0x582   : > { %v8864_v19 = vld [vmem:[#allocation2 + $0x64] sm:$0xf]  ;;  %v16775_v22 = vld [vmem:[#allocation2 + $0x68] ss:$0 sps:$4 sm:$0x11]  }
 0x583   : > { %v16769_v36 = vpop.permute.xlu1 %9413  ;;  %v16773_v62 = vcombine.low %v8863_v29, %v8864_v19  ;;  %v16781_v35 = vcombine.low %v8904_v55, %v8864_v19  ;;  %9423 = vrot.lane.b32.xlu0 %v16775_v22, %s12833_s14  ;;  %v12720_v51 = vld [vmem:[#allocation2 + $0x68] ss:$0 sps:$4 sm:$0x11]   ;;  %v16787_v46 = vld [vmem:[#allocation2 + $0x5c] ss:$0 sps:$4 sm:$0x11]  }
 0x584   : > { %v12719_v12 = vld [vmem:[#allocation2 + $0x60] sm:$0xff]   ;;  %v8862_v30 = vld [vmem:[#allocation2 + $0x58] sm:$0xf]  ;;  %v12721_v63 = vld [vmem:[#allocation2 + $0x5c] ss:$0 sps:$4 sm:$0x11]  }
 0x585   : > { %9421 = vrot.lane.b32.xlu1 %v16773_v62, %s12833_s14  ;;  %v9219_v48 = vshrl.u32 %v16773_v62, 16  ;;  %v16797_v38 = vpop.permute.xlu0 %9939  ;;  %v8903_v27 = vld [vmem:[#allocation2 + $0x54] sm:$0xe]  ;;  %v9222_v24 = vshll.u32 %v16773_v62, 16  ;;  %v9604_v5 = vshrl.u32 %v16781_v35, 16  ;;  %v16809_v37 = vcombine.low %v8861_v13, %v8862_v30 }
 0x586   : > { %v9606_v29 = vshll.u32 %v16781_v35, 16  ;;  %v12722_v55 = vld [vmem:[#allocation2 + $0x54] sm:$0xff]   ;;  %v16814_v8 = vcombine.low %v8903_v27, %v8862_v30 }
 0x587   : > { %v16791_v59 = vpop.permute.xlu1 %9937  ;;  %v12378_v11 = vpop.f32.mrb[48].mxu0  ;;  %9947 = vrot.lane.b32.xlu0 %v12720_v51, %s12841_s30  ;;  %v16816_v62 = vrot.slane %v9219_v48, 7  ;;  %v9212_v27 = vshrl.u32 %v16809_v37, 16 }
 0x588   : > { %v8153_v49 = vmul.f32 %v16718_v26, %v12378_v11  ;;  %v8065_v2 = vpop.f32.mrb[49].mxu0 }
 0x589   : > { %v8151_v0 = vmul.f32 %v16718_v26, %v8065_v2  ;;  %9945 = vrot.lane.b32.xlu1 %v12719_v12, %s12841_s30  ;;  %v12379_v60 = vpop.f32.mrb[50].mxu0  ;;  %v9934_v12 = vpop.permute.xlu0 %9933 }
 0x58a   : > { %v8192_v52 = vadd.f32 %v16729_v50, %v8153_v49  ;;  %v8154_v33 = vmul.f32 %v16718_v26, %v12379_v60  ;;  %v8068_v58 = vpop.f32.mrb[51].mxu0 }
 0x58b   : > { %v8190_v16 = vadd.f32 %v16729_v50, %v8151_v0  ;;  %v8152_v19 = vmul.f32 %v16718_v26, %v8068_v58  ;;  %v9936_v21 = vpop.permute.xlu1 %9935  ;;  %v10222_v0 = vsel %vm18413_vm2, %v10158_v47, %v9934_v12  ;;  %9941 = vrot.lane.b32.xlu0 %v12722_v55, %s12841_s30  ;;  %v9224_v55 = vor.u32 %v9222_v24, %v16816_v62 }
 0x58c   : > { %v8224_v51 = vmax.f32 %v8192_v52, 0.0  ;;  %v8193_v31 = vadd.f32 %v16729_v50, %v8154_v33  ;;  %v10224_v11 = vsel %vm18389_vm1, %v10160_v40, %v9936_v21  ;;  %v10305_v60 = vshll.u32 %v10222_v0, 16 }
 0x58d   : > { %v8222_v49 = vmax.f32 %v8190_v16, 0.0  ;;  %v8191_v35 = vadd.f32 %v16729_v50, %v8152_v19  ;;  %v10309_v2 = vshll.u32 %v10224_v11, 16  ;;  %9943 = vrot.lane.b32.xlu1 %v12721_v63, %s12841_s30  ;;  %v10303_v33 = vshrl.u32 %v10222_v0, 16  ;;  %v16828_v47 = vpop.permute.xlu0 %9409 }
 0x58e   : > { %v8256_v30 = vmin.f32 %v8224_v51, 6.0  ;;  %v8225_v48 = vmax.f32 %v8193_v31, 0.0  ;;  %v9608_v16 = vrot.slane %v9606_v29, 1  ;;  %v10307_v13 = vrot.slane %v10305_v60, 1 }
 0x58f   : > { %v8254_v52 = vmin.f32 %v8222_v49, 6.0  ;;  %v8223_v40 = vmax.f32 %v8191_v35, 0.0  ;;  %v16826_v58 = vpop.permute.xlu1 %9411  ;;  %v10311_v11 = vrot.slane %v10309_v2, 1  ;;  %9417 = vrot.lane.b32.xlu0 %v16809_v37, %s12833_s14  ;;  %v9611_v51 = vshll.u32 %v16775_v22, 16 }
 0x590   : > { %v12068_v21 = vpack.c.bf16 %v8256_v30, %v8256_v30  ;;  %v8257_v19 = vmin.f32 %v8225_v48, 6.0  ;;  %v10308_v49 = vor.u32 %v10307_v13, %v10303_v33  ;;  %v16836_v35 = vrot.slane %v9212_v27, 7 }
 0x591   : > { %v12066_v63 = vpack.c.bf16 %v8254_v52, %v8254_v52  ;;  %v8255_v12 = vmin.f32 %v8223_v40, 6.0  ;;  %9419 = vrot.lane.b32.xlu1 %v16787_v46, %s12833_s14  ;;  %v9215_v48 = vshll.u32 %v16809_v37, 16  ;;  %v9609_v60 = vor.u32 %v9608_v16, %v9604_v5  ;;  %v16841_v23 = vpop.permute.xlu0 %9301 }
 0x592   : > { %v8520_v31 = vshrl.u32 %v12068_v21, 16  ;;  %v12069_v29 = vpack.c.bf16 %v8257_v19, %v8257_v19  ;;  %v8523_v40 = vshll.u32 %v12068_v21, 16  ;;  %v10312_v24 = vsel %vm4377_vm8, %v10308_v49, %v10311_v11  ;;  %v8752_v11 = vld [vmem:[#allocation2 + $0x78] sm:$0xf] }
 0x593   : > { %v8503_v2 = vshrl.u32 %v12066_v63, 16  ;;  %v12067_v0 = vpack.c.bf16 %v8255_v12, %v8255_v12  ;;  %v16838_v30 = vpop.permute.xlu1 %9751  ;;  %v8506_v54 = vshll.u32 %v12066_v63, 16  ;;  %12407 = vmatmul.mubr.msk.bf16.gmra.mrb[36].mxu1 %vm10473_vm4, %v10312_v24  ;;  %v18414_v13 = vshrl.u32 %v16775_v22, 16  ;;  %9309 = vrot.lane.b32.xlu0 %v9224_v55, %s12834_s15  ;;  %v8745_v24 = vld [vmem:[#allocation2 + $0x6c] sm:$0xf] }
 0x594   : > { %v8522_v52 = vrot.slane %v8520_v31, 7  ;;  %v8528_v14 = vshrl.u32 %v12069_v29, 16  ;;  %v9592_v27 = vshll.u32 %v16814_v8, 16  ;;  %v8531_v33 = vshll.u32 %v12069_v29, 16  ;;  %v8756_v55 = vld [vmem:[#allocation2 + $0x80] sm:$0x1] }
 0x595   : > { %v8505_v44 = vrot.slane %v8503_v2, 7  ;;  %v8511_v19 = vshrl.u32 %v12067_v0, 16  ;;  %9759 = vrot.lane.b32.xlu1 %v18414_v13, %s12840_s22  ;;  %v9217_v16 = vor.u32 %v9215_v48, %v16836_v35  ;;  %v8514_v31 = vshll.u32 %v12067_v0, 16 }
 0x596   : > { %v8525_v37 = vor.u32 %v8523_v40, %v8522_v52  ;;  %v8530_v5 = vrot.slane %v8528_v14, 7  ;;  %v8526_v21 = vrot.slane %v8522_v52, 4  ;;  %v9298_v40 = vpop.permute.xlu0 %9297  ;;  %v9594_v0 = vrot.slane %v9592_v27, 1 }
 0x597   : > { %v8508_v12 = vor.u32 %v8506_v54, %v8505_v44  ;;  %v8513_v63 = vrot.slane %v8511_v19, 7  ;;  %v9748_v49 = vpop.permute.xlu1 %9747  ;;  %v8509_v22 = vrot.slane %v8505_v44, 4  ;;  %v18415_v54 = vshrl.u32 %v16787_v46, 16  ;;  %v8749_v19 = vld [vmem:[#allocation2 + $0x74] sm:$0x1]  ;;  %9305 = vrot.lane.b32.xlu0 %v9217_v16, %s12834_s15 }
 0x598   : > { %v8753_v2 = vsel %vm16348_vm7, %v8525_v37, %v8752_v11  ;;  %v8533_v13 = vor.u32 %v8531_v33, %v8530_v5  ;;  %v8535_v9 = vrot.slane %v8530_v5, 4  ;;  %v9613_v37 = vrot.slane %v9611_v51, 1  ;;  %v12727_v33 = vld [vmem:[#allocation2 + $0x30] sm:$0xff]  }
 0x599   : > { %8754 = vst [vmem:[#allocation2 + $0x78] sm:$0xf] %v8753_v2  ;;  %v8746_v14 = vsel %vm16348_vm7, %v8508_v12, %v8745_v24  ;;  %v8516_v29 = vor.u32 %v8514_v31, %v8513_v63  ;;  %v8518_v48 = vrot.slane %v8513_v63, 4  ;;  %9755 = vrot.lane.b32.xlu1 %v18415_v54, %s12840_s22  ;;  %v10011_v16 = vsel %vm4954_vm11, %v12727_v33, %v9298_v40  ;;  %v12729_v31 = vld [vmem:[#allocation2 + $0x38] ss:$0 sps:$4 sm:$0x11]  }
 0x59a   : > { %8747 = vst [vmem:[#allocation2 + $0x6c] sm:$0xf] %v8746_v14  ;;  %v8534_v44 = vsel %vm12999_vm9, %v8526_v21, %v8533_v13  ;;  %v8757_v52 = vsel %vm16358_vm5, %v8535_v9, %v8756_v55  ;;  %v9590_v21 = vshrl.u32 %v16814_v8, 16  ;;  %v9597_v9 = vshll.u32 %v16787_v46, 16  ;;  %v16873_v51 = vpop.permute.xlu0 %9749 }
 0x59b   : > { %8755 = vst.msk [vmem:[#allocation2 + $0x7c] sm:$0xf] %vm442_vm0, %v8534_v44  ;;  %8758 = vst [vmem:[#allocation2 + $0x80] sm:$0x1] %v8757_v52  ;;  %v8517_v5 = vsel %vm12999_vm9, %v8509_v22, %v8516_v29  ;;  %v8750_v27 = vsel %vm16358_vm5, %v8518_v48, %v8749_v19  ;;  %v16868_v11 = vpop.permute.xlu1 %9303  ;;  %v9614_v12 = vsel %vm4377_vm8, %v9609_v60, %v9613_v37 }
 0x59c   : > { %8748 = vst.msk [vmem:[#allocation2 + $0x70] sm:$0xf] %vm442_vm0, %v8517_v5  ;;  %8751 = vst [vmem:[#allocation2 + $0x74] sm:$0x1] %v8750_v27  ;;  %v9595_v63 = vor.u32 %v9594_v0, %v9590_v21  ;;  %9757 = vrot.lane.b32.xlu0 %v9614_v12, %s12840_s22  ;;  %v9599_v8 = vrot.slane %v9597_v9, 1  ;;  %v10098_v22 = vsel %vm5084_vm13, %v10011_v16, %v16828_v47 }
 0x59d   : > { %9311 = vrot.lane.b32.xlu1 %v16816_v62, %s12834_s15 }
 0x59e   : > { %v9746_v24 = vpop.permute.xlu0 %9745  ;;  %v9600_v62 = vsel %vm4377_vm8, %v9595_v63, %v9599_v8 }
 0x59f   : > { %v9300_v2 = vpop.permute.xlu1 %9299  ;;  %v10162_v40 = vsel %vm7796_vm3, %v10098_v22, %v9746_v24 }
 0x5a0   : > { %v10014_v46 = vsel %vm4954_vm11, %v12729_v31, %v9300_v2  ;;  %v8867_v60 = vld [vmem:[#allocation2 + $0x78] sm:$0xf]  ;;  %v10226_v55 = vsel %vm18416_vm15, %v10162_v40, %v16791_v59  ;;  %9753 = vrot.lane.b32.xlu0 %v9600_v62, %s12840_s22 }
 0x5a1   : > { %v10100_v13 = vsel %vm5084_vm13, %v10014_v46, %v16826_v58  ;;  %9307 = vrot.lane.b32.xlu1 %v16836_v35, %s12834_s15  ;;  %v10315_v58 = vshll.u32 %v10226_v55, 16  ;;  %v10313_v0 = vshrl.u32 %v10226_v55, 16  ;;  %v8906_v9 = vld [vmem:[#allocation2 + $0x78] sm:$0xe] }
 0x5a2   : > { %v10164_v14 = vsel %vm7796_vm3, %v10100_v13, %v9748_v49  ;;  %v8868_v47 = vld [vmem:[#allocation2 + $0x7c] sm:$0xf]  ;;  %v16897_v54 = vld [vmem:[#allocation2 + $0x80] ss:$0 sps:$4 sm:$0x11]  }
 0x5a3   : > { %v10228_v29 = vsel %vm18417_vm10, %v10164_v14, %v16797_v38  ;;  %v16895_v48 = vcombine.low %v8867_v60, %v8868_v47  ;;  %v10317_v44 = vrot.slane %v10315_v58, 1  ;;  %v8865_v49 = vld [vmem:[#allocation2 + $0x6c] sm:$0xf]  ;;  %v12733_v59 = vld [vmem:[#allocation2 + $0x78] sm:$0xff]   ;;  %v8866_v5 = vld [vmem:[#allocation2 + $0x70] sm:$0xf]  ;;  %v11952_v31 = vcombine.low %v8906_v9, %v8868_v47 }
 0x5a4   : > { %v10319_v35 = vshll.u32 %v10228_v29, 16  ;;  %9431 = vrot.lane.b32.xlu0 %v16897_v54, %s12833_s14  ;;  %v12734_v38 = vld [vmem:[#allocation2 + $0x80] ss:$0 sps:$4 sm:$0x11]   ;;  %v11919_v21 = vcombine.low %v8865_v49, %v8866_v5  ;;  %v12736_v14 = vld [vmem:[#allocation2 + $0x6c] sm:$0xff]  }
 0x5a5   : > { %9429 = vrot.lane.b32.xlu1 %v16895_v48, %s12833_s14  ;;  %v10318_v19 = vor.u32 %v10317_v44, %v10313_v0  ;;  %v12735_v13 = vld [vmem:[#allocation2 + $0x74] ss:$0 sps:$4 sm:$0x11]   ;;  %v9233_v40 = vshrl.u32 %v16895_v48, 16  ;;  %v9236_v9 = vshll.u32 %v16895_v48, 16 }
 0x5a6   : > { %v10321_v52 = vrot.slane %v10319_v35, 1  ;;  %v9226_v55 = vshrl.u32 %v11919_v21, 16  ;;  %v16917_v58 = vld [vmem:[#allocation2 + $0x74] ss:$0 sps:$4 sm:$0x11]  }
 0x5a7   : > { %v12382_v37 = vpop.f32.mrb[52].mxu0  ;;  %v8905_v35 = vld [vmem:[#allocation2 + $0x6c] sm:$0xe] }
 0x5a8   : > { %v8157_v27 = vmul.f32 %v16718_v26, %v12382_v37  ;;  %v8081_v33 = vpop.f32.mrb[53].mxu0  ;;  %v10322_v63 = vsel %vm4377_vm8, %v10318_v19, %v10321_v52  ;;  %9955 = vrot.lane.b32.xlu0 %v12734_v38, %s12841_s30  ;;  %v16920_v49 = vcombine.low %v8905_v35, %v8866_v5  ;;  %v9643_v37 = vshrl.u32 %v16897_v54, 16 }
 0x5a9   : > { %v8155_v16 = vmul.f32 %v16718_v26, %v8081_v33  ;;  %9953 = vrot.lane.b32.xlu1 %v12733_v59, %s12841_s30  ;;  %v12383_v12 = vpop.f32.mrb[54].mxu0  ;;  %12410 = vmatprep.mubr.msk.bf16.mxu1 %vm10473_vm4, %v10322_v63  ;;  %v9634_v59 = vshll.u32 %v11952_v31, 16  ;;  %v16923_v38 = vrot.slane %v9233_v40, 7  ;;  %v9629_v5 = vshrl.u32 %v16917_v58, 16 }
 0x5aa   : > { %v8196_v2 = vadd.f32 %v16729_v50, %v8157_v27  ;;  %v8158_v8 = vmul.f32 %v16718_v26, %v12383_v12  ;;  %v8084_v46 = vpop.f32.mrb[55].mxu0 }
 0x5ab   : > { %v8194_v22 = vadd.f32 %v16729_v50, %v8155_v16  ;;  %v8156_v24 = vmul.f32 %v16718_v26, %v8084_v46  ;;  %v16926_v16 = vrot.slane %v9226_v55, 7  ;;  %v9238_v48 = vor.u32 %v9236_v9, %v16923_v38 }
 0x5ac   : > { %v8228_v62 = vmax.f32 %v8196_v2, 0.0  ;;  %v8197_v60 = vadd.f32 %v16729_v50, %v8158_v8  ;;  %9949 = vrot.lane.b32.xlu0 %v12736_v14, %s12841_s30  ;;  %v9229_v2 = vshll.u32 %v11919_v21, 16 }
 0x5ad   : > { %v8226_v47 = vmax.f32 %v8194_v22, 0.0  ;;  %v8195_v29 = vadd.f32 %v16729_v50, %v8156_v24  ;;  %9951 = vrot.lane.b32.xlu1 %v12735_v13, %s12841_s30  ;;  %v9632_v22 = vshrl.u32 %v11952_v31, 16  ;;  %v9636_v24 = vrot.slane %v9634_v59, 1 }
 0x5ae   : > { %v8260_v0 = vmin.f32 %v8228_v62, 6.0  ;;  %v8229_v44 = vmax.f32 %v8197_v60, 0.0  ;;  %v9620_v62 = vshll.u32 %v16920_v49, 16 }
 0x5af   : > { %v8258_v52 = vmin.f32 %v8226_v47, 6.0  ;;  %v8227_v19 = vmax.f32 %v8195_v29, 0.0  ;;  %v9231_v47 = vor.u32 %v9229_v2, %v16926_v16  ;;  %v8759_v2 = vld [vmem:[#allocation2 + $0x84] sm:$0xf] }
 0x5b0   : > { %v12072_v27 = vpack.c.bf16 %v8260_v0, %v8260_v0  ;;  %v8261_v33 = vmin.f32 %v8229_v44, 6.0  ;;  %9425 = vrot.lane.b32.xlu0 %v11919_v21, %s12833_s14  ;;  %v9639_v21 = vshll.u32 %v16897_v54, 16 }
 0x5b1   : > { %v12070_v12 = vpack.c.bf16 %v8258_v52, %v8258_v52  ;;  %v8259_v63 = vmin.f32 %v8227_v19, 6.0  ;;  %9427 = vrot.lane.b32.xlu1 %v16917_v58, %s12833_s14  ;;  %v9637_v52 = vor.u32 %v9636_v24, %v9632_v22  ;;  %v8766_v19 = vld [vmem:[#allocation2 + $0x90] sm:$0xf] }
 0x5b2   : > { %v8554_v8 = vshrl.u32 %v12072_v27, 16  ;;  %v12073_v46 = vpack.c.bf16 %v8261_v33, %v8261_v33  ;;  %v8557_v14 = vshll.u32 %v12072_v27, 16 }
 0x5b3   : > { %v8537_v13 = vshrl.u32 %v12070_v12, 16  ;;  %v12071_v40 = vpack.c.bf16 %v8259_v63, %v8259_v63  ;;  %v8540_v35 = vshll.u32 %v12070_v12, 16  ;;  %v9622_v63 = vrot.slane %v9620_v62, 1  ;;  %v8763_v62 = vld [vmem:[#allocation2 + $0x8c] sm:$0x1] }
 0x5b4   : > { %v8556_v60 = vrot.slane %v8554_v8, 7  ;;  %v8562_v55 = vshrl.u32 %v12073_v46, 16  ;;  %v8565_v59 = vshll.u32 %v12073_v46, 16  ;;  %9317 = vrot.lane.b32.xlu0 %v9238_v48, %s12834_s15 }
 0x5b5   : > { %v8539_v29 = vrot.slane %v8537_v13, 7  ;;  %v8545_v0 = vshrl.u32 %v12071_v40, 16  ;;  %9767 = vrot.lane.b32.xlu1 %v9643_v37, %s12840_s22  ;;  %v8548_v27 = vshll.u32 %v12071_v40, 16 }
 0x5b6   : > { %v8559_v31 = vor.u32 %v8557_v14, %v8556_v60  ;;  %v8564_v44 = vrot.slane %v8562_v55, 7  ;;  %v8560_v8 = vrot.slane %v8556_v60, 4  ;;  %v8770_v14 = vld [vmem:[#allocation2 + $0x98] sm:$0x1]  ;;  %v9618_v60 = vshrl.u32 %v16920_v49, 16 }
 0x5b7   : > { %v8542_v33 = vor.u32 %v8540_v35, %v8539_v29  ;;  %v8547_v9 = vrot.slane %v8545_v0, 7  ;;  %v8543_v54 = vrot.slane %v8539_v29, 4  ;;  %v9641_v29 = vrot.slane %v9639_v21, 1 }
 0x5b8   : > { %v8767_v12 = vsel %vm16348_vm7, %v8559_v31, %v8766_v19  ;;  %v8567_v13 = vor.u32 %v8565_v59, %v8564_v44  ;;  %v8569_v37 = vrot.slane %v8564_v44, 4  ;;  %9313 = vrot.lane.b32.xlu0 %v9231_v47, %s12834_s15  ;;  %v9625_v35 = vshll.u32 %v16917_v58, 16 }
 0x5b9   : > { %8768 = vst [vmem:[#allocation2 + $0x90] sm:$0xf] %v8767_v12  ;;  %v8760_v46 = vsel %vm16348_vm7, %v8542_v33, %v8759_v2  ;;  %v8550_v48 = vor.u32 %v8548_v27, %v8547_v9  ;;  %v8552_v22 = vrot.slane %v8547_v9, 4  ;;  %9763 = vrot.lane.b32.xlu1 %v9629_v5, %s12840_s22  ;;  %v9642_v49 = vsel %vm4377_vm8, %v9637_v52, %v9641_v29 }
 0x5ba   : > { %8761 = vst [vmem:[#allocation2 + $0x84] sm:$0xf] %v8760_v46  ;;  %v8568_v24 = vsel %vm12999_vm9, %v8560_v8, %v8567_v13  ;;  %v8771_v40 = vsel %vm16358_vm5, %v8569_v37, %v8770_v14  ;;  %v9623_v47 = vor.u32 %v9622_v63, %v9618_v60  ;;  %v9627_v0 = vrot.slane %v9625_v35, 1 }
 0x5bb   : > { %8769 = vst.msk [vmem:[#allocation2 + $0x94] sm:$0xf] %vm442_vm0, %v8568_v24  ;;  %8772 = vst [vmem:[#allocation2 + $0x98] sm:$0x1] %v8771_v40  ;;  %v8551_v55 = vsel %vm12999_vm9, %v8543_v54, %v8550_v48  ;;  %v8764_v5 = vsel %vm16358_vm5, %v8552_v22, %v8763_v62 }
 0x5bc   : > { %8762 = vst.msk [vmem:[#allocation2 + $0x88] sm:$0xf] %vm442_vm0, %v8551_v55  ;;  %8765 = vst [vmem:[#allocation2 + $0x8c] sm:$0x1] %v8764_v5  ;;  %9765 = vrot.lane.b32.xlu0 %v9642_v49, %s12840_s22  ;;  %v9628_v31 = vsel %vm4377_vm8, %v9623_v47, %v9627_v0 }
 0x5bd   : > { %9319 = vrot.lane.b32.xlu1 %v16923_v38, %s12834_s15 }
 0x5c0   : > { %v8871_v21 = vld [vmem:[#allocation2 + $0x90] sm:$0xf]  ;;  %9761 = vrot.lane.b32.xlu0 %v9628_v31, %s12840_s22 }
 0x5c1   : > { %9315 = vrot.lane.b32.xlu1 %v16926_v16, %s12834_s15  ;;  %v8908_v38 = vld [vmem:[#allocation2 + $0x90] sm:$0xe]  ;;  %v8869_v13 = vld [vmem:[#allocation2 + $0x84] sm:$0xf] }
 0x5c2   : > { %v8872_v58 = vld [vmem:[#allocation2 + $0x94] sm:$0xf]  ;;  %v16964_v59 = vld [vmem:[#allocation2 + $0x98] ss:$0 sps:$4 sm:$0x11]  }
 0x5c3   : > { %v11922_v44 = vcombine.low %v8871_v21, %v8872_v58  ;;  %v12743_v52 = vld [vmem:[#allocation2 + $0x90] sm:$0xff]   ;;  %v12744_v33 = vld [vmem:[#allocation2 + $0x98] ss:$0 sps:$4 sm:$0x11]   ;;  %v8870_v9 = vld [vmem:[#allocation2 + $0x88] sm:$0xf]  ;;  %v11954_v63 = vcombine.low %v8908_v38, %v8872_v58 }
 0x5c4   : > { %9439 = vrot.lane.b32.xlu0 %v16964_v59, %s12833_s14  ;;  %v12745_v2 = vld [vmem:[#allocation2 + $0x8c] ss:$0 sps:$4 sm:$0x11]   ;;  %v11921_v14 = vcombine.low %v8869_v13, %v8870_v9  ;;  %v12746_v60 = vld [vmem:[#allocation2 + $0x84] sm:$0xff]  }
 0x5c5   : > { %9437 = vrot.lane.b32.xlu1 %v11922_v44, %s12833_s14  ;;  %v9247_v24 = vshrl.u32 %v11922_v44, 16  ;;  %v16980_v29 = vld [vmem:[#allocation2 + $0x8c] ss:$0 sps:$4 sm:$0x11]   ;;  %v9662_v35 = vshll.u32 %v11954_v63, 16 }
 0x5c6   : > { %v8907_v0 = vld [vmem:[#allocation2 + $0x84] sm:$0xe]  ;;  %v9240_v31 = vshrl.u32 %v11921_v14, 16 }
 0x5c7   : > { %v12386_v19 = vpop.f32.mrb[56].mxu0  ;;  %v16984_v38 = vcombine.low %v8907_v0, %v8870_v9 }
 0x5c8   : > { %v8161_v16 = vmul.f32 %v16718_v26, %v12386_v19  ;;  %v8097_v27 = vpop.f32.mrb[57].mxu0  ;;  %9963 = vrot.lane.b32.xlu0 %v12744_v33, %s12841_s30  ;;  %v9250_v33 = vshll.u32 %v11922_v44, 16  ;;  %v9242_v9 = vrot.slane %v9240_v31, 7  ;;  %v8780_v31 = vld [vmem:[#allocation2 + $0xa8] sm:$0xf] }
 0x5c9   : > { %v8159_v8 = vmul.f32 %v16718_v26, %v8097_v27  ;;  %9961 = vrot.lane.b32.xlu1 %v12743_v52, %s12841_s30  ;;  %v12387_v12 = vpop.f32.mrb[58].mxu0  ;;  %v16986_v52 = vrot.slane %v9247_v24, 7 }
 0x5ca   : > { %v8200_v37 = vadd.f32 %v16729_v50, %v8161_v16  ;;  %v8162_v54 = vmul.f32 %v16718_v26, %v12387_v12  ;;  %v8100_v46 = vpop.f32.mrb[59].mxu0  ;;  %v9660_v16 = vshrl.u32 %v11954_v63, 16  ;;  %v9657_v12 = vshrl.u32 %v16980_v29, 16 }
 0x5cb   : > { %v8198_v48 = vadd.f32 %v16729_v50, %v8159_v8  ;;  %v8160_v22 = vmul.f32 %v16718_v26, %v8100_v46  ;;  %v9671_v26 = vshrl.u32 %v16964_v59, 16  ;;  %v9252_v44 = vor.u32 %v9250_v33, %v16986_v52 }
 0x5cc   : > { %v8232_v40 = vmax.f32 %v8200_v37, 0.0  ;;  %v8201_v62 = vadd.f32 %v16729_v50, %v8162_v54  ;;  %9957 = vrot.lane.b32.xlu0 %v12746_v60, %s12841_s30  ;;  %v9667_v54 = vshll.u32 %v16964_v59, 16  ;;  %v9648_v63 = vshll.u32 %v16984_v38, 16 }
 0x5cd   : > { %v8230_v55 = vmax.f32 %v8198_v48, 0.0  ;;  %v8199_v5 = vadd.f32 %v16729_v50, %v8160_v22  ;;  %9959 = vrot.lane.b32.xlu1 %v12745_v2, %s12841_s30  ;;  %v9664_v2 = vrot.slane %v9662_v35, 1 }
 0x5ce   : > { %v8264_v49 = vmin.f32 %v8232_v40, 6.0  ;;  %v8233_v47 = vmax.f32 %v8201_v62, 0.0  ;;  %v9243_v62 = vshll.u32 %v11921_v14, 16  ;;  %v9650_v33 = vrot.slane %v9648_v63, 1  ;;  %v8777_v63 = vld [vmem:[#allocation2 + $0xa4] sm:$0x1] }
 0x5cf   : > { %v8262_v21 = vmin.f32 %v8230_v55, 6.0  ;;  %v8231_v58 = vmax.f32 %v8199_v5, 0.0  ;;  %v9665_v35 = vor.u32 %v9664_v2, %v9660_v16  ;;  %v8784_v2 = vld [vmem:[#allocation2 + $0xb0] sm:$0x1] }
 0x5d0   : > { %v12076_v50 = vpack.c.bf16 %v8264_v49, %v8264_v49  ;;  %v8265_v19 = vmin.f32 %v8233_v47, 6.0  ;;  %9433 = vrot.lane.b32.xlu0 %v11921_v14, %s12833_s14  ;;  %v9245_v59 = vor.u32 %v9243_v62, %v9242_v9  ;;  %v9653_v62 = vshll.u32 %v16980_v29, 16 }
 0x5d1   : > { %v12074_v27 = vpack.c.bf16 %v8262_v21, %v8262_v21  ;;  %v8263_v8 = vmin.f32 %v8231_v58, 6.0  ;;  %9435 = vrot.lane.b32.xlu1 %v16980_v29, %s12833_s14 }
 0x5d2   : > { %v8588_v13 = vshrl.u32 %v12076_v50, 16  ;;  %v12077_v37 = vpack.c.bf16 %v8265_v19, %v8265_v19  ;;  %v8591_v24 = vshll.u32 %v12076_v50, 16 }
 0x5d3   : > { %v8571_v46 = vshrl.u32 %v12074_v27, 16  ;;  %v12075_v48 = vpack.c.bf16 %v8263_v8, %v8263_v8  ;;  %v8574_v55 = vshll.u32 %v12074_v27, 16  ;;  %v8773_v27 = vld [vmem:[#allocation2 + $0x9c] sm:$0xf] }
 0x5d4   : > { %v8590_v22 = vrot.slane %v8588_v13, 7  ;;  %v8596_v40 = vshrl.u32 %v12077_v37, 16  ;;  %v8599_v0 = vshll.u32 %v12077_v37, 16  ;;  %9325 = vrot.lane.b32.xlu0 %v9252_v44, %s12834_s15 }
 0x5d5   : > { %v8573_v60 = vrot.slane %v8571_v46, 7  ;;  %v8579_v5 = vshrl.u32 %v12075_v48, 16  ;;  %9775 = vrot.lane.b32.xlu1 %v9671_v26, %s12840_s22  ;;  %v8582_v19 = vshll.u32 %v12075_v48, 16 }
 0x5d6   : > { %v8593_v49 = vor.u32 %v8591_v24, %v8590_v22  ;;  %v8598_v47 = vrot.slane %v8596_v40, 7  ;;  %v8594_v50 = vrot.slane %v8590_v22, 4  ;;  %v9669_v22 = vrot.slane %v9667_v54, 1 }
 0x5d7   : > { %v8576_v21 = vor.u32 %v8574_v55, %v8573_v60  ;;  %v8581_v58 = vrot.slane %v8579_v5, 7  ;;  %v8577_v26 = vrot.slane %v8573_v60, 4  ;;  %v9646_v40 = vshrl.u32 %v16984_v38, 16 }
 0x5d8   : > { %v8781_v14 = vsel %vm16348_vm7, %v8593_v49, %v8780_v31  ;;  %v8601_v8 = vor.u32 %v8599_v0, %v8598_v47  ;;  %v8603_v13 = vrot.slane %v8598_v47, 4  ;;  %9321 = vrot.lane.b32.xlu0 %v9245_v59, %s12834_s15  ;;  %v9670_v54 = vsel %vm4377_vm8, %v9665_v35, %v9669_v22 }
 0x5d9   : > { %8782 = vst [vmem:[#allocation2 + $0xa8] sm:$0xf] %v8781_v14  ;;  %v8774_v16 = vsel %vm16348_vm7, %v8576_v21, %v8773_v27  ;;  %v8584_v37 = vor.u32 %v8582_v19, %v8581_v58  ;;  %v8586_v46 = vrot.slane %v8581_v58, 4  ;;  %9771 = vrot.lane.b32.xlu1 %v9657_v12, %s12840_s22  ;;  %v9651_v60 = vor.u32 %v9650_v33, %v9646_v40  ;;  %v12726_v33 = vld [vmem:[#allocation2 + $0x3c] sm:$0xff]  }
 0x5da   : > { %8775 = vst [vmem:[#allocation2 + $0x9c] sm:$0xf] %v8774_v16  ;;  %v8602_v48 = vsel %vm12999_vm9, %v8594_v50, %v8601_v8  ;;  %v8785_v44 = vsel %vm16358_vm5, %v8603_v13, %v8784_v2  ;;  %v9655_v55 = vrot.slane %v9653_v62, 1  ;;  %v12822_v8 = vld [vmem:[%s18064_s8] ss:$0 sm:$0xff]  ;;  %v17040_v62 = vsel %vm4954_vm11, %v12726_v33, %v16841_v23 }
 0x5db   : > { %8783 = vst.msk [vmem:[#allocation2 + $0xac] sm:$0xf] %vm442_vm0, %v8602_v48  ;;  %8786 = vst [vmem:[#allocation2 + $0xb0] sm:$0x1] %v8785_v44  ;;  %v8585_v24 = vsel %vm12999_vm9, %v8577_v26, %v8584_v37  ;;  %v8778_v12 = vsel %vm16358_vm5, %v8586_v46, %v8777_v63  ;;  %v12823_v44 = vld [vmem:[%s18065_s9] ss:$0 sm:$0xff]  ;;  %v10102_v42 = vsel %vm5084_vm13, %v17040_v62, %v16769_v36 }
 0x5dc   : > { %8776 = vst.msk [vmem:[#allocation2 + $0xa0] sm:$0xf] %vm442_vm0, %v8585_v24  ;;  %8779 = vst [vmem:[#allocation2 + $0xa4] sm:$0x1] %v8778_v12  ;;  %9773 = vrot.lane.b32.xlu0 %v9670_v54, %s12840_s22  ;;  %v9656_v5 = vsel %vm4377_vm8, %v9651_v60, %v9655_v55 }
 0x5dd   : > { %9327 = vrot.lane.b32.xlu1 %v16986_v52, %s12834_s15  ;;  %v12728_v48 = vld [vmem:[#allocation2 + $0x44] ss:$0 sps:$4 sm:$0x11]  }
 0x5de   : > { %v10020_v55 = vsel %vm4954_vm11, %v12728_v48, %v16868_v11 }
 0x5e0   : > { %v8875_v49 = vld [vmem:[#allocation2 + $0xa8] sm:$0xf]  ;;  %9769 = vrot.lane.b32.xlu0 %v9656_v5, %s12840_s22 }
 0x5e1   : > { %9323 = vrot.lane.b32.xlu1 %v9242_v9, %s12834_s15  ;;  %v8910_v0 = vld [vmem:[#allocation2 + $0xa8] sm:$0xe]  ;;  %v8873_v9 = vld [vmem:[#allocation2 + $0x9c] sm:$0xf] }
 0x5e2   : > { %v8876_v29 = vld [vmem:[#allocation2 + $0xac] sm:$0xf]  ;;  %v17022_v47 = vld [vmem:[#allocation2 + $0xb0] ss:$0 sps:$4 sm:$0x11]  }
 0x5e3   : > { %v11924_v38 = vcombine.low %v8875_v49, %v8876_v29  ;;  %v8874_v52 = vld [vmem:[#allocation2 + $0xa0] sm:$0xf]  ;;  %v11956_v59 = vcombine.low %v8910_v0, %v8876_v29  ;;  %v12753_v31 = vld [vmem:[#allocation2 + $0xa8] sm:$0xff]   ;;  %v12755_v19 = vld [vmem:[#allocation2 + $0xa4] ss:$0 sps:$4 sm:$0x11]  }
 0x5e4   : > { %9447 = vrot.lane.b32.xlu0 %v17022_v47, %s12833_s14  ;;  %v12754_v21 = vld [vmem:[#allocation2 + $0x9c] sm:$0xff]   ;;  %v11923_v58 = vcombine.low %v8873_v9, %v8874_v52  ;;  %v12758_v29 = vld [vmem:[#allocation2 + $0xa4] ss:$0 sps:$4 sm:$0x11]  }
 0x5e5   : > { %9445 = vrot.lane.b32.xlu1 %v11924_v38, %s12833_s14  ;;  %v9261_v35 = vshrl.u32 %v11924_v38, 16  ;;  %v8909_v14 = vld [vmem:[#allocation2 + $0x9c] sm:$0xe]  ;;  %v9690_v16 = vshll.u32 %v11956_v59, 16  ;;  %v9264_v40 = vshll.u32 %v11924_v38, 16 }
 0x5e6   : > { %v9254_v46 = vshrl.u32 %v11923_v58, 16  ;;  %v11955_v12 = vcombine.low %v8909_v14, %v8874_v52  ;;  %v9257_v11 = vshll.u32 %v11923_v58, 16  ;;  %v9695_v14 = vshll.u32 %v17022_v47, 16 }
 0x5e7   : > { %v17029_v27 = vrot.slane %v9261_v35, 7  ;;  %v9692_v38 = vrot.slane %v9690_v16, 1  ;;  %v9699_v16 = vshrl.u32 %v17022_v47, 16 }
 0x5e8   : > { %9965 = vrot.lane.b32.xlu0 %v12754_v21, %s12841_s30  ;;  %v17046_v52 = vrot.slane %v9254_v46, 7  ;;  %v9688_v21 = vshrl.u32 %v11956_v59, 16 }
 0x5e9   : > { %9969 = vrot.lane.b32.xlu1 %v12753_v31, %s12841_s30  ;;  %v9266_v0 = vor.u32 %v9264_v40, %v17029_v27  ;;  %v9681_v40 = vshll.u32 %v12758_v29, 16 }
 0x5ea   : > { %v12390_v50 = vpop.f32.mrb[60].mxu0  ;;  %v9259_v59 = vor.u32 %v9257_v11, %v17046_v52  ;;  %v9693_v46 = vor.u32 %v9692_v38, %v9688_v21 }
 0x5eb   : > { %v8165_v13 = vmul.f32 %v12822_v8, %v12390_v50  ;;  %v8113_v26 = vpop.f32.mrb[61].mxu0 }
 0x5ec   : > { %v8163_v2 = vmul.f32 %v12822_v8, %v8113_v26  ;;  %v12391_v37 = vpop.f32.mrb[62].mxu0  ;;  %9441 = vrot.lane.b32.xlu0 %v11923_v58, %s12833_s14  ;;  %v9685_v58 = vshrl.u32 %v12758_v29, 16 }
 0x5ed   : > { %v8204_v63 = vadd.f32 %v12823_v44, %v8165_v13  ;;  %v8166_v22 = vmul.f32 %v12822_v8, %v12391_v37  ;;  %9967 = vrot.lane.b32.xlu1 %v12755_v19, %s12841_s30  ;;  %v8116_v24 = vpop.f32.mrb[63].mxu0  ;;  %v9676_v19 = vshll.u32 %v11955_v12, 16 }
 0x5ee   : > { %v8202_v54 = vadd.f32 %v12823_v44, %v8163_v2  ;;  %v8164_v60 = vmul.f32 %v12822_v8, %v8116_v24  ;;  %v17053_v8 = vsel %vm5084_vm13, %v10020_v55, %v16771_v7  ;;  %v9697_v7 = vrot.slane %v9695_v14, 1 }
 0x5ef   : > { %v8236_v5 = vmax.f32 %v8204_v63, 0.0  ;;  %v8205_v49 = vadd.f32 %v12823_v44, %v8166_v22  ;;  %v9678_v63 = vrot.slane %v9676_v19, 1  ;;  %v9683_v14 = vrot.slane %v9681_v40, 1 }
 0x5f0   : > { %v8234_v35 = vmax.f32 %v8202_v54, 0.0  ;;  %v8203_v31 = vadd.f32 %v12823_v44, %v8164_v60  ;;  %9333 = vrot.lane.b32.xlu0 %v9266_v0, %s12834_s15  ;;  %v9698_v38 = vsel %vm4377_vm8, %v9693_v46, %v9697_v7  ;;  %v8791_v7 = vld [vmem:[#allocation2 + $0xbc] sm:$0x1]  ;;  %v10168_v36 = vsel %vm7796_vm3, %v17053_v8, %v16838_v30 }
 0x5f1   : > { %v8268_v9 = vmin.f32 %v8236_v5, 6.0  ;;  %v8237_v23 = vmax.f32 %v8205_v49, 0.0  ;;  %9443 = vrot.lane.b32.xlu1 %v12758_v29, %s12833_s14  ;;  %v9674_v49 = vshrl.u32 %v11955_v12, 16  ;;  %v8794_v29 = vld [vmem:[#allocation2 + $0xc0] sm:$0xf] }
 0x5f2   : > { %v8266_v33 = vmin.f32 %v8234_v35, 6.0  ;;  %v8235_v50 = vmax.f32 %v8203_v31, 0.0 }
 0x5f3   : > { %v12080_v13 = vpack.c.bf16 %v8268_v9, %v8268_v9  ;;  %v8269_v26 = vmin.f32 %v8237_v23, 6.0  ;;  %v9679_v19 = vor.u32 %v9678_v63, %v9674_v49 }
 0x5f4   : > { %v12078_v2 = vpack.c.bf16 %v8266_v33, %v8266_v33  ;;  %v8267_v37 = vmin.f32 %v8235_v50, 6.0  ;;  %9329 = vrot.lane.b32.xlu0 %v9259_v59, %s12834_s15 }
 0x5f5   : > { %v8622_v48 = vshrl.u32 %v12080_v13, 16  ;;  %v12081_v44 = vpack.c.bf16 %v8269_v26, %v8269_v26  ;;  %9783 = vrot.lane.b32.xlu1 %v9699_v16, %s12840_s22  ;;  %v8625_v60 = vshll.u32 %v12080_v13, 16  ;;  %v17061_v5 = vpop.permute.xlu0 %9423  ;;  %v8787_v26 = vld [vmem:[#allocation2 + $0xb4] sm:$0xf]  ;;  %v9684_v40 = vsel %vm4377_vm8, %v9679_v19, %v9683_v14 }
 0x5f6   : > { %v8605_v22 = vshrl.u32 %v12078_v2, 16  ;;  %v12079_v24 = vpack.c.bf16 %v8267_v37, %v8267_v37  ;;  %v8608_v35 = vshll.u32 %v12078_v2, 16 }
 0x5f7   : > { %v8624_v54 = vrot.slane %v8622_v48, 7  ;;  %v8630_v47 = vshrl.u32 %v12081_v44, 16  ;;  %v17059_v55 = vpop.permute.xlu1 %9421  ;;  %v8633_v21 = vshll.u32 %v12081_v44, 16  ;;  %v8798_v44 = vld [vmem:[#allocation2 + $0xc8] sm:$0x1] }
 0x5f8   : > { %v8607_v0 = vrot.slane %v8605_v22, 7  ;;  %v8613_v31 = vshrl.u32 %v12079_v24, 16  ;;  %v8616_v11 = vshll.u32 %v12079_v24, 16  ;;  %9781 = vrot.lane.b32.xlu0 %v9698_v38, %s12840_s22 }
 0x5f9   : > { %v8627_v9 = vor.u32 %v8625_v60, %v8624_v54  ;;  %v8632_v23 = vrot.slane %v8630_v47, 7  ;;  %9779 = vrot.lane.b32.xlu1 %v9685_v58, %s12840_s22  ;;  %v8628_v13 = vrot.slane %v8624_v54, 4  ;;  %v17070_v59 = vpop.permute.xlu0 %9947 }
 0x5fa   : > { %v8610_v33 = vor.u32 %v8608_v35, %v8607_v0  ;;  %v8615_v50 = vrot.slane %v8613_v31, 7  ;;  %v8611_v46 = vrot.slane %v8607_v0, 4 }
 0x5fb   : > { %v8795_v12 = vsel %vm16348_vm7, %v8627_v9, %v8794_v29  ;;  %v8635_v16 = vor.u32 %v8633_v21, %v8632_v23  ;;  %v8637_v2 = vrot.slane %v8632_v23, 4  ;;  %v17068_v37 = vpop.permute.xlu1 %9945 }
 0x5fc   : > { %8796 = vst [vmem:[#allocation2 + $0xc0] sm:$0xf] %v8795_v12  ;;  %v8788_v48 = vsel %vm16348_vm7, %v8610_v33, %v8787_v26  ;;  %v8618_v58 = vor.u32 %v8616_v11, %v8615_v50  ;;  %v8620_v63 = vrot.slane %v8615_v50, 4  ;;  %9777 = vrot.lane.b32.xlu0 %v9684_v40, %s12840_s22  ;;  %vm18418_vm7 = vmmov %vm18389_vm1 }
 0x5fd   : > { %8789 = vst [vmem:[#allocation2 + $0xb4] sm:$0xf] %v8788_v48  ;;  %v8636_v22 = vsel %vm12999_vm9, %v8628_v13, %v8635_v16  ;;  %v8799_v24 = vsel %vm16358_vm5, %v8637_v2, %v8798_v44  ;;  %9335 = vrot.lane.b32.xlu1 %v17029_v27, %s12834_s15  ;;  %v10166_v27 = vsel %vm7796_vm3, %v10102_v42, %v16873_v51  ;;  %v9942_v62 = vpop.permute.xlu0 %9941 }
 0x5fe   : > { %8797 = vst.msk [vmem:[#allocation2 + $0xc4] sm:$0xf] %vm442_vm0, %v8636_v22  ;;  %8800 = vst [vmem:[#allocation2 + $0xc8] sm:$0x1] %v8799_v24  ;;  %v8619_v54 = vsel %vm12999_vm9, %v8611_v46, %v8618_v58  ;;  %v8792_v60 = vsel %vm16358_vm5, %v8620_v63, %v8791_v7  ;;  %v12761_v24 = vld [vmem:[#allocation2 + $0x48] sm:$0xff]  }
 0x5ff   : > { %8790 = vst.msk [vmem:[#allocation2 + $0xb8] sm:$0xf] %vm442_vm0, %v8619_v54  ;;  %8793 = vst [vmem:[#allocation2 + $0xbc] sm:$0x1] %v8792_v60  ;;  %v9944_v47 = vpop.permute.xlu1 %9943 }
 0x600   : > { %v10232_v17 = vsel %vm18418_vm7, %v10168_v36, %v9944_v47  ;;  %vm18419_vm9 = vmmov %vm18389_vm1  ;;  %v12765_v36 = vld [vmem:[#allocation2 + $0x50] ss:$0 sps:$4 sm:$0x11]  }
 0x601   : > { %v10230_v49 = vsel %vm18419_vm9, %v10166_v27, %v9942_v62  ;;  %v10329_v18 = vshll.u32 %v10232_v17, 16  ;;  %9331 = vrot.lane.b32.xlu1 %v17046_v52, %s12834_s15  ;;  %v9418_v9 = vpop.permute.xlu0 %9417  ;;  %vm18420_vm0 = vmmov %vm18389_vm1 }
 0x602   : > { %v10325_v0 = vshll.u32 %v10230_v49, 16  ;;  %v10323_v51 = vshrl.u32 %v10230_v49, 16  ;;  %vm18421_vm5 = vmmov %vm18420_vm0 }
 0x603   : > { %v10331_v35 = vrot.slane %v10329_v18, 1  ;;  %v9420_v38 = vpop.permute.xlu1 %9419  ;;  %v8879_v23 = vld [vmem:[#allocation2 + $0xc0] sm:$0xf]  ;;  %vm18422_vm1 = vmmov %vm18420_vm0 }
 0x604   : > { %v10327_v31 = vrot.slane %v10325_v0, 1  ;;  %v8877_v29 = vld [vmem:[#allocation2 + $0xb4] sm:$0xf]  ;;  %v8912_v60 = vld [vmem:[#allocation2 + $0xc0] sm:$0xe]  ;;  %vm18423_vm2 = vmmov %vm18420_vm0 }
 0x605   : > { %v8880_v19 = vld [vmem:[#allocation2 + $0xc4] sm:$0xf]  ;;  %v17103_v13 = vpop.permute.xlu0 %9309  ;;  %v8911_v46 = vld [vmem:[#allocation2 + $0xb4] sm:$0xe]  ;;  %vm18424_vm15 = vmmov %vm18420_vm0 }
 0x606   : > { %v10328_v21 = vor.u32 %v10327_v31, %v10323_v51  ;;  %v12760_v30 = vld [vmem:[#allocation2 + $0xb4] sm:$0xff]   ;;  %v11926_v8 = vcombine.low %v8879_v23, %v8880_v19  ;;  %v11958_v47 = vcombine.low %v8912_v60, %v8880_v19  ;;  %v12766_v62 = vld [vmem:[#allocation2 + $0xbc] ss:$0 sps:$4 sm:$0x11]   ;;  %vm18425_vm10 = vmmov %vm18420_vm0 }
 0x607   : > { %v8878_v33 = vld [vmem:[#allocation2 + $0xb8] sm:$0xf]  ;;  %v17100_v50 = vpop.permute.xlu1 %9759  ;;  %9973 = vrot.lane.b32.xlu0 %v12760_v30, %s12841_s30  ;;  %v17112_v49 = vld [vmem:[#allocation2 + $0xbc] ss:$0 sps:$4 sm:$0x11]   ;;  %vm18426_vm7 = vmmov %vm18420_vm0 }
 0x608   : > { %v10332_v11 = vsel %vm4377_vm8, %v10328_v21, %v10331_v35  ;;  %v11925_v14 = vcombine.low %v8877_v29, %v8878_v33  ;;  %v9275_v52 = vshrl.u32 %v11926_v8, 16  ;;  %v9278_v16 = vshll.u32 %v11926_v8, 16  ;;  %v12767_v51 = vld [vmem:[#allocation2 + $0xb0] ss:$0 sps:$4 sm:$0x11]   ;;  %vm18427_vm9 = vmmov %vm18420_vm0 }
 0x609   : > { %12411 = vmatmul.mubr.msk.bf16.gmra.mrb[40].mxu1 %vm10473_vm4, %v10332_v11  ;;  %v9306_v48 = vpop.permute.xlu0 %9305  ;;  %v11957_v63 = vcombine.low %v8911_v46, %v8878_v33  ;;  %v9718_v19 = vshll.u32 %v11958_v47, 16  ;;  %v12763_v29 = vld [vmem:[#allocation2 + $0x5c] ss:$0 sps:$4 sm:$0x11]  }
 0x60a   : > { %v9268_v12 = vshrl.u32 %v11925_v14, 16  ;;  %v9277_v26 = vrot.slane %v9275_v52, 7  ;;  %v9271_v22 = vshll.u32 %v11925_v14, 16  ;;  %v10023_v27 = vsel %vm4954_vm11, %v12761_v24, %v9306_v48 }
 0x60b   : > { %v9756_v2 = vpop.permute.xlu1 %9755  ;;  %v9704_v54 = vshll.u32 %v11957_v63, 16  ;;  %v10106_v0 = vsel %vm5084_vm13, %v10023_v27, %v9418_v9  ;;  %v9702_v11 = vshrl.u32 %v11957_v63, 16  ;;  %v12759_v63 = vld [vmem:[#allocation2 + $0x54] sm:$0xff]  }
 0x60c   : > { %9343 = vrot.lane.b32.xlu1 %v9277_v26, %s12834_s15  ;;  %v9280_v44 = vor.u32 %v9278_v16, %v9277_v26  ;;  %v9270_v58 = vrot.slane %v9268_v12, 7  ;;  %v12771_v26 = vld [vmem:[#allocation2 + $0xc8] ss:$0 sps:$4 sm:$0x11]  }
 0x60d   : > { %v9706_v31 = vrot.slane %v9704_v54, 1  ;;  %v9716_v54 = vshrl.u32 %v11958_v47, 16  ;;  %v9723_v60 = vshll.u32 %v12771_v26, 16  ;;  %v12770_v47 = vld [vmem:[#allocation2 + $0xc0] sm:$0xff]  }
 0x60e   : > { %9341 = vrot.lane.b32.xlu0 %v9280_v44, %s12834_s15  ;;  %v9758_v40 = vpop.permute.xlu0 %9757  ;;  %v9273_v42 = vor.u32 %v9271_v22, %v9270_v58 }
 0x60f   : > { %v9312_v7 = vpop.permute.xlu1 %9311  ;;  %v9707_v46 = vor.u32 %v9706_v31, %v9702_v11  ;;  %v17157_v31 = vld [vmem:[%s18061_s5] ss:$0 sm:$0xff] }
 0x610   : > { %9339 = vrot.lane.b32.xlu1 %v9270_v58, %s12834_s15  ;;  %v9720_v58 = vrot.slane %v9718_v19, 1 }
 0x612   : > { %9337 = vrot.lane.b32.xlu0 %v9273_v42, %s12834_s15  ;;  %v9754_v35 = vpop.permute.xlu0 %9753 }
 0x613   : > { %v9308_v17 = vpop.permute.xlu1 %9307  ;;  %v10170_v21 = vsel %vm7796_vm3, %v10106_v0, %v9754_v35 }
 0x614   : > { %v10026_v18 = vsel %vm4954_vm11, %v12765_v36, %v9308_v17  ;;  %9975 = vrot.lane.b32.xlu1 %v12766_v62, %s12841_s30  ;;  %v10234_v33 = vsel %vm18420_vm0, %v10170_v21, %v17068_v37  ;;  %v10032_v37 = vsel %vm4954_vm11, %v12763_v29, %v9312_v7  ;;  %v9721_v62 = vor.u32 %v9720_v58, %v9716_v54 }
 0x615   : > { %v10108_v23 = vsel %vm5084_vm13, %v10026_v18, %v9420_v38  ;;  %v10335_v52 = vshll.u32 %v10234_v33, 16  ;;  %v9709_v38 = vshll.u32 %v17112_v49, 16  ;;  %v10333_v48 = vshrl.u32 %v10234_v33, 16 }
 0x616   : > { %v10172_v30 = vsel %vm7796_vm3, %v10108_v23, %v9756_v2  ;;  %9971 = vrot.lane.b32.xlu0 %v12767_v51, %s12841_s30  ;;  %v17128_v16 = vpop.permute.xlu0 %9431  ;;  %v10112_v27 = vsel %vm5084_vm13, %v10032_v37, %v17061_v5  ;;  %v9725_v18 = vrot.slane %v9723_v60, 1  ;;  %v5551_v37 = vmul.f32 %v15778_v61, %v17157_v31 }
 0x617   : > { %v10236_v9 = vsel %vm18421_vm5, %v10172_v30, %v17070_v59  ;;  %v17125_v12 = vpop.permute.xlu1 %9429  ;;  %v10337_v44 = vrot.slane %v10335_v52, 1  ;;  %v9711_v42 = vrot.slane %v9709_v38, 1  ;;  %v10176_v5 = vsel %vm7796_vm3, %v10112_v27, %v17100_v50  ;;  %vm18437_vm5 = vmmov %vm18420_vm0 }
 0x618   : > { %9453 = vrot.lane.b32.xlu1 %v11926_v8, %s12833_s14  ;;  %v10339_v2 = vshll.u32 %v10236_v9, 16  ;;  %v10029_v8 = vsel %vm4954_vm11, %v12759_v63, %v17103_v13  ;;  %v9726_v21 = vsel %vm4377_vm8, %v9721_v62, %v9725_v18  ;;  %v5550_v50 = vmul.f32 %v17157_v31, %v15798_v56  ;;  %v17173_v56 = vld [vmem:[%s18062_s6] ss:$0 sm:$0xff]  ;;  %v12776_v63 = vld [vmem:[#allocation2 + $0xd4] ss:$0 sps:$4 sm:$0x11]  }
 0x619   : > { %v10338_v22 = vor.u32 %v10337_v44, %v10333_v48  ;;  %v9712_v36 = vsel %vm4377_vm8, %v9707_v46, %v9711_v42  ;;  %v10110_v13 = vsel %vm5084_vm13, %v10029_v8, %v17059_v55  ;;  %v5549_v30 = vmul.f32 %v17157_v31, %v15784_v43  ;;  %v12774_v46 = vld [vmem:[#allocation2 + $0xcc] sm:$0xff]  }
 0x61a   : > { %9449 = vrot.lane.b32.xlu0 %v11925_v14, %s12833_s14  ;;  %v10341_v59 = vrot.slane %v10339_v2, 1  ;;  %v17139_v7 = vpop.permute.xlu0 %9955  ;;  %v10174_v0 = vsel %vm7796_vm3, %v10110_v13, %v9758_v40  ;;  %v9713_v40 = vshrl.u32 %v17112_v49, 16  ;;  %v5552_v38 = vmul.f32 %v15790_v41, %v17157_v31 }
 0x61b   : > { %v17133_v24 = vpop.permute.xlu1 %9953  ;;  %v9727_v43 = vshrl.u32 %v12771_v26, 16  ;;  %v5588_v44 = vadd.f32 %v17173_v56, %v5549_v30  ;;  %v5590_v61 = vadd.f32 %v17173_v56, %v5551_v37  ;;  %v5553_v42 = vmul.f32 %v17157_v31, %v16065_v32 }
 0x61c   : > { %9451 = vrot.lane.b32.xlu1 %v17112_v49, %s12833_s14  ;;  %v10342_v14 = vsel %vm4377_vm8, %v10338_v22, %v10341_v59  ;;  %v5589_v49 = vadd.f32 %v17173_v56, %v5550_v50  ;;  %v5554_v59 = vmul.f32 %v17157_v31, %v16083_v15  ;;  %v5556_v8 = vmul.f32 %v16072_v1, %v17157_v31  ;;  %v12777_v15 = vld [vmem:[#allocation2 + $0xc8] ss:$0 sps:$4 sm:$0x11]  }
 0x61d   : > { %12414 = vmatprep.mubr.msk.bf16.mxu1 %vm10473_vm4, %v10342_v14  ;;  %v5620_v60 = vmax.f32 %v5588_v44, 0.0  ;;  %v5555_v13 = vmul.f32 %v16056_v34, %v17157_v31  ;;  %v5592_v32 = vadd.f32 %v17173_v56, %v5553_v42  ;;  %v12779_v34 = vld [vmem:[#allocation2 + $0x68] ss:$0 sps:$4 sm:$0x11]  }
 0x61e   : > { %9785 = vrot.lane.b32.xlu0 %v9712_v36, %s12840_s22  ;;  %v9950_v51 = vpop.permute.xlu0 %9949  ;;  %v5621_v22 = vmax.f32 %v5589_v49, 0.0  ;;  %v5593_v14 = vadd.f32 %v17173_v56, %v5554_v59  ;;  %v5595_v1 = vadd.f32 %v17173_v56, %v5556_v8  ;;  %v5559_v49 = vmul.f32 %v16389_v4, %v17157_v31 }
 0x61f   : > { %v9952_v17 = vpop.permute.xlu1 %9951  ;;  %v10238_v55 = vsel %vm18423_vm2, %v10174_v0, %v9950_v51  ;;  %v5652_v18 = vmin.f32 %v5620_v60, 6.0  ;;  %v5594_v50 = vadd.f32 %v17173_v56, %v5555_v13  ;;  %vm18443_vm2 = vmmov %vm18420_vm0 }
 0x620   : > { %v10240_v35 = vsel %vm18422_vm1, %v10176_v5, %v9952_v17  ;;  %9977 = vrot.lane.b32.xlu1 %v12770_v47, %s12841_s30  ;;  %v10345_v19 = vshll.u32 %v10238_v55, 16  ;;  %v10343_v11 = vshrl.u32 %v10238_v55, 16  ;;  %v5653_v62 = vmin.f32 %v5621_v22, 6.0  ;;  %v12775_v17 = vld [vmem:[#allocation2 + $0x60] sm:$0xff]   ;;  %vm18440_vm1 = vmmov %vm18420_vm0 }
 0x621   : > { %v10349_v23 = vshll.u32 %v10240_v35, 16  ;;  %v5622_v47 = vmax.f32 %v5590_v61, 0.0  ;;  %v5625_v35 = vmax.f32 %v5593_v14, 0.0  ;;  %v5558_v55 = vmul.f32 %v17157_v31, %v16400_v10 }
 0x622   : > { %9789 = vrot.lane.b32.xlu0 %v9726_v21, %s12840_s22  ;;  %v10347_v9 = vrot.slane %v10345_v19, 1  ;;  %v9426_v52 = vpop.permute.xlu0 %9425  ;;  %v5624_v19 = vmax.f32 %v5592_v32, 0.0  ;;  %v5627_v30 = vmax.f32 %v5595_v1, 0.0  ;;  %v5626_v44 = vmax.f32 %v5594_v50, 0.0 }
 0x623   : > { %v17165_v29 = vpop.permute.xlu1 %9427  ;;  %v10351_v33 = vrot.slane %v10349_v23, 1  ;;  %v5654_v21 = vmin.f32 %v5622_v47, 6.0  ;;  %v5657_v10 = vmin.f32 %v5625_v35, 6.0 }
 0x624   : > { %9787 = vrot.lane.b32.xlu1 %v9713_v40, %s12840_s22  ;;  %v10348_v2 = vor.u32 %v10347_v9, %v10343_v11  ;;  %v5656_v59 = vmin.f32 %v5624_v19, 6.0  ;;  %v5658_v13 = vmin.f32 %v5626_v44, 6.0 }
 0x626   : > { %9455 = vrot.lane.b32.xlu0 %v12771_v26, %s12833_s14  ;;  %v17184_v58 = vpop.permute.xlu0 %9317  ;;  %v10352_v41 = vsel %vm4377_vm8, %v10348_v2, %v10351_v33  ;;  %v5591_v26 = vadd.f32 %v17173_v56, %v5552_v38  ;;  %v5557_v33 = vmul.f32 %v17157_v31, %v16394_v45  ;;  %v5597_v45 = vadd.f32 %v17173_v56, %v5558_v55 }
 0x627   : > { %v17181_v48 = vpop.permute.xlu1 %9767  ;;  %12415 = vmatmul.mubr.msk.bf16.gmra.mrb[44].mxu1 %vm10473_vm4, %v10352_v41  ;;  %v12778_v41 = vld [vmem:[#allocation2 + $0x74] ss:$0 sps:$4 sm:$0x11]  }
 0x628   : > { %9791 = vrot.lane.b32.xlu1 %v9727_v43, %s12840_s22  ;;  %v5623_v36 = vmax.f32 %v5591_v26, 0.0  ;;  %v5659_v26 = vmin.f32 %v5627_v30, 6.0  ;;  %v5629_v8 = vmax.f32 %v5597_v45, 0.0 }
 0x62a   : > { %9981 = vrot.lane.b32.xlu0 %v12774_v46, %s12841_s30  ;;  %v9314_v27 = vpop.permute.xlu0 %9313  ;;  %v5655_v23 = vmin.f32 %v5623_v36, 6.0  ;;  %v5560_v46 = vmul.f32 %v16396_v25, %v17157_v31  ;;  %v5596_v25 = vadd.f32 %v17173_v56, %v5557_v33  ;;  %v5561_v36 = vmul.f32 %v17157_v31, %v16488_v28 }
 0x62b   : > { %v9764_v54 = vpop.permute.xlu1 %9763  ;;  %v10035_v51 = vsel %vm4954_vm11, %v12775_v17, %v9314_v27  ;;  %v5562_v27 = vmul.f32 %v17157_v31, %v16495_v20  ;;  %v5564_v28 = vmul.f32 %v16493_v53, %v17157_v31  ;;  %v5661_v55 = vmin.f32 %v5629_v8, 6.0 }
 0x62c   : > { %9983 = vrot.lane.b32.xlu1 %v12776_v63, %s12841_s30  ;;  %v10114_v9 = vsel %vm5084_vm13, %v10035_v51, %v9426_v52  ;;  %v5628_v32 = vmax.f32 %v5596_v25, 0.0  ;;  %v5600_v53 = vadd.f32 %v17173_v56, %v5561_v36 }
 0x62e   : > { %9979 = vrot.lane.b32.xlu0 %v12777_v15, %s12841_s30  ;;  %v17205_v0 = vpop.permute.xlu0 %9765  ;;  %v12773_v15 = vld [vmem:[#allocation2 + $0x6c] sm:$0xff]   ;;  %v5660_v30 = vmin.f32 %v5628_v32, 6.0 }
 0x62f   : > { %v9320_v5 = vpop.permute.xlu1 %9319  ;;  %v10041_v17 = vsel %vm4954_vm11, %v12773_v15, %v17184_v58  ;;  %v5601_v58 = vadd.f32 %v17173_v56, %v5562_v27 }
 0x630   : > { %10859 = vrot.lane.b32.xlu1 %v5653_v62, %s12835_s16  ;;  %v10044_v42 = vsel %vm4954_vm11, %v12778_v41, %v9320_v5 }
 0x631   : > { %v10120_v5 = vsel %vm5084_vm13, %v10044_v42, %v17128_v16  ;;  %v5563_v16 = vmul.f32 %v16486_v6, %v17157_v31  ;;  %v5603_v6 = vadd.f32 %v17173_v56, %v5564_v28 }
 0x632   : > { %10857 = vrot.lane.b32.xlu0 %v5652_v18, %s12835_s16  ;;  %v9762_v38 = vpop.permute.xlu0 %9761 }
 0x633   : > { %v9316_v40 = vpop.permute.xlu1 %9315  ;;  %v10178_v43 = vsel %vm7796_vm3, %v10114_v9, %v9762_v38 }
 0x634   : > { %v10038_v11 = vsel %vm4954_vm11, %v12779_v34, %v9316_v40  ;;  %10863 = vrot.lane.b32.xlu1 %v5655_v23, %s12835_s16  ;;  %v10242_v52 = vsel %vm18424_vm15, %v10178_v43, %v17133_v24  ;;  %v5598_v24 = vadd.f32 %v17173_v56, %v5559_v49  ;;  %v10184_v40 = vsel %vm7796_vm3, %v10120_v5, %v17181_v48  ;;  %v18430_v5 = vld [vmem:[#allocation61_spill] sm:$0xff]  ;;  %vm18453_vm15 = vmmov %vm18420_vm0 }
 0x635   : > { %v10116_v2 = vsel %vm5084_vm13, %v10038_v11, %v17165_v29  ;;  %v10355_v29 = vshll.u32 %v10242_v52, 16  ;;  %v5633_v49 = vmax.f32 %v5601_v58, 0.0  ;;  %v5569_v28 = vmul.f32 %v17157_v31, %v18430_v5 }
 0x636   : > { %v10180_v37 = vsel %vm7796_vm3, %v10116_v2, %v9764_v54  ;;  %10861 = vrot.lane.b32.xlu0 %v5654_v21, %s12835_s16  ;;  %v17235_v22 = vpop.permute.xlu0 %9439  ;;  %v10353_v54 = vshrl.u32 %v10242_v52, 16  ;;  %v5630_v51 = vmax.f32 %v5598_v24, 0.0  ;;  %v10118_v21 = vsel %vm5084_vm13, %v10041_v17, %v17125_v12 }
 0x637   : > { %v10244_v4 = vsel %vm18425_vm10, %v10180_v37, %v17139_v7  ;;  %v17232_v63 = vpop.permute.xlu1 %9437  ;;  %v10357_v60 = vrot.slane %v10355_v29, 1  ;;  %v5599_v7 = vadd.f32 %v17173_v56, %v5560_v46  ;;  %v10182_v33 = vsel %vm7796_vm3, %v10118_v21, %v17205_v0  ;;  %v12781_v21 = vld [vmem:[#allocation2 + $0x78] sm:$0xff]   ;;  %vm18454_vm10 = vmmov %vm18420_vm0 }
 0x638   : > { %10867 = vrot.lane.b32.xlu1 %v5657_v10, %s12835_s16  ;;  %v10359_v61 = vshll.u32 %v10244_v4, 16  ;;  %v5566_v2 = vmul.f32 %v17157_v31, %v16598_v3  ;;  %v5662_v43 = vmin.f32 %v5630_v51, 6.0  ;;  %v5602_v0 = vadd.f32 %v17173_v56, %v5563_v16  ;;  %v18431_v51 = vld [vmem:[#allocation29_spill] sm:$0xff] }
 0x639   : > { %v10358_v62 = vor.u32 %v10357_v60, %v10353_v54  ;;  %v17252_v18 = vpop.f32.mrb[32].mxu1  ;;  %v5631_v23 = vmax.f32 %v5599_v7, 0.0  ;;  %v5632_v46 = vmax.f32 %v5600_v53, 0.0  ;;  %v5565_v37 = vmul.f32 %v17157_v31, %v16585_v57 }
 0x63a   : > { %10865 = vrot.lane.b32.xlu0 %v5656_v59, %s12835_s16  ;;  %v10361_v14 = vrot.slane %v10359_v61, 1  ;;  %v17254_v20 = vpop.permute.xlu0 %9963  ;;  %v17259_v1 = vpop.f32.mrb[33].mxu1  ;;  %v5635_v29 = vmax.f32 %v5603_v6, 0.0  ;;  %v5665_v3 = vmin.f32 %v5633_v49, 6.0  ;;  %v5568_v59 = vmul.f32 %v16589_v39, %v17157_v31  ;;  %v18428_v61 = vld [vmem:[#allocation59_spill] sm:$0xff] }
 0x63b   : > { %v17246_v47 = vpop.permute.xlu1 %9961  ;;  %v17263_v34 = vpop.f32.mrb[34].mxu1  ;;  %v5663_v10 = vmin.f32 %v5631_v23, 6.0  ;;  %v5567_v24 = vmul.f32 %v18428_v61, %v17157_v31  ;;  %v5634_v42 = vmax.f32 %v5602_v0, 0.0  ;;  %v5664_v54 = vmin.f32 %v5632_v46, 6.0  ;;  %v18433_v49 = vld [vmem:[#allocation3_spill] sm:$0xff] }
 0x63c   : > { %10871 = vrot.lane.b32.xlu1 %v5659_v26, %s12835_s16  ;;  %v10362_v35 = vsel %vm4377_vm8, %v10358_v62, %v10361_v14  ;;  %v17272_v50 = vpop.f32.mrb[35].mxu1  ;;  %v5605_v26 = vadd.f32 %v17173_v56, %v5566_v2  ;;  %v5604_v60 = vadd.f32 %v17173_v56, %v5565_v37  ;;  %v5667_v8 = vmin.f32 %v5635_v29, 6.0  ;;  %v18429_v14 = vld [vmem:[#allocation31_spill] sm:$0xff] }
 0x63d   : > { %12418 = vmatprep.mubr.msk.bf16.mxu1 %vm10473_vm4, %v10362_v35  ;;  %v5607_v27 = vadd.f32 %v17173_v56, %v5568_v59  ;;  %v5570_v36 = vmul.f32 %v17157_v31, %v18429_v14  ;;  %v5606_v62 = vadd.f32 %v17173_v56, %v5567_v24  ;;  %v5666_v32 = vmin.f32 %v5634_v42, 6.0  ;;  %v18434_v0 = vld [vmem:[#allocation67_spill] sm:$0xff]  ;;  %v12782_v14 = vld [vmem:[#allocation2 + $0x8c] ss:$0 sps:$4 sm:$0x11]  }
 0x63e   : > { %10869 = vrot.lane.b32.xlu0 %v5658_v13, %s12835_s16  ;;  %v9958_v9 = vpop.permute.xlu0 %9957  ;;  %v5637_v15 = vmax.f32 %v5605_v26, 0.0  ;;  %v5636_v17 = vmax.f32 %v5604_v60, 0.0  ;;  %v5572_v23 = vmul.f32 %v18431_v51, %v17157_v31  ;;  %v5574_v2 = vmul.f32 %v17157_v31, %v18433_v49  ;;  %v18435_v26 = vld [vmem:[#allocation7_spill] sm:$0xff]  ;;  %v12780_v60 = vld [vmem:[#allocation2 + $0x84] sm:$0xff]  }
 0x63f   : > { %v9960_v19 = vpop.permute.xlu1 %9959  ;;  %v10246_v12 = vsel %vm18427_vm9, %v10182_v33, %v9958_v9  ;;  %v5609_v16 = vadd.f32 %v17173_v56, %v5570_v36  ;;  %v5638_v53 = vmax.f32 %v5606_v62, 0.0  ;;  %v5573_v46 = vmul.f32 %v17157_v31, %v18434_v0  ;;  %vm18460_vm9 = vmmov %vm18420_vm0 }
 0x640   : > { %v10248_v11 = vsel %vm18426_vm7, %v10184_v40, %v9960_v19  ;;  %10875 = vrot.lane.b32.xlu1 %v5661_v55, %s12835_s16  ;;  %v10365_v48 = vshll.u32 %v10246_v12, 16  ;;  %v10363_v44 = vshrl.u32 %v10246_v12, 16  ;;  %v5639_v55 = vmax.f32 %v5607_v27, 0.0  ;;  %vm18458_vm7 = vmmov %vm18420_vm0 }
 0x641   : > { %v10369_v38 = vshll.u32 %v10248_v11, 16  ;;  %v5669_v58 = vmin.f32 %v5637_v15, 6.0  ;;  %v5668_v40 = vmin.f32 %v5636_v17, 6.0  ;;  %v5608_v11 = vadd.f32 %v17173_v56, %v5569_v28 }
 0x642   : > { %10873 = vrot.lane.b32.xlu0 %v5660_v30, %s12835_s16  ;;  %v10367_v41 = vrot.slane %v10365_v48, 1  ;;  %v9434_v4 = vpop.permute.xlu0 %9433  ;;  %v18432_v30 = vld [vmem:[#allocation60_spill] sm:$0xff]  ;;  %v5611_v6 = vadd.f32 %v17173_v56, %v5572_v23  ;;  %v5671_v12 = vmin.f32 %v5639_v55, 6.0  ;;  %v5612_v15 = vadd.f32 %v17173_v56, %v5573_v46 }
 0x643   : > { %v17286_v45 = vpop.permute.xlu1 %9435  ;;  %v10371_v52 = vrot.slane %v10369_v38, 1  ;;  %v5571_v33 = vmul.f32 %v18432_v30, %v17157_v31  ;;  %v12783_v48 = vld [vmem:[#allocation2 + $0x80] ss:$0 sps:$4 sm:$0x11]  }
 0x644   : > { %10879 = vrot.lane.b32.xlu1 %v5663_v10, %s12835_s16  ;;  %v10368_v25 = vor.u32 %v10367_v41, %v10363_v44  ;;  %v5641_v10 = vmax.f32 %v5609_v16, 0.0  ;;  %v5640_v44 = vmax.f32 %v5608_v11, 0.0  ;;  %v5643_v59 = vmax.f32 %v5611_v6, 0.0  ;;  %v18439_v11 = vld [vmem:[#allocation63_spill] sm:$0xff] }
 0x645   : > { %v5577_v6 = vmul.f32 %v17157_v31, %v18439_v11  ;;  %v18448_v11 = vld [vmem:[#allocation25_spill] sm:$0xff] }
 0x646   : > { %10877 = vrot.lane.b32.xlu0 %v5662_v43, %s12835_s16  ;;  %v17300_v7 = vpop.permute.xlu0 %9325  ;;  %v10372_v39 = vsel %vm4377_vm8, %v10368_v25, %v10371_v52  ;;  %v5670_v43 = vmin.f32 %v5638_v53, 6.0  ;;  %v5610_v52 = vadd.f32 %v17173_v56, %v5571_v33  ;;  %v5576_v25 = vmul.f32 %v18435_v26, %v17157_v31 }
 0x647   : > { %v17297_v57 = vpop.permute.xlu1 %9775  ;;  %12419 = vmatmul.mubr.msk.bf16.gmra.mrb[48].mxu1 %vm10473_vm4, %v10372_v39  ;;  %v5673_v42 = vmin.f32 %v5641_v10, 6.0  ;;  %v5672_v17 = vmin.f32 %v5640_v44, 6.0 }
 0x648   : > { %10883 = vrot.lane.b32.xlu1 %v5665_v3, %s12835_s16  ;;  %v5615_v28 = vadd.f32 %v17173_v56, %v5576_v25 }
 0x64a   : > { %10881 = vrot.lane.b32.xlu0 %v5664_v54, %s12835_s16  ;;  %v9322_v35 = vpop.permute.xlu0 %9321  ;;  %v5613_v54 = vadd.f32 %v17173_v56, %v5574_v2  ;;  %v5647_v49 = vmax.f32 %v5615_v28, 0.0 }
 0x64b   : > { %v9772_v13 = vpop.permute.xlu1 %9771  ;;  %v10047_v38 = vsel %vm4954_vm11, %v12781_v21, %v9322_v35  ;;  %v5644_v21 = vmax.f32 %v5612_v15, 0.0 }
 0x64c   : > { %10887 = vrot.lane.b32.xlu1 %v5667_v8, %s12835_s16  ;;  %v10122_v29 = vsel %vm5084_vm13, %v10047_v38, %v9434_v4  ;;  %v18436_v8 = vld [vmem:[#allocation30_spill] sm:$0xff]  ;;  %v5645_v55 = vmax.f32 %v5613_v54, 0.0 }
 0x64d   : > { %v5575_v27 = vmul.f32 %v18436_v8, %v17157_v31 }
 0x64e   : > { %10885 = vrot.lane.b32.xlu0 %v5666_v32, %s12835_s16  ;;  %v9774_v9 = vpop.permute.xlu0 %9773  ;;  %v5642_v32 = vmax.f32 %v5610_v52, 0.0 }
 0x64f   : > { %v9328_v19 = vpop.permute.xlu1 %9327 }
 0x650   : > { %10891 = vrot.lane.b32.xlu1 %v5669_v58, %s12835_s16  ;;  %v10056_v35 = vsel %vm4954_vm11, %v12782_v14, %v9328_v19  ;;  %v18438_v58 = vld [vmem:[#allocation68_spill] sm:$0xff]  ;;  %v5674_v19 = vmin.f32 %v5642_v32, 6.0 }
 0x651   : > { %v5578_v16 = vmul.f32 %v17157_v31, %v18438_v58  ;;  %v10128_v38 = vsel %vm5084_vm13, %v10056_v35, %v17235_v22  ;;  %v18444_v58 = vld [vmem:[#allocation26_spill] sm:$0xff] }
 0x652   : > { %10889 = vrot.lane.b32.xlu0 %v5668_v40, %s12835_s16  ;;  %v9770_v3 = vpop.permute.xlu0 %9769  ;;  %v10192_v44 = vsel %vm7796_vm3, %v10128_v38, %v17297_v57 }
 0x653   : > { %v9324_v37 = vpop.permute.xlu1 %9323  ;;  %v10186_v24 = vsel %vm7796_vm3, %v10122_v29, %v9770_v3  ;;  %v5617_v46 = vadd.f32 %v17173_v56, %v5578_v16  ;;  %v5616_v3 = vadd.f32 %v17173_v56, %v5577_v6 }
 0x654   : > { %v10050_v41 = vsel %vm4954_vm11, %v12783_v48, %v9324_v37  ;;  %10895 = vrot.lane.b32.xlu1 %v5671_v12, %s12835_s16  ;;  %v10250_v4 = vsel %vm18420_vm0, %v10186_v24, %v17246_v47  ;;  %v5677_v48 = vmin.f32 %v5645_v55, 6.0 }
 0x655   : > { %v10124_v61 = vsel %vm5084_vm13, %v10050_v41, %v17286_v45  ;;  %v10375_v36 = vshll.u32 %v10250_v4, 16  ;;  %v10373_v51 = vshrl.u32 %v10250_v4, 16  ;;  %v18442_v41 = vld [vmem:[#allocation6_spill] sm:$0xff] }
 0x656   : > { %v10188_v39 = vsel %vm7796_vm3, %v10124_v61, %v9772_v13  ;;  %10893 = vrot.lane.b32.xlu0 %v5670_v43, %s12835_s16  ;;  %v10053_v13 = vsel %vm4954_vm11, %v12780_v60, %v17300_v7  ;;  %v17351_v47 = vpop.permute.xlu0 %9447  ;;  %v5614_v7 = vadd.f32 %v17173_v56, %v5575_v27  ;;  %v18441_v43 = vld [vmem:[#allocation37_spill] sm:$0xff]  ;;  %v5579_v29 = vmul.f32 %v18442_v41, %v17157_v31 }
 0x657   : > { %v10252_v45 = vsel %vm18437_vm5, %v10188_v39, %v17254_v20  ;;  %v17347_v62 = vpop.permute.xlu1 %9445  ;;  %v10377_v23 = vrot.slane %v10375_v36, 1  ;;  %v5675_v20 = vmin.f32 %v5643_v59, 6.0  ;;  %v10126_v40 = vsel %vm5084_vm13, %v10053_v13, %v17232_v63  ;;  %vm18471_vm5 = vmmov %vm18420_vm0 }
 0x658   : > { %10899 = vrot.lane.b32.xlu1 %v5673_v42, %s12835_s16  ;;  %v10379_v5 = vshll.u32 %v10252_v45, 16  ;;  %v10190_v12 = vsel %vm7796_vm3, %v10126_v40, %v9774_v9  ;;  %v5580_v0 = vmul.f32 %v18441_v43, %v17157_v31  ;;  %v5646_v22 = vmax.f32 %v5614_v7, 0.0  ;;  %v18447_v40 = vld [vmem:[#allocation12_spill] sm:$0xff] }
 0x659   : > { %v10378_v30 = vor.u32 %v10377_v23, %v10373_v51  ;;  %v5676_v9 = vmin.f32 %v5644_v21, 6.0  ;;  %v5679_v42 = vmin.f32 %v5647_v49, 6.0  ;;  %v5649_v60 = vmax.f32 %v5617_v46, 0.0  ;;  %v18446_v21 = vld [vmem:[#allocation28_spill] sm:$0xff] }
 0x65a   : > { %10897 = vrot.lane.b32.xlu0 %v5672_v17, %s12835_s16  ;;  %v10381_v53 = vrot.slane %v10379_v5, 1  ;;  %v9966_v10 = vpop.permute.xlu0 %9965  ;;  %v5619_v54 = vadd.f32 %v17173_v56, %v5580_v0  ;;  %v5678_v31 = vmin.f32 %v5646_v22, 6.0  ;;  %v5618_v8 = vadd.f32 %v17173_v56, %v5579_v29  ;;  %v12786_v43 = vld [vmem:[#allocation2 + $0xa4] ss:$0 sps:$4 sm:$0x11]  }
 0x65b   : > { %v17362_v33 = vpop.permute.xlu1 %9969  ;;  %v10254_v2 = vsel %vm18440_vm1, %v10190_v12, %v9966_v10  ;;  %v5648_v27 = vmax.f32 %v5616_v3, 0.0  ;;  %v5681_v45 = vmin.f32 %v5649_v60, 6.0  ;;  %v18449_v12 = vld [vmem:[#allocation9_spill] sm:$0xff]  ;;  %v12784_v10 = vld [vmem:[#allocation2 + $0x9c] sm:$0xff]   ;;  %vm18473_vm1 = vmmov %vm18420_vm0 }
 0x65c   : > { %10903 = vrot.lane.b32.xlu1 %v5675_v20, %s12835_s16  ;;  %v10382_v63 = vsel %vm4377_vm8, %v10378_v30, %v10381_v53  ;;  %v10385_v37 = vshll.u32 %v10254_v2, 16  ;;  %v10383_v61 = vshrl.u32 %v10254_v2, 16  ;;  %v5651_v14 = vmax.f32 %v5619_v54, 0.0  ;;  %v18445_v53 = vld [vmem:[#allocation10_spill] sm:$0xff]  ;;  %v18450_v2 = vld [vmem:[#allocation27_spill] sm:$0xff] }
 0x65d   : > { %12422 = vmatprep.mubr.msk.bf16.mxu1 %vm10473_vm4, %v10382_v63  ;;  %v5650_v32 = vmax.f32 %v5618_v8, 0.0  ;;  %v5680_v17 = vmin.f32 %v5648_v27, 6.0  ;;  %v12785_v30 = vld [vmem:[#allocation2 + $0x90] sm:$0xff]  }
 0x65e   : > { %10901 = vrot.lane.b32.xlu0 %v5674_v19, %s12835_s16  ;;  %v10387_v59 = vrot.slane %v10385_v37, 1  ;;  %v9442_v25 = vpop.permute.xlu0 %9441  ;;  %v5683_v28 = vmin.f32 %v5651_v14, 6.0  ;;  %v18451_v37 = vld [vmem:[#allocation11_spill] sm:$0xff] }
 0x65f   : > { %v9968_v52 = vpop.permute.xlu1 %9967  ;;  %v5682_v23 = vmin.f32 %v5650_v32, 6.0 }
 0x660   : > { %v10256_v26 = vsel %vm18443_vm2, %v10192_v44, %v9968_v52  ;;  %10907 = vrot.lane.b32.xlu1 %v5677_v48, %s12835_s16  ;;  %v10388_v57 = vor.u32 %v10387_v59, %v10383_v61  ;;  %v12787_v52 = vld [vmem:[#allocation2 + $0x98] ss:$0 sps:$4 sm:$0x11]   ;;  %v18452_v44 = vld [vmem:[#allocation33_spill] sm:$0xff]  ;;  %vm18521_vm2 = vmmov %vm18420_vm0 }
 0x661   : > { %v10389_v24 = vshll.u32 %v10256_v26, 16 }
 0x662   : > { %10905 = vrot.lane.b32.xlu0 %v5676_v9, %s12835_s16  ;;  %v9334_v36 = vpop.permute.xlu0 %9333 }
 0x663   : > { %v10391_v39 = vrot.slane %v10389_v24, 1  ;;  %v17386_v4 = vpop.permute.xlu1 %9443  ;;  %v10065_v63 = vsel %vm4954_vm11, %v12784_v10, %v9334_v36 }
 0x664   : > { %10911 = vrot.lane.b32.xlu1 %v5679_v42, %s12835_s16  ;;  %v10134_v22 = vsel %vm5084_vm13, %v10065_v63, %v17347_v62  ;;  %v18455_v62 = vld [vmem:[#allocation14_spill] sm:$0xff]  ;;  %v18456_v42 = vld [vmem:[#allocation35_spill] sm:$0xff] }
 0x665   : > { %v10392_v15 = vsel %vm4377_vm8, %v10388_v57, %v10391_v39  ;;  %v18464_v63 = vld [vmem:[#allocation42_spill] sm:$0xff] }
 0x666   : > { %10909 = vrot.lane.b32.xlu0 %v5678_v31, %s12835_s16  ;;  %12423 = vmatmul.mubr.msk.bf16.gmra.mrb[52].mxu1 %vm10473_vm4, %v10392_v15  ;;  %v17393_v5 = vpop.f32.mrb[36].mxu1  ;;  %v9330_v20 = vpop.permute.xlu0 %9329  ;;  %v18457_v31 = vld [vmem:[#allocation16_spill] sm:$0xff] }
 0x667   : > { %v9784_v13 = vpop.permute.xlu1 %9783  ;;  %v17396_v56 = vpop.f32.mrb[37].mxu1  ;;  %v10059_v6 = vsel %vm4954_vm11, %v12785_v30, %v9330_v20  ;;  %v18462_v30 = vld [vmem:[#allocation34_spill] sm:$0xff] }
 0x668   : > { %10915 = vrot.lane.b32.xlu1 %v5681_v45, %s12835_s16  ;;  %v17398_v35 = vpop.f32.mrb[38].mxu1  ;;  %v10130_v48 = vsel %vm5084_vm13, %v10059_v6, %v9442_v25 }
 0x669   : > { %v17401_v51 = vpop.f32.mrb[39].mxu1 }
 0x66a   : > { %10913 = vrot.lane.b32.xlu0 %v5680_v17, %s12835_s16  ;;  %v9782_v16 = vpop.permute.xlu0 %9781 }
 0x66b   : > { %v9780_v55 = vpop.permute.xlu1 %9779  ;;  %v10198_v29 = vsel %vm7796_vm3, %v10134_v22, %v9782_v16  ;;  %v18465_v22 = vld [vmem:[#allocation18_spill] sm:$0xff] }
 0x66c   : > { %10919 = vrot.lane.b32.xlu1 %v5683_v28, %s12835_s16 }
 0x66e   : > { %10917 = vrot.lane.b32.xlu0 %v5682_v23, %s12835_s16  ;;  %v9778_v19 = vpop.permute.xlu0 %9777 }
 0x66f   : > { %v9336_v7 = vpop.permute.xlu1 %9335  ;;  %v10194_v0 = vsel %vm7796_vm3, %v10130_v48, %v9778_v19 }
 0x670   : > { %11145 = vrot.lane.b32.xlu1 %v18444_v58, %s12833_s14  ;;  %v10068_v9 = vsel %vm4954_vm11, %v12786_v43, %v9336_v7  ;;  %v10258_v3 = vsel %vm18453_vm15, %v10194_v0, %v17362_v33  ;;  %v12791_v43 = vld [vmem:[#allocation2 + $0xa8] sm:$0xff]   ;;  %vm18522_vm15 = vmmov %vm18420_vm0 }
 0x671   : > { %v10136_v61 = vsel %vm5084_vm13, %v10068_v9, %v17351_v47  ;;  %v10395_v24 = vshll.u32 %v10258_v3, 16  ;;  %v18459_v47 = vld [vmem:[#allocation32_spill] sm:$0xff]  ;;  %v10393_v32 = vshrl.u32 %v10258_v3, 16 }
 0x672   : > { %11113 = vrot.lane.b32.xlu0 %v18445_v53, %s12833_s14  ;;  %v10200_v39 = vsel %vm7796_vm3, %v10136_v61, %v9784_v13  ;;  %v18461_v13 = vld [vmem:[#allocation13_spill] sm:$0xff]  ;;  %v18467_v61 = vld [vmem:[#allocation20_spill] sm:$0xff] }
 0x673   : > { %v9332_v38 = vpop.permute.xlu1 %9331  ;;  %v10397_v27 = vrot.slane %v10395_v24, 1  ;;  %v12788_v24 = vld [vmem:[#allocation2 + $0xbc] ss:$0 sps:$4 sm:$0x11]  }
 0x674   : > { %11147 = vrot.lane.b32.xlu1 %v18446_v21, %s12833_s14  ;;  %v10062_v59 = vsel %vm4954_vm11, %v12787_v52, %v9332_v38  ;;  %v18463_v38 = vld [vmem:[#allocation15_spill] sm:$0xff]  ;;  %v18466_v52 = vld [vmem:[#allocation45_spill] sm:$0xff] }
 0x675   : > { %v10132_v33 = vsel %vm5084_vm13, %v10062_v59, %v17386_v4  ;;  %v10398_v16 = vor.u32 %v10397_v27, %v10393_v32 }
 0x676   : > { %11115 = vrot.lane.b32.xlu0 %v18447_v40, %s12833_s14  ;;  %v10196_v14 = vsel %vm7796_vm3, %v10132_v33, %v9780_v55  ;;  %v12789_v33 = vld [vmem:[#allocation2 + $0xb4] sm:$0xff]  }
 0x678   : > { %11149 = vrot.lane.b32.xlu1 %v18448_v11, %s12833_s14 }
 0x679   : > { %v9974_v49 = vpop.permute.xlu0 %9973 }
 0x67a   : > { %11117 = vrot.lane.b32.xlu0 %v18449_v12, %s12833_s14  ;;  %v10262_v26 = vsel %vm18454_vm10, %v10198_v29, %v9974_v49  ;;  %vm18523_vm10 = vmmov %vm18420_vm0 }
 0x67b   : > { %v10405_v60 = vshll.u32 %v10262_v26, 16  ;;  %v10403_v23 = vshrl.u32 %v10262_v26, 16 }
 0x67c   : > { %11151 = vrot.lane.b32.xlu1 %v18450_v2, %s12833_s14 }
 0x67d   : > { %v10407_v36 = vrot.slane %v10405_v60, 1  ;;  %v18468_v60 = vld [vmem:[#allocation41_spill] sm:$0xff] }
 0x67e   : > { %v17423_v46 = vpop.permute.xlu1 %9343  ;;  %11119 = vrot.lane.b32.xlu0 %v18451_v37, %s12833_s14 }
 0x67f   : > { %v10408_v6 = vor.u32 %v10407_v36, %v10403_v23  ;;  %v12790_v36 = vld [vmem:[#allocation2 + $0xb0] ss:$0 sps:$4 sm:$0x11]  }
 0x680   : > { %11153 = vrot.lane.b32.xlu1 %v18452_v44, %s12833_s14  ;;  %v9342_v41 = vpop.permute.xlu0 %9341 }
 0x682   : > { %v17437_v25 = vpop.permute.xlu1 %9339  ;;  %11121 = vrot.lane.b32.xlu0 %v18455_v62, %s12833_s14 }
 0x684   : > { %11155 = vrot.lane.b32.xlu1 %v18456_v42, %s12833_s14  ;;  %v9338_v54 = vpop.permute.xlu0 %9337 }
 0x685   : > { %v10071_v9 = vsel %vm4954_vm11, %v12791_v43, %v9338_v54 }
 0x686   : > { %v9976_v57 = vpop.permute.xlu1 %9975  ;;  %11123 = vrot.lane.b32.xlu0 %v18457_v31, %s12833_s14 }
 0x687   : > { %v10264_v8 = vsel %vm18458_vm7, %v10200_v39, %v9976_v57  ;;  %v10080_v39 = vsel %vm4954_vm11, %v12788_v24, %v17423_v46  ;;  %vm18524_vm7 = vmmov %vm18420_vm0 }
 0x688   : > { %v10409_v15 = vshll.u32 %v10264_v8, 16  ;;  %11157 = vrot.lane.b32.xlu1 %v18459_v47, %s12833_s14  ;;  %v9972_v45 = vpop.permute.xlu0 %9971  ;;  %v10077_v8 = vsel %vm4954_vm11, %v12789_v33, %v9342_v41  ;;  %v10074_v41 = vsel %vm4954_vm11, %v12790_v36, %v17437_v25  ;;  %vm18475_vm11 = vmmov %vm18420_vm0  ;;  %v18476_v33 = vld [vmem:[#allocation22_spill] sm:$0xff] }
 0x689   : > { %v10260_v4 = vsel %vm18460_vm9, %v10196_v14, %v9972_v45  ;;  %vm18525_vm9 = vmmov %vm18420_vm0 }
 0x68a   : > { %v10399_v17 = vshll.u32 %v10260_v4, 16  ;;  %v9454_v28 = vpop.permute.xlu1 %9453  ;;  %11125 = vrot.lane.b32.xlu0 %v18461_v13, %s12833_s14  ;;  %v10411_v20 = vrot.slane %v10409_v15, 1  ;;  %v18469_v15 = vld [vmem:[#allocation17_spill] sm:$0xff] }
 0x68b   : > { %v10142_v14 = vsel %vm5084_vm13, %v10077_v8, %v9454_v28  ;;  %v18472_v28 = vld [vmem:[#allocation19_spill] sm:$0xff] }
 0x68c   : > { %v10401_v7 = vrot.slane %v10399_v17, 1  ;;  %11159 = vrot.lane.b32.xlu1 %v18462_v30, %s12833_s14  ;;  %v9450_v19 = vpop.permute.xlu0 %9449  ;;  %v10412_v49 = vsel %vm4377_vm8, %v10408_v6, %v10411_v20  ;;  %v18470_v17 = vld [vmem:[#allocation44_spill] sm:$0xff] }
 0x68d   : > { %v10138_v3 = vsel %vm5084_vm13, %v10071_v9, %v9450_v19  ;;  %v17503_v9 = vld [vmem:[%s18067_s11] ss:$0 sm:$0xff] }
 0x68e   : > { %v9452_v55 = vpop.permute.xlu1 %9451  ;;  %11127 = vrot.lane.b32.xlu0 %v18463_v38, %s12833_s14  ;;  %v10402_v10 = vsel %vm4377_vm8, %v10398_v16, %v10401_v7  ;;  %v10692_v8 = vmul.f32 %v17252_v18, %v17503_v9  ;;  %v18478_v18 = vld [vmem:[#allocation24_spill] sm:$0xff] }
 0x68f   : > { %12426 = vmatprep.mubr.msk.bf16.mxu1 %vm10473_vm4, %v10402_v10  ;;  %v10140_v19 = vsel %vm5084_vm13, %v10074_v41, %v9452_v55  ;;  %v10693_v55 = vmul.f32 %v17263_v34, %v17503_v9  ;;  %v17521_v34 = vld [vmem:[%s18068_s12] ss:$0 sm:$0xff] }
 0x690   : > { %11161 = vrot.lane.b32.xlu1 %v18464_v63, %s12833_s14  ;;  %12427 = vmatmul.mubr.msk.bf16.gmra.mrb[56].mxu1 %vm10473_vm4, %v10412_v49  ;;  %v9786_v48 = vpop.permute.xlu0 %9785  ;;  %v10731_v41 = vadd.f32 %v17521_v34, %v10692_v8 }
 0x691   : > { %v10202_v59 = vsel %vm7796_vm3, %v10138_v3, %v9786_v48 }
 0x692   : > { %v9978_v0 = vpop.permute.xlu1 %9977  ;;  %11129 = vrot.lane.b32.xlu0 %v18465_v22, %s12833_s14 }
 0x693   : > { %v10266_v54 = vsel %vm18420_vm0, %v10202_v59, %v9978_v0  ;;  %v18474_v0 = vld [vmem:[#allocation51_spill] sm:$0xff] }
 0x694   : > { %11163 = vrot.lane.b32.xlu1 %v18466_v52, %s12833_s14  ;;  %v9790_v29 = vpop.permute.xlu0 %9789  ;;  %v10415_v4 = vshll.u32 %v10266_v54, 16  ;;  %v10413_v59 = vshrl.u32 %v10266_v54, 16  ;;  %v10732_v54 = vadd.f32 %v17521_v34, %v10693_v55 }
 0x695   : > { %v10206_v32 = vsel %vm7796_vm3, %v10142_v14, %v9790_v29 }
 0x696   : > { %v9788_v26 = vpop.permute.xlu1 %9787  ;;  %11131 = vrot.lane.b32.xlu0 %v18467_v61, %s12833_s14  ;;  %v10417_v10 = vrot.slane %v10415_v4, 1  ;;  %v10691_v4 = vmul.f32 %v17503_v9, %v17272_v50 }
 0x697   : > { %v10204_v49 = vsel %vm7796_vm3, %v10140_v19, %v9788_v26 }
 0x698   : > { %11165 = vrot.lane.b32.xlu1 %v18468_v60, %s12833_s14  ;;  %v9456_v57 = vpop.permute.xlu0 %9455  ;;  %v10730_v19 = vadd.f32 %v17521_v34, %v10691_v4 }
 0x699   : > { %v10144_v45 = vsel %vm5084_vm13, %v10080_v39, %v9456_v57  ;;  %vm18518_vm13 = vmmov %vm18420_vm0 }
 0x69a   : > { %v9792_v27 = vpop.permute.xlu1 %9791  ;;  %11133 = vrot.lane.b32.xlu0 %v18469_v15, %s12833_s14  ;;  %v10762_v55 = vmax.f32 %v10730_v19, 0.0 }
 0x69b   : > { %v10208_v20 = vsel %vm7796_vm3, %v10144_v45, %v9792_v27  ;;  %v10418_v27 = vor.u32 %v10417_v10, %v10413_v59  ;;  %v18477_v45 = vld [vmem:[#allocation53_spill] sm:$0xff]  ;;  %v10695_v59 = vmul.f32 %v17503_v9, %v17401_v51  ;;  %vm18519_vm3 = vmmov %vm18420_vm0 }
 0x69c   : > { %11167 = vrot.lane.b32.xlu1 %v18470_v17, %s12833_s14  ;;  %v9982_v23 = vpop.permute.xlu0 %9981 }
 0x69d   : > { %v10270_v46 = vsel %vm18471_vm5, %v10206_v32, %v9982_v23  ;;  %v10734_v51 = vadd.f32 %v17521_v34, %v10695_v59  ;;  %vm18526_vm5 = vmmov %vm18420_vm0 }
 0x69e   : > { %v10425_v16 = vshll.u32 %v10270_v46, 16  ;;  %v9984_v7 = vpop.permute.xlu1 %9983  ;;  %11135 = vrot.lane.b32.xlu0 %v18472_v28, %s12833_s14  ;;  %v10423_v29 = vshrl.u32 %v10270_v46, 16 }
 0x69f   : > { %v10272_v6 = vsel %vm18473_vm1, %v10208_v20, %v9984_v7  ;;  %v10690_v20 = vmul.f32 %v17503_v9, %v17259_v1  ;;  %v10764_v7 = vmax.f32 %v10732_v54, 0.0  ;;  %v10794_v54 = vmin.f32 %v10762_v55, 6.0  ;;  %vm18527_vm1 = vmmov %vm18420_vm0 }
 0x6a0   : > { %v10427_v48 = vrot.slane %v10425_v16, 1  ;;  %v10429_v43 = vshll.u32 %v10272_v6, 16  ;;  %11169 = vrot.lane.b32.xlu1 %v18474_v0, %s12833_s14  ;;  %v9980_v25 = vpop.permute.xlu0 %9979  ;;  %v18479_v16 = vld [vmem:[#allocation50_spill] sm:$0xff]  ;;  %v10697_v6 = vmul.f32 %v17398_v35, %v17503_v9  ;;  %v10766_v19 = vmax.f32 %v10734_v51, 0.0 }
 0x6a1   : > { %v10268_v3 = vsel %vm18475_vm11, %v10204_v49, %v9980_v25  ;;  %v18480_v49 = vld [vmem:[#allocation21_spill] sm:$0xff]  ;;  %v10729_v1 = vadd.f32 %v17521_v34, %v10690_v20  ;;  %v18481_v25 = vld [vmem:[#allocation52_spill] sm:$0xff]  ;;  %vm18529_vm11 = vmmov %vm18420_vm0 }
 0x6a2   : > { %v10419_v24 = vshll.u32 %v10268_v3, 16  ;;  %v17508_v26 = vpop.permute.xlu1 %10859  ;;  %11137 = vrot.lane.b32.xlu0 %v18476_v33, %s12833_s14  ;;  %v10428_v57 = vor.u32 %v10427_v48, %v10423_v29  ;;  %v10431_v39 = vrot.slane %v10429_v43, 1  ;;  %v10763_v48 = vmax.f32 %v10731_v41, 0.0 }
 0x6a3   : > { %v10696_v43 = vmul.f32 %v17393_v5, %v17503_v9  ;;  %v10796_v3 = vmin.f32 %v10764_v7, 6.0  ;;  %v10736_v35 = vadd.f32 %v17521_v34, %v10697_v6  ;;  %v10761_v8 = vmax.f32 %v10729_v1, 0.0 }
 0x6a4   : > { %v10421_v14 = vrot.slane %v10419_v24, 1  ;;  %11171 = vrot.lane.b32.xlu1 %v18477_v45, %s12833_s14  ;;  %v17516_v36 = vpop.permute.xlu0 %10857  ;;  %v10432_v46 = vsel %vm4377_vm8, %v10428_v57, %v10431_v39  ;;  %v18482_v57 = vld [vmem:[#allocation23_spill] sm:$0xff]  ;;  %v10795_v39 = vmin.f32 %v10763_v48, 6.0 }
 0x6a5   : > { %v10735_v5 = vadd.f32 %v17521_v34, %v10696_v43  ;;  %v10768_v4 = vmax.f32 %v10736_v35, 0.0 }
 0x6a6   : > { %v17526_v32 = vpop.permute.xlu1 %10863  ;;  %11139 = vrot.lane.b32.xlu0 %v18478_v18, %s12833_s14  ;;  %v10422_v23 = vsel %vm4377_vm8, %v10418_v27, %v10421_v14  ;;  %v10694_v27 = vmul.f32 %v17503_v9, %v17396_v56  ;;  %vm18517_vm8 = vmmov %vm18420_vm0 }
 0x6a7   : > { %12430 = vmatprep.mubr.msk.bf16.mxu1 %vm10473_vm4, %v10422_v23  ;;  %v10767_v41 = vmax.f32 %v10735_v5, 0.0  ;;  %v10800_v56 = vmin.f32 %v10768_v4, 6.0 }
 0x6a8   : > { %11173 = vrot.lane.b32.xlu1 %v18479_v16, %s12833_s14  ;;  %12431 = vmatmul.mubr.msk.bf16.gmra.mrb[60].mxu1 %vm10473_vm4, %v10432_v46  ;;  %v17539_v50 = vpop.permute.xlu0 %10861  ;;  %v10793_v46 = vmin.f32 %v10761_v8, 6.0  ;;  %v10733_v20 = vadd.f32 %v17521_v34, %v10694_v27  ;;  %vm18520_vm4 = vmmov %vm18420_vm0 }
 0x6a9   : > { %v10799_v48 = vmin.f32 %v10767_v41, 6.0 }
 0x6aa   : > { %v17544_v10 = vpop.permute.xlu1 %10867  ;;  %11141 = vrot.lane.b32.xlu0 %v18480_v49, %s12833_s14  ;;  %v10765_v1 = vmax.f32 %v10733_v20, 0.0 }
 0x6ac   : > { %11175 = vrot.lane.b32.xlu1 %v18481_v25, %s12833_s14  ;;  %v17553_v29 = vpop.permute.xlu0 %10865  ;;  %v10797_v35 = vmin.f32 %v10765_v1, 6.0 }
 0x6ae   : > { %v17558_v24 = vpop.permute.xlu1 %10871  ;;  %11143 = vrot.lane.b32.xlu0 %v18482_v57, %s12833_s14 }
 0x6b0   : > { %10991 = vrot.lane.b32.xlu1 %v10796_v3, %s12839_s19  ;;  %v17566_v14 = vpop.permute.xlu0 %10869  ;;  %v10798_v3 = vmin.f32 %v10766_v19, 6.0 }
 0x6b2   : > { %v17569_v23 = vpop.permute.xlu1 %10875  ;;  %10989 = vrot.lane.b32.xlu0 %v10795_v39, %s12839_s19 }
 0x6b4   : > { %10987 = vrot.lane.b32.xlu1 %v10794_v54, %s12839_s19  ;;  %v17574_v7 = vpop.permute.xlu0 %10873 }
 0x6b6   : > { %v17576_v6 = vpop.permute.xlu1 %10879  ;;  %10985 = vrot.lane.b32.xlu0 %v10793_v46, %s12839_s19 }
 0x6b7   : > { %18483 = vst [vmem:[#allocation74_spill] sm:$0xff] %v17576_v6 }
 0x6b8   : > { %10999 = vrot.lane.b32.xlu1 %v10800_v56, %s12839_s19  ;;  %v17580_v43 = vpop.permute.xlu0 %10877 }
 0x6b9   : > { %18484 = vst [vmem:[#allocation64_spill] sm:$0xff] %v17580_v43 }
 0x6ba   : > { %v17582_v55 = vpop.permute.xlu1 %10883  ;;  %10997 = vrot.lane.b32.xlu0 %v10799_v48, %s12839_s19 }
 0x6bb   : > { %18485 = vst [vmem:[#allocation39_spill] sm:$0xff] %v17582_v55 }
 0x6bc   : > { %10995 = vrot.lane.b32.xlu1 %v10798_v3, %s12839_s19  ;;  %v17586_v59 = vpop.permute.xlu0 %10881 }
 0x6bd   : > { %18486 = vst [vmem:[#allocation43_spill] sm:$0xff] %v17586_v59 }
 0x6be   : > { %v17588_v39 = vpop.permute.xlu1 %10887  ;;  %10993 = vrot.lane.b32.xlu0 %v10797_v35, %s12839_s19 }
 0x6bf   : > { %18487 = vst [vmem:[#allocation69_spill] sm:$0xff] %v17588_v39 }
 0x6c0   : > { %v17591_v8 = vpop.permute.xlu0 %10885 }
 0x6c1   : > { %18488 = vst [vmem:[#allocation84_spill] sm:$0xff] %v17591_v8 }
 0x6c2   : > { %v17593_v5 = vpop.permute.xlu1 %10891 }
 0x6c4   : > { %v17595_v27 = vpop.permute.xlu0 %10889 }
 0x6c6   : > { %v17597_v54 = vpop.permute.xlu1 %10895 }
 0x6c8   : > { %v17599_v4 = vpop.permute.xlu0 %10893 }
 0x6ca   : > { %v17601_v51 = vpop.permute.xlu1 %10899 }
 0x6cc   : > { %v17603_v46 = vpop.permute.xlu0 %10897 }
 0x6ce   : > { %v17605_v41 = vpop.permute.xlu1 %10903 }
 0x6cf   : > { %18489 = vst [vmem:[#allocation73_spill] sm:$0xff] %v17605_v41 }
 0x6d0   : > { %v17607_v20 = vpop.permute.xlu0 %10901 }
 0x6d1   : > { %18490 = vst [vmem:[#allocation76_spill] sm:$0xff] %v17607_v20 }
 0x6d2   : > { %v17609_v56 = vpop.permute.xlu1 %10907 }
 0x6d3   : > { %18491 = vst [vmem:[#allocation85_spill] sm:$0xff] %v17609_v56 }
 0x6d4   : > { %v17611_v19 = vpop.permute.xlu0 %10905 }
 0x6d5   : > { %18492 = vst [vmem:[#allocation75_spill] sm:$0xff] %v17611_v19 }
 0x6d6   : > { %v17613_v48 = vpop.permute.xlu1 %10911 }
 0x6d7   : > { %18493 = vst [vmem:[#allocation71_spill] sm:$0xff] %v17613_v48 }
 0x6d8   : > { %v17615_v1 = vpop.permute.xlu0 %10909 }
 0x6d9   : > { %18494 = vst [vmem:[#allocation77_spill] sm:$0xff] %v17615_v1 }
 0x6da   : > { %v17617_v3 = vpop.permute.xlu1 %10915 }
 0x6db   : > { %18495 = vst [vmem:[#allocation88_spill] sm:$0xff] %v17617_v3 }
 0x6dc   : > { %v12412_v35 = vpop.f32.mrb[40].mxu1  ;;  %v17620_v45 = vpop.permute.xlu0 %10913 }
 0x6dd   : > { %v10700_v25 = vmul.f32 %v12412_v35, %v17503_v9  ;;  %v10588_v16 = vpop.f32.mrb[41].mxu1  ;;  %18496 = vst [vmem:[#allocation79_spill] sm:$0xff] %v17620_v45 }
 0x6de   : > { %v10698_v0 = vmul.f32 %v17503_v9, %v10588_v16  ;;  %v12413_v17 = vpop.f32.mrb[42].mxu1  ;;  %v17625_v56 = vpop.permute.xlu1 %10919 }
 0x6df   : > { %v10739_v60 = vadd.f32 %v17521_v34, %v10700_v25  ;;  %v10701_v52 = vmul.f32 %v12413_v17, %v17503_v9  ;;  %18497 = vst [vmem:[#allocation36_spill] sm:$0xff] %v17625_v56  ;;  %v10591_v48 = vpop.f32.mrb[43].mxu1 }
 0x6e0   : > { %v10737_v1 = vadd.f32 %v17521_v34, %v10698_v0  ;;  %v10699_v3 = vmul.f32 %v17503_v9, %v10591_v48  ;;  %v17630_v19 = vpop.permute.xlu0 %10917 }
 0x6e1   : > { %v10771_v63 = vmax.f32 %v10739_v60, 0.0  ;;  %v10740_v35 = vadd.f32 %v17521_v34, %v10701_v52  ;;  %18498 = vst [vmem:[#allocation80_spill] sm:$0xff] %v17630_v19 }
 0x6e2   : > { %v10738_v45 = vadd.f32 %v17521_v34, %v10699_v3  ;;  %v10769_v57 = vmax.f32 %v10737_v1, 0.0  ;;  %v17633_v25 = vpop.permute.xlu1 %11145 }
 0x6e3   : > { %v10803_v16 = vmin.f32 %v10771_v63, 6.0  ;;  %v10772_v39 = vmax.f32 %v10740_v35, 0.0 }
 0x6e4   : > { %v10770_v49 = vmax.f32 %v10738_v45, 0.0  ;;  %v17636_v56 = vpop.permute.xlu0 %11113  ;;  %v10801_v0 = vmin.f32 %v10769_v57, 6.0 }
 0x6e5   : > { %v10804_v17 = vmin.f32 %v10772_v39, 6.0  ;;  %11005 = vrot.lane.b32.xlu0 %v10803_v16, %s12839_s19 }
 0x6e6   : > { %v17638_v48 = vpop.permute.xlu1 %11147  ;;  %v10802_v52 = vmin.f32 %v10770_v49, 6.0 }
 0x6e7   : > { %11007 = vrot.lane.b32.xlu1 %v10804_v17, %s12839_s19 }
 0x6e8   : > { %v17642_v60 = vpop.permute.xlu0 %11115 }
 0x6e9   : > { %11001 = vrot.lane.b32.xlu0 %v10801_v0, %s12839_s19 }
 0x6ea   : > { %v17644_v63 = vpop.permute.xlu1 %11149 }
 0x6eb   : > { %11003 = vrot.lane.b32.xlu1 %v10802_v52, %s12839_s19 }
 0x6ec   : > { %v17647_v39 = vpop.permute.xlu0 %11117 }
 0x6ee   : > { %v17649_v45 = vpop.permute.xlu1 %11151 }
 0x6f0   : > { %v17651_v1 = vpop.permute.xlu0 %11119 }
 0x6f2   : > { %v17653_v57 = vpop.permute.xlu1 %11153 }
 0x6f4   : > { %v17655_v3 = vpop.permute.xlu0 %11121 }
 0x6f6   : > { %v17657_v35 = vpop.permute.xlu1 %11155 }
 0x6f7   : > { %18499 = vst [vmem:[#allocation89_spill] sm:$0xff] %v17657_v35 }
 0x6f8   : > { %v17659_v49 = vpop.permute.xlu0 %11123 }
 0x6fa   : > { %v17661_v16 = vpop.permute.xlu1 %11157  ;;  %v12416_v17 = vpop.f32.mrb[44].mxu1 }
 0x6fb   : > { %18500 = vst [vmem:[#allocation38_spill] sm:$0xff] %v17661_v16  ;;  %v10704_v52 = vmul.f32 %v12416_v17, %v17503_v9  ;;  %v10604_v19 = vpop.f32.mrb[45].mxu1 }
 0x6fc   : > { %v17663_v0 = vpop.permute.xlu0 %11125  ;;  %v10702_v8 = vmul.f32 %v17503_v9, %v10604_v19  ;;  %v12417_v18 = vpop.f32.mrb[46].mxu1 }
 0x6fd   : > { %v10743_v33 = vadd.f32 %v17521_v34, %v10704_v52  ;;  %v10705_v59 = vmul.f32 %v12417_v18, %v17503_v9  ;;  %v10607_v28 = vpop.f32.mrb[47].mxu1 }
 0x6fe   : > { %v17667_v55 = vpop.permute.xlu1 %11159  ;;  %v10741_v6 = vadd.f32 %v17521_v34, %v10702_v8  ;;  %v10703_v16 = vmul.f32 %v17503_v9, %v10607_v28 }
 0x6ff   : > { %18501 = vst [vmem:[#allocation40_spill] sm:$0xff] %v17667_v55  ;;  %v10775_v41 = vmax.f32 %v10743_v33, 0.0  ;;  %v10744_v17 = vadd.f32 %v17521_v34, %v10705_v59 }
 0x700   : > { %v17673_v30 = vpop.permute.xlu0 %11127  ;;  %v10742_v15 = vadd.f32 %v17521_v34, %v10703_v16  ;;  %v10773_v55 = vmax.f32 %v10741_v6, 0.0 }
 0x701   : > { %v10807_v43 = vmin.f32 %v10775_v41, 6.0  ;;  %v10776_v35 = vmax.f32 %v10744_v17, 0.0 }
 0x702   : > { %v17677_v19 = vpop.permute.xlu1 %11161  ;;  %v10774_v47 = vmax.f32 %v10742_v15, 0.0  ;;  %v10805_v28 = vmin.f32 %v10773_v55, 6.0 }
 0x703   : > { %18502 = vst [vmem:[#allocation81_spill] sm:$0xff] %v17677_v19  ;;  %v10808_v18 = vmin.f32 %v10776_v35, 6.0  ;;  %11013 = vrot.lane.b32.xlu0 %v10807_v43, %s12839_s19 }
 0x704   : > { %v17679_v52 = vpop.permute.xlu0 %11129  ;;  %v10806_v59 = vmin.f32 %v10774_v47, 6.0 }
 0x705   : > { %18503 = vst [vmem:[#allocation83_spill] sm:$0xff] %v17679_v52  ;;  %11015 = vrot.lane.b32.xlu1 %v10808_v18, %s12839_s19 }
 0x706   : > { %v17682_v8 = vpop.permute.xlu1 %11163 }
 0x707   : > { %18504 = vst [vmem:[#allocation90_spill] sm:$0xff] %v17682_v8  ;;  %11009 = vrot.lane.b32.xlu0 %v10805_v28, %s12839_s19 }
 0x708   : > { %v17685_v33 = vpop.permute.xlu0 %11131 }
 0x709   : > { %18505 = vst [vmem:[#allocation82_spill] sm:$0xff] %v17685_v33  ;;  %11011 = vrot.lane.b32.xlu1 %v10806_v59, %s12839_s19 }
 0x70a   : > { %v17688_v16 = vpop.permute.xlu1 %11165 }
 0x70b   : > { %18506 = vst [vmem:[#allocation86_spill] sm:$0xff] %v17688_v16 }
 0x70c   : > { %v17691_v6 = vpop.permute.xlu0 %11133 }
 0x70d   : > { %18507 = vst [vmem:[#allocation66_spill] sm:$0xff] %v17691_v6 }
 0x70e   : > { %v17693_v41 = vpop.permute.xlu1 %11167 }
 0x70f   : > { %18508 = vst [vmem:[#allocation48_spill] sm:$0xff] %v17693_v41 }
 0x710   : > { %v17695_v15 = vpop.permute.xlu0 %11135 }
 0x711   : > { %18509 = vst [vmem:[#allocation49_spill] sm:$0xff] %v17695_v15 }
 0x712   : > { %v17697_v43 = vpop.permute.xlu1 %11169 }
 0x713   : > { %18510 = vst [vmem:[#allocation55_spill] sm:$0xff] %v17697_v43 }
 0x714   : > { %v17699_v55 = vpop.permute.xlu0 %11137 }
 0x715   : > { %18511 = vst [vmem:[#allocation97_spill] sm:$0xff] %v17699_v55 }
 0x716   : > { %v17701_v35 = vpop.permute.xlu1 %11171 }
 0x717   : > { %18512 = vst [vmem:[#allocation99_spill] sm:$0xff] %v17701_v35 }
 0x718   : > { %v17703_v17 = vpop.permute.xlu0 %11139 }
 0x719   : > { %18513 = vst [vmem:[#allocation95_spill] sm:$0xff] %v17703_v17 }
 0x71a   : > { %v17705_v47 = vpop.permute.xlu1 %11173  ;;  %v12420_v18 = vpop.f32.mrb[48].mxu1 }
 0x71b   : > { %18514 = vst [vmem:[#allocation100_spill] sm:$0xff] %v17705_v47  ;;  %v10708_v59 = vmul.f32 %v12420_v18, %v17503_v9  ;;  %v10620_v16 = vpop.f32.mrb[49].mxu1 }
 0x71c   : > { %v17707_v28 = vpop.permute.xlu0 %11141  ;;  %v10706_v41 = vmul.f32 %v17503_v9, %v10620_v16  ;;  %v12421_v8 = vpop.f32.mrb[50].mxu1 }
 0x71d   : > { %18515 = vst [vmem:[#allocation101_spill] sm:$0xff] %v17707_v28  ;;  %v10747_v43 = vadd.f32 %v17521_v34, %v10708_v59  ;;  %v10709_v55 = vmul.f32 %v12421_v8, %v17503_v9  ;;  %v10623_v35 = vpop.f32.mrb[51].mxu1  ;;  %v11210_v8 = vsel %vm2705_vm14, %v18447_v40, %v17508_v26  ;;  %v11212_v40 = vsel %vm2705_vm14, %v18451_v37, %v17526_v32 }
 0x71e   : > { %v17711_v19 = vpop.permute.xlu1 %11175  ;;  %v10745_v17 = vadd.f32 %v17521_v34, %v10706_v41  ;;  %v10707_v47 = vmul.f32 %v17503_v9, %v10623_v35  ;;  %v11211_v41 = vsel %vm2705_vm14, %v18449_v12, %v17539_v50 }
 0x71f   : > { %18516 = vst [vmem:[#allocation98_spill] sm:$0xff] %v17711_v19  ;;  %v10779_v28 = vmax.f32 %v10747_v43, 0.0  ;;  %v10748_v18 = vadd.f32 %v17521_v34, %v10709_v55 }
 0x720   : > { %v17717_v15 = vpop.permute.xlu0 %11143  ;;  %v10746_v6 = vadd.f32 %v17521_v34, %v10707_v47  ;;  %v10777_v20 = vmax.f32 %v10745_v17, 0.0  ;;  %v11215_v47 = vsel %vm2705_vm14, %v18461_v13, %v17566_v14 }
 0x721   : > { %v10811_v33 = vmin.f32 %v10779_v28, 6.0  ;;  %v10780_v19 = vmax.f32 %v10748_v18, 0.0 }
 0x722   : > { %v10992_v16 = vpop.permute.xlu1 %10991  ;;  %v10778_v61 = vmax.f32 %v10746_v6, 0.0  ;;  %v10809_v55 = vmin.f32 %v10777_v20, 6.0 }
 0x723   : > { %v10812_v59 = vmin.f32 %v10780_v19, 6.0  ;;  %11021 = vrot.lane.b32.xlu0 %v10811_v33, %s12839_s19  ;;  %v11244_v26 = vsel %vm5019_vm12, %v11212_v40, %v10992_v16 }
 0x724   : > { %v10990_v52 = vpop.permute.xlu0 %10989  ;;  %v10810_v6 = vmin.f32 %v10778_v61, 6.0  ;;  %v17749_v20 = vsel %vm7829_vm6, %v11244_v26, %v17651_v1 }
 0x725   : > { %v11243_v35 = vsel %vm5019_vm12, %v11211_v41, %v10990_v52  ;;  %11023 = vrot.lane.b32.xlu1 %v10812_v59, %s12839_s19  ;;  %v11213_v52 = vsel %vm2705_vm14, %v18455_v62, %v17553_v29 }
 0x726   : > { %v10988_v43 = vpop.permute.xlu1 %10987  ;;  %v17743_v12 = vsel %vm7829_vm6, %v11243_v35, %v17647_v39  ;;  %v11214_v39 = vsel %vm2705_vm14, %v18457_v31, %v17544_v10  ;;  %v11216_v31 = vsel %vm2705_vm14, %v18463_v38, %v17558_v24 }
 0x727   : > { %v11242_v17 = vsel %vm5019_vm12, %v11210_v8, %v10988_v43  ;;  %11017 = vrot.lane.b32.xlu0 %v10809_v55, %s12839_s19 }
 0x728   : > { %v17731_v19 = vpop.permute.xlu0 %10985  ;;  %v17735_v33 = vsel %vm7829_vm6, %v11242_v17, %v17642_v60 }
 0x729   : > { %11019 = vrot.lane.b32.xlu1 %v10810_v6, %s12839_s19 }
 0x72a   : > { %v11000_v61 = vpop.permute.xlu1 %10999 }
 0x72c   : > { %v10998_v50 = vpop.permute.xlu0 %10997 }
 0x72d   : > { %v11247_v28 = vsel %vm5019_vm12, %v11215_v47, %v10998_v50 }
 0x72e   : > { %v10996_v32 = vpop.permute.xlu1 %10995  ;;  %v17778_v14 = vsel %vm7829_vm6, %v11247_v28, %v17663_v0 }
 0x72f   : > { %v11246_v18 = vsel %vm5019_vm12, %v11214_v39, %v10996_v32 }
 0x730   : > { %v10994_v60 = vpop.permute.xlu0 %10993  ;;  %v17774_v13 = vsel %vm7829_vm6, %v11246_v18, %v17659_v49 }
 0x731   : > { %v11245_v37 = vsel %vm5019_vm12, %v11213_v52, %v10994_v60 }
 0x732   : > { %v17763_v1 = vsel %vm7829_vm6, %v11245_v37, %v17655_v3  ;;  %v11248_v3 = vsel %vm5019_vm12, %v11216_v31, %v11000_v61 }
 0x733   : > { %v17789_v0 = vsel %vm7829_vm6, %v11248_v3, %v17673_v30 }
 0x739   : > { %v12424_v62 = vpop.f32.mrb[52].mxu1 }
 0x73a   : > { %v10712_v29 = vmul.f32 %v12424_v62, %v17503_v9  ;;  %v10636_v16 = vpop.f32.mrb[53].mxu1 }
 0x73b   : > { %v10710_v10 = vmul.f32 %v17503_v9, %v10636_v16  ;;  %v12425_v59 = vpop.f32.mrb[54].mxu1 }
 0x73c   : > { %v10751_v8 = vadd.f32 %v17521_v34, %v10712_v29  ;;  %v10713_v41 = vmul.f32 %v12425_v59, %v17503_v9  ;;  %v10639_v43 = vpop.f32.mrb[55].mxu1 }
 0x73d   : > { %v10749_v38 = vadd.f32 %v17521_v34, %v10710_v10  ;;  %v10711_v24 = vmul.f32 %v17503_v9, %v10639_v43 }
 0x73e   : > { %v10783_v55 = vmax.f32 %v10751_v8, 0.0  ;;  %v10752_v35 = vadd.f32 %v17521_v34, %v10713_v41 }
 0x73f   : > { %v10750_v49 = vadd.f32 %v17521_v34, %v10711_v24  ;;  %v10781_v6 = vmax.f32 %v10749_v38, 0.0 }
 0x740   : > { %v10815_v17 = vmin.f32 %v10783_v55, 6.0  ;;  %v10784_v40 = vmax.f32 %v10752_v35, 0.0 }
 0x741   : > { %v10782_v50 = vmax.f32 %v10750_v49, 0.0  ;;  %v10813_v61 = vmin.f32 %v10781_v6, 6.0 }
 0x742   : > { %v10816_v26 = vmin.f32 %v10784_v40, 6.0  ;;  %11029 = vrot.lane.b32.xlu0 %v10815_v17, %s12839_s19 }
 0x743   : > { %v10814_v60 = vmin.f32 %v10782_v50, 6.0 }
 0x744   : > { %11031 = vrot.lane.b32.xlu1 %v10816_v26, %s12839_s19 }
 0x746   : > { %11025 = vrot.lane.b32.xlu0 %v10813_v61, %s12839_s19 }
 0x748   : > { %11027 = vrot.lane.b32.xlu1 %v10814_v60, %s12839_s19 }
 0x763   : > { %v12428_v52 = vpop.f32.mrb[56].mxu1 }
 0x764   : > { %v10716_v37 = vmul.f32 %v12428_v52, %v17503_v9  ;;  %v10652_v30 = vpop.f32.mrb[57].mxu1 }
 0x765   : > { %v10714_v32 = vmul.f32 %v17503_v9, %v10652_v30  ;;  %v12429_v39 = vpop.f32.mrb[58].mxu1 }
 0x766   : > { %v10755_v47 = vadd.f32 %v17521_v34, %v10716_v37  ;;  %v10717_v28 = vmul.f32 %v12429_v39, %v17503_v9  ;;  %v10655_v18 = vpop.f32.mrb[59].mxu1 }
 0x767   : > { %v10753_v62 = vadd.f32 %v17521_v34, %v10714_v32  ;;  %v10715_v29 = vmul.f32 %v17503_v9, %v10655_v18 }
 0x768   : > { %v10787_v16 = vmax.f32 %v10755_v47, 0.0  ;;  %v10756_v31 = vadd.f32 %v17521_v34, %v10717_v28 }
 0x769   : > { %v10754_v10 = vadd.f32 %v17521_v34, %v10715_v29  ;;  %v10785_v3 = vmax.f32 %v10753_v62, 0.0 }
 0x76a   : > { %v10819_v59 = vmin.f32 %v10787_v16, 6.0  ;;  %v10788_v8 = vmax.f32 %v10756_v31, 0.0  ;;  %v17821_v16 = vpop.permute.xlu1 %11007 }
 0x76b   : > { %v10786_v43 = vmax.f32 %v10754_v10, 0.0  ;;  %v10817_v38 = vmin.f32 %v10785_v3, 6.0  ;;  %v11209_v3 = vsel %vm2705_vm14, %v18445_v53, %v17516_v36  ;;  %v11225_v53 = vsel %vm2705_vm14, %v18444_v58, %v17595_v27 }
 0x76c   : > { %v10820_v41 = vmin.f32 %v10788_v8, 6.0  ;;  %11037 = vrot.lane.b32.xlu0 %v10819_v59, %s12839_s19  ;;  %v11241_v8 = vsel %vm5019_vm12, %v11209_v3, %v17731_v19  ;;  %v11227_v27 = vsel %vm2705_vm14, %v18448_v11, %v17599_v4  ;;  %v18536_v3 = vld [vmem:[#allocation17_spill] sm:$0xff] }
 0x76d   : > { %v10818_v24 = vmin.f32 %v10786_v43, 6.0  ;;  %v11273_v43 = vsel %vm7829_vm6, %v11241_v8, %v17636_v56  ;;  %v11307_v56 = vsel %vm18519_vm3, %v17743_v12, 0.0  ;;  %vm18542_vm3 = vmmov %vm18420_vm0 }
 0x76e   : > { %11039 = vrot.lane.b32.xlu1 %v10820_v41, %s12839_s19  ;;  %v17823_v31 = vpop.permute.xlu1 %11003 }
 0x770   : > { %11033 = vrot.lane.b32.xlu0 %v10817_v38, %s12839_s19 }
 0x772   : > { %11035 = vrot.lane.b32.xlu1 %v10818_v24, %s12839_s19 }
 0x777   : > { %v17827_v59 = vpop.permute.xlu1 %11015 }
 0x77b   : > { %v12432_v55 = vpop.f32.mrb[60].mxu1  ;;  %v17838_v38 = vpop.permute.xlu1 %11011 }
 0x77c   : > { %v10720_v35 = vmul.f32 %v12432_v55, %v17503_v9  ;;  %v10668_v49 = vpop.f32.mrb[61].mxu1  ;;  %v11305_v55 = vsel %vm18517_vm8, %v11273_v43, 0.0  ;;  %vm18534_vm8 = vmmov %vm18420_vm0 }
 0x77d   : > { %v10718_v17 = vmul.f32 %v17503_v9, %v10668_v49  ;;  %v12433_v6 = vpop.f32.mrb[62].mxu1 }
 0x77e   : > { %v10759_v40 = vadd.f32 %v17521_v34, %v10720_v35  ;;  %v10721_v26 = vmul.f32 %v12433_v6, %v17503_v9  ;;  %v10671_v50 = vpop.f32.mrb[63].mxu1  ;;  %v11226_v6 = vsel %vm2705_vm14, %v18446_v21, %v17593_v5 }
 0x77f   : > { %v10757_v61 = vadd.f32 %v17521_v34, %v10718_v17  ;;  %v10719_v60 = vmul.f32 %v17503_v9, %v10671_v50  ;;  %v17819_v9 = vpop.permute.xlu0 %11005  ;;  %v11306_v17 = vsel %vm18518_vm13, %v17735_v33, 0.0  ;;  %v11228_v50 = vsel %vm2705_vm14, %v18450_v2, %v17597_v54  ;;  %vm18537_vm13 = vmmov %vm18420_vm0 }
 0x780   : > { %v10791_v52 = vmax.f32 %v10759_v40, 0.0  ;;  %v10760_v37 = vadd.f32 %v17521_v34, %v10721_v26  ;;  %v11308_v26 = vsel %vm18520_vm4, %v17749_v20, 0.0  ;;  %vm18545_vm4 = vmmov %vm18420_vm0 }
 0x781   : > { %v10758_v30 = vadd.f32 %v17521_v34, %v10719_v60  ;;  %v10789_v39 = vmax.f32 %v10757_v61, 0.0  ;;  %v11310_v60 = vsel %vm18524_vm7, %v17774_v13, 0.0  ;;  %v11217_v13 = vsel %vm2705_vm14, %v18465_v22, %v17574_v7  ;;  %v18528_v22 = vld [vmem:[#allocation20_spill] sm:$0xff]  ;;  %vm18557_vm7 = vmmov %vm18420_vm0 }
 0x782   : > { %v10823_v32 = vmin.f32 %v10791_v52, 6.0  ;;  %v10792_v47 = vmax.f32 %v10760_v37, 0.0  ;;  %v11229_v52 = vsel %vm2705_vm14, %v18452_v44, %v17603_v46  ;;  %v11311_v37 = vsel %vm18420_vm0, %v17778_v14, 0.0 }
 0x783   : > { %v10790_v18 = vmax.f32 %v10758_v30, 0.0  ;;  %v10821_v62 = vmin.f32 %v10789_v39, 6.0  ;;  %v11002_v34 = vpop.permute.xlu0 %11001  ;;  %v11230_v44 = vsel %vm2705_vm14, %v18456_v42, %v17601_v51  ;;  %v11312_v14 = vsel %vm18527_vm1, %v17789_v0, 0.0  ;;  %v18531_v51 = vld [vmem:[#allocation76_spill] sm:$0xff]  ;;  %vm18571_vm1 = vmmov %vm18420_vm0 }
 0x784   : > { %v10824_v28 = vmin.f32 %v10792_v47, 6.0  ;;  %11045 = vrot.lane.b32.xlu0 %v10823_v32, %s12839_s19  ;;  %v11249_v46 = vsel %vm5019_vm12, %v11217_v13, %v11002_v34  ;;  %v11218_v7 = vsel %vm2705_vm14, %v18528_v22, %v17569_v23  ;;  %v18530_v47 = vld [vmem:[#allocation83_spill] sm:$0xff]  ;;  %v18535_v34 = vld [vmem:[#allocation64_spill] sm:$0xff] }
 0x785   : > { %v10822_v29 = vmin.f32 %v10790_v18, 6.0  ;;  %v11281_v42 = vsel %vm7829_vm6, %v11249_v46, %v18530_v47  ;;  %v11219_v8 = vsel %vm2705_vm14, %v18536_v3, %v18535_v34  ;;  %v18558_v13 = vld [vmem:[#allocation84_spill] sm:$0xff]  ;;  %v18563_v22 = vld [vmem:[#allocation23_spill] sm:$0xff]  ;;  %v18568_v34 = vld [vmem:[#allocation85_spill] sm:$0xff] }
 0x786   : > { %11047 = vrot.lane.b32.xlu1 %v10824_v28, %s12839_s19  ;;  %v18532_v28 = vld [vmem:[#allocation32_spill] sm:$0xff]  ;;  %v11313_v23 = vsel %vm18534_vm8, %v11281_v42, 0.0  ;;  %vm18579_vm8 = vmmov %vm18420_vm0 }
 0x787   : > { %v17825_v10 = vpop.permute.xlu0 %11013  ;;  %v11231_v18 = vsel %vm2705_vm14, %v18532_v28, %v18531_v51 }
 0x788   : > { %11041 = vrot.lane.b32.xlu0 %v10821_v62, %s12839_s19  ;;  %v18533_v62 = vld [vmem:[#allocation89_spill] sm:$0xff] }
 0x78a   : > { %11043 = vrot.lane.b32.xlu1 %v10822_v29, %s12839_s19 }
 0x78b   : > { %v17834_v41 = vpop.permute.xlu0 %11009 }
 0x795   : > { %v11022_v24 = vpop.permute.xlu0 %11021 }
 0x796   : > { %v11259_v21 = vsel %vm5019_vm12, %v11227_v27, %v11022_v24  ;;  %v18538_v24 = vld [vmem:[#allocation82_spill] sm:$0xff] }
 0x797   : > { %v11024_v35 = vpop.permute.xlu1 %11023  ;;  %v11291_v11 = vsel %vm7829_vm6, %v11259_v21, %v17644_v63 }
 0x798   : > { %v11260_v4 = vsel %vm5019_vm12, %v11228_v50, %v11024_v35  ;;  %v18539_v35 = vld [vmem:[#allocation73_spill] sm:$0xff] }
 0x799   : > { %v11018_v49 = vpop.permute.xlu0 %11017  ;;  %v11292_v2 = vsel %vm7829_vm6, %v11260_v4, %v17649_v45 }
 0x79a   : > { %v11257_v36 = vsel %vm5019_vm12, %v11225_v53, %v11018_v49  ;;  %v11324_v30 = vsel %vm18526_vm5, %v11292_v2, 0.0  ;;  %v18541_v53 = vld [vmem:[#allocation38_spill] sm:$0xff]  ;;  %v18556_v2 = vld [vmem:[#allocation97_spill] sm:$0xff]  ;;  %vm18565_vm5 = vmmov %vm18420_vm0 }
 0x79b   : > { %v11020_v19 = vpop.permute.xlu1 %11019  ;;  %v11289_v40 = vsel %vm7829_vm6, %v11257_v36, %v17633_v25  ;;  %v11309_v25 = vsel %vm18522_vm15, %v17763_v1, 0.0  ;;  %v11323_v1 = vsel %vm18525_vm9, %v11291_v11, 0.0  ;;  %vm18551_vm15 = vmmov %vm18420_vm0  ;;  %v18552_v11 = vld [vmem:[#allocation49_spill] sm:$0xff] }
 0x79c   : > { %v11258_v33 = vsel %vm5019_vm12, %v11226_v6, %v11020_v19  ;;  %v11321_v58 = vsel %vm18521_vm2, %v11289_v40, 0.0  ;;  %v18543_v6 = vld [vmem:[#allocation74_spill] sm:$0xff]  ;;  %v18544_v40 = vld [vmem:[#allocation19_spill] sm:$0xff]  ;;  %vm18548_vm2 = vmmov %vm18420_vm0 }
 0x79d   : > { %v11290_v12 = vsel %vm7829_vm6, %v11258_v33, %v17638_v48  ;;  %v11220_v33 = vsel %vm2705_vm14, %v18544_v40, %v18543_v6  ;;  %vm18561_vm9 = vmmov %vm18420_vm0  ;;  %v18577_v6 = vld [vmem:[#allocation44_spill] sm:$0xff] }
 0x79e   : > { %v11322_v20 = vsel %vm18523_vm10, %v11290_v12, 0.0  ;;  %v18547_v12 = vld [vmem:[#allocation40_spill] sm:$0xff]  ;;  %vm18553_vm10 = vmmov %vm18420_vm0 }
 0x7a6   : > { %11337 = vxpose.xlu0.b32.start [1/16] (narrow) %v11305_v55, 64 }
 0x7aa   : > { %11338 = vxpose.xlu0.b32.cont [2/16] (narrow) %v11306_v17, 64  ;;  %v11251_v17 = vsel %vm5019_vm12, %v11219_v8, %v17819_v9  ;;  %v11252_v9 = vsel %vm5019_vm12, %v11220_v33, %v17821_v16  ;;  %v18578_v33 = vld [vmem:[#allocation86_spill] sm:$0xff] }
 0x7ab   : > { %v11284_v4 = vsel %vm7829_vm6, %v11252_v9, %v18552_v11  ;;  %v18580_v9 = vld [vmem:[#allocation48_spill] sm:$0xff] }
 0x7ac   : > { %v11316_v16 = vsel %vm18553_vm10, %v11284_v4, 0.0 }
 0x7ae   : > { %11339 = vxpose.xlu0.b32.cont [3/16] (narrow) %v11307_v56, 64 }
 0x7b2   : > { %11340 = vxpose.xlu0.b32.cont [4/16] (narrow) %v11308_v26, 64 }
 0x7b3   : > { %11369 = vxpose.xlu1.b32.start [1/16] (narrow) %v11321_v58, 64  ;;  %v18546_v58 = vld [vmem:[#allocation66_spill] sm:$0xff] }
 0x7b4   : > { %v11030_v5 = vpop.permute.xlu0 %11029  ;;  %v11283_v27 = vsel %vm7829_vm6, %v11251_v17, %v18546_v58  ;;  %v18574_v17 = vld [vmem:[#allocation90_spill] sm:$0xff] }
 0x7b5   : > { %v11263_v29 = vsel %vm5019_vm12, %v11231_v18, %v11030_v5  ;;  %v11315_v5 = vsel %vm18548_vm2, %v11283_v27, 0.0  ;;  %vm18595_vm2 = vmmov %vm18420_vm0 }
 0x7b6   : > { %11341 = vxpose.xlu0.b32.cont [5/16] (narrow) %v11309_v25, 64  ;;  %v11032_v61 = vpop.permute.xlu1 %11031  ;;  %v11295_v36 = vsel %vm7829_vm6, %v11263_v29, %v18541_v53  ;;  %v18549_v25 = vld [vmem:[#allocation43_spill] sm:$0xff] }
 0x7b7   : > { %11370 = vxpose.xlu1.b32.cont [2/16] (narrow) %v11322_v20, 64  ;;  %v11327_v26 = vsel %vm18545_vm4, %v11295_v36, 0.0  ;;  %v18550_v20 = vld [vmem:[#allocation22_spill] sm:$0xff]  ;;  %vm18591_vm4 = vmmov %vm18420_vm0 }
 0x7b8   : > { %v11026_v48 = vpop.permute.xlu0 %11025  ;;  %v11221_v50 = vsel %vm2705_vm14, %v18550_v20, %v18549_v25  ;;  %v18582_v20 = vld [vmem:[#allocation79_spill] sm:$0xff] }
 0x7b9   : > { %v11261_v54 = vsel %vm5019_vm12, %v11229_v52, %v11026_v48  ;;  %v11253_v48 = vsel %vm5019_vm12, %v11221_v50, %v17834_v41  ;;  %v18583_v50 = vld [vmem:[#allocation51_spill] sm:$0xff] }
 0x7ba   : > { %11342 = vxpose.xlu0.b32.cont [6/16] (narrow) %v11310_v60, 64  ;;  %v11028_v63 = vpop.permute.xlu1 %11027  ;;  %v11293_v45 = vsel %vm7829_vm6, %v11261_v54, %v17653_v57  ;;  %v11250_v57 = vsel %vm5019_vm12, %v11218_v7, %v17823_v31  ;;  %v18540_v31 = vld [vmem:[#allocation34_spill] sm:$0xff]  ;;  %v18554_v60 = vld [vmem:[#allocation39_spill] sm:$0xff]  ;;  %v11285_v54 = vsel %vm7829_vm6, %v11253_v48, %v18556_v2  ;;  %v18584_v48 = vld [vmem:[#allocation88_spill] sm:$0xff] }
 0x7bb   : > { %11371 = vxpose.xlu1.b32.cont [3/16] (narrow) %v11323_v1, 64  ;;  %v11262_v32 = vsel %vm5019_vm12, %v11230_v44, %v11028_v63  ;;  %v11325_v39 = vsel %vm18529_vm11, %v11293_v45, 0.0  ;;  %v11282_v55 = vsel %vm7829_vm6, %v11250_v57, %v18538_v24  ;;  %v11232_v49 = vsel %vm2705_vm14, %v18540_v31, %v18539_v35  ;;  %v18555_v1 = vld [vmem:[#allocation24_spill] sm:$0xff]  ;;  %v18560_v44 = vld [vmem:[#allocation95_spill] sm:$0xff]  ;;  %v18572_v35 = vld [vmem:[#allocation77_spill] sm:$0xff] }
 0x7bc   : > { %v11294_v0 = vsel %vm7829_vm6, %v11262_v32, %v18533_v62  ;;  %v11264_v19 = vsel %vm5019_vm12, %v11232_v49, %v11032_v61  ;;  %v11314_v56 = vsel %vm18542_vm3, %v11282_v55, 0.0  ;;  %v11222_v52 = vsel %vm2705_vm14, %v18555_v1, %v18554_v60  ;;  %v18566_v57 = vld [vmem:[#allocation75_spill] sm:$0xff]  ;;  %v18567_v62 = vld [vmem:[#allocation42_spill] sm:$0xff]  ;;  %v18573_v31 = vld [vmem:[#allocation41_spill] sm:$0xff] }
 0x7bd   : > { %v11326_v43 = vsel %vm18537_vm13, %v11294_v0, 0.0  ;;  %v11296_v21 = vsel %vm7829_vm6, %v11264_v19, %v18547_v12  ;;  %v11254_v63 = vsel %vm5019_vm12, %v11222_v52, %v17838_v38  ;;  %v18564_v38 = vld [vmem:[#allocation101_spill] sm:$0xff]  ;;  %v11233_v0 = vsel %vm2705_vm14, %v18567_v62, %v18566_v57  ;;  %vm18575_vm11 = vmmov %vm18420_vm0  ;;  %v18586_v52 = vld [vmem:[#allocation55_spill] sm:$0xff] }
 0x7be   : > { %11343 = vxpose.xlu0.b32.cont [7/16] (narrow) %v11311_v37, 64  ;;  %v11328_v61 = vsel %vm18551_vm15, %v11296_v21, 0.0  ;;  %v11317_v37 = vsel %vm18557_vm7, %v11285_v54, 0.0  ;;  %v11286_v46 = vsel %vm7829_vm6, %v11254_v63, %v18560_v44  ;;  %v11235_v49 = vsel %vm2705_vm14, %v18573_v31, %v18572_v35  ;;  %vm18581_vm13 = vmmov %vm18420_vm0 }
 0x7bf   : > { %11372 = vxpose.xlu1.b32.cont [4/16] (narrow) %v11324_v30, 64  ;;  %v18559_v30 = vld [vmem:[#allocation21_spill] sm:$0xff]  ;;  %v11318_v32 = vsel %vm18561_vm9, %v11286_v46, 0.0  ;;  %vm18587_vm3 = vmmov %vm18420_vm0 }
 0x7c0   : > { %v11223_v41 = vsel %vm2705_vm14, %v18559_v30, %v18558_v13  ;;  %v18589_v13 = vld [vmem:[#allocation50_spill] sm:$0xff]  ;;  %vm18597_vm15 = vmmov %vm18420_vm0 }
 0x7c1   : > { %v11255_v45 = vsel %vm5019_vm12, %v11223_v41, %v17825_v10  ;;  %v18590_v41 = vld [vmem:[#allocation99_spill] sm:$0xff] }
 0x7c2   : > { %11344 = vxpose.xlu0.b32.cont [8/16] (narrow) %v11312_v14, 64  ;;  %v18562_v14 = vld [vmem:[#allocation69_spill] sm:$0xff] }
 0x7c3   : > { %11373 = vxpose.xlu1.b32.cont [5/16] (narrow) %v11325_v39, 64  ;;  %v11224_v7 = vsel %vm2705_vm14, %v18563_v22, %v18562_v14  ;;  %v11287_v39 = vsel %vm7829_vm6, %v11255_v45, %v18564_v38  ;;  %v18593_v14 = vld [vmem:[#allocation52_spill] sm:$0xff] }
 0x7c4   : > { %v11256_v47 = vsel %vm5019_vm12, %v11224_v7, %v17827_v59  ;;  %v11319_v42 = vsel %vm18420_vm0, %v11287_v39, 0.0  ;;  %v18569_v59 = vld [vmem:[#allocation45_spill] sm:$0xff]  ;;  %v18594_v7 = vld [vmem:[#allocation100_spill] sm:$0xff] }
 0x7c5   : > { %v11288_v10 = vsel %vm7829_vm6, %v11256_v47, %v17717_v15  ;;  %v11234_v3 = vsel %vm2705_vm14, %v18569_v59, %v18568_v34 }
 0x7c6   : > { %11345 = vxpose.xlu0.b32.cont [9/16] (narrow) %v11313_v23, 64  ;;  %v11320_v18 = vsel %vm18565_vm5, %v11288_v10, 0.0 }
 0x7c7   : > { %11374 = vxpose.xlu1.b32.cont [6/16] (narrow) %v11326_v43, 64  ;;  %v18570_v43 = vld [vmem:[#allocation81_spill] sm:$0xff] }
 0x7ca   : > { %11346 = vxpose.xlu0.b32.cont [10/16] (narrow) %v11314_v56, 64  ;;  %v18576_v56 = vld [vmem:[#allocation71_spill] sm:$0xff] }
 0x7cb   : > { %11375 = vxpose.xlu1.b32.cont [7/16] (narrow) %v11327_v26, 64  ;;  %v11236_v40 = vsel %vm2705_vm14, %v18577_v6, %v18576_v56 }
 0x7ce   : > { %11347 = vxpose.xlu0.b32.cont [11/16] (narrow) %v11315_v5, 64 }
 0x7cf   : > { %11376 = vxpose.xlu1.b32.cont [8/16] (narrow) %v11328_v61, 64  ;;  %v11237_v61 = vsel %vm2705_vm14, %v18583_v50, %v18582_v20 }
 0x7d2   : > { %11348 = vxpose.xlu0.b32.cont [12/16] (narrow) %v11316_v16, 64  ;;  %v18585_v16 = vld [vmem:[#allocation53_spill] sm:$0xff] }
 0x7d3   : > { %v11238_v60 = vsel %vm2705_vm14, %v18585_v16, %v18584_v48 }
 0x7d6   : > { %11349 = vxpose.xlu0.b32.cont [13/16] (narrow) %v11317_v37, 64  ;;  %v18588_v37 = vld [vmem:[#allocation80_spill] sm:$0xff] }
 0x7d7   : > { %v11239_v30 = vsel %vm2705_vm14, %v18589_v13, %v18588_v37 }
 0x7da   : > { %11350 = vxpose.xlu0.b32.cont [14/16] (narrow) %v11318_v32, 64  ;;  %v18592_v32 = vld [vmem:[#allocation36_spill] sm:$0xff] }
 0x7db   : > { %v11240_v22 = vsel %vm2705_vm14, %v18593_v14, %v18592_v32 }
 0x7de   : > { %11351 = vxpose.xlu0.b32.cont [15/16] (narrow) %v11319_v42, 64  ;;  %v11038_v51 = vpop.permute.xlu0 %11037  ;;  %v18596_v42 = vld [vmem:[#allocation98_spill] sm:$0xff] }
 0x7df   : > { %v11267_v36 = vsel %vm5019_vm12, %v11235_v49, %v11038_v51 }
 0x7e0   : > { %v11040_v28 = vpop.permute.xlu1 %11039  ;;  %v11299_v26 = vsel %vm7829_vm6, %v11267_v36, %v18578_v33 }
 0x7e1   : > { %v11268_v58 = vsel %vm5019_vm12, %v11236_v40, %v11040_v28  ;;  %v11331_v27 = vsel %vm18579_vm8, %v11299_v26, 0.0 }
 0x7e2   : > { %11352 = vxpose.xlu0.b32.end [16/16] (narrow) %v11320_v18, 64  ;;  %v11034_v29 = vpop.permute.xlu0 %11033  ;;  %v11300_v12 = vsel %vm7829_vm6, %v11268_v58, %v18580_v9 }
 0x7e3   : > { %v11265_v23 = vsel %vm5019_vm12, %v11233_v0, %v11034_v29  ;;  %v11332_v21 = vsel %vm18581_vm13, %v11300_v12, 0.0 }
 0x7e4   : > { %v11036_v8 = vpop.permute.xlu1 %11035  ;;  %v11297_v24 = vsel %vm7829_vm6, %v11265_v23, %v18570_v43 }
 0x7e5   : > { %v11266_v15 = vsel %vm5019_vm12, %v11234_v3, %v11036_v8  ;;  %v11329_v55 = vsel %vm18571_vm1, %v11297_v24, 0.0 }
 0x7e6   : > { %11377 = vxpose.xlu1.b32.cont [9/16] (narrow) %v11329_v55, 64  ;;  %v11298_v53 = vsel %vm7829_vm6, %v11266_v15, %v18574_v17 }
 0x7e7   : > { %v11330_v19 = vsel %vm18575_vm11, %v11298_v53, 0.0 }
 0x7ea   : > { %11378 = vxpose.xlu1.b32.cont [10/16] (narrow) %v11330_v19, 64 }
 0x7ee   : > { %11379 = vxpose.xlu1.b32.cont [11/16] (narrow) %v11331_v27, 64 }
 0x7f2   : > { %11380 = vxpose.xlu1.b32.cont [12/16] (narrow) %v11332_v21, 64 }
 0x7f6   : > { %v11046_v5 = vpop.permute.xlu0 %11045 }
 0x7f7   : > { %v11271_v46 = vsel %vm5019_vm12, %v11239_v30, %v11046_v5 }
 0x7f8   : > { %v11048_v25 = vpop.permute.xlu1 %11047  ;;  %v11303_v38 = vsel %vm7829_vm6, %v11271_v46, %v18594_v7 }
 0x7f9   : > { %v11272_v39 = vsel %vm5019_vm12, %v11240_v22, %v11048_v25  ;;  %v11335_v47 = vsel %vm18595_vm2, %v11303_v38, 0.0 }
 0x7fa   : > { %v11042_v11 = vpop.permute.xlu0 %11041  ;;  %v11304_v51 = vsel %vm7829_vm6, %v11272_v39, %v18596_v42 }
 0x7fb   : > { %v11269_v4 = vsel %vm5019_vm12, %v11237_v61, %v11042_v11  ;;  %v11336_v10 = vsel %vm18597_vm15, %v11304_v51, 0.0 }
 0x7fc   : > { %v11044_v1 = vpop.permute.xlu1 %11043  ;;  %v11301_v2 = vsel %vm7829_vm6, %v11269_v4, %v18586_v52 }
 0x7fd   : > { %v11270_v54 = vsel %vm5019_vm12, %v11238_v60, %v11044_v1  ;;  %v11333_v63 = vsel %vm18587_vm3, %v11301_v2, 0.0 }
 0x7fe   : > { %11381 = vxpose.xlu1.b32.cont [13/16] (narrow) %v11333_v63, 64  ;;  %v11302_v44 = vsel %vm7829_vm6, %v11270_v54, %v18590_v41 }
 0x7ff   : > { %v11334_v45 = vsel %vm18591_vm4, %v11302_v44, 0.0 }
 0x802   : > { %11382 = vxpose.xlu1.b32.cont [14/16] (narrow) %v11334_v45, 64 }
 0x806   : > { %11383 = vxpose.xlu1.b32.cont [15/16] (narrow) %v11335_v47, 64 }
 0x80a   : > { %11384 = vxpose.xlu1.b32.end [16/16] (narrow) %v11336_v10, 64 }
 0x826   : > { %v11353_v28 = vpop.trf.xlu0 }
 0x827   : > { %11401 = vst [vmem:[%s18035_s20] sm:$0xff] %v11353_v28 }
 0x82a   : > { %v11354_v18 = vpop.trf.xlu0 }
 0x82b   : > { %11403 = vst [vmem:[%s18035_s20 + $0x10] sm:$0xff] %v11354_v18 }
 0x82e   : > { %v11355_v57 = vpop.trf.xlu0 }
 0x82f   : > { %11405 = vst [vmem:[%s18035_s20 + $0x20] sm:$0xff] %v11355_v57 }
 0x832   : > { %v11356_v62 = vpop.trf.xlu0 }
 0x833   : > { %11407 = vst [vmem:[%s18035_s20 + $0x30] sm:$0xff] %v11356_v62 }
 0x836   : > { %v11357_v0 = vpop.trf.xlu0 }
 0x837   : > { %11409 = vst [vmem:[%s18035_s20 + $0x40] sm:$0xff] %v11357_v0 }
 0x83a   : > { %v11358_v29 = vpop.trf.xlu0 }
 0x83b   : > { %11411 = vst [vmem:[%s18035_s20 + $0x50] sm:$0xff] %v11358_v29 }
 0x83e   : > { %v11359_v23 = vpop.trf.xlu0 }
 0x83f   : > { %11413 = vst [vmem:[%s18035_s20 + $0x60] sm:$0xff] %v11359_v23 }
 0x842   : > { %v11360_v34 = vpop.trf.xlu0 }
 0x843   : > { %11415 = vst [vmem:[%s18035_s20 + $0x70] sm:$0xff] %v11360_v34 }
 0x84e   : > { %v11385_v59 = vpop.trf.xlu1 }
 0x84f   : > { %11402 = vst [vmem:[%s18035_s20 + $0x8] sm:$0xff] %v11385_v59 }
 0x852   : > { %v11386_v3 = vpop.trf.xlu1 }
 0x853   : > { %11404 = vst [vmem:[%s18035_s20 + $0x18] sm:$0xff] %v11386_v3 }
 0x856   : > { %v11387_v8 = vpop.trf.xlu1 }
 0x857   : > { %11406 = vst [vmem:[%s18035_s20 + $0x28] sm:$0xff] %v11387_v8 }
 0x85a   : > { %v11388_v43 = vpop.trf.xlu1 }
 0x85b   : > { %11408 = vst [vmem:[%s18035_s20 + $0x38] sm:$0xff] %v11388_v43 }
 0x85e   : > { %v11389_v24 = vpop.trf.xlu1 }
 0x85f   : > { %11410 = vst [vmem:[%s18035_s20 + $0x48] sm:$0xff] %v11389_v24 }
 0x862   : > { %v11390_v15 = vpop.trf.xlu1 }
 0x863   : > { %11412 = vst [vmem:[%s18035_s20 + $0x58] sm:$0xff] %v11390_v15 }
 0x866   : > { %v11391_v55 = vpop.trf.xlu1 }
 0x867   : > { %11414 = vst [vmem:[%s18035_s20 + $0x68] sm:$0xff] %v11391_v55 }
 0x86a   : > { %v11392_v35 = vpop.trf.xlu1 }
 0x86b   : > { %11416 = vst [vmem:[%s18035_s20 + $0x78] sm:$0xff] %v11392_v35 }
 0x86c PF: > { %s23_s25 = sadd.s32 1, %s12830_s25  }
 0x86d   : > { %p20_p4 = scmp.ge.s32.totalorder %s23_s25, 4  }
 0x86f   :  { %22 = sbr.rel (!%p20_p4) target bundleno = 1 (0x1), region = 104 }

</bundles_post_ra>
